<compile_context>
chip_gen: v6e
topology: v6e:2x2x1
jax: 0.10.0
libtpu: 0.0.40
codegen_flags: <defaults>
</compile_context>

<pallas_src>
import functools

import jax
import jax.numpy as jnp
from jax import lax
from jax.experimental import pallas as pl
from jax.experimental.pallas import tpu as pltpu

_EPS = 1e-5                     # PyTorch BatchNorm default eps
_LANES = 128                    # TPU lane width (head hidden dim == 128 == lane dense)
_VMEM_LIMIT = 16 * 1024 * 1024  # modest scoped-VMEM budget (working set is ~2-3 MiB)
_B_CONV = 4                     # samples per conv-stage grid step


def _round_up(x, m):
    return ((x + m - 1) // m) * m


# ----------------------------------------------------------------------------
# Kernel 1: fused im2col-conv (single matmul / sample) + folded BN + ReLU + pool
# ----------------------------------------------------------------------------
def _conv_stage_kernel(x_ref, w_ref, scale_ref, shift_ref, o_ref, scr_ref, *,
                       h_out, w_out, b_blk):
    """b_blk samples per grid step.

    x_ref       : (b_blk, m, k)  bf16 im2col patches, row = h*w_out + w, m = h_out*w_out
    w_ref       : (k, c)         bf16, k = 25*cin  (VMEM resident across the grid)
    scale/shift : (1, c)         f32 folded conv-bias + eval-mode BN
    o_ref       : (b_blk, (h_out//2)*(w_out//2), c) bf16, row = h_p*(w_out//2) + w_p
    scr_ref     : VMEM (m, c) f32 — post-ReLU activation, written once per sample,
                  read back with strided rows for the 2x2 max-pool.
    """
    w = w_ref[...]
    scale = scale_ref[...]
    shift = shift_ref[...]
    m = h_out * w_out
    h2, w2 = h_out // 2, w_out // 2
    c = w.shape[1]
    for s in range(b_blk):
        # --- conv: one matmul, all 25 taps merged into K, f32 register accumulation ---
        acc = jnp.dot(x_ref[s], w, preferred_element_type=jnp.float32)    # (m, c) f32
        # --- fused folded-BN affine + ReLU (f32 epilogue), single scratch pass ---
        scr_ref[...] = jnp.maximum(acc * scale + shift, 0.0)
        # --- fused 2x2 stride-2 max-pool (w is the fastest-varying row index) ---
        even = scr_ref[pl.ds(0, m // 2, 2), :]
        odd = scr_ref[pl.ds(1, m // 2, 2), :]
        wp = jnp.maximum(even, odd).reshape(h2, 2, w2, c)
        hp = jnp.maximum(wp[:, 0], wp[:, 1])                              # (h2, w2, c)
        o_ref[s] = hp.reshape(h2 * w2, c).astype(o_ref.dtype)


def conv_bn_relu_pool(xcol, w, scale, shift, *, b_blk, h_out, w_out):
    n_pad, m, k = xcol.shape
    cout = w.shape[1]
    p_rows = (h_out // 2) * (w_out // 2)
    kernel = functools.partial(_conv_stage_kernel,
                               h_out=h_out, w_out=w_out, b_blk=b_blk)
    return pl.pallas_call(
        kernel,
        out_shape=jax.ShapeDtypeStruct((n_pad, p_rows, cout), jnp.bfloat16),
        grid=(n_pad // b_blk,),                      # batch blocks
        in_specs=[
            pl.BlockSpec((b_blk, m, k), lambda i: (i, 0, 0)),
            pl.BlockSpec((k, cout), lambda i: (0, 0)),        # weights: constant block
            pl.BlockSpec((1, cout), lambda i: (0, 0)),
            pl.BlockSpec((1, cout), lambda i: (0, 0)),
        ],
        out_specs=pl.BlockSpec((b_blk, p_rows, cout), lambda i: (i, 0, 0)),
        scratch_shapes=[pltpu.VMEM((m, cout), jnp.float32)],
        compiler_params=pltpu.CompilerParams(
            dimension_semantics=("parallel",),       # batch axis -> both TCs on v7x
            vmem_limit_bytes=_VMEM_LIMIT),
    )(xcol, w, scale, shift)


# ----------------------------------------------------------------------------
# Kernel 2: fused FC1 (1600->128) + BN1d + ReLU + FC2 (128->10 padded to 128),
#           tiled over the batch, weights VMEM resident
# ----------------------------------------------------------------------------
def _head_kernel(a_ref, w1_ref, scale_ref, shift_ref, w2_ref, b2_ref, o_ref):
    h = jnp.dot(a_ref[...], w1_ref[...], preferred_element_type=jnp.float32)
    h = jnp.maximum(h * scale_ref[...] + shift_ref[...], 0.0)
    o_ref[...] = jnp.dot(h.astype(jnp.bfloat16), w2_ref[...],
                         preferred_element_type=jnp.float32) + b2_ref[...]


def fc_head(act, w1, scale, shift, w2, b2):
    n_pad, k = act.shape
    b_head = min(128, n_pad)
    while n_pad % b_head:                            # block must divide the padded batch
        b_head //= 2
    return pl.pallas_call(
        _head_kernel,
        out_shape=jax.ShapeDtypeStruct((n_pad, _LANES), jnp.float32),
        grid=(n_pad // b_head,),
        in_specs=[
            pl.BlockSpec((b_head, k), lambda i: (i, 0)),
            pl.BlockSpec((k, _LANES), lambda i: (0, 0)),
            pl.BlockSpec((1, _LANES), lambda i: (0, 0)),
            pl.BlockSpec((1, _LANES), lambda i: (0, 0)),
            pl.BlockSpec((_LANES, _LANES), lambda i: (0, 0)),
            pl.BlockSpec((1, _LANES), lambda i: (0, 0)),
        ],
        out_specs=pl.BlockSpec((b_head, _LANES), lambda i: (i, 0)),
        compiler_params=pltpu.CompilerParams(
            dimension_semantics=("parallel",),
            vmem_limit_bytes=_VMEM_LIMIT),
    )(act, w1, scale, shift, w2, b2)


# ----------------------------------------------------------------------------
# Plain-JAX glue: im2col layout prep, BN folding, parameter init
# ----------------------------------------------------------------------------
def _im2col_5x5(x_nhwc, out_hw):
    """5x5 VALID patches: (n, H, W, C) -> (n, out_hw*out_hw, 25*C).

    Row index = h*out_hw + w, column index = (kh*5 + kw)*C + c, matching
    weight.reshape(25*C, Cout) for HWIO weights.  Tiny wrapper-side duplication
    (<= 160 KB/sample bf16) that turns each conv into a single MXU matmul.
    """
    n, _, _, c = x_nhwc.shape
    taps = [x_nhwc[:, kh:kh + out_hw, kw:kw + out_hw, :]
            for kh in range(5) for kw in range(5)]
    return jnp.concatenate(taps, axis=-1).reshape(n, out_hw * out_hw, 25 * c)


def fold_bn(bias, gamma, beta, mean, var):
    """Fold conv/linear bias + eval-mode BN into per-channel scale/shift."""
    scale = gamma / jnp.sqrt(var + _EPS)
    shift = beta + (bias - mean) * scale
    return scale, shift


def _row(v):
    """(C,) -> (1, C) f32 row for the kernel epilogues."""
    return v.reshape(1, -1).astype(jnp.float32)


def _bn_init(kg, kb, km, kv, n):
    return dict(
        gamma=1.0 + 0.05 * jax.random.normal(kg, (n,), jnp.float32),
        beta=0.05 * jax.random.normal(kb, (n,), jnp.float32),
        mean=0.05 * jax.random.normal(km, (n,), jnp.float32),
        var=jax.random.uniform(kv, (n,), jnp.float32, minval=0.5, maxval=1.5),
    )


def init_params(key):
    ks = jax.random.split(key, 20)
    n = lambda k, shape: 0.05 * jax.random.normal(k, shape, jnp.float32)
    p = {}
    p["W1"] = n(ks[0], (5, 5, 3, 32))            # HWIO
    p["b1"] = n(ks[1], (32,))
    p["bn1"] = _bn_init(ks[2], ks[3], ks[4], ks[5], 32)
    p["W2"] = n(ks[6], (5, 5, 32, 64))           # HWIO
    p["b2"] = n(ks[7], (64,))
    p["bn2"] = _bn_init(ks[8], ks[9], ks[10], ks[11], 64)
    p["Wfc1"] = n(ks[12], (64 * 5 * 5, 128))     # (in, out), in index = c*25 + h*5 + w
    p["bfc1"] = n(ks[13], (128,))
    p["bn3"] = _bn_init(ks[14], ks[15], ks[16], ks[17], 128)
    p["Wfc2"] = n(ks[18], (128, 10))
    p["bfc2"] = n(ks[19], (10,))
    return p


# ----------------------------------------------------------------------------
# CoolNet forward (three fused Pallas kernels)
# ----------------------------------------------------------------------------
def coolnet_forward(x_nchw, p):
    n = x_nchw.shape[0]
    bf16 = jnp.bfloat16

    b_conv = max(1, min(_B_CONV, n))
    if n <= b_conv:
        n_pad = n                       # single conv grid step
    else:
        # multiple of 16: even conv grid (2 TensorCores on v7x) and 16-row-aligned
        # bf16 batch blocks for the head.
        n_pad = _round_up(n, 16)
    assert n_pad % b_conv == 0

    # NCHW -> NHWC, zero-pad the batch, cast once to bf16 (MXU input dtype).
    x = jnp.transpose(x_nchw, (0, 2, 3, 1))
    x = jnp.pad(x, ((0, n_pad - n), (0, 0), (0, 0), (0, 0))).astype(bf16)

    # ---- stage 1: conv1 (3->32, 5x5) + BN + ReLU + 2x2 maxpool --------------
    s1, t1 = fold_bn(p["b1"], **p["bn1"])
    xc1 = _im2col_5x5(x, 28)                                 # (n_pad, 784, 75) bf16
    w1 = p["W1"].reshape(75, 32).astype(bf16)
    y1 = conv_bn_relu_pool(xc1, w1, _row(s1), _row(t1),
                           b_blk=b_conv, h_out=28, w_out=28) # (n_pad, 196, 32) bf16

    # ---- stage 2: conv2 (32->64, 5x5) + BN + ReLU + 2x2 maxpool -------------
    s2, t2 = fold_bn(p["b2"], **p["bn2"])
    xc2 = _im2col_5x5(y1.reshape(n_pad, 14, 14, 32), 10)     # (n_pad, 100, 800) bf16
    w2 = p["W2"].reshape(800, 64).astype(bf16)
    y2 = conv_bn_relu_pool(xc2, w2, _row(s2), _row(t2),
                           b_blk=b_conv, h_out=10, w_out=10) # (n_pad, 25, 64) bf16

    # ---- head: FC1 (1600->128) + BN1d + ReLU + FC2 (128->10) ----------------
    s3, t3 = fold_bn(p["bfc1"], **p["bn3"])
    act = y2.reshape(n_pad, 1600)                # free reshape; index = (h*5+w)*64 + c
    # PyTorch flatten order is (c, h, w): permute FC1 rows to our (h, w, c) order.
    wfc1 = (p["Wfc1"].reshape(64, 25, 128).transpose(1, 0, 2)
            .reshape(1600, 128).astype(bf16))
    # FC2 columns / bias padded with ZEROS to 128 lanes (sliced back to 10 below).
    wfc2 = jnp.pad(p["Wfc2"], ((0, 0), (0, _LANES - 10))).astype(bf16)
    bfc2 = _row(jnp.pad(p["bfc2"], (0, _LANES - 10)))
    logits = fc_head(act, wfc1, _row(s3), _row(t3), wfc2, bfc2)
    return logits[:n, :10]


# ----------------------------------------------------------------------------
# Pure-JAX references for verification
# ----------------------------------------------------------------------------
def reference_forward(x, p, *, quantize_matmul_inputs=False):
    # quantize_matmul_inputs=True rounds every matmul/conv operand to bf16 (exactly what
    # the MXU consumes) while keeping f32 accumulation -> differences vs the kernels are
    # accumulation-order only (plus rare one-ulp requantization flips downstream).
    if quantize_matmul_inputs:
        q = lambda a: a.astype(jnp.bfloat16).astype(jnp.float32)
    else:
        q = lambda a: a

    def conv(z, w_hwio, b):
        out = lax.conv_general_dilated(
            q(z), q(w_hwio), (1, 1), "VALID",
            dimension_numbers=("NCHW", "HWIO", "NCHW"),
            precision=lax.Precision.HIGHEST,
        )
        return out + b[None, :, None, None]

    def bn(z, d):  # eval-mode BN, channel axis = 1
        shape = [1] * z.ndim
        shape[1] = -1
        return ((z - d["mean"].reshape(shape))
                / jnp.sqrt(d["var"].reshape(shape) + _EPS)
                * d["gamma"].reshape(shape) + d["beta"].reshape(shape))

    def pool(z):
        return lax.reduce_window(z, -jnp.inf, lax.max,
                                 (1, 1, 2, 2), (1, 1, 2, 2), "VALID")

    y = pool(jax.nn.relu(bn(conv(x, p["W1"], p["b1"]), p["bn1"])))
    y = pool(jax.nn.relu(bn(conv(y, p["W2"], p["b2"]), p["bn2"])))
    y = y.reshape(y.shape[0], -1)
    y = jax.nn.relu(bn(jnp.dot(q(y), q(p["Wfc1"]), precision=lax.Precision.HIGHEST)
                       + p["bfc1"], p["bn3"]))
    y = jnp.dot(q(y), q(p["Wfc2"]), precision=lax.Precision.HIGHEST) + p["bfc2"]
    return y


if __name__ == "__main__":
    key = jax.random.PRNGKey(0)
    kx, kp = jax.random.split(key)
    x = jax.random.normal(kx, (2, 3, 32, 32), jnp.float32)   # NCHW, like PyTorch
    params = init_params(kp)

    out = jax.jit(coolnet_forward)(x, params)
    out = jax.block_until_ready(out)
    assert out.shape == (2, 10)

    # Tight check vs a reference whose matmul inputs are bf16-rounded (same quantization
    # the MXU sees; f32 accumulation in both).
    ref_bf16 = reference_forward(x, params, quantize_matmul_inputs=True)
    err_bf16 = float(jnp.max(jnp.abs(out - ref_bf16)))
    assert err_bf16 < 1.5e-2, f"mismatch vs bf16-matched reference: {err_bf16}"

    # Loose sanity check vs the full-f32 reference (bounded by bf16 input quantization).
    ref_f32 = reference_forward(x, params)
    err_f32 = float(jnp.max(jnp.abs(out - ref_f32)))
    assert err_f32 < 1.5e-1, f"mismatch vs f32 reference: {err_f32}"

    print("KERNEL_OK")
</pallas_src>

<mosaic_0001>
module attributes {stable_mosaic.version = 11 : i64} {
  func.func @_conv_stage_kernel(%arg0: i32, %arg1: memref<2x784x75xbf16, #tpu.memory_space<vmem>>, %arg2: memref<75x32xbf16, #tpu.memory_space<vmem>>, %arg3: memref<1x32xf32, #tpu.memory_space<vmem>>, %arg4: memref<1x32xf32, #tpu.memory_space<vmem>>, %arg5: memref<2x196x32xbf16, #tpu.memory_space<vmem>>, %arg6: memref<784x32xf32, #tpu.memory_space<vmem>>) attributes {dimension_semantics = [#tpu.dimension_semantics<parallel>], iteration_bounds = array<i64: 1>, scalar_prefetch = 0 : i64, scratch_operands = 1 : i64, tpu.core_type = #tpu.core_type<tc>, window_params = [{transform_indices = @transform_0, window_bounds = array<i64: 2, 784, 75>}, {pipeline_mode = #tpu.pipeline_mode<synchronous>, transform_indices = @transform_1, window_bounds = array<i64: 75, 32>}, {pipeline_mode = #tpu.pipeline_mode<synchronous>, transform_indices = @transform_2, window_bounds = array<i64: 1, 32>}, {pipeline_mode = #tpu.pipeline_mode<synchronous>, transform_indices = @transform_3, window_bounds = array<i64: 1, 32>}, {transform_indices = @transform_4, window_bounds = array<i64: 2, 196, 32>}]} {
    %c0 = arith.constant 0 : index
    %c0_0 = arith.constant 0 : index
    %0 = vector.load %arg2[%c0, %c0_0] : memref<75x32xbf16, #tpu.memory_space<vmem>>, vector<75x32xbf16>
    %c0_1 = arith.constant 0 : index
    %c0_2 = arith.constant 0 : index
    %1 = vector.load %arg3[%c0_1, %c0_2] : memref<1x32xf32, #tpu.memory_space<vmem>>, vector<1x32xf32>
    %c0_3 = arith.constant 0 : index
    %c0_4 = arith.constant 0 : index
    %2 = vector.load %arg4[%c0_3, %c0_4] : memref<1x32xf32, #tpu.memory_space<vmem>>, vector<1x32xf32>
    %c0_5 = arith.constant 0 : index
    %c0_6 = arith.constant 0 : index
    %c0_7 = arith.constant 0 : index
    %3 = vector.load %arg1[%c0_5, %c0_6, %c0_7] : memref<2x784x75xbf16, #tpu.memory_space<vmem>>, vector<1x784x75xbf16>
    %4 = vector.shape_cast %3 : vector<1x784x75xbf16> to vector<784x75xbf16>
    %cst = arith.constant dense<0.000000e+00> : vector<784x32xf32>
    %5 = tpu.matmul %4, %0, %cst {dimension_numbers = #tpu.dot_dimension_numbers<[1], [0], [0], [1], [0, 0, 1, 1], [], []>} : vector<784x75xbf16>, vector<75x32xbf16>, vector<784x32xf32> -> vector<784x32xf32>
    %6 = vector.broadcast %1 : vector<1x32xf32> to vector<784x32xf32>
    %7 = arith.mulf %5, %6 : vector<784x32xf32>
    %8 = vector.broadcast %2 : vector<1x32xf32> to vector<784x32xf32>
    %9 = arith.addf %7, %8 : vector<784x32xf32>
    %cst_8 = arith.constant 0.000000e+00 : f32
    %10 = vector.broadcast %cst_8 : f32 to vector<784x32xf32>
    %11 = arith.maximumf %9, %10 : vector<784x32xf32>
    %c0_9 = arith.constant 0 : index
    %c0_10 = arith.constant 0 : index
    %12 = vector.load %arg6[%c0_9, %c0_10] : memref<784x32xf32, #tpu.memory_space<vmem>>, vector<784x32xf32>
    tpu.vector_store %arg6[%c0_9, %c0_10], %11 {strides = array<i32>} : memref<784x32xf32, #tpu.memory_space<vmem>>, vector<784x32xf32>,
    %c0_11 = arith.constant 0 : index
    %c0_12 = arith.constant 0 : index
    %13 = tpu.strided_load %arg6[%c0_11, %c0_12] {strides = array<i32: 2, 1>} : memref<784x32xf32, #tpu.memory_space<vmem>>, vector<392x32xf32>
    %c1 = arith.constant 1 : index
    %c0_13 = arith.constant 0 : index
    %14 = tpu.strided_load %arg6[%c1, %c0_13] {strides = array<i32: 2, 1>} : memref<784x32xf32, #tpu.memory_space<vmem>>, vector<392x32xf32>
    %15 = arith.maximumf %13, %14 : vector<392x32xf32>
    %16 = vector.shape_cast %15 : vector<392x32xf32> to vector<14x2x14x32xf32>
    %17 = vector.extract_strided_slice %16 {offsets = [0, 0, 0, 0], sizes = [14, 1, 14, 32], strides = [1, 1, 1, 1]} : vector<14x2x14x32xf32> to vector<14x1x14x32xf32>
    %18 = vector.shape_cast %17 : vector<14x1x14x32xf32> to vector<14x14x32xf32>
    %19 = vector.extract_strided_slice %16 {offsets = [0, 1, 0, 0], sizes = [14, 1, 14, 32], strides = [1, 1, 1, 1]} : vector<14x2x14x32xf32> to vector<14x1x14x32xf32>
    %20 = vector.shape_cast %19 : vector<14x1x14x32xf32> to vector<14x14x32xf32>
    %21 = arith.maximumf %18, %20 : vector<14x14x32xf32>
    %22 = vector.shape_cast %21 : vector<14x14x32xf32> to vector<196x32xf32>
    %23 = arith.truncf %22 : vector<196x32xf32> to vector<196x32xbf16>
    %c0_14 = arith.constant 0 : index
    %c0_15 = arith.constant 0 : index
    %c0_16 = arith.constant 0 : index
    %24 = vector.load %arg5[%c0_14, %c0_15, %c0_16] : memref<2x196x32xbf16, #tpu.memory_space<vmem>>, vector<1x196x32xbf16>
    %25 = vector.shape_cast %24 : vector<1x196x32xbf16> to vector<196x32xbf16>
    %26 = vector.shape_cast %23 : vector<196x32xbf16> to vector<1x196x32xbf16>
    tpu.vector_store %arg5[%c0_14, %c0_15, %c0_16], %26 {strides = array<i32>} : memref<2x196x32xbf16, #tpu.memory_space<vmem>>, vector<1x196x32xbf16>,
    %c1_17 = arith.constant 1 : index
    %c0_18 = arith.constant 0 : index
    %c0_19 = arith.constant 0 : index
    %27 = vector.load %arg1[%c1_17, %c0_18, %c0_19] : memref<2x784x75xbf16, #tpu.memory_space<vmem>>, vector<1x784x75xbf16>
    %28 = vector.shape_cast %27 : vector<1x784x75xbf16> to vector<784x75xbf16>
    %cst_20 = arith.constant dense<0.000000e+00> : vector<784x32xf32>
    %29 = tpu.matmul %28, %0, %cst_20 {dimension_numbers = #tpu.dot_dimension_numbers<[1], [0], [0], [1], [0, 0, 1, 1], [], []>} : vector<784x75xbf16>, vector<75x32xbf16>, vector<784x32xf32> -> vector<784x32xf32>
    %30 = vector.broadcast %1 : vector<1x32xf32> to vector<784x32xf32>
    %31 = arith.mulf %29, %30 : vector<784x32xf32>
    %32 = vector.broadcast %2 : vector<1x32xf32> to vector<784x32xf32>
    %33 = arith.addf %31, %32 : vector<784x32xf32>
    %cst_21 = arith.constant 0.000000e+00 : f32
    %34 = vector.broadcast %cst_21 : f32 to vector<784x32xf32>
    %35 = arith.maximumf %33, %34 : vector<784x32xf32>
    %c0_22 = arith.constant 0 : index
    %c0_23 = arith.constant 0 : index
    %36 = vector.load %arg6[%c0_22, %c0_23] : memref<784x32xf32, #tpu.memory_space<vmem>>, vector<784x32xf32>
    tpu.vector_store %arg6[%c0_22, %c0_23], %35 {strides = array<i32>} : memref<784x32xf32, #tpu.memory_space<vmem>>, vector<784x32xf32>,
    %c0_24 = arith.constant 0 : index
    %c0_25 = arith.constant 0 : index
    %37 = tpu.strided_load %arg6[%c0_24, %c0_25] {strides = array<i32: 2, 1>} : memref<784x32xf32, #tpu.memory_space<vmem>>, vector<392x32xf32>
    %c1_26 = arith.constant 1 : index
    %c0_27 = arith.constant 0 : index
    %38 = tpu.strided_load %arg6[%c1_26, %c0_27] {strides = array<i32: 2, 1>} : memref<784x32xf32, #tpu.memory_space<vmem>>, vector<392x32xf32>
    %39 = arith.maximumf %37, %38 : vector<392x32xf32>
    %40 = vector.shape_cast %39 : vector<392x32xf32> to vector<14x2x14x32xf32>
    %41 = vector.extract_strided_slice %40 {offsets = [0, 0, 0, 0], sizes = [14, 1, 14, 32], strides = [1, 1, 1, 1]} : vector<14x2x14x32xf32> to vector<14x1x14x32xf32>
    %42 = vector.shape_cast %41 : vector<14x1x14x32xf32> to vector<14x14x32xf32>
    %43 = vector.extract_strided_slice %40 {offsets = [0, 1, 0, 0], sizes = [14, 1, 14, 32], strides = [1, 1, 1, 1]} : vector<14x2x14x32xf32> to vector<14x1x14x32xf32>
    %44 = vector.shape_cast %43 : vector<14x1x14x32xf32> to vector<14x14x32xf32>
    %45 = arith.maximumf %42, %44 : vector<14x14x32xf32>
    %46 = vector.shape_cast %45 : vector<14x14x32xf32> to vector<196x32xf32>
    %47 = arith.truncf %46 : vector<196x32xf32> to vector<196x32xbf16>
    %c1_28 = arith.constant 1 : index
    %c0_29 = arith.constant 0 : index
    %c0_30 = arith.constant 0 : index
    %48 = vector.load %arg5[%c1_28, %c0_29, %c0_30] : memref<2x196x32xbf16, #tpu.memory_space<vmem>>, vector<1x196x32xbf16>
    %49 = vector.shape_cast %48 : vector<1x196x32xbf16> to vector<196x32xbf16>
    %50 = vector.shape_cast %47 : vector<196x32xbf16> to vector<1x196x32xbf16>
    tpu.vector_store %arg5[%c1_28, %c0_29, %c0_30], %50 {strides = array<i32>} : memref<2x196x32xbf16, #tpu.memory_space<vmem>>, vector<1x196x32xbf16>,
    return
  }
  func.func @transform_0(%arg0: i32) -> (i32, i32, i32) {
    %c0_i32 = arith.constant 0 : i32
    %c0_i32_0 = arith.constant 0 : i32
    %c0_i32_1 = arith.constant 0 : i32
    return %arg0, %c0_i32, %c0_i32_0 : i32, i32, i32
  }
  func.func @transform_1(%arg0: i32) -> (i32, i32) {
    %c0_i32 = arith.constant 0 : i32
    %c0_i32_0 = arith.constant 0 : i32
    %c0_i32_1 = arith.constant 0 : i32
    return %c0_i32, %c0_i32_0 : i32, i32
  }
  func.func @transform_2(%arg0: i32) -> (i32, i32) {
    %c0_i32 = arith.constant 0 : i32
    %c0_i32_0 = arith.constant 0 : i32
    %c0_i32_1 = arith.constant 0 : i32
    return %c0_i32, %c0_i32_0 : i32, i32
  }
  func.func @transform_3(%arg0: i32) -> (i32, i32) {
    %c0_i32 = arith.constant 0 : i32
    %c0_i32_0 = arith.constant 0 : i32
    %c0_i32_1 = arith.constant 0 : i32
    return %c0_i32, %c0_i32_0 : i32, i32
  }
  func.func @transform_4(%arg0: i32) -> (i32, i32, i32) {
    %c0_i32 = arith.constant 0 : i32
    %c0_i32_0 = arith.constant 0 : i32
    %c0_i32_1 = arith.constant 0 : i32
    return %arg0, %c0_i32, %c0_i32_0 : i32, i32, i32
  }
}

module attributes {stable_mosaic.version = 11 : i64} {
  func.func @_conv_stage_kernel(%arg0: i32, %arg1: memref<2x100x800xbf16, #tpu.memory_space<vmem>>, %arg2: memref<800x64xbf16, #tpu.memory_space<vmem>>, %arg3: memref<1x64xf32, #tpu.memory_space<vmem>>, %arg4: memref<1x64xf32, #tpu.memory_space<vmem>>, %arg5: memref<2x25x64xbf16, #tpu.memory_space<vmem>>, %arg6: memref<100x64xf32, #tpu.memory_space<vmem>>) attributes {dimension_semantics = [#tpu.dimension_semantics<parallel>], iteration_bounds = array<i64: 1>, scalar_prefetch = 0 : i64, scratch_operands = 1 : i64, tpu.core_type = #tpu.core_type<tc>, window_params = [{transform_indices = @transform_0, window_bounds = array<i64: 2, 100, 800>}, {pipeline_mode = #tpu.pipeline_mode<synchronous>, transform_indices = @transform_1, window_bounds = array<i64: 800, 64>}, {pipeline_mode = #tpu.pipeline_mode<synchronous>, transform_indices = @transform_2, window_bounds = array<i64: 1, 64>}, {pipeline_mode = #tpu.pipeline_mode<synchronous>, transform_indices = @transform_3, window_bounds = array<i64: 1, 64>}, {transform_indices = @transform_4, window_bounds = array<i64: 2, 25, 64>}]} {
    %c0 = arith.constant 0 : index
    %c0_0 = arith.constant 0 : index
    %0 = vector.load %arg2[%c0, %c0_0] : memref<800x64xbf16, #tpu.memory_space<vmem>>, vector<800x64xbf16>
    %c0_1 = arith.constant 0 : index
    %c0_2 = arith.constant 0 : index
    %1 = vector.load %arg3[%c0_1, %c0_2] : memref<1x64xf32, #tpu.memory_space<vmem>>, vector<1x64xf32>
    %c0_3 = arith.constant 0 : index
    %c0_4 = arith.constant 0 : index
    %2 = vector.load %arg4[%c0_3, %c0_4] : memref<1x64xf32, #tpu.memory_space<vmem>>, vector<1x64xf32>
    %c0_5 = arith.constant 0 : index
    %c0_6 = arith.constant 0 : index
    %c0_7 = arith.constant 0 : index
    %3 = vector.load %arg1[%c0_5, %c0_6, %c0_7] : memref<2x100x800xbf16, #tpu.memory_space<vmem>>, vector<1x100x800xbf16>
    %4 = vector.shape_cast %3 : vector<1x100x800xbf16> to vector<100x800xbf16>
    %cst = arith.constant dense<0.000000e+00> : vector<100x64xf32>
    %5 = tpu.matmul %4, %0, %cst {dimension_numbers = #tpu.dot_dimension_numbers<[1], [0], [0], [1], [0, 0, 1, 1], [], []>} : vector<100x800xbf16>, vector<800x64xbf16>, vector<100x64xf32> -> vector<100x64xf32>
    %6 = vector.broadcast %1 : vector<1x64xf32> to vector<100x64xf32>
    %7 = arith.mulf %5, %6 : vector<100x64xf32>
    %8 = vector.broadcast %2 : vector<1x64xf32> to vector<100x64xf32>
    %9 = arith.addf %7, %8 : vector<100x64xf32>
    %cst_8 = arith.constant 0.000000e+00 : f32
    %10 = vector.broadcast %cst_8 : f32 to vector<100x64xf32>
    %11 = arith.maximumf %9, %10 : vector<100x64xf32>
    %c0_9 = arith.constant 0 : index
    %c0_10 = arith.constant 0 : index
    %12 = vector.load %arg6[%c0_9, %c0_10] : memref<100x64xf32, #tpu.memory_space<vmem>>, vector<100x64xf32>
    tpu.vector_store %arg6[%c0_9, %c0_10], %11 {strides = array<i32>} : memref<100x64xf32, #tpu.memory_space<vmem>>, vector<100x64xf32>,
    %c0_11 = arith.constant 0 : index
    %c0_12 = arith.constant 0 : index
    %13 = tpu.strided_load %arg6[%c0_11, %c0_12] {strides = array<i32: 2, 1>} : memref<100x64xf32, #tpu.memory_space<vmem>>, vector<50x64xf32>
    %c1 = arith.constant 1 : index
    %c0_13 = arith.constant 0 : index
    %14 = tpu.strided_load %arg6[%c1, %c0_13] {strides = array<i32: 2, 1>} : memref<100x64xf32, #tpu.memory_space<vmem>>, vector<50x64xf32>
    %15 = arith.maximumf %13, %14 : vector<50x64xf32>
    %16 = vector.shape_cast %15 : vector<50x64xf32> to vector<5x2x5x64xf32>
    %17 = vector.extract_strided_slice %16 {offsets = [0, 0, 0, 0], sizes = [5, 1, 5, 64], strides = [1, 1, 1, 1]} : vector<5x2x5x64xf32> to vector<5x1x5x64xf32>
    %18 = vector.shape_cast %17 : vector<5x1x5x64xf32> to vector<5x5x64xf32>
    %19 = vector.extract_strided_slice %16 {offsets = [0, 1, 0, 0], sizes = [5, 1, 5, 64], strides = [1, 1, 1, 1]} : vector<5x2x5x64xf32> to vector<5x1x5x64xf32>
    %20 = vector.shape_cast %19 : vector<5x1x5x64xf32> to vector<5x5x64xf32>
    %21 = arith.maximumf %18, %20 : vector<5x5x64xf32>
    %22 = vector.shape_cast %21 : vector<5x5x64xf32> to vector<25x64xf32>
    %23 = arith.truncf %22 : vector<25x64xf32> to vector<25x64xbf16>
    %c0_14 = arith.constant 0 : index
    %c0_15 = arith.constant 0 : index
    %c0_16 = arith.constant 0 : index
    %24 = vector.load %arg5[%c0_14, %c0_15, %c0_16] : memref<2x25x64xbf16, #tpu.memory_space<vmem>>, vector<1x25x64xbf16>
    %25 = vector.shape_cast %24 : vector<1x25x64xbf16> to vector<25x64xbf16>
    %26 = vector.shape_cast %23 : vector<25x64xbf16> to vector<1x25x64xbf16>
    tpu.vector_store %arg5[%c0_14, %c0_15, %c0_16], %26 {strides = array<i32>} : memref<2x25x64xbf16, #tpu.memory_space<vmem>>, vector<1x25x64xbf16>,
    %c1_17 = arith.constant 1 : index
    %c0_18 = arith.constant 0 : index
    %c0_19 = arith.constant 0 : index
    %27 = vector.load %arg1[%c1_17, %c0_18, %c0_19] : memref<2x100x800xbf16, #tpu.memory_space<vmem>>, vector<1x100x800xbf16>
    %28 = vector.shape_cast %27 : vector<1x100x800xbf16> to vector<100x800xbf16>
    %cst_20 = arith.constant dense<0.000000e+00> : vector<100x64xf32>
    %29 = tpu.matmul %28, %0, %cst_20 {dimension_numbers = #tpu.dot_dimension_numbers<[1], [0], [0], [1], [0, 0, 1, 1], [], []>} : vector<100x800xbf16>, vector<800x64xbf16>, vector<100x64xf32> -> vector<100x64xf32>
    %30 = vector.broadcast %1 : vector<1x64xf32> to vector<100x64xf32>
    %31 = arith.mulf %29, %30 : vector<100x64xf32>
    %32 = vector.broadcast %2 : vector<1x64xf32> to vector<100x64xf32>
    %33 = arith.addf %31, %32 : vector<100x64xf32>
    %cst_21 = arith.constant 0.000000e+00 : f32
    %34 = vector.broadcast %cst_21 : f32 to vector<100x64xf32>
    %35 = arith.maximumf %33, %34 : vector<100x64xf32>
    %c0_22 = arith.constant 0 : index
    %c0_23 = arith.constant 0 : index
    %36 = vector.load %arg6[%c0_22, %c0_23] : memref<100x64xf32, #tpu.memory_space<vmem>>, vector<100x64xf32>
    tpu.vector_store %arg6[%c0_22, %c0_23], %35 {strides = array<i32>} : memref<100x64xf32, #tpu.memory_space<vmem>>, vector<100x64xf32>,
    %c0_24 = arith.constant 0 : index
    %c0_25 = arith.constant 0 : index
    %37 = tpu.strided_load %arg6[%c0_24, %c0_25] {strides = array<i32: 2, 1>} : memref<100x64xf32, #tpu.memory_space<vmem>>, vector<50x64xf32>
    %c1_26 = arith.constant 1 : index
    %c0_27 = arith.constant 0 : index
    %38 = tpu.strided_load %arg6[%c1_26, %c0_27] {strides = array<i32: 2, 1>} : memref<100x64xf32, #tpu.memory_space<vmem>>, vector<50x64xf32>
    %39 = arith.maximumf %37, %38 : vector<50x64xf32>
    %40 = vector.shape_cast %39 : vector<50x64xf32> to vector<5x2x5x64xf32>
    %41 = vector.extract_strided_slice %40 {offsets = [0, 0, 0, 0], sizes = [5, 1, 5, 64], strides = [1, 1, 1, 1]} : vector<5x2x5x64xf32> to vector<5x1x5x64xf32>
    %42 = vector.shape_cast %41 : vector<5x1x5x64xf32> to vector<5x5x64xf32>
    %43 = vector.extract_strided_slice %40 {offsets = [0, 1, 0, 0], sizes = [5, 1, 5, 64], strides = [1, 1, 1, 1]} : vector<5x2x5x64xf32> to vector<5x1x5x64xf32>
    %44 = vector.shape_cast %43 : vector<5x1x5x64xf32> to vector<5x5x64xf32>
    %45 = arith.maximumf %42, %44 : vector<5x5x64xf32>
    %46 = vector.shape_cast %45 : vector<5x5x64xf32> to vector<25x64xf32>
    %47 = arith.truncf %46 : vector<25x64xf32> to vector<25x64xbf16>
    %c1_28 = arith.constant 1 : index
    %c0_29 = arith.constant 0 : index
    %c0_30 = arith.constant 0 : index
    %48 = vector.load %arg5[%c1_28, %c0_29, %c0_30] : memref<2x25x64xbf16, #tpu.memory_space<vmem>>, vector<1x25x64xbf16>
    %49 = vector.shape_cast %48 : vector<1x25x64xbf16> to vector<25x64xbf16>
    %50 = vector.shape_cast %47 : vector<25x64xbf16> to vector<1x25x64xbf16>
    tpu.vector_store %arg5[%c1_28, %c0_29, %c0_30], %50 {strides = array<i32>} : memref<2x25x64xbf16, #tpu.memory_space<vmem>>, vector<1x25x64xbf16>,
    return
  }
  func.func @transform_0(%arg0: i32) -> (i32, i32, i32) {
    %c0_i32 = arith.constant 0 : i32
    %c0_i32_0 = arith.constant 0 : i32
    %c0_i32_1 = arith.constant 0 : i32
    return %arg0, %c0_i32, %c0_i32_0 : i32, i32, i32
  }
  func.func @transform_1(%arg0: i32) -> (i32, i32) {
    %c0_i32 = arith.constant 0 : i32
    %c0_i32_0 = arith.constant 0 : i32
    %c0_i32_1 = arith.constant 0 : i32
    return %c0_i32, %c0_i32_0 : i32, i32
  }
  func.func @transform_2(%arg0: i32) -> (i32, i32) {
    %c0_i32 = arith.constant 0 : i32
    %c0_i32_0 = arith.constant 0 : i32
    %c0_i32_1 = arith.constant 0 : i32
    return %c0_i32, %c0_i32_0 : i32, i32
  }
  func.func @transform_3(%arg0: i32) -> (i32, i32) {
    %c0_i32 = arith.constant 0 : i32
    %c0_i32_0 = arith.constant 0 : i32
    %c0_i32_1 = arith.constant 0 : i32
    return %c0_i32, %c0_i32_0 : i32, i32
  }
  func.func @transform_4(%arg0: i32) -> (i32, i32, i32) {
    %c0_i32 = arith.constant 0 : i32
    %c0_i32_0 = arith.constant 0 : i32
    %c0_i32_1 = arith.constant 0 : i32
    return %arg0, %c0_i32, %c0_i32_0 : i32, i32, i32
  }
}

module attributes {stable_mosaic.version = 11 : i64} {
  func.func @_head_kernel(%arg0: i32, %arg1: memref<2x1600xbf16, #tpu.memory_space<vmem>>, %arg2: memref<1600x128xbf16, #tpu.memory_space<vmem>>, %arg3: memref<1x128xf32, #tpu.memory_space<vmem>>, %arg4: memref<1x128xf32, #tpu.memory_space<vmem>>, %arg5: memref<128x128xbf16, #tpu.memory_space<vmem>>, %arg6: memref<1x128xf32, #tpu.memory_space<vmem>>, %arg7: memref<2x128xf32, #tpu.memory_space<vmem>>) attributes {dimension_semantics = [#tpu.dimension_semantics<parallel>], iteration_bounds = array<i64: 1>, scalar_prefetch = 0 : i64, scratch_operands = 0 : i64, tpu.core_type = #tpu.core_type<tc>, window_params = [{transform_indices = @transform_0, window_bounds = array<i64: 2, 1600>}, {pipeline_mode = #tpu.pipeline_mode<synchronous>, transform_indices = @transform_1, window_bounds = array<i64: 1600, 128>}, {pipeline_mode = #tpu.pipeline_mode<synchronous>, transform_indices = @transform_2, window_bounds = array<i64: 1, 128>}, {pipeline_mode = #tpu.pipeline_mode<synchronous>, transform_indices = @transform_3, window_bounds = array<i64: 1, 128>}, {pipeline_mode = #tpu.pipeline_mode<synchronous>, transform_indices = @transform_4, window_bounds = array<i64: 128, 128>}, {pipeline_mode = #tpu.pipeline_mode<synchronous>, transform_indices = @transform_5, window_bounds = array<i64: 1, 128>}, {transform_indices = @transform_6, window_bounds = array<i64: 2, 128>}]} {
    %c0 = arith.constant 0 : index
    %c0_0 = arith.constant 0 : index
    %0 = vector.load %arg1[%c0, %c0_0] : memref<2x1600xbf16, #tpu.memory_space<vmem>>, vector<2x1600xbf16>
    %c0_1 = arith.constant 0 : index
    %c0_2 = arith.constant 0 : index
    %1 = vector.load %arg2[%c0_1, %c0_2] : memref<1600x128xbf16, #tpu.memory_space<vmem>>, vector<1600x128xbf16>
    %cst = arith.constant dense<0.000000e+00> : vector<2x128xf32>
    %2 = tpu.matmul %0, %1, %cst {dimension_numbers = #tpu.dot_dimension_numbers<[1], [0], [0], [1], [0, 0, 1, 1], [], []>} : vector<2x1600xbf16>, vector<1600x128xbf16>, vector<2x128xf32> -> vector<2x128xf32>
    %c0_3 = arith.constant 0 : index
    %c0_4 = arith.constant 0 : index
    %3 = vector.load %arg3[%c0_3, %c0_4] : memref<1x128xf32, #tpu.memory_space<vmem>>, vector<1x128xf32>
    %4 = vector.broadcast %3 : vector<1x128xf32> to vector<2x128xf32>
    %5 = arith.mulf %2, %4 : vector<2x128xf32>
    %c0_5 = arith.constant 0 : index
    %c0_6 = arith.constant 0 : index
    %6 = vector.load %arg4[%c0_5, %c0_6] : memref<1x128xf32, #tpu.memory_space<vmem>>, vector<1x128xf32>
    %7 = vector.broadcast %6 : vector<1x128xf32> to vector<2x128xf32>
    %8 = arith.addf %5, %7 : vector<2x128xf32>
    %cst_7 = arith.constant 0.000000e+00 : f32
    %9 = vector.broadcast %cst_7 : f32 to vector<2x128xf32>
    %10 = arith.maximumf %8, %9 : vector<2x128xf32>
    %11 = arith.truncf %10 : vector<2x128xf32> to vector<2x128xbf16>
    %c0_8 = arith.constant 0 : index
    %c0_9 = arith.constant 0 : index
    %12 = vector.load %arg5[%c0_8, %c0_9] : memref<128x128xbf16, #tpu.memory_space<vmem>>, vector<128x128xbf16>
    %cst_10 = arith.constant dense<0.000000e+00> : vector<2x128xf32>
    %13 = tpu.matmul %11, %12, %cst_10 {dimension_numbers = #tpu.dot_dimension_numbers<[1], [0], [0], [1], [0, 0, 1, 1], [], []>} : vector<2x128xbf16>, vector<128x128xbf16>, vector<2x128xf32> -> vector<2x128xf32>
    %c0_11 = arith.constant 0 : index
    %c0_12 = arith.constant 0 : index
    %14 = vector.load %arg6[%c0_11, %c0_12] : memref<1x128xf32, #tpu.memory_space<vmem>>, vector<1x128xf32>
    %15 = vector.broadcast %14 : vector<1x128xf32> to vector<2x128xf32>
    %16 = arith.addf %13, %15 : vector<2x128xf32>
    %c0_13 = arith.constant 0 : index
    %c0_14 = arith.constant 0 : index
    %17 = vector.load %arg7[%c0_13, %c0_14] : memref<2x128xf32, #tpu.memory_space<vmem>>, vector<2x128xf32>
    tpu.vector_store %arg7[%c0_13, %c0_14], %16 {strides = array<i32>} : memref<2x128xf32, #tpu.memory_space<vmem>>, vector<2x128xf32>,
    return
  }
  func.func @transform_0(%arg0: i32) -> (i32, i32) {
    %c0_i32 = arith.constant 0 : i32
    %c0_i32_0 = arith.constant 0 : i32
    return %arg0, %c0_i32 : i32, i32
  }
  func.func @transform_1(%arg0: i32) -> (i32, i32) {
    %c0_i32 = arith.constant 0 : i32
    %c0_i32_0 = arith.constant 0 : i32
    %c0_i32_1 = arith.constant 0 : i32
    return %c0_i32, %c0_i32_0 : i32, i32
  }
  func.func @transform_2(%arg0: i32) -> (i32, i32) {
    %c0_i32 = arith.constant 0 : i32
    %c0_i32_0 = arith.constant 0 : i32
    %c0_i32_1 = arith.constant 0 : i32
    return %c0_i32, %c0_i32_0 : i32, i32
  }
  func.func @transform_3(%arg0: i32) -> (i32, i32) {
    %c0_i32 = arith.constant 0 : i32
    %c0_i32_0 = arith.constant 0 : i32
    %c0_i32_1 = arith.constant 0 : i32
    return %c0_i32, %c0_i32_0 : i32, i32
  }
  func.func @transform_4(%arg0: i32) -> (i32, i32) {
    %c0_i32 = arith.constant 0 : i32
    %c0_i32_0 = arith.constant 0 : i32
    %c0_i32_1 = arith.constant 0 : i32
    return %c0_i32, %c0_i32_0 : i32, i32
  }
  func.func @transform_5(%arg0: i32) -> (i32, i32) {
    %c0_i32 = arith.constant 0 : i32
    %c0_i32_0 = arith.constant 0 : i32
    %c0_i32_1 = arith.constant 0 : i32
    return %c0_i32, %c0_i32_0 : i32, i32
  }
  func.func @transform_6(%arg0: i32) -> (i32, i32) {
    %c0_i32 = arith.constant 0 : i32
    %c0_i32_0 = arith.constant 0 : i32
    return %arg0, %c0_i32 : i32, i32
  }
}

</mosaic_0001>

<bundles_post_ra>
// kernel: coolnet_forward.3
= control target key start
LH: loop header
LB: loop body
LE: loop exit
PB: predicated region body
PF: predicated region fallthrough
CT: control target
= control target key end

     0   :  { %vm550_vm0 = vcmask 1044480   ;;  %vm551_vm1 = vcmask 1045504   ;;  %v7836_v0 = vmov 0.0   ;;  %v7837_v2 = vmov 65535   ;;  %s10980_s1 = inlined_call_operand.vmem [shape: bf16[75,32], index: 1, kind: input, shape index: {}]   ;;  %s10981_s0 = inlined_call_operand.vmem [shape: bf16[2,784,75], index: 0, kind: input, shape index: {}]   ;;  %s10982_s2 = inlined_call_operand.vmem [shape: f32[1,32], index: 2, kind: input, shape index: {}]   ;;  %s10983_s3 = inlined_call_operand.vmem [shape: f32[1,32], index: 3, kind: input, shape index: {}]   ;;  %s10984_s4 = inlined_call_operand.vmem [shape: bf16[2,196,32], index: 4, kind: output, shape index: {}]  }
   0x1   :  { %7309 = vmatprep.subr.bf16.mxu0 %v7836_v0  ;;  %v7725_v1 = vld [vmem:[%s10980_s1 + $0x20] sm:$0x3f]   ;;  %7515 = vmatprep.subr.bf16.mxu1 %v7836_v0  ;;  %v552_v3 = vsel %vm550_vm0, 4294967295, %v7837_v2  ;;  %vm7838_vm2 = vmmov 0   ;;  %v7726_v6 = vld [vmem:[%s10980_s1 + $0x18] sm:$0xff]   ;;  %v7727_v7 = vld [vmem:[%s10980_s1 + $0x10] sm:$0xff]  }
   0x2   :  { %v553_v4 = vsel %vm551_vm1, %v552_v3, 0  ;;  %7319 = vmatprep.mubr.msk.bf16.mxu0 %vm7838_vm2, %v7836_v0  ;;  %7525 = vmatprep.mubr.msk.bf16.mxu1 %vm7838_vm2, %v7836_v0  ;;  %v7728_v8 = vld [vmem:[%s10980_s1 + $0x8] sm:$0xff]   ;;  %v7729_v9 = vld [vmem:[%s10980_s1] sm:$0xff]   ;;  %vm402_vm3 = vcmask 613376   ;;  %v7733_v13 = vld [vmem:[%s10981_s0 + $0x190] sm:$0xff]   ;;  %vm1288_vm4 = vcmask 261120  }
   0x3   :  { %v555_v5 = vand.u32 %v7725_v1, %v553_v4  ;;  %v7730_v10 = vld [vmem:[%s10981_s0] sm:$0xff]   ;;  %v7731_v11 = vld [vmem:[%s10981_s0 + $0x188] sm:$0xff]   ;;  %v7734_v14 = vld [vmem:[%s10981_s0 + $0x10] sm:$0xff]   ;;  %vm3447_vm5 = vcmask 257024   ;;  %vm3472_vm6 = vcmask 254976  }
   0x4   :  { %v7732_v12 = vld [vmem:[%s10981_s0 + $0x8] sm:$0xff]   ;;  %v7735_v15 = vld [vmem:[%s10981_s0 + $0x198] sm:$0xff]   ;;  %v7737_v17 = vld [vmem:[%s10981_s0 + $0x1a0] sm:$0xff]  }
   0x5   :  { %7310 = vmatpush3.bf16.msra.mxu0 %v555_v5  ;;  %7516 = vmatpush3.bf16.msra.mxu1 %v555_v5  ;;  %v7736_v16 = vld [vmem:[%s10981_s0 + $0x18] sm:$0xff]   ;;  %v7738_v18 = vld [vmem:[%s10981_s0 + $0x20] sm:$0xff]   ;;  %v7739_v19 = vld [vmem:[%s10981_s0 + $0x1a8] sm:$0xff]  }
   0x6   :  { %7311 = vmatprep.subr.bf16.mxu0 %v7836_v0  ;;  %7517 = vmatprep.subr.bf16.mxu1 %v7836_v0  ;;  %v7740_v20 = vld [vmem:[%s10981_s0 + $0x28] sm:$0xff]   ;;  %v7741_v21 = vld [vmem:[%s10981_s0 + $0x1b0] sm:$0xff]   ;;  %v7743_v23 = vld [vmem:[%s10981_s0 + $0x1b8] sm:$0xff]  }
   0x7   :  { %v7742_v22 = vld [vmem:[%s10981_s0 + $0x30] sm:$0xff]   ;;  %v7744_v24 = vld [vmem:[%s10981_s0 + $0x38] sm:$0xff]   ;;  %v7745_v25 = vld [vmem:[%s10981_s0 + $0x1c0] sm:$0xff]  }
   0x8   :  { %v7746_v26 = vld [vmem:[%s10981_s0 + $0x40] sm:$0xff]   ;;  %v7747_v27 = vld [vmem:[%s10981_s0 + $0x1c8] sm:$0xff]   ;;  %v7749_v29 = vld [vmem:[%s10981_s0 + $0x1d0] sm:$0xff]  }
   0x9   :  { %7312 = vmatpush3.bf16.msra.mxu0 %v7726_v6  ;;  %7518 = vmatpush3.bf16.msra.mxu1 %v7726_v6  ;;  %v7748_v28 = vld [vmem:[%s10981_s0 + $0x48] sm:$0xff]   ;;  %v7750_v30 = vld [vmem:[%s10981_s0 + $0x50] sm:$0xff]   ;;  %v7751_v31 = vld [vmem:[%s10981_s0 + $0x1d8] sm:$0xff]  }
   0xa   :  { %7313 = vmatprep.subr.bf16.mxu0 %v7836_v0  ;;  %7519 = vmatprep.subr.bf16.mxu1 %v7836_v0  ;;  %v7752_v32 = vld [vmem:[%s10981_s0 + $0x58] sm:$0xff]   ;;  %v7753_v33 = vld [vmem:[%s10981_s0 + $0x1e0] sm:$0xff]   ;;  %v7755_v35 = vld [vmem:[%s10981_s0 + $0x1e8] sm:$0xff]  }
   0xb   :  { %v7754_v34 = vld [vmem:[%s10981_s0 + $0x60] sm:$0xff]   ;;  %v7756_v36 = vld [vmem:[%s10981_s0 + $0x68] sm:$0xff]   ;;  %v7757_v37 = vld [vmem:[%s10981_s0 + $0x1f0] sm:$0xff]  }
   0xc   :  { %v7758_v38 = vld [vmem:[%s10981_s0 + $0x70] sm:$0xff]   ;;  %v7759_v39 = vld [vmem:[%s10981_s0 + $0x1f8] sm:$0xff]   ;;  %v7761_v41 = vld [vmem:[%s10981_s0 + $0x200] sm:$0xff]  }
   0xd   :  { %7314 = vmatpush3.bf16.msra.mxu0 %v7727_v7  ;;  %7520 = vmatpush3.bf16.msra.mxu1 %v7727_v7  ;;  %v7760_v40 = vld [vmem:[%s10981_s0 + $0x78] sm:$0xff]   ;;  %v7762_v42 = vld [vmem:[%s10981_s0 + $0x80] sm:$0xff]   ;;  %v7763_v43 = vld [vmem:[%s10981_s0 + $0x208] sm:$0xff]  }
   0xe   :  { %7315 = vmatprep.subr.bf16.mxu0 %v7836_v0  ;;  %7521 = vmatprep.subr.bf16.mxu1 %v7836_v0  ;;  %v7764_v44 = vld [vmem:[%s10981_s0 + $0x88] sm:$0xff]   ;;  %v7765_v45 = vld [vmem:[%s10981_s0 + $0x210] sm:$0xff]   ;;  %v7767_v47 = vld [vmem:[%s10981_s0 + $0x218] sm:$0xff]  }
   0xf   :  { %v7766_v46 = vld [vmem:[%s10981_s0 + $0x90] sm:$0xff]   ;;  %v7768_v48 = vld [vmem:[%s10981_s0 + $0x98] sm:$0xff]   ;;  %v7769_v49 = vld [vmem:[%s10981_s0 + $0x220] sm:$0xff]  }
  0x10   :  { %v7770_v50 = vld [vmem:[%s10981_s0 + $0xa0] sm:$0xff]   ;;  %v7771_v51 = vld [vmem:[%s10981_s0 + $0x228] sm:$0xff]   ;;  %v7773_v53 = vld [vmem:[%s10981_s0 + $0x230] sm:$0xff]  }
  0x11   :  { %7316 = vmatpush3.bf16.msra.mxu0 %v7728_v8  ;;  %7522 = vmatpush3.bf16.msra.mxu1 %v7728_v8  ;;  %v7772_v52 = vld [vmem:[%s10981_s0 + $0xa8] sm:$0xff]   ;;  %v7774_v54 = vld [vmem:[%s10981_s0 + $0xb0] sm:$0xff]   ;;  %v7775_v55 = vld [vmem:[%s10981_s0 + $0x238] sm:$0xff]  }
  0x12   :  { %7317 = vmatprep.subr.bf16.mxu0 %v7836_v0  ;;  %7523 = vmatprep.subr.bf16.mxu1 %v7836_v0  ;;  %v7776_v56 = vld [vmem:[%s10981_s0 + $0xb8] sm:$0xff]   ;;  %v7777_v57 = vld [vmem:[%s10981_s0 + $0x240] sm:$0xff]   ;;  %v7779_v59 = vld [vmem:[%s10981_s0 + $0x248] sm:$0xff]  }
  0x13   :  { %v7778_v58 = vld [vmem:[%s10981_s0 + $0xc0] sm:$0xff]   ;;  %v7780_v7 = vld [vmem:[%s10981_s0 + $0xc8] sm:$0xff]   ;;  %v7781_v8 = vld [vmem:[%s10981_s0 + $0x250] sm:$0xff]  }
  0x14   :  { %v8191_v60 = vld [vmem:[%s10982_s2] ss:$0 sm:$0xff] }
  0x15   :  { %7318 = vmatpush3.bf16.msra.mxu0 %v7729_v9  ;;  %7524 = vmatpush3.bf16.msra.mxu1 %v7729_v9  ;;  %v8196_v61 = vld [vmem:[%s10983_s3] ss:$0 sm:$0xff] }
  0x18   :  { %7320 = vmatmul.mubr.msk.bf16.vlgmr.msra.gmra.mxu0 %vm402_vm3, %v7730_v10  ;;  %7526 = vmatmul.mubr.msk.bf16.vlgmr.msra.gmra.mxu1 %vm402_vm3, %v7731_v11 }
  0x19   :  { %7323 = vmatprep.mubr.msk.bf16.mxu0 %vm7838_vm2, %v7836_v0  ;;  %7529 = vmatprep.mubr.msk.bf16.mxu1 %vm7838_vm2, %v7836_v0 }
  0x20   :  { %7324 = vmatmul.mubr.msk.bf16.gmra.mxu0 %vm402_vm3, %v7732_v12  ;;  %7530 = vmatmul.mubr.msk.bf16.gmra.mxu1 %vm402_vm3, %v7733_v13 }
  0x21   :  { %7327 = vmatprep.mubr.msk.bf16.mxu0 %vm7838_vm2, %v7836_v0  ;;  %7533 = vmatprep.mubr.msk.bf16.mxu1 %vm7838_vm2, %v7836_v0 }
  0x28   :  { %7328 = vmatmul.mubr.msk.bf16.gmra.mxu0 %vm402_vm3, %v7734_v14  ;;  %7534 = vmatmul.mubr.msk.bf16.gmra.mxu1 %vm402_vm3, %v7735_v15 }
  0x29   :  { %7331 = vmatprep.mubr.msk.bf16.mxu0 %vm7838_vm2, %v7836_v0  ;;  %7537 = vmatprep.mubr.msk.bf16.mxu1 %vm7838_vm2, %v7836_v0 }
  0x30   :  { %7332 = vmatmul.mubr.msk.bf16.gmra.mxu0 %vm402_vm3, %v7736_v16  ;;  %7538 = vmatmul.mubr.msk.bf16.gmra.mxu1 %vm402_vm3, %v7737_v17 }
  0x31   :  { %7335 = vmatprep.mubr.msk.bf16.mxu0 %vm7838_vm2, %v7836_v0  ;;  %7541 = vmatprep.mubr.msk.bf16.mxu1 %vm7838_vm2, %v7836_v0 }
  0x38   :  { %7336 = vmatmul.mubr.msk.bf16.gmra.mxu0 %vm402_vm3, %v7738_v18  ;;  %7542 = vmatmul.mubr.msk.bf16.gmra.mxu1 %vm402_vm3, %v7739_v19 }
  0x39   :  { %7339 = vmatprep.mubr.msk.bf16.mxu0 %vm7838_vm2, %v7836_v0  ;;  %7545 = vmatprep.mubr.msk.bf16.mxu1 %vm7838_vm2, %v7836_v0 }
  0x40   :  { %7340 = vmatmul.mubr.msk.bf16.gmra.mxu0 %vm402_vm3, %v7740_v20  ;;  %7546 = vmatmul.mubr.msk.bf16.gmra.mxu1 %vm402_vm3, %v7741_v21 }
  0x41   :  { %7343 = vmatprep.mubr.msk.bf16.mxu0 %vm7838_vm2, %v7836_v0  ;;  %7549 = vmatprep.mubr.msk.bf16.mxu1 %vm7838_vm2, %v7836_v0 }
  0x48   :  { %7344 = vmatmul.mubr.msk.bf16.gmra.mxu0 %vm402_vm3, %v7742_v22  ;;  %7550 = vmatmul.mubr.msk.bf16.gmra.mxu1 %vm402_vm3, %v7743_v23 }
  0x49   :  { %7347 = vmatprep.mubr.msk.bf16.mxu0 %vm7838_vm2, %v7836_v0  ;;  %7553 = vmatprep.mubr.msk.bf16.mxu1 %vm7838_vm2, %v7836_v0 }
  0x50   :  { %7348 = vmatmul.mubr.msk.bf16.gmra.mxu0 %vm402_vm3, %v7744_v24  ;;  %7554 = vmatmul.mubr.msk.bf16.gmra.mxu1 %vm402_vm3, %v7745_v25  ;;  %v7782_v25 = vld [vmem:[%s10981_s0 + $0xd0] sm:$0xff]  }
  0x51   :  { %7351 = vmatprep.mubr.msk.bf16.mxu0 %vm7838_vm2, %v7836_v0  ;;  %7557 = vmatprep.mubr.msk.bf16.mxu1 %vm7838_vm2, %v7836_v0 }
  0x58   :  { %7352 = vmatmul.mubr.msk.bf16.gmra.mxu0 %vm402_vm3, %v7746_v26  ;;  %7558 = vmatmul.mubr.msk.bf16.gmra.mxu1 %vm402_vm3, %v7747_v27  ;;  %v7783_v26 = vld [vmem:[%s10981_s0 + $0x258] sm:$0xff]  }
  0x59   :  { %7355 = vmatprep.mubr.msk.bf16.mxu0 %vm7838_vm2, %v7836_v0  ;;  %7561 = vmatprep.mubr.msk.bf16.mxu1 %vm7838_vm2, %v7836_v0 }
  0x60   :  { %7356 = vmatmul.mubr.msk.bf16.gmra.mxu0 %vm402_vm3, %v7748_v28  ;;  %7562 = vmatmul.mubr.msk.bf16.gmra.mxu1 %vm402_vm3, %v7749_v29 }
  0x61   :  { %7359 = vmatprep.mubr.msk.bf16.mxu0 %vm7838_vm2, %v7836_v0  ;;  %7565 = vmatprep.mubr.msk.bf16.mxu1 %vm7838_vm2, %v7836_v0 }
  0x68   :  { %7360 = vmatmul.mubr.msk.bf16.gmra.mxu0 %vm402_vm3, %v7750_v30  ;;  %7566 = vmatmul.mubr.msk.bf16.gmra.mxu1 %vm402_vm3, %v7751_v31 }
  0x69   :  { %7363 = vmatprep.mubr.msk.bf16.mxu0 %vm7838_vm2, %v7836_v0  ;;  %7569 = vmatprep.mubr.msk.bf16.mxu1 %vm7838_vm2, %v7836_v0 }
  0x70   :  { %7364 = vmatmul.mubr.msk.bf16.gmra.mxu0 %vm402_vm3, %v7752_v32  ;;  %7570 = vmatmul.mubr.msk.bf16.gmra.mxu1 %vm402_vm3, %v7753_v33 }
  0x71   :  { %7367 = vmatprep.mubr.msk.bf16.mxu0 %vm7838_vm2, %v7836_v0  ;;  %7573 = vmatprep.mubr.msk.bf16.mxu1 %vm7838_vm2, %v7836_v0 }
  0x78   :  { %7368 = vmatmul.mubr.msk.bf16.gmra.mxu0 %vm402_vm3, %v7754_v34  ;;  %7574 = vmatmul.mubr.msk.bf16.gmra.mxu1 %vm402_vm3, %v7755_v35 }
  0x79   :  { %7371 = vmatprep.mubr.msk.bf16.mxu0 %vm7838_vm2, %v7836_v0  ;;  %7577 = vmatprep.mubr.msk.bf16.mxu1 %vm7838_vm2, %v7836_v0 }
  0x80   :  { %7372 = vmatmul.mubr.msk.bf16.gmra.mxu0 %vm402_vm3, %v7756_v36  ;;  %7578 = vmatmul.mubr.msk.bf16.gmra.mxu1 %vm402_vm3, %v7757_v37 }
  0x81   :  { %7375 = vmatprep.mubr.msk.bf16.mxu0 %vm7838_vm2, %v7836_v0  ;;  %7581 = vmatprep.mubr.msk.bf16.mxu1 %vm7838_vm2, %v7836_v0 }
  0x88   :  { %7376 = vmatmul.mubr.msk.bf16.gmra.mxu0 %vm402_vm3, %v7758_v38  ;;  %7582 = vmatmul.mubr.msk.bf16.gmra.mxu1 %vm402_vm3, %v7759_v39 }
  0x89   :  { %7379 = vmatprep.mubr.msk.bf16.mxu0 %vm7838_vm2, %v7836_v0  ;;  %7585 = vmatprep.mubr.msk.bf16.mxu1 %vm7838_vm2, %v7836_v0 }
  0x90   :  { %7380 = vmatmul.mubr.msk.bf16.gmra.mxu0 %vm402_vm3, %v7760_v40  ;;  %7586 = vmatmul.mubr.msk.bf16.gmra.mxu1 %vm402_vm3, %v7761_v41 }
  0x91   :  { %7383 = vmatprep.mubr.msk.bf16.mxu0 %vm7838_vm2, %v7836_v0  ;;  %7589 = vmatprep.mubr.msk.bf16.mxu1 %vm7838_vm2, %v7836_v0 }
  0x98   :  { %7384 = vmatmul.mubr.msk.bf16.gmra.mxu0 %vm402_vm3, %v7762_v42  ;;  %7590 = vmatmul.mubr.msk.bf16.gmra.mxu1 %vm402_vm3, %v7763_v43 }
  0x99   :  { %7387 = vmatprep.mubr.msk.bf16.mxu0 %vm7838_vm2, %v7836_v0  ;;  %7593 = vmatprep.mubr.msk.bf16.mxu1 %vm7838_vm2, %v7836_v0 }
  0xa0   :  { %7388 = vmatmul.mubr.msk.bf16.gmra.mxu0 %vm402_vm3, %v7764_v44  ;;  %7594 = vmatmul.mubr.msk.bf16.gmra.mxu1 %vm402_vm3, %v7765_v45 }
  0xa1   :  { %7391 = vmatprep.mubr.msk.bf16.mxu0 %vm7838_vm2, %v7836_v0  ;;  %7597 = vmatprep.mubr.msk.bf16.mxu1 %vm7838_vm2, %v7836_v0 }
  0xa8   :  { %7392 = vmatmul.mubr.msk.bf16.gmra.mxu0 %vm402_vm3, %v7766_v46  ;;  %7598 = vmatmul.mubr.msk.bf16.gmra.mxu1 %vm402_vm3, %v7767_v47  ;;  %v7839_v47 = vmov 1983009808  }
  0xa9   :  { %7395 = vmatprep.mubr.msk.bf16.mxu0 %vm7838_vm2, %v7836_v0  ;;  %7601 = vmatprep.mubr.msk.bf16.mxu1 %vm7838_vm2, %v7836_v0 }
  0xb0   :  { %7396 = vmatmul.mubr.msk.bf16.gmra.mxu0 %vm402_vm3, %v7768_v48  ;;  %7602 = vmatmul.mubr.msk.bf16.gmra.mxu1 %vm402_vm3, %v7769_v49  ;;  %v1682_v48 = vunpack.c.l.s4 %v7839_v47  ;;  %v1684_v49 = vlaneseq }
  0xb1   :  { %7399 = vmatprep.mubr.msk.bf16.mxu0 %vm7838_vm2, %v7836_v0  ;;  %7605 = vmatprep.mubr.msk.bf16.mxu1 %vm7838_vm2, %v7836_v0 }
  0xb8   :  { %7400 = vmatmul.mubr.msk.bf16.gmra.mxu0 %vm402_vm3, %v7770_v50  ;;  %7606 = vmatmul.mubr.msk.bf16.gmra.mxu1 %vm402_vm3, %v7771_v51 }
  0xb9   :  { %7403 = vmatprep.mubr.msk.bf16.mxu0 %vm7838_vm2, %v7836_v0  ;;  %7609 = vmatprep.mubr.msk.bf16.mxu1 %vm7838_vm2, %v7836_v0 }
  0xc0   :  { %7404 = vmatmul.mubr.msk.bf16.gmra.mxu0 %vm402_vm3, %v7772_v52  ;;  %7610 = vmatmul.mubr.msk.bf16.gmra.mxu1 %vm402_vm3, %v7773_v53  ;;  %v7784_v52 = vld [vmem:[%s10981_s0 + $0xd8] sm:$0xff]   ;;  %v7785_v53 = vld [vmem:[%s10981_s0 + $0x260] sm:$0xff]  }
  0xc1   :  { %7407 = vmatprep.mubr.msk.bf16.mxu0 %vm7838_vm2, %v7836_v0  ;;  %7613 = vmatprep.mubr.msk.bf16.mxu1 %vm7838_vm2, %v7836_v0 }
  0xc8   :  { %7408 = vmatmul.mubr.msk.bf16.gmra.mxu0 %vm402_vm3, %v7774_v54  ;;  %7614 = vmatmul.mubr.msk.bf16.gmra.mxu1 %vm402_vm3, %v7775_v55 }
  0xc9   :  { %7411 = vmatprep.mubr.msk.bf16.mxu0 %vm7838_vm2, %v7836_v0  ;;  %7617 = vmatprep.mubr.msk.bf16.mxu1 %vm7838_vm2, %v7836_v0 }
  0xd0   :  { %7412 = vmatmul.mubr.msk.bf16.gmra.mxu0 %vm402_vm3, %v7776_v56  ;;  %7618 = vmatmul.mubr.msk.bf16.gmra.mxu1 %vm402_vm3, %v7777_v57 }
  0xd1   :  { %7415 = vmatprep.mubr.msk.bf16.mxu0 %vm7838_vm2, %v7836_v0  ;;  %7621 = vmatprep.mubr.msk.bf16.mxu1 %vm7838_vm2, %v7836_v0 }
  0xd8   :  { %v591_v62 = vpop.f32.mrf.mxu0  ;;  %7416 = vmatmul.mubr.msk.bf16.gmra.mxu0 %vm402_vm3, %v7778_v58  ;;  %v3999_v63 = vpop.f32.mrf.mxu1  ;;  %7622 = vmatmul.mubr.msk.bf16.gmra.mxu1 %vm402_vm3, %v7779_v59 }
  0xd9   :  { %v988_v1 = vmul.f32 %v8191_v60, %v591_v62  ;;  %7419 = vmatprep.mubr.msk.bf16.mxu0 %vm7838_vm2, %v7836_v0  ;;  %7625 = vmatprep.mubr.msk.bf16.mxu1 %vm7838_vm2, %v7836_v0  ;;  %v4390_v16 = vmul.f32 %v8191_v60, %v3999_v63  ;;  %v1683_v62 = vunpack.c.0.s8 %v1682_v48  ;;  %v1685_v63 = vshrl.u32 %v1684_v49, 7 }
  0xda   :  { %v7321_v2 = vpop.f32.mrf.mxu0  ;;  %v7527_v3 = vpop.f32.mrf.mxu1 }
  0xdb   :  { %v1092_v4 = vadd.f32 %v8196_v61, %v988_v1  ;;  %v4488_v27 = vadd.f32 %v8196_v61, %v4390_v16  ;;  %v8271_v16 = vsub.s32 %v1683_v62, %v1685_v63  ;;  %v7789_v62 = vld [vmem:[%s10981_s0 + $0x270] sm:$0xff]  }
  0xdc   :  { %v594_v5 = vpop.f32.mrf.mxu0  ;;  %v4002_v6 = vpop.f32.mrf.mxu1 }
  0xdd   :  { %v1190_v9 = vmax.f32 %v1092_v4, 0.0  ;;  %v989_v10 = vmul.f32 %v8191_v60, %v594_v5  ;;  %v4391_v18 = vmul.f32 %v8191_v60, %v4002_v6  ;;  %v4586_v36 = vmax.f32 %v4488_v27, 0.0 }
  0xde   :  { %v7322_v11 = vpop.f32.mrf.mxu0  ;;  %v7528_v12 = vpop.f32.mrf.mxu1 }
  0xdf   :  { %1289 = vst.msk [vmem:[#allocation2] sm:$0xff] %vm1288_vm4, %v1190_v9  ;;  %v1093_v13 = vadd.f32 %v8196_v61, %v989_v10  ;;  %v4489_v28 = vadd.f32 %v8196_v61, %v4391_v18 }
  0xe0   :  { %v599_v14 = vpop.f32.mrf.mxu0  ;;  %7420 = vmatmul.mubr.msk.bf16.gmra.mxu0 %vm402_vm3, %v7780_v7  ;;  %v4007_v15 = vpop.f32.mrf.mxu1  ;;  %7626 = vmatmul.mubr.msk.bf16.gmra.mxu1 %vm402_vm3, %v7781_v8 }
  0xe1   :  { %v1191_v17 = vmax.f32 %v1093_v13, 0.0  ;;  %v990_v19 = vmul.f32 %v8191_v60, %v599_v14  ;;  %7423 = vmatprep.mubr.msk.bf16.mxu0 %vm7838_vm2, %v7836_v0  ;;  %7629 = vmatprep.mubr.msk.bf16.mxu1 %vm7838_vm2, %v7836_v0  ;;  %v4587_v37 = vmax.f32 %v4489_v28, 0.0  ;;  %v4392_v42 = vmul.f32 %v8191_v60, %v4007_v15 }
  0xe2   :  { %v7325_v20 = vpop.f32.mrf.mxu0  ;;  %v7531_v21 = vpop.f32.mrf.mxu1 }
  0xe3   :  { %1290 = vst.msk [vmem:[#allocation2 + $0x8] sm:$0xff] %vm1288_vm4, %v1191_v17  ;;  %v1094_v22 = vadd.f32 %v8196_v61, %v990_v19  ;;  %v4490_v55 = vadd.f32 %v8196_v61, %v4392_v42  ;;  %v7786_v20 = vld [vmem:[%s10981_s0 + $0xe0] sm:$0xff]   ;;  %v7787_v21 = vld [vmem:[%s10981_s0 + $0x268] sm:$0xff]  }
  0xe4   :  { %v602_v23 = vpop.f32.mrf.mxu0  ;;  %v4010_v24 = vpop.f32.mrf.mxu1 }
  0xe5   :  { %v1192_v29 = vmax.f32 %v1094_v22, 0.0  ;;  %v991_v30 = vmul.f32 %v8191_v60, %v602_v23  ;;  %v4393_v43 = vmul.f32 %v8191_v60, %v4010_v24  ;;  %v4588_v6 = vmax.f32 %v4490_v55, 0.0 }
  0xe6   :  { %v7326_v31 = vpop.f32.mrf.mxu0  ;;  %v7532_v32 = vpop.f32.mrf.mxu1 }
  0xe7   :  { %1291 = vst.msk [vmem:[#allocation2 + $0x10] sm:$0xff] %vm1288_vm4, %v1192_v29  ;;  %v1095_v33 = vadd.f32 %v8196_v61, %v991_v30  ;;  %v4491_v56 = vadd.f32 %v8196_v61, %v4393_v43 }
  0xe8   :  { %v607_v34 = vpop.f32.mrf.mxu0  ;;  %7424 = vmatmul.mubr.msk.bf16.gmra.mxu0 %vm402_vm3, %v7782_v25  ;;  %v4015_v35 = vpop.f32.mrf.mxu1  ;;  %7630 = vmatmul.mubr.msk.bf16.gmra.mxu1 %vm402_vm3, %v7783_v26 }
  0xe9   :  { %v1193_v38 = vmax.f32 %v1095_v33, 0.0  ;;  %v992_v39 = vmul.f32 %v8191_v60, %v607_v34  ;;  %7427 = vmatprep.mubr.msk.bf16.mxu0 %vm7838_vm2, %v7836_v0  ;;  %7633 = vmatprep.mubr.msk.bf16.mxu1 %vm7838_vm2, %v7836_v0  ;;  %v4589_v8 = vmax.f32 %v4491_v56, 0.0  ;;  %v4394_v12 = vmul.f32 %v8191_v60, %v4015_v35 }
  0xea   :  { %v1387_v40 = vld [vmem:[#allocation2] ss:$2 sm:$0xff]  ;;  %v1485_v41 = vld [vmem:[#allocation2 + $0x1] ss:$2 sm:$0xff]  ;;  %v7329_v44 = vpop.f32.mrf.mxu0  ;;  %v7535_v45 = vpop.f32.mrf.mxu1 }
  0xeb   :  { %4684 = vst.msk [vmem:[#allocation2] sm:$0xff] %vm1288_vm4, %v4586_v36  ;;  %4685 = vst.msk [vmem:[#allocation2 + $0x8] sm:$0xff] %vm1288_vm4, %v4587_v37  ;;  %v1096_v46 = vadd.f32 %v8196_v61, %v992_v39  ;;  %v1582_v4 = vmax.f32 %v1387_v40, %v1485_v41  ;;  %v4492_v30 = vadd.f32 %v8196_v61, %v4394_v12  ;;  %v7788_v45 = vld [vmem:[%s10981_s0 + $0xe8] sm:$0xff]  }
  0xec   :  { %1292 = vst.msk [vmem:[#allocation2 + $0x18] sm:$0xff] %vm1288_vm4, %v1193_v38  ;;  %v610_v50 = vpop.f32.mrf.mxu0  ;;  %v4018_v51 = vpop.f32.mrf.mxu1 }
  0xed   :  { %v1194_v54 = vmax.f32 %v1096_v46, 0.0  ;;  %v993_v57 = vmul.f32 %v8191_v60, %v610_v50  ;;  %v4395_v14 = vmul.f32 %v8191_v60, %v4018_v51  ;;  %v1680_v22 = vcombine.high %v1582_v4, %v1582_v4 }
  0xee   :  { %v7330_v58 = vpop.f32.mrf.mxu0  ;;  %v7536_v59 = vpop.f32.mrf.mxu1  ;;  %v1687_v34 = vrot.slane %v1582_v4, %v8271_v16  ;;  %v4590_v48 = vmax.f32 %v4492_v30, 0.0 }
  0xef   :  { %1293 = vst.msk [vmem:[#allocation2 + $0x20] sm:$0xff] %vm1288_vm4, %v1194_v54  ;;  %v1097_v1 = vadd.f32 %v8196_v61, %v993_v57  ;;  %v4493_v31 = vadd.f32 %v8196_v61, %v4395_v14  ;;  %v8296_v39 = vrot.slane %v1680_v22, %v8271_v16 }
  0xf0   :  { %v615_v2 = vpop.f32.mrf.mxu0  ;;  %7428 = vmatmul.mubr.msk.bf16.gmra.mxu0 %vm402_vm3, %v7784_v52  ;;  %v4023_v3 = vpop.f32.mrf.mxu1  ;;  %7634 = vmatmul.mubr.msk.bf16.gmra.mxu1 %vm402_vm3, %v7785_v53  ;;  %v1695_v52 = vcombine.high %v1687_v34, %v1687_v34 }
  0xf1   :  { %v994_v5 = vmul.f32 %v8191_v60, %v615_v2  ;;  %7431 = vmatprep.mubr.msk.bf16.mxu0 %vm7838_vm2, %v7836_v0  ;;  %7637 = vmatprep.mubr.msk.bf16.mxu1 %vm7838_vm2, %v7836_v0  ;;  %v1195_v13 = vmax.f32 %v1097_v1, 0.0  ;;  %v4396_v32 = vmul.f32 %v8191_v60, %v4023_v3  ;;  %v4591_v49 = vmax.f32 %v4493_v31, 0.0 }
  0xf2   :  { %v7333_v9 = vpop.f32.mrf.mxu0  ;;  %v7539_v10 = vpop.f32.mrf.mxu1  ;;  %v4782_v28 = vld [vmem:[#allocation2] ss:$2 sm:$0xff]  ;;  %v4831_v29 = vld [vmem:[#allocation2 + $0x1] ss:$2 sm:$0xff]  ;;  %v1696_v63 = vcombine.high %v8296_v39, %v8296_v39 }
  0xf3   :  { %v1389_v7 = vld [vmem:[#allocation2 + $0x10] ss:$2 sm:$0xff]  ;;  %v1487_v11 = vld [vmem:[#allocation2 + $0x11] ss:$2 sm:$0xff]  ;;  %v1098_v15 = vadd.f32 %v8196_v61, %v994_v5  ;;  %1294 = vst.msk [vmem:[#allocation2 + $0x28] sm:$0xff] %vm1288_vm4, %v1195_v13  ;;  %v4880_v42 = vmax.f32 %v4782_v28, %v4831_v29  ;;  %v4494_v50 = vadd.f32 %v8196_v61, %v4396_v32 }
  0xf4   :  { %v1583_v17 = vmax.f32 %v1389_v7, %v1487_v11  ;;  %4686 = vst.msk [vmem:[#allocation2 + $0x10] sm:$0xff] %vm1288_vm4, %v4588_v6  ;;  %4687 = vst.msk [vmem:[#allocation2 + $0x18] sm:$0xff] %vm1288_vm4, %v4589_v8  ;;  %v618_v18 = vpop.f32.mrf.mxu0  ;;  %v4026_v19 = vpop.f32.mrf.mxu1 }
  0xf5   :  { %v1196_v23 = vmax.f32 %v1098_v15, 0.0  ;;  %v995_v24 = vmul.f32 %v8191_v60, %v618_v18  ;;  %v4397_v36 = vmul.f32 %v8191_v60, %v4026_v19  ;;  %v4978_v4 = vcombine.high %v4880_v42, %v4880_v42 }
  0xf6   :  { %v1697_v25 = vcombine.high %v1583_v17, %v1583_v17  ;;  %v7334_v26 = vpop.f32.mrf.mxu0  ;;  %v7540_v27 = vpop.f32.mrf.mxu1  ;;  %v8323_v5 = vrot.slane %v4880_v42, %v8271_v16  ;;  %v8326_v6 = vrot.slane %v1583_v17, %v8271_v16  ;;  %v4592_v12 = vmax.f32 %v4494_v50, 0.0 }
  0xf7   :  { %1295 = vst.msk [vmem:[#allocation2 + $0x30] sm:$0xff] %vm1288_vm4, %v1196_v23  ;;  %v1099_v33 = vadd.f32 %v8196_v61, %v995_v24  ;;  %v4495_v57 = vadd.f32 %v8196_v61, %v4397_v36  ;;  %v4992_v31 = vrot.slane %v4978_v4, %v8271_v16 }
  0xf8   :  { %v8290_v35 = vrot.slane %v1697_v25, %v8271_v16  ;;  %v623_v37 = vpop.f32.mrf.mxu0  ;;  %7432 = vmatmul.mubr.msk.bf16.gmra.mxu0 %vm402_vm3, %v7786_v20  ;;  %v4031_v38 = vpop.f32.mrf.mxu1  ;;  %7638 = vmatmul.mubr.msk.bf16.gmra.mxu1 %vm402_vm3, %v7787_v21 }
  0xf9   :  { %v1197_v40 = vmax.f32 %v1099_v33, 0.0  ;;  %v996_v41 = vmul.f32 %v8191_v60, %v623_v37  ;;  %7435 = vmatprep.mubr.msk.bf16.mxu0 %vm7838_vm2, %v7836_v0  ;;  %7641 = vmatprep.mubr.msk.bf16.mxu1 %vm7838_vm2, %v7836_v0  ;;  %v4593_v15 = vmax.f32 %v4495_v57, 0.0  ;;  %v4398_v18 = vmul.f32 %v8191_v60, %v4031_v38 }
  0xfa   :  { %v7337_v43 = vpop.f32.mrf.mxu0  ;;  %v7543_v44 = vpop.f32.mrf.mxu1  ;;  %v1713_v53 = vcombine.high %v8290_v35, %v8290_v35  ;;  %v1391_v55 = vld [vmem:[#allocation2 + $0x20] ss:$2 sm:$0xff]  ;;  %v1489_v56 = vld [vmem:[#allocation2 + $0x21] ss:$2 sm:$0xff] }
  0xfb   :  { %v4783_v46 = vld [vmem:[#allocation2 + $0x10] ss:$2 sm:$0xff]  ;;  %v4832_v47 = vld [vmem:[#allocation2 + $0x11] ss:$2 sm:$0xff]  ;;  %1296 = vst.msk [vmem:[#allocation2 + $0x38] sm:$0xff] %vm1288_vm4, %v1197_v40  ;;  %v1100_v51 = vadd.f32 %v8196_v61, %v996_v41  ;;  %v1584_v1 = vmax.f32 %v1391_v55, %v1489_v56  ;;  %4688 = vst.msk [vmem:[#allocation2 + $0x20] sm:$0xff] %vm1288_vm4, %v4590_v48  ;;  %v4496_v40 = vadd.f32 %v8196_v61, %v4398_v18 }
  0xfc   :  { %v8311_v54 = vmax.f32 %v4783_v46, %v4832_v47  ;;  %v626_v58 = vpop.f32.mrf.mxu0  ;;  %v4034_v59 = vpop.f32.mrf.mxu1  ;;  %4689 = vst.msk [vmem:[#allocation2 + $0x28] sm:$0xff] %vm1288_vm4, %v4591_v49  ;;  %v2709_v14 = vmax.f32 %v1687_v34, %v1713_v53  ;;  %v7790_v44 = vld [vmem:[%s10981_s0 + $0xf0] sm:$0xff]   ;;  %v1712_v46 = vcombine.high %v8326_v6, %v8326_v6  ;;  %v7791_v49 = vld [vmem:[%s10981_s0 + $0x278] sm:$0xff]  }
  0xfd   :  { %v1198_v2 = vmax.f32 %v1100_v51, 0.0  ;;  %v997_v3 = vmul.f32 %v8191_v60, %v626_v58  ;;  %v1714_v10 = vcombine.high %v1584_v1, %v1584_v1  ;;  %v1721_v11 = vrot.slane %v1584_v1, %v8271_v16 }
  0xfe   :  { %v4995_v7 = vcombine.high %v8311_v54, %v8311_v54  ;;  %v7338_v8 = vpop.f32.mrf.mxu0  ;;  %v7544_v9 = vpop.f32.mrf.mxu1  ;;  %v4399_v17 = vmul.f32 %v8191_v60, %v4034_v59 }
  0xff   :  { %1297 = vst.msk [vmem:[#allocation2 + $0x40] sm:$0xff] %vm1288_vm4, %v1198_v2  ;;  %v1101_v13 = vadd.f32 %v8196_v61, %v997_v3  ;;  %v8340_v21 = vrot.slane %v1714_v10, %v8271_v16  ;;  %v1729_v22 = vcombine.high %v1721_v11, %v1721_v11  ;;  %v2710_v23 = vmax.f32 %v1695_v52, %v1721_v11 }
 0x100   :  { %v631_v19 = vpop.f32.mrf.mxu0  ;;  %7436 = vmatmul.mubr.msk.bf16.gmra.mxu0 %vm402_vm3, %v7788_v45  ;;  %v8336_v20 = vpop.f32.mrf.mxu1  ;;  %7642 = vmatmul.mubr.msk.bf16.gmra.mxu1 %vm402_vm3, %v7789_v62  ;;  %v8347_v25 = vrot.slane %v4995_v7, %v8271_v16  ;;  %v4497_v41 = vadd.f32 %v8196_v61, %v4399_v17  ;;  %v4993_v45 = vcombine.high %v8323_v5, %v8323_v5  ;;  %v4594_v2 = vmax.f32 %v4496_v40, 0.0 }
 0x101   :  { %v1199_v24 = vmax.f32 %v1101_v13, 0.0  ;;  %7439 = vmatprep.mubr.msk.bf16.mxu0 %vm7838_vm2, %v7836_v0  ;;  %7645 = vmatprep.mubr.msk.bf16.mxu1 %vm7838_vm2, %v7836_v0  ;;  %v998_v28 = vmul.f32 %v8191_v60, %v631_v19  ;;  %v2711_v32 = vmax.f32 %v8296_v39, %v1729_v22  ;;  %v2712_v33 = vmax.f32 %v1696_v63, %v8340_v21 }
 0x102   :  { %v1393_v26 = vld [vmem:[#allocation2 + $0x30] ss:$2 sm:$0xff]  ;;  %v1491_v27 = vld [vmem:[#allocation2 + $0x31] ss:$2 sm:$0xff]  ;;  %v7341_v29 = vpop.f32.mrf.mxu0  ;;  %v7547_v30 = vpop.f32.mrf.mxu1  ;;  %v2905_v34 = vcombine.low %v2709_v14, %v2710_v23  ;;  %v5011_v50 = vcombine.high %v8347_v25, %v8347_v25  ;;  %v4994_v63 = vcombine.high %v4992_v31, %v4992_v31  ;;  %v1730_v1 = vcombine.high %v8340_v21, %v8340_v21 }
 0x103   :  { %4690 = vst.msk [vmem:[#allocation2 + $0x30] sm:$0xff] %vm1288_vm4, %v4592_v12  ;;  %4691 = vst.msk [vmem:[#allocation2 + $0x38] sm:$0xff] %vm1288_vm4, %v4593_v15  ;;  %v4784_v36 = vld [vmem:[#allocation2 + $0x20] ss:$2 sm:$0xff]  ;;  %v4833_v37 = vld [vmem:[#allocation2 + $0x21] ss:$2 sm:$0xff]  ;;  %v8356_v38 = vmax.f32 %v1393_v26, %v1491_v27  ;;  %v1102_v42 = vadd.f32 %v8196_v61, %v998_v28  ;;  %v2906_v47 = vcombine.low %v2711_v32, %v2712_v33 }
 0x104   :  { %1298 = vst.msk [vmem:[#allocation2 + $0x48] sm:$0xff] %vm1288_vm4, %v1199_v24  ;;  %v634_v39 = vpop.f32.mrf.mxu0  ;;  %v4042_v43 = vpop.f32.mrf.mxu1  ;;  %v4882_v48 = vmax.f32 %v4784_v36, %v4833_v37  ;;  %v2913_v51 = vrot.slane %v2905_v34, %v8271_v16  ;;  %v4595_v3 = vmax.f32 %v4497_v41, 0.0  ;;  %v6007_v12 = vmax.f32 %v8323_v5, %v5011_v50  ;;  %v7792_v32 = vld [vmem:[%s10981_s0 + $0xf8] sm:$0xff]   ;;  %v7793_v36 = vld [vmem:[%s10981_s0 + $0x280] sm:$0xff]  }
 0x105   :  { %v8376_v52 = vrot.slane %v8356_v38, %v8271_v16  ;;  %v1200_v53 = vmax.f32 %v1102_v42, 0.0  ;;  %v2920_v57 = vrot.slane %v2906_v47, %v8271_v16  ;;  %v999_v62 = vmul.f32 %v8191_v60, %v634_v39 }
 0x106   :  { %v7342_v55 = vpop.f32.mrf.mxu0  ;;  %v7548_v56 = vpop.f32.mrf.mxu1  ;;  %v5012_v58 = vcombine.high %v4882_v48, %v4882_v48  ;;  %v5019_v59 = vrot.slane %v4882_v48, %v8271_v16  ;;  %v1731_v13 = vcombine.high %v8356_v38, %v8356_v38  ;;  %v4400_v17 = vmul.f32 %v8191_v60, %v8336_v20 }
 0x107   :  { %1299 = vst.msk [vmem:[#allocation2 + $0x50] sm:$0xff] %vm1288_vm4, %v1200_v53  ;;  %v2921_v8 = vcombine.low %v2913_v51, %v2920_v57  ;;  %v1103_v19 = vadd.f32 %v8196_v61, %v999_v62  ;;  %v2714_v26 = vmax.f32 %v1712_v46, %v8376_v52  ;;  %v5002_v20 = vrot.slane %v8311_v54, %v8271_v16 }
 0x108   :  { %v639_v4 = vpop.f32.mrf.mxu0  ;;  %7440 = vmatmul.mubr.msk.bf16.gmra.mxu0 %vm402_vm3, %v7790_v44  ;;  %v8385_v7 = vpop.f32.mrf.mxu1  ;;  %v8388_v9 = vrot.slane %v5012_v58, %v8271_v16  ;;  %v5027_v10 = vcombine.high %v5019_v59, %v5019_v59  ;;  %v6008_v11 = vmax.f32 %v4993_v45, %v5019_v59  ;;  %7646 = vmatmul.mubr.msk.bf16.gmra.mxu1 %vm402_vm3, %v7791_v49 }
 0x109   :  { %7443 = vmatprep.mubr.msk.bf16.mxu0 %vm7838_vm2, %v7836_v0  ;;  %v7151_v23 = vpack.c.bf16 %v2921_v8, %v2921_v8  ;;  %7649 = vmatprep.mubr.msk.bf16.mxu1 %vm7838_vm2, %v7836_v0  ;;  %v2713_v29 = vmax.f32 %v8326_v6, %v1730_v1  ;;  %v1201_v34 = vmax.f32 %v1103_v19, 0.0  ;;  %v4401_v6 = vmul.f32 %v8191_v60, %v4042_v43  ;;  %v7795_v19 = vld [vmem:[%s10981_s0 + $0x288] sm:$0xff]  }
 0x10a   :  { %v4785_v14 = vld [vmem:[#allocation2 + $0x30] ss:$2 sm:$0xff]  ;;  %v4834_v15 = vld [vmem:[#allocation2 + $0x31] ss:$2 sm:$0xff]  ;;  %v7345_v21 = vpop.f32.mrf.mxu0  ;;  %v7551_v22 = vpop.f32.mrf.mxu1  ;;  %v6009_v24 = vmax.f32 %v4992_v31, %v5027_v10  ;;  %v6010_v5 = vmax.f32 %v4994_v63, %v8388_v9  ;;  %v6203_v28 = vcombine.low %v6007_v12, %v6008_v11  ;;  %v8422_v37 = vrot.slane %v1731_v13, %v8271_v16  ;;  %v7794_v13 = vld [vmem:[%s10981_s0 + $0x100] sm:$0xff]  }
 0x10b   :  { %v1395_v18 = vld [vmem:[#allocation2 + $0x40] ss:$2 sm:$0xff]  ;;  %v1493_v27 = vld [vmem:[#allocation2 + $0x41] ss:$2 sm:$0xff]  ;;  %3448 = vst.msk [vmem:[%s10984_s4] sm:$0xf] %vm3447_vm5, %v7151_v23  ;;  %v4883_v33 = vmax.f32 %v4785_v14, %v4834_v15  ;;  %v1746_v38 = vcombine.high %v8376_v52, %v8376_v52  ;;  %v4498_v40 = vadd.f32 %v8196_v61, %v4400_v17  ;;  %v2922_v45 = vcombine.low %v2713_v29, %v2714_v26 }
 0x10c   :  { %4692 = vst.msk [vmem:[#allocation2 + $0x40] sm:$0xff] %vm1288_vm4, %v4594_v2  ;;  %4693 = vst.msk [vmem:[#allocation2 + $0x48] sm:$0xff] %vm1288_vm4, %v4595_v3  ;;  %v642_v30 = vpop.f32.mrf.mxu0  ;;  %v8408_v31 = vpop.f32.mrf.mxu1  ;;  %v6204_v54 = vcombine.low %v6009_v24, %v6010_v5  ;;  %v6211_v39 = vrot.slane %v6203_v28, %v8271_v16  ;;  %v1000_v43 = vmul.f32 %v8191_v60, %v639_v4 }
 0x10d   :  { %1300 = vst.msk [vmem:[#allocation2 + $0x58] sm:$0xff] %vm1288_vm4, %v1201_v34  ;;  %v5010_v46 = vcombine.high %v5002_v20, %v5002_v20  ;;  %v5028_v47 = vcombine.high %v8388_v9, %v8388_v9  ;;  %v1586_v48 = vmax.f32 %v1395_v18, %v1493_v27  ;;  %v8435_v52 = vrot.slane %v4883_v33, %v8271_v16 }
 0x10e   :  { %v7346_v41 = vpop.f32.mrf.mxu0  ;;  %v7552_v42 = vpop.f32.mrf.mxu1  ;;  %v6218_v44 = vrot.slane %v6204_v54, %v8271_v16  ;;  %v4499_v53 = vadd.f32 %v8196_v61, %v4401_v6  ;;  %v1104_v55 = vadd.f32 %v8196_v61, %v1000_v43  ;;  %v1747_v56 = vcombine.high %v8422_v37, %v8422_v37 }
 0x10f   :  { %v8443_v57 = vmax.f32 %v8290_v35, %v1746_v38  ;;  %v5029_v58 = vcombine.high %v4883_v33, %v4883_v33  ;;  %v4596_v59 = vmax.f32 %v4498_v40, 0.0  ;;  %v8448_v2 = vrot.slane %v2922_v45, %v8271_v16 }
 0x110   :  { %v647_v49 = vpop.f32.mrf.mxu0  ;;  %7444 = vmatmul.mubr.msk.bf16.gmra.mxu0 %vm402_vm3, %v7792_v32  ;;  %v4055_v50 = vpop.f32.mrf.mxu1  ;;  %v6219_v51 = vcombine.low %v6211_v39, %v6218_v44  ;;  %7650 = vmatmul.mubr.msk.bf16.gmra.mxu1 %vm402_vm3, %v7793_v36  ;;  %v1202_v3 = vmax.f32 %v1104_v55, 0.0  ;;  %v1001_v4 = vmul.f32 %v8191_v60, %v642_v30  ;;  %v8453_v8 = vmax.f32 %v5002_v20, %v5028_v47 }
 0x111   :  { %7447 = vmatprep.mubr.msk.bf16.mxu0 %vm7838_vm2, %v7836_v0  ;;  %7653 = vmatprep.mubr.msk.bf16.mxu1 %vm7838_vm2, %v7836_v0  ;;  %v1748_v35 = vcombine.high %v1586_v48, %v1586_v48  ;;  %v8456_v9 = vrot.slane %v1586_v48, %v8271_v16  ;;  %v1002_v10 = vmul.f32 %v8191_v60, %v647_v49  ;;  %v4597_v15 = vmax.f32 %v4499_v53, 0.0 }
 0x112   :  { %v7349_v62 = vpop.f32.mrf.mxu0  ;;  %v7555_v63 = vpop.f32.mrf.mxu1  ;;  %v7176_v1 = vpack.c.bf16 %v6219_v51, %v6219_v51  ;;  %v6012_v14 = vmax.f32 %v5010_v46, %v8435_v52  ;;  %1301 = vst.msk [vmem:[#allocation2 + $0x60] sm:$0xff] %vm1288_vm4, %v1202_v3  ;;  %v1105_v18 = vadd.f32 %v8196_v61, %v1001_v4  ;;  %v8474_v21 = vrot.slane %v5029_v58, %v8271_v16 }
 0x113   :  { %v5044_v22 = vcombine.high %v8435_v52, %v8435_v52  ;;  %v4402_v5 = vmul.f32 %v8191_v60, %v8385_v7  ;;  %v1106_v26 = vadd.f32 %v8196_v61, %v1002_v10  ;;  %v4786_v28 = vld [vmem:[#allocation2 + $0x40] ss:$2 sm:$0xff]  ;;  %v4835_v29 = vld [vmem:[#allocation2 + $0x41] ss:$2 sm:$0xff]  ;;  %v4403_v54 = vmul.f32 %v8191_v60, %v8408_v31 }
 0x114   :  { %v650_v11 = vpop.f32.mrf.mxu0  ;;  %v4058_v12 = vpop.f32.mrf.mxu1  ;;  %7126 = vst.msk [vmem:[%s10984_s4 + $0x64] sm:$0xf] %vm3447_vm5, %v7176_v1  ;;  %v1397_v23 = vld [vmem:[#allocation2 + $0x50] ss:$2 sm:$0xff]  ;;  %v1495_v24 = vld [vmem:[#allocation2 + $0x51] ss:$2 sm:$0xff]  ;;  %v8487_v34 = vrot.slane %v1748_v35, %v8271_v16  ;;  %v1763_v7 = vcombine.high %v8456_v9, %v8456_v9  ;;  %v4404_v36 = vmul.f32 %v8191_v60, %v4055_v50  ;;  %v6220_v41 = vcombine.low %v8453_v8, %v6012_v14 }
 0x115   :  { %v1003_v17 = vmul.f32 %v8191_v60, %v650_v11  ;;  %v1587_v30 = vmax.f32 %v1397_v23, %v1495_v24  ;;  %4694 = vst.msk [vmem:[#allocation2 + $0x50] sm:$0xff] %vm1288_vm4, %v4596_v59  ;;  %4695 = vst.msk [vmem:[#allocation2 + $0x58] sm:$0xff] %vm1288_vm4, %v4597_v15  ;;  %v1203_v32 = vmax.f32 %v1105_v18, 0.0  ;;  %v1204_v6 = vmax.f32 %v1106_v26, 0.0  ;;  %v7796_v1 = vld [vmem:[%s10981_s0 + $0x108] sm:$0xff]   ;;  %v7797_v35 = vld [vmem:[%s10981_s0 + $0x290] sm:$0xff]  }
 0x116   :  { %v7350_v27 = vpop.f32.mrf.mxu0  ;;  %v7556_v20 = vpop.f32.mrf.mxu1  ;;  %v8501_v44 = vmax.f32 %v4786_v28, %v4835_v29  ;;  %v4500_v45 = vadd.f32 %v8196_v61, %v4402_v5  ;;  %v4405_v43 = vmul.f32 %v8191_v60, %v4058_v12  ;;  %v5045_v49 = vcombine.high %v8474_v21, %v8474_v21 }
 0x117   :  { %v1107_v33 = vadd.f32 %v8196_v61, %v1003_v17  ;;  %v1765_v42 = vcombine.high %v1587_v30, %v1587_v30  ;;  %v8495_v31 = vrot.slane %v1587_v30, %v8271_v16  ;;  %1302 = vst.msk [vmem:[#allocation2 + $0x68] sm:$0xff] %vm1288_vm4, %v1203_v32  ;;  %1303 = vst.msk [vmem:[#allocation2 + $0x70] sm:$0xff] %vm1288_vm4, %v1204_v6 }
 0x118   :  { %v655_v38 = vpop.f32.mrf.mxu0  ;;  %7448 = vmatmul.mubr.msk.bf16.gmra.mxu0 %vm402_vm3, %v7794_v13  ;;  %v4063_v40 = vpop.f32.mrf.mxu1  ;;  %7654 = vmatmul.mubr.msk.bf16.gmra.mxu1 %vm402_vm3, %v7795_v19  ;;  %v4501_v52 = vadd.f32 %v8196_v61, %v4403_v54  ;;  %v8517_v53 = vmax.f32 %v8347_v25, %v5044_v22  ;;  %v4502_v55 = vadd.f32 %v8196_v61, %v4404_v36  ;;  %v4598_v14 = vmax.f32 %v4500_v45, 0.0 }
 0x119   :  { %v1205_v39 = vmax.f32 %v1107_v33, 0.0  ;;  %7451 = vmatprep.mubr.msk.bf16.mxu0 %vm7838_vm2, %v7836_v0  ;;  %v1004_v46 = vmul.f32 %v8191_v60, %v655_v38  ;;  %7657 = vmatprep.mubr.msk.bf16.mxu1 %vm7838_vm2, %v7836_v0  ;;  %v1779_v50 = vrot.slane %v1765_v42, %v8271_v16  ;;  %v1780_v51 = vcombine.high %v8495_v31, %v8495_v31 }
 0x11a   :  { %v7353_v47 = vpop.f32.mrf.mxu0  ;;  %v7559_v48 = vpop.f32.mrf.mxu1  ;;  %v4503_v58 = vadd.f32 %v8196_v61, %v4405_v43  ;;  %v8526_v3 = vrot.slane %v6220_v41, %v8271_v16  ;;  %v1764_v4 = vcombine.high %v8487_v34, %v8487_v34  ;;  %v5046_v10 = vcombine.high %v8501_v44, %v8501_v44 }
 0x11b   :  { %1304 = vst.msk [vmem:[#allocation2 + $0x78] sm:$0xff] %vm1288_vm4, %v1205_v39  ;;  %v1108_v59 = vadd.f32 %v8196_v61, %v1004_v46  ;;  %v2716_v25 = vmax.f32 %v8422_v37, %v1780_v51  ;;  %v1781_v11 = vcombine.high %v1779_v50, %v1779_v50  ;;  %v4599_v23 = vmax.f32 %v4501_v52, 0.0 }
 0x11c   :  { %v658_v62 = vpop.f32.mrf.mxu0  ;;  %v4066_v63 = vpop.f32.mrf.mxu1  ;;  %v4787_v12 = vld [vmem:[#allocation2 + $0x50] ss:$2 sm:$0xff]  ;;  %v4836_v13 = vld [vmem:[#allocation2 + $0x51] ss:$2 sm:$0xff]  ;;  %v4406_v24 = vmul.f32 %v8191_v60, %v4063_v40  ;;  %v8541_v5 = vrot.slane %v8501_v44, %v8271_v16  ;;  %v4600_v20 = vmax.f32 %v4502_v55, 0.0  ;;  %v4601_v28 = vmax.f32 %v4503_v58, 0.0 }
 0x11d   :  { %v1005_v8 = vmul.f32 %v8191_v60, %v658_v62  ;;  %v1206_v15 = vmax.f32 %v1108_v59, 0.0  ;;  %v2923_v19 = vcombine.low %v8443_v57, %v2716_v25  ;;  %v4885_v22 = vmax.f32 %v4787_v12, %v4836_v13 }
 0x11e   :  { %v7354_v18 = vpop.f32.mrf.mxu0  ;;  %v7560_v17 = vpop.f32.mrf.mxu1  ;;  %v1399_v26 = vld [vmem:[#allocation2 + $0x60] ss:$2 sm:$0xff]  ;;  %v1497_v27 = vld [vmem:[#allocation2 + $0x61] ss:$2 sm:$0xff]  ;;  %v4407_v6 = vmul.f32 %v8191_v60, %v4066_v63  ;;  %v2718_v36 = vmax.f32 %v8456_v9, %v1781_v11  ;;  %v4504_v51 = vadd.f32 %v8196_v61, %v4406_v24  ;;  %v2717_v52 = vmax.f32 %v1747_v56, %v1779_v50  ;;  %v7798_v63 = vld [vmem:[%s10981_s0 + $0x110] sm:$0xff]  }
 0x11f   :  { %1305 = vst.msk [vmem:[#allocation2 + $0x80] sm:$0xff] %vm1288_vm4, %v1206_v15  ;;  %v1109_v29 = vadd.f32 %v8196_v61, %v1005_v8  ;;  %v2937_v32 = vrot.slane %v2923_v19, %v8271_v16  ;;  %v5063_v54 = vcombine.high %v4885_v22, %v4885_v22  ;;  %v8550_v33 = vrot.slane %v4885_v22, %v8271_v16  ;;  %v7799_v50 = vld [vmem:[%s10981_s0 + $0x298] sm:$0xff]  }
 0x120   :  { %v663_v30 = vpop.f32.mrf.mxu0  ;;  %7452 = vmatmul.mubr.msk.bf16.gmra.mxu0 %vm402_vm3, %v7796_v1  ;;  %v8546_v57 = vpop.f32.mrf.mxu1  ;;  %4696 = vst.msk [vmem:[#allocation2 + $0x60] sm:$0xff] %vm1288_vm4, %v4598_v14  ;;  %4697 = vst.msk [vmem:[#allocation2 + $0x68] sm:$0xff] %vm1288_vm4, %v4599_v23  ;;  %7658 = vmatmul.mubr.msk.bf16.gmra.mxu1 %vm402_vm3, %v7797_v35  ;;  %v1588_v38 = vmax.f32 %v1399_v26, %v1497_v27  ;;  %v4505_v56 = vadd.f32 %v8196_v61, %v4407_v6  ;;  %v4602_v24 = vmax.f32 %v4504_v51, 0.0 }
 0x121   :  { %v1207_v42 = vmax.f32 %v1109_v29, 0.0  ;;  %v1006_v39 = vmul.f32 %v8191_v60, %v663_v30  ;;  %7455 = vmatprep.mubr.msk.bf16.mxu0 %vm7838_vm2, %v7836_v0  ;;  %7661 = vmatprep.mubr.msk.bf16.mxu1 %vm7838_vm2, %v7836_v0  ;;  %v2938_v46 = vcombine.low %v8448_v2, %v2937_v32  ;;  %v5077_v47 = vrot.slane %v5063_v54, %v8271_v16 }
 0x122   :  { %v1401_v40 = vld [vmem:[#allocation2 + $0x70] ss:$2 sm:$0xff]  ;;  %v1499_v41 = vld [vmem:[#allocation2 + $0x71] ss:$2 sm:$0xff]  ;;  %v7357_v45 = vpop.f32.mrf.mxu0  ;;  %v7563_v43 = vpop.f32.mrf.mxu1  ;;  %v5078_v48 = vcombine.high %v8550_v33, %v8550_v33  ;;  %v1782_v55 = vcombine.high %v1588_v38, %v1588_v38  ;;  %v1789_v58 = vrot.slane %v1588_v38, %v8271_v16  ;;  %v2939_v8 = vcombine.low %v2717_v52, %v2718_v36 }
 0x123   :  { %4698 = vst.msk [vmem:[#allocation2 + $0x70] sm:$0xff] %vm1288_vm4, %v4600_v20  ;;  %4699 = vst.msk [vmem:[#allocation2 + $0x78] sm:$0xff] %vm1288_vm4, %v4601_v28  ;;  %v1110_v2 = vadd.f32 %v8196_v61, %v1006_v39  ;;  %v7152_v1 = vpack.c.bf16 %v2938_v46, %v2938_v46  ;;  %v5079_v25 = vcombine.high %v5077_v47, %v5077_v47  ;;  %v4603_v28 = vmax.f32 %v4505_v56, 0.0 }
 0x124   :  { %1306 = vst.msk [vmem:[#allocation2 + $0x88] sm:$0xff] %vm1288_vm4, %v1207_v42  ;;  %v8575_v59 = vpop.f32.mrf.mxu0  ;;  %v8577_v62 = vpop.f32.mrf.mxu1  ;;  %v6014_v37 = vmax.f32 %v8474_v21, %v5078_v48  ;;  %v1796_v35 = vrot.slane %v1782_v55, %v8271_v16  ;;  %v1797_v11 = vcombine.high %v1789_v58, %v1789_v58  ;;  %v8588_v12 = vmax.f32 %v1401_v40, %v1499_v41  ;;  %v7800_v48 = vld [vmem:[%s10981_s0 + $0x118] sm:$0xff]  }
 0x125   :  { %v8594_v15 = vrot.slane %v5046_v10, %v8271_v16  ;;  %v5061_v61 = vcombine.high %v8541_v5, %v8541_v5  ;;  %3449 = vst.msk [vmem:[%s10984_s4 + $0x4] sm:$0xf] %vm3447_vm5, %v7152_v1  ;;  %v1208_v17 = vmax.f32 %v1110_v2, 0.0  ;;  %v8604_v19 = vmax.f32 %v8541_v5, %v5079_v25  ;;  %v7801_v2 = vld [vmem:[%s10981_s0 + $0x2a0] sm:$0xff]  }
 0x126   :  { %v7358_v13 = vpop.f32.mrf.mxu0  ;;  %v7564_v14 = vpop.f32.mrf.mxu1  ;;  %v6221_v18 = vcombine.low %v8517_v53, %v6014_v37  ;;  %v2719_v44 = vmax.f32 %v1763_v7, %v1789_v58  ;;  %v2720_v10 = vmax.f32 %v8487_v34, %v1797_v11  ;;  %v1798_v20 = vcombine.high %v1796_v35, %v1796_v35 }
 0x127   :  { %v4788_v22 = vld [vmem:[#allocation2 + $0x60] ss:$2 sm:$0xff]  ;;  %v4837_v23 = vld [vmem:[#allocation2 + $0x61] ss:$2 sm:$0xff]  ;;  %1307 = vst.msk [vmem:[#allocation2 + $0x90] sm:$0xff] %vm1288_vm4, %v1208_v17  ;;  %v2947_v9 = vrot.slane %v2939_v8, %v8271_v16  ;;  %v6015_v7 = vmax.f32 %v5045_v49, %v5077_v47  ;;  %v1799_v30 = vcombine.high %v8588_v12, %v8588_v12  ;;  %v8630_v21 = vrot.slane %v8588_v12, %v8271_v16 }
 0x128   :  { %v8610_v26 = vpop.f32.mrf.mxu0  ;;  %7456 = vmatmul.mubr.msk.bf16.gmra.mxu0 %vm402_vm3, %v7798_v63  ;;  %v8613_v27 = vpop.f32.mrf.mxu1  ;;  %v6235_v53 = vrot.slane %v6221_v18, %v8271_v16  ;;  %v4886_v5 = vmax.f32 %v4788_v22, %v4837_v23  ;;  %7662 = vmatmul.mubr.msk.bf16.gmra.mxu1 %vm402_vm3, %v7799_v50  ;;  %v2940_v29 = vcombine.low %v2719_v44, %v2720_v10  ;;  %v8686_v44 = vld [vmem:[%s10982_s2] ss:$0 sm:$0xff] }
 0x129   :  { %7459 = vmatprep.mubr.msk.bf16.mxu0 %vm7838_vm2, %v7836_v0  ;;  %7665 = vmatprep.mubr.msk.bf16.mxu1 %vm7838_vm2, %v7836_v0  ;;  %v6237_v39 = vcombine.low %v6015_v7, %v8604_v19  ;;  %v2722_v52 = vmax.f32 %v8495_v31, %v1798_v20  ;;  %v2721_v63 = vmax.f32 %v1764_v4, %v1796_v35 }
 0x12a   :  { %v4789_v32 = vld [vmem:[#allocation2 + $0x70] ss:$2 sm:$0xff]  ;;  %v4838_v54 = vld [vmem:[#allocation2 + $0x71] ss:$2 sm:$0xff]  ;;  %v7361_v6 = vpop.f32.mrf.mxu0  ;;  %v7567_v36 = vpop.f32.mrf.mxu1  ;;  %v6236_v38 = vcombine.low %v8526_v3, %v6235_v53  ;;  %v5080_v40 = vcombine.high %v4886_v5, %v4886_v5  ;;  %v5087_v41 = vrot.slane %v4886_v5, %v8271_v16  ;;  %v2954_v45 = vrot.slane %v2940_v29, %v8271_v16 }
 0x12b   :  { %v1403_v49 = vld [vmem:[#allocation2 + $0x80] ss:$2 sm:$0xff]  ;;  %v1501_v42 = vld [vmem:[#allocation2 + $0x81] ss:$2 sm:$0xff]  ;;  %v4887_v43 = vmax.f32 %v4789_v32, %v4838_v54  ;;  %v5062_v12 = vcombine.high %v8594_v15, %v8594_v15  ;;  %v8661_v34 = vrot.slane %v1799_v30, %v8271_v16  ;;  %v4408_v4 = vmul.f32 %v8191_v60, %v8546_v57 }
 0x12c   :  { %v1590_v46 = vmax.f32 %v1403_v49, %v1501_v42  ;;  %4700 = vst.msk [vmem:[#allocation2 + $0x80] sm:$0xff] %vm1288_vm4, %v4602_v24  ;;  %4701 = vst.msk [vmem:[#allocation2 + $0x88] sm:$0xff] %vm1288_vm4, %v4603_v28  ;;  %v8638_v3 = vpop.f32.mrf.mxu0  ;;  %v8640_v47 = vpop.f32.mrf.mxu1  ;;  %v7177_v51 = vpack.c.bf16 %v6236_v38, %v6236_v38  ;;  %v5094_v55 = vrot.slane %v5080_v40, %v8271_v16  ;;  %v7802_v6 = vld [vmem:[%s10981_s0 + $0x120] sm:$0xff]  }
 0x12d   :  { %v5095_v58 = vcombine.high %v5087_v41, %v5087_v41  ;;  %v2955_v1 = vcombine.low %v2947_v9, %v2954_v45  ;;  %v5097_v25 = vcombine.high %v4887_v43, %v4887_v43  ;;  %v6017_v50 = vmax.f32 %v5061_v61, %v5087_v41  ;;  %v8706_v9 = vld [vmem:[%s10983_s3] ss:$0 sm:$0xff] }
 0x12e   :  { %v7362_v37 = vpop.f32.mrf.mxu0  ;;  %v7568_v56 = vpop.f32.mrf.mxu1  ;;  %7127 = vst.msk [vmem:[%s10984_s4 + $0x68] sm:$0xf] %vm3447_vm5, %v7177_v51  ;;  %v5096_v31 = vcombine.high %v5094_v55, %v5094_v55  ;;  %v1816_v11 = vcombine.high %v1590_v46, %v1590_v46  ;;  %v6245_v61 = vrot.slane %v6237_v39, %v8271_v16  ;;  %v2956_v18 = vcombine.low %v2721_v63, %v2722_v52 }
 0x12f   :  { %v6018_v8 = vmax.f32 %v8594_v15, %v5095_v58  ;;  %v7153_v13 = vpack.c.bf16 %v2955_v1, %v2955_v1  ;;  %v1814_v19 = vcombine.high %v8630_v21, %v8630_v21  ;;  %v8678_v57 = vrot.slane %v4887_v43, %v8271_v16 }
 0x130   :  { %v679_v35 = vpop.f32.mrf.mxu0  ;;  %7460 = vmatmul.mubr.msk.bf16.gmra.mxu0 %vm402_vm3, %v7800_v48  ;;  %v8666_v14 = vpop.f32.mrf.mxu1  ;;  %7666 = vmatmul.mubr.msk.bf16.gmra.mxu1 %vm402_vm3, %v7801_v2  ;;  %v6020_v60 = vmax.f32 %v8550_v33, %v5096_v31  ;;  %v8681_v15 = vrot.slane %v5097_v25, %v8271_v16  ;;  %v1007_v10 = vmul.f32 %v8686_v44, %v8575_v59 }
 0x131   :  { %v6238_v17 = vcombine.low %v6017_v50, %v6018_v8  ;;  %3450 = vst.msk [vmem:[%s10984_s4 + $0x8] sm:$0xf] %vm3447_vm5, %v7153_v13  ;;  %7463 = vmatprep.mubr.msk.bf16.mxu0 %vm7838_vm2, %v7836_v0  ;;  %v6019_v33 = vmax.f32 %v5062_v12, %v5094_v55  ;;  %v8694_v53 = vrot.slane %v1590_v46, %v8271_v16 }
 0x132   :  { %v7365_v22 = vpop.f32.mrf.mxu0  ;;  %v7571_v23 = vpop.f32.mrf.mxu1  ;;  %v8697_v20 = vrot.slane %v1816_v11, %v8271_v16  ;;  %7669 = vmatprep.mubr.msk.bf16.mxu1 %vm7838_vm2, %v7836_v0  ;;  %v8709_v7 = vadd.f32 %v8706_v9, %v4408_v4  ;;  %v1111_v29 = vadd.f32 %v8706_v9, %v1007_v10  ;;  %v1008_v30 = vmul.f32 %v8686_v44, %v8610_v26  ;;  %v7803_v26 = vld [vmem:[%s10981_s0 + $0x2a8] sm:$0xff]  }
 0x133   :  { %v6252_v24 = vrot.slane %v6238_v17, %v8271_v16  ;;  %v4790_v5 = vld [vmem:[#allocation2 + $0x80] ss:$2 sm:$0xff]  ;;  %v4839_v28 = vld [vmem:[#allocation2 + $0x81] ss:$2 sm:$0xff]  ;;  %v8718_v36 = vrot.slane %v2956_v18, %v8271_v16  ;;  %v1815_v40 = vcombine.high %v8661_v34, %v8661_v34  ;;  %v4409_v41 = vmul.f32 %v8686_v44, %v8577_v62 }
 0x134   :  { %v8701_v59 = vmax.f32 %v4790_v5, %v4839_v28  ;;  %v682_v32 = vpop.f32.mrf.mxu0  ;;  %v4090_v54 = vpop.f32.mrf.mxu1  ;;  %v6254_v49 = vcombine.low %v6019_v33, %v6020_v60  ;;  %v5112_v42 = vcombine.high %v8678_v57, %v8678_v57  ;;  %v5113_v39 = vcombine.high %v8681_v15, %v8681_v15  ;;  %v7804_v33 = vld [vmem:[%s10981_s0 + $0x128] sm:$0xff]  }
 0x135   :  { %v6253_v38 = vcombine.low %v6245_v61, %v6252_v24  ;;  %v1209_v45 = vmax.f32 %v1111_v29, 0.0  ;;  %v1831_v51 = vcombine.high %v8694_v53, %v8694_v53  ;;  %v1112_v62 = vadd.f32 %v8706_v9, %v1008_v30 }
 0x136   :  { %v7366_v43 = vpop.f32.mrf.mxu0  ;;  %v7572_v46 = vpop.f32.mrf.mxu1  ;;  %v1009_v52 = vmul.f32 %v8686_v44, %v8638_v3  ;;  %v1832_v55 = vcombine.high %v8697_v20, %v8697_v20  ;;  %v5114_v58 = vcombine.high %v8701_v59, %v8701_v59  ;;  %v4604_v2 = vmax.f32 %v8709_v7, 0.0  ;;  %v7805_v7 = vld [vmem:[%s10981_s0 + $0x2b0] sm:$0xff]  }
 0x137   :  { %v7178_v48 = vpack.c.bf16 %v6253_v38, %v6253_v38  ;;  %1308 = vst.msk [vmem:[#allocation2 + $0x98] sm:$0xff] %vm1288_vm4, %v1209_v45  ;;  %v1010_v63 = vmul.f32 %v8686_v44, %v679_v35  ;;  %v4507_v3 = vadd.f32 %v8706_v9, %v4409_v41  ;;  %v1210_v37 = vmax.f32 %v1112_v62, 0.0 }
 0x138   :  { %v687_v1 = vpop.f32.mrf.mxu0  ;;  %7464 = vmatmul.mubr.msk.bf16.gmra.mxu0 %vm402_vm3, %v7802_v6  ;;  %v4095_v25 = vpop.f32.mrf.mxu1  ;;  %v4410_v56 = vmul.f32 %v8686_v44, %v8613_v27  ;;  %v1113_v31 = vadd.f32 %v8706_v9, %v1009_v52  ;;  %7670 = vmatmul.mubr.msk.bf16.gmra.mxu1 %vm402_vm3, %v7803_v26  ;;  %v8756_v50 = vrot.slane %v6254_v49, %v8271_v16 }
 0x139   :  { %7128 = vst.msk [vmem:[%s10984_s4 + $0x6c] sm:$0xf] %vm3447_vm5, %v7178_v48  ;;  %7467 = vmatprep.mubr.msk.bf16.mxu0 %vm7838_vm2, %v7836_v0  ;;  %v4411_v8 = vmul.f32 %v8686_v44, %v8640_v47  ;;  %v1114_v11 = vadd.f32 %v8706_v9, %v1010_v63  ;;  %v1011_v12 = vmul.f32 %v8686_v44, %v682_v32 }
 0x13a   :  { %v7369_v13 = vpop.f32.mrf.mxu0  ;;  %v7575_v4 = vpop.f32.mrf.mxu1  ;;  %7673 = vmatprep.mubr.msk.bf16.mxu1 %vm7838_vm2, %v7836_v0  ;;  %1309 = vst.msk [vmem:[#allocation2 + $0xa0] sm:$0xff] %vm1288_vm4, %v1210_v37  ;;  %v1211_v27 = vmax.f32 %v1113_v31, 0.0  ;;  %v4412_v35 = vmul.f32 %v8686_v44, %v8666_v14  ;;  %v4413_v61 = vmul.f32 %v8686_v44, %v4090_v54  ;;  %v1012_v18 = vmul.f32 %v8686_v44, %v687_v1 }
 0x13b   :  { %v8770_v47 = vrot.slane %v5114_v58, %v8271_v16  ;;  %v8773_v17 = vmax.f32 %v8630_v21, %v1832_v55  ;;  %v1212_v60 = vmax.f32 %v1114_v11, 0.0  ;;  %v1115_v10 = vadd.f32 %v8706_v9, %v1011_v12 }
 0x13c   :  { %v690_v22 = vpop.f32.mrf.mxu0  ;;  %v4098_v23 = vpop.f32.mrf.mxu1  ;;  %v4605_v14 = vmax.f32 %v4507_v3, 0.0  ;;  %v4508_v24 = vadd.f32 %v8706_v9, %v4410_v56  ;;  %1310 = vst.msk [vmem:[#allocation2 + $0xa8] sm:$0xff] %vm1288_vm4, %v1211_v27  ;;  %v1116_v5 = vadd.f32 %v8706_v9, %v1012_v18  ;;  %v4414_v28 = vmul.f32 %v8686_v44, %v4095_v25 }
 0x13d   :  { %v4509_v29 = vadd.f32 %v8706_v9, %v4411_v8  ;;  %1311 = vst.msk [vmem:[#allocation2 + $0xb0] sm:$0xff] %vm1288_vm4, %v1212_v60  ;;  %v1213_v30 = vmax.f32 %v1115_v10, 0.0  ;;  %v1013_v32 = vmul.f32 %v8686_v44, %v690_v22  ;;  %v4415_v6 = vmul.f32 %v8686_v44, %v4098_v23 }
 0x13e   :  { %v7370_v54 = vpop.f32.mrf.mxu0  ;;  %v7576_v38 = vpop.f32.mrf.mxu1  ;;  %v1405_v41 = vld [vmem:[#allocation2 + $0x90] ss:$2 sm:$0xff]  ;;  %v1503_v26 = vld [vmem:[#allocation2 + $0x91] ss:$2 sm:$0xff]  ;;  %v8791_v49 = vadd.f32 %v8706_v9, %v4412_v35  ;;  %v8794_v45 = vadd.f32 %v8706_v9, %v4413_v61  ;;  %v1214_v43 = vmax.f32 %v1116_v5, 0.0  ;;  %v8797_v46 = vadd.f32 %v8706_v9, %v4414_v28 }
 0x13f   :  { %v8801_v48 = vrot.slane %v8701_v59, %v8271_v16  ;;  %v5130_v62 = vcombine.high %v8770_v47, %v8770_v47  ;;  %v1591_v52 = vmax.f32 %v1405_v41, %v1503_v26  ;;  %4702 = vst.msk [vmem:[#allocation2 + $0x90] sm:$0xff] %vm1288_vm4, %v4604_v2  ;;  %4703 = vst.msk [vmem:[#allocation2 + $0x98] sm:$0xff] %vm1288_vm4, %v4605_v14  ;;  %v4606_v1 = vmax.f32 %v4508_v24, 0.0  ;;  %v7806_v14 = vld [vmem:[%s10981_s0 + $0x130] sm:$0xff]   ;;  %v7807_v28 = vld [vmem:[%s10981_s0 + $0x2b8] sm:$0xff]  }
 0x140   :  { %1312 = vst.msk [vmem:[#allocation2 + $0xb8] sm:$0xff] %vm1288_vm4, %v1213_v30  ;;  %v1117_v55 = vadd.f32 %v8706_v9, %v1013_v32  ;;  %v695_v58 = vpop.f32.mrf.mxu0  ;;  %7468 = vmatmul.mubr.msk.bf16.gmra.mxu0 %vm402_vm3, %v7804_v33  ;;  %v4103_v63 = vpop.f32.mrf.mxu1  ;;  %1313 = vst.msk [vmem:[#allocation2 + $0xc0] sm:$0xff] %vm1288_vm4, %v1214_v43  ;;  %v8812_v59 = vadd.f32 %v8706_v9, %v4415_v6  ;;  %7674 = vmatmul.mubr.msk.bf16.gmra.mxu1 %vm402_vm3, %v7805_v7  ;;  %v4607_v56 = vmax.f32 %v4509_v29, 0.0 }
 0x141   :  { %v1014_v25 = vmul.f32 %v8686_v44, %v695_v58  ;;  %v4416_v2 = vmul.f32 %v8686_v44, %v4103_v63  ;;  %7471 = vmatprep.mubr.msk.bf16.mxu0 %vm7838_vm2, %v7836_v0  ;;  %v1833_v3 = vcombine.high %v1591_v52, %v1591_v52  ;;  %v1840_v37 = vrot.slane %v1591_v52, %v8271_v16 }
 0x142   :  { %v1215_v31 = vmax.f32 %v1117_v55, 0.0  ;;  %v7373_v8 = vpop.f32.mrf.mxu0  ;;  %v7579_v11 = vpop.f32.mrf.mxu1  ;;  %7677 = vmatprep.mubr.msk.bf16.mxu1 %vm7838_vm2, %v7836_v0  ;;  %v4608_v12 = vmax.f32 %v8791_v49, 0.0  ;;  %v4609_v13 = vmax.f32 %v8794_v45, 0.0  ;;  %v4610_v4 = vmax.f32 %v8797_v46, 0.0  ;;  %v7809_v46 = vld [vmem:[%s10981_s0 + $0x2c0] sm:$0xff]  }
 0x143   :  { %v1118_v27 = vadd.f32 %v8706_v9, %v1014_v25  ;;  %v1847_v35 = vrot.slane %v1833_v3, %v8271_v16  ;;  %v1848_v61 = vcombine.high %v1840_v37, %v1840_v37  ;;  %v2724_v18 = vmax.f32 %v1814_v19, %v1840_v37  ;;  %v1407_v60 = vld [vmem:[#allocation2 + $0xa0] ss:$2 sm:$0xff]  ;;  %v1505_v10 = vld [vmem:[#allocation2 + $0xa1] ss:$2 sm:$0xff] }
 0x144   :  { %1314 = vst.msk [vmem:[#allocation2 + $0xc8] sm:$0xff] %vm1288_vm4, %v1215_v31  ;;  %v8832_v22 = vadd.f32 %v8706_v9, %v4416_v2  ;;  %v698_v23 = vpop.f32.mrf.mxu0  ;;  %v4106_v33 = vpop.f32.mrf.mxu1  ;;  %v1592_v24 = vmax.f32 %v1407_v60, %v1505_v10  ;;  %4704 = vst.msk [vmem:[#allocation2 + $0xa0] sm:$0xff] %vm1288_vm4, %v4606_v1  ;;  %v4611_v21 = vmax.f32 %v8812_v59, 0.0  ;;  %v5129_v38 = vcombine.high %v8801_v48, %v8801_v48 }
 0x145   :  { %4705 = vst.msk [vmem:[#allocation2 + $0xa8] sm:$0xff] %vm1288_vm4, %v4607_v56  ;;  %v1216_v19 = vmax.f32 %v1118_v27, 0.0  ;;  %v1015_v5 = vmul.f32 %v8686_v44, %v698_v23  ;;  %v1849_v7 = vcombine.high %v1847_v35, %v1847_v35  ;;  %v2725_v29 = vmax.f32 %v8661_v34, %v1848_v61 }
 0x146   :  { %v2726_v30 = vmax.f32 %v1815_v40, %v1847_v35  ;;  %v2957_v32 = vcombine.low %v8773_v17, %v2724_v18  ;;  %v7374_v54 = vpop.f32.mrf.mxu0  ;;  %v7580_v6 = vpop.f32.mrf.mxu1  ;;  %v4791_v41 = vld [vmem:[#allocation2 + $0x90] ss:$2 sm:$0xff]  ;;  %v4840_v26 = vld [vmem:[#allocation2 + $0x91] ss:$2 sm:$0xff]  ;;  %v6021_v49 = vmax.f32 %v8678_v57, %v5130_v62  ;;  %v1850_v45 = vcombine.high %v1592_v24, %v1592_v24 }
 0x147   :  { %v8853_v43 = vrot.slane %v1592_v24, %v8271_v16  ;;  %v1409_v52 = vld [vmem:[#allocation2 + $0xb0] ss:$2 sm:$0xff]  ;;  %1315 = vst.msk [vmem:[#allocation2 + $0xd0] sm:$0xff] %vm1288_vm4, %v1216_v19  ;;  %v4889_v40 = vmax.f32 %v4791_v41, %v4840_v26  ;;  %v1507_v17 = vld [vmem:[#allocation2 + $0xb1] ss:$2 sm:$0xff]  ;;  %v4612_v55 = vmax.f32 %v8832_v22, 0.0  ;;  %v8859_v58 = vadd.f32 %v8706_v9, %v1015_v5 }
 0x148   :  { %v2971_v34 = vrot.slane %v2957_v32, %v8271_v16  ;;  %v8861_v63 = vpop.f32.mrf.mxu0  ;;  %7472 = vmatmul.mubr.msk.bf16.gmra.mxu0 %vm402_vm3, %v7806_v14  ;;  %v8864_v62 = vpop.f32.mrf.mxu1  ;;  %v2973_v1 = vcombine.low %v2725_v29, %v2726_v30  ;;  %v2727_v59 = vmax.f32 %v8694_v53, %v1849_v7  ;;  %v1593_v2 = vmax.f32 %v1409_v52, %v1507_v17  ;;  %v7808_v24 = vld [vmem:[%s10981_s0 + $0x138] sm:$0xff]  }
 0x149   :  { %v2728_v25 = vmax.f32 %v1831_v51, %v8853_v43  ;;  %4706 = vst.msk [vmem:[#allocation2 + $0xb0] sm:$0xff] %vm1288_vm4, %v4608_v12  ;;  %4707 = vst.msk [vmem:[#allocation2 + $0xb8] sm:$0xff] %vm1288_vm4, %v4609_v13  ;;  %7678 = vmatmul.mubr.msk.bf16.gmra.mxu1 %vm402_vm3, %v7807_v28  ;;  %v5131_v37 = vcombine.high %v4889_v40, %v4889_v40  ;;  %v5138_v56 = vrot.slane %v4889_v40, %v8271_v16 }
 0x14a   :  { %v2972_v3 = vcombine.low %v8718_v36, %v2971_v34  ;;  %v8877_v31 = vmul.f32 %v8686_v44, %v4106_v33  ;;  %v7377_v8 = vpop.f32.mrf.mxu0  ;;  %v7583_v11 = vpop.f32.mrf.mxu1  ;;  %7475 = vmatprep.mubr.msk.bf16.mxu0 %vm7838_vm2, %v7836_v0  ;;  %v8882_v53 = vrot.slane %v1850_v45, %v8271_v16  ;;  %v1865_v51 = vcombine.high %v8853_v43, %v8853_v43 }
 0x14b   :  { %v2974_v12 = vcombine.low %v2727_v59, %v2728_v25  ;;  %v1867_v13 = vcombine.high %v1593_v2, %v1593_v2  ;;  %v1411_v36 = vld [vmem:[#allocation2 + $0xc0] ss:$2 sm:$0xff]  ;;  %v1509_v27 = vld [vmem:[#allocation2 + $0xc1] ss:$2 sm:$0xff]  ;;  %7681 = vmatprep.mubr.msk.bf16.mxu1 %vm7838_vm2, %v7836_v0  ;;  %v5145_v61 = vrot.slane %v5131_v37, %v8271_v16  ;;  %v5146_v18 = vcombine.high %v5138_v56, %v5138_v56 }
 0x14c   :  { %v7154_v35 = vpack.c.bf16 %v2972_v3, %v2972_v3  ;;  %v6022_v60 = vmax.f32 %v5112_v42, %v5138_v56  ;;  %v4792_v10 = vld [vmem:[#allocation2 + $0xa0] ss:$2 sm:$0xff]  ;;  %v4841_v23 = vld [vmem:[#allocation2 + $0xa1] ss:$2 sm:$0xff]  ;;  %4708 = vst.msk [vmem:[#allocation2 + $0xc0] sm:$0xff] %vm1288_vm4, %v4610_v4  ;;  %4709 = vst.msk [vmem:[#allocation2 + $0xc8] sm:$0xff] %vm1288_vm4, %v4611_v21  ;;  %v8896_v33 = vpop.f32.mrf.mxu0  ;;  %v8898_v14 = vpop.f32.mrf.mxu1  ;;  %v2981_v19 = vrot.slane %v2973_v1, %v8271_v16 }
 0x14d   :  { %v2988_v57 = vrot.slane %v2974_v12, %v8271_v16  ;;  %v4890_v42 = vmax.f32 %v4792_v10, %v4841_v23  ;;  %v8906_v5 = vrot.slane %v1593_v2, %v8271_v16  ;;  %v5147_v4 = vcombine.high %v5145_v61, %v5145_v61 }
 0x14e   :  { %3451 = vst.msk [vmem:[%s10984_s4 + $0xc] sm:$0xf] %vm3447_vm5, %v7154_v35  ;;  %v6023_v21 = vmax.f32 %v8681_v15, %v5146_v18  ;;  %v6024_v28 = vmax.f32 %v5113_v39, %v5145_v61  ;;  %v6255_v7 = vcombine.low %v6021_v49, %v6022_v60  ;;  %v7378_v29 = vpop.f32.mrf.mxu0  ;;  %v7584_v30 = vpop.f32.mrf.mxu1  ;;  %v8921_v41 = vrot.slane %v1867_v13, %v8271_v16  ;;  %v7810_v18 = vld [vmem:[%s10981_s0 + $0x140] sm:$0xff]  }
 0x14f   :  { %v2989_v32 = vcombine.low %v2981_v19, %v2988_v57  ;;  %v5148_v54 = vcombine.high %v4890_v42, %v4890_v42  ;;  %v5155_v6 = vrot.slane %v4890_v42, %v8271_v16  ;;  %v1866_v43 = vcombine.high %v8882_v53, %v8882_v53 }
 0x150   :  { %v6269_v26 = vrot.slane %v6255_v7, %v8271_v16  ;;  %v6271_v45 = vcombine.low %v6023_v21, %v6024_v28  ;;  %v8927_v52 = vmax.f32 %v8697_v20, %v1865_v51  ;;  %v4793_v15 = vld [vmem:[#allocation2 + $0xb0] ss:$2 sm:$0xff]  ;;  %v4842_v39 = vld [vmem:[#allocation2 + $0xb1] ss:$2 sm:$0xff]  ;;  %v8929_v49 = vpop.f32.mrf.mxu0  ;;  %7476 = vmatmul.mubr.msk.bf16.gmra.mxu0 %vm402_vm3, %v7808_v24  ;;  %v8932_v34 = vpop.f32.mrf.mxu1  ;;  %v6025_v1 = vmax.f32 %v8801_v48, %v5147_v4  ;;  %v7811_v24 = vld [vmem:[%s10981_s0 + $0x2c8] sm:$0xff]  }
 0x151   :  { %v7155_v40 = vpack.c.bf16 %v2989_v32, %v2989_v32  ;;  %v8935_v17 = vrot.slane %v5148_v54, %v8271_v16  ;;  %v6026_v59 = vmax.f32 %v5129_v38, %v5155_v6  ;;  %7682 = vmatmul.mubr.msk.bf16.gmra.mxu1 %vm402_vm3, %v7809_v46  ;;  %v5163_v25 = vcombine.high %v5155_v6, %v5155_v6 }
 0x152   :  { %v6270_v20 = vcombine.low %v8756_v50, %v6269_v26  ;;  %v4891_v2 = vmax.f32 %v4793_v15, %v4842_v39  ;;  %v1594_v3 = vmax.f32 %v1411_v36, %v1509_v27  ;;  %v7381_v37 = vpop.f32.mrf.mxu0  ;;  %v7587_v56 = vpop.f32.mrf.mxu1  ;;  %7479 = vmatprep.mubr.msk.bf16.mxu0 %vm7838_vm2, %v7836_v0  ;;  %v1882_v48 = vcombine.high %v8906_v5, %v8906_v5 }
 0x153   :  { %3452 = vst.msk [vmem:[%s10984_s4 + $0x10] sm:$0xf] %vm3447_vm5, %v7155_v40  ;;  %v6272_v8 = vcombine.low %v6025_v1, %v6026_v59  ;;  %v1883_v50 = vcombine.high %v8921_v41, %v8921_v41  ;;  %v4794_v38 = vld [vmem:[#allocation2 + $0xc0] ss:$2 sm:$0xff]  ;;  %v4843_v11 = vld [vmem:[#allocation2 + $0xc1] ss:$2 sm:$0xff]  ;;  %7685 = vmatprep.mubr.msk.bf16.mxu1 %vm7838_vm2, %v7836_v0  ;;  %v6279_v12 = vrot.slane %v6271_v45, %v8271_v16 }
 0x154   :  { %v1217_v51 = vmax.f32 %v8859_v58, 0.0  ;;  %v7179_v13 = vpack.c.bf16 %v6270_v20, %v6270_v20  ;;  %v5165_v36 = vcombine.high %v4891_v2, %v4891_v2  ;;  %v1884_v27 = vcombine.high %v1594_v3, %v1594_v3  ;;  %v8957_v35 = vpop.f32.mrf.mxu0  ;;  %v8959_v61 = vpop.f32.mrf.mxu1 }
 0x155   :  { %v5164_v60 = vcombine.high %v8935_v17, %v8935_v17  ;;  %v6286_v58 = vrot.slane %v6272_v8, %v8271_v16  ;;  %v8968_v10 = vrot.slane %v1594_v3, %v8271_v16  ;;  %v4892_v23 = vmax.f32 %v4794_v38, %v4843_v11 }
 0x156   :  { %1316 = vst.msk [vmem:[#allocation2 + $0xd8] sm:$0xff] %vm1288_vm4, %v1217_v51  ;;  %v8979_v19 = vmax.f32 %v8770_v47, %v5163_v25  ;;  %v1898_v57 = vrot.slane %v1884_v27, %v8271_v16  ;;  %v4515_v42 = vadd.f32 %v8706_v9, %v8877_v31  ;;  %v1016_v46 = vmul.f32 %v8686_v44, %v8861_v63  ;;  %v7382_v4 = vpop.f32.mrf.mxu0  ;;  %v7588_v21 = vpop.f32.mrf.mxu1 }
 0x157   :  { %7129 = vst.msk [vmem:[%s10984_s4 + $0x70] sm:$0xf] %vm3447_vm5, %v7179_v13  ;;  %v6287_v28 = vcombine.low %v6279_v12, %v6286_v58  ;;  %v1899_v7 = vcombine.high %v8968_v10, %v8968_v10  ;;  %v5182_v29 = vcombine.high %v4892_v23, %v4892_v23  ;;  %v8989_v30 = vrot.slane %v4892_v23, %v8271_v16 }
 0x158   :  { %v8992_v47 = vrot.slane %v4891_v2, %v8271_v16  ;;  %v8995_v32 = vrot.slane %v5165_v36, %v8271_v16  ;;  %v1900_v31 = vcombine.high %v1898_v57, %v1898_v57  ;;  %v2731_v54 = vmax.f32 %v1866_v43, %v1898_v57  ;;  %v8997_v6 = vpop.f32.mrf.mxu0  ;;  %7480 = vmatmul.mubr.msk.bf16.gmra.mxu0 %vm402_vm3, %v7810_v18  ;;  %v9000_v63 = vpop.f32.mrf.mxu1  ;;  %v7813_v18 = vld [vmem:[%s10981_s0 + $0x2d0] sm:$0xff]  }
 0x159   :  { %v7180_v26 = vpack.c.bf16 %v6287_v28, %v6287_v28  ;;  %v2730_v45 = vmax.f32 %v8882_v53, %v1899_v7  ;;  %v5196_v15 = vrot.slane %v5182_v29, %v8271_v16  ;;  %v5197_v39 = vcombine.high %v8989_v30, %v8989_v30  ;;  %7686 = vmatmul.mubr.msk.bf16.gmra.mxu1 %vm402_vm3, %v7811_v24 }
 0x15a   :  { %v2732_v40 = vmax.f32 %v8906_v5, %v1900_v31  ;;  %v1120_v43 = vadd.f32 %v8706_v9, %v1016_v46  ;;  %v4418_v1 = vmul.f32 %v8686_v44, %v8864_v62  ;;  %v1017_v59 = vmul.f32 %v8686_v44, %v8896_v33  ;;  %v7385_v20 = vpop.f32.mrf.mxu0  ;;  %v7591_v25 = vpop.f32.mrf.mxu1  ;;  %7483 = vmatprep.mubr.msk.bf16.mxu0 %vm7838_vm2, %v7836_v0 }
 0x15b   :  { %7130 = vst.msk [vmem:[%s10984_s4 + $0x74] sm:$0xf] %vm3447_vm5, %v7180_v26  ;;  %v2990_v53 = vcombine.low %v8927_v52, %v2730_v45  ;;  %v5198_v2 = vcombine.high %v5196_v15, %v5196_v15  ;;  %v6028_v3 = vmax.f32 %v8935_v17, %v5197_v39  ;;  %v4613_v37 = vmax.f32 %v4515_v42, 0.0  ;;  %7689 = vmatprep.mubr.msk.bf16.mxu1 %vm7838_vm2, %v7836_v0  ;;  %v7812_v52 = vld [vmem:[%s10981_s0 + $0x148] sm:$0xff]  }
 0x15c   :  { %v2991_v62 = vcombine.low %v2731_v54, %v2732_v40  ;;  %v6029_v33 = vmax.f32 %v5164_v60, %v5196_v15  ;;  %v1218_v38 = vmax.f32 %v1120_v43, 0.0  ;;  %v1121_v11 = vadd.f32 %v8706_v9, %v1017_v59  ;;  %v9024_v51 = vpop.f32.mrf.mxu0  ;;  %v9026_v12 = vpop.f32.mrf.mxu1 }
 0x15d   :  { %v1413_v56 = vld [vmem:[#allocation2 + $0xd0] ss:$2 sm:$0xff]  ;;  %v1511_v8 = vld [vmem:[#allocation2 + $0xd1] ss:$2 sm:$0xff]  ;;  %v6030_v17 = vmax.f32 %v8992_v47, %v5198_v2  ;;  %v6288_v13 = vcombine.low %v8979_v19, %v6028_v3  ;;  %v9038_v27 = vadd.f32 %v8706_v9, %v4418_v1  ;;  %v2998_v60 = vrot.slane %v2990_v53, %v8271_v16 }
 0x15e   :  { %v1595_v36 = vmax.f32 %v1413_v56, %v1511_v8  ;;  %4710 = vst.msk [vmem:[#allocation2 + $0xd0] sm:$0xff] %vm1288_vm4, %v4612_v55  ;;  %4711 = vst.msk [vmem:[#allocation2 + $0xd8] sm:$0xff] %vm1288_vm4, %v4613_v37  ;;  %v3005_v58 = vrot.slane %v2991_v62, %v8271_v16  ;;  %v1219_v23 = vmax.f32 %v1121_v11, 0.0  ;;  %v4419_v22 = vmul.f32 %v8686_v44, %v8898_v14  ;;  %v7386_v55 = vpop.f32.mrf.mxu0  ;;  %v7592_v24 = vpop.f32.mrf.mxu1  ;;  %v7814_v56 = vld [vmem:[%s10981_s0 + $0x150] sm:$0xff]  }
 0x15f   :  { %1317 = vst.msk [vmem:[#allocation2 + $0xe0] sm:$0xff] %vm1288_vm4, %v1218_v38  ;;  %v5180_v19 = vcombine.high %v8992_v47, %v8992_v47  ;;  %v6289_v57 = vcombine.low %v6029_v33, %v6030_v17  ;;  %v5181_v4 = vcombine.high %v8995_v32, %v8995_v32  ;;  %v6296_v28 = vrot.slane %v6288_v13, %v8271_v16 }
 0x160   :  { %v1901_v42 = vcombine.high %v1595_v36, %v1595_v36  ;;  %v1908_v46 = vrot.slane %v1595_v36, %v8271_v16  ;;  %v3006_v21 = vcombine.low %v2998_v60, %v3005_v58  ;;  %1318 = vst.msk [vmem:[#allocation2 + $0xe8] sm:$0xff] %vm1288_vm4, %v1219_v23  ;;  %v1018_v14 = vmul.f32 %v8686_v44, %v8929_v49  ;;  %v9057_v7 = vpop.f32.mrf.mxu0  ;;  %v9060_v29 = vpop.f32.mrf.mxu1 }
 0x161   :  { %7484 = vmatmul.mubr.msk.bf16.gmra.mxu0 %vm402_vm3, %v7812_v52  ;;  %v6303_v31 = vrot.slane %v6289_v57, %v8271_v16  ;;  %v4517_v45 = vadd.f32 %v8706_v9, %v4419_v22  ;;  %7690 = vmatmul.mubr.msk.bf16.gmra.mxu1 %vm402_vm3, %v7813_v18  ;;  %v4614_v39 = vmax.f32 %v9038_v27, 0.0  ;;  %v4420_v40 = vmul.f32 %v8686_v44, %v8932_v34 }
 0x162   :  { %v1915_v54 = vrot.slane %v1901_v42, %v8271_v16  ;;  %v1916_v26 = vcombine.high %v1908_v46, %v1908_v46  ;;  %v7156_v15 = vpack.c.bf16 %v3006_v21, %v3006_v21  ;;  %v1122_v49 = vadd.f32 %v8706_v9, %v1018_v14  ;;  %v7389_v43 = vpop.f32.mrf.mxu0  ;;  %v7595_v1 = vpop.f32.mrf.mxu1  ;;  %7487 = vmatprep.mubr.msk.bf16.mxu0 %vm7838_vm2, %v7836_v0 }
 0x163   :  { %7693 = vmatprep.mubr.msk.bf16.mxu1 %vm7838_vm2, %v7836_v0  ;;  %v6304_v59 = vcombine.low %v6296_v28, %v6303_v31  ;;  %v2733_v25 = vmax.f32 %v1882_v48, %v1908_v46  ;;  %v1019_v62 = vmul.f32 %v8686_v44, %v8957_v35  ;;  %v4421_v5 = vmul.f32 %v8686_v44, %v8959_v61  ;;  %v7815_v35 = vld [vmem:[%s10981_s0 + $0x2d8] sm:$0xff]  }
 0x164   :  { %v1917_v20 = vcombine.high %v1915_v54, %v1915_v54  ;;  %v2734_v53 = vmax.f32 %v8921_v41, %v1916_v26  ;;  %3453 = vst.msk [vmem:[%s10984_s4 + $0x14] sm:$0xf] %vm3447_vm5, %v7156_v15  ;;  %v2735_v34 = vmax.f32 %v1883_v50, %v1915_v54  ;;  %v1220_v37 = vmax.f32 %v1122_v49, 0.0  ;;  %v9089_v48 = vpop.f32.mrf.mxu0  ;;  %v9091_v33 = vpop.f32.mrf.mxu1 }
 0x165   :  { %v4795_v2 = vld [vmem:[#allocation2 + $0xd0] ss:$2 sm:$0xff]  ;;  %v4844_v3 = vld [vmem:[#allocation2 + $0xd1] ss:$2 sm:$0xff]  ;;  %v7181_v8 = vpack.c.bf16 %v6304_v59, %v6304_v59  ;;  %v4615_v11 = vmax.f32 %v4517_v45, 0.0  ;;  %v9102_v61 = vadd.f32 %v8706_v9, %v4420_v40  ;;  %v1123_v52 = vadd.f32 %v8706_v9, %v1019_v62 }
 0x166   :  { %v2736_v41 = vmax.f32 %v8968_v10, %v1917_v20  ;;  %v3007_v50 = vcombine.low %v2733_v25, %v2734_v53  ;;  %v4893_v38 = vmax.f32 %v4795_v2, %v4844_v3  ;;  %1319 = vst.msk [vmem:[#allocation2 + $0xf0] sm:$0xff] %vm1288_vm4, %v1220_v37  ;;  %v1020_v17 = vmul.f32 %v8686_v44, %v8997_v6  ;;  %v7390_v13 = vpop.f32.mrf.mxu0  ;;  %v7596_v36 = vpop.f32.mrf.mxu1  ;;  %v7816_v53 = vld [vmem:[%s10981_s0 + $0x158] sm:$0xff]   ;;  %v7817_v3 = vld [vmem:[%s10981_s0 + $0x2e0] sm:$0xff]  }
 0x167   :  { %7131 = vst.msk [vmem:[%s10984_s4 + $0x78] sm:$0xf] %vm3447_vm5, %v7181_v8  ;;  %v1415_v60 = vld [vmem:[#allocation2 + $0xe0] ss:$2 sm:$0xff]  ;;  %v1513_v58 = vld [vmem:[#allocation2 + $0xe1] ss:$2 sm:$0xff]  ;;  %v9113_v23 = vadd.f32 %v8706_v9, %v4421_v5  ;;  %v4422_v24 = vmul.f32 %v8686_v44, %v9000_v63  ;;  %v1021_v59 = vmul.f32 %v8686_v44, %v9024_v51  ;;  %v4423_v2 = vmul.f32 %v8686_v44, %v9026_v12 }
 0x168   :  { %v3008_v10 = vcombine.low %v2735_v34, %v2736_v41  ;;  %v5199_v27 = vcombine.high %v4893_v38, %v4893_v38  ;;  %v5206_v18 = vrot.slane %v4893_v38, %v8271_v16  ;;  %v1596_v22 = vmax.f32 %v1415_v60, %v1513_v58  ;;  %4712 = vst.msk [vmem:[#allocation2 + $0xe0] sm:$0xff] %vm1288_vm4, %v4614_v39  ;;  %v9120_v57 = vpop.f32.mrf.mxu0  ;;  %v9123_v42 = vpop.f32.mrf.mxu1 }
 0x169   :  { %4713 = vst.msk [vmem:[#allocation2 + $0xe8] sm:$0xff] %vm1288_vm4, %v4615_v11  ;;  %v1221_v6 = vmax.f32 %v1123_v52, 0.0  ;;  %v1124_v55 = vadd.f32 %v8706_v9, %v1020_v17  ;;  %7488 = vmatmul.mubr.msk.bf16.gmra.mxu0 %vm402_vm3, %v7814_v56  ;;  %v3015_v46 = vrot.slane %v3007_v50, %v8271_v16  ;;  %7694 = vmatmul.mubr.msk.bf16.gmra.mxu1 %vm402_vm3, %v7815_v35  ;;  %v4616_v54 = vmax.f32 %v9102_v61, 0.0 }
 0x16a   :  { %v3022_v21 = vrot.slane %v3008_v10, %v8271_v16  ;;  %v5213_v28 = vrot.slane %v5199_v27, %v8271_v16  ;;  %v5214_v14 = vcombine.high %v5206_v18, %v5206_v18  ;;  %v6031_v31 = vmax.f32 %v5180_v19, %v5206_v18  ;;  %v7393_v45 = vpop.f32.mrf.mxu0  ;;  %v7599_v15 = vpop.f32.mrf.mxu1  ;;  %7491 = vmatprep.mubr.msk.bf16.mxu0 %vm7838_vm2, %v7836_v0 }
 0x16b   :  { %v1918_v63 = vcombine.high %v1596_v22, %v1596_v22  ;;  %1320 = vst.msk [vmem:[#allocation2 + $0xf8] sm:$0xff] %vm1288_vm4, %v1221_v6  ;;  %v1222_v26 = vmax.f32 %v1124_v55, 0.0  ;;  %7697 = vmatprep.mubr.msk.bf16.mxu1 %vm7838_vm2, %v7836_v0  ;;  %v9140_v47 = vrot.slane %v1596_v22, %v8271_v16  ;;  %v4617_v43 = vmax.f32 %v9113_v23, 0.0 }
 0x16c   :  { %v3023_v39 = vcombine.low %v3015_v46, %v3022_v21  ;;  %v5215_v49 = vcombine.high %v5213_v28, %v5213_v28  ;;  %v6032_v40 = vmax.f32 %v8995_v32, %v5214_v14  ;;  %v6033_v19 = vmax.f32 %v5181_v4, %v5213_v28  ;;  %v9152_v20 = vpop.f32.mrf.mxu0  ;;  %v9154_v25 = vpop.f32.mrf.mxu1 }
 0x16d   :  { %1321 = vst.msk [vmem:[#allocation2 + $0x100] sm:$0xff] %vm1288_vm4, %v1222_v26  ;;  %v9148_v1 = vadd.f32 %v8706_v9, %v4422_v24  ;;  %v9166_v51 = vrot.slane %v1918_v63, %v8271_v16  ;;  %v1125_v37 = vadd.f32 %v8706_v9, %v1021_v59  ;;  %v1022_v62 = vmul.f32 %v8686_v44, %v9057_v7  ;;  %v7818_v26 = vld [vmem:[%s10981_s0 + $0x160] sm:$0xff]  }
 0x16e   :  { %v7157_v32 = vpack.c.bf16 %v3023_v39, %v3023_v39  ;;  %v6034_v4 = vmax.f32 %v8989_v30, %v5215_v49  ;;  %v6305_v34 = vcombine.low %v6031_v31, %v6032_v40  ;;  %v4424_v5 = vmul.f32 %v8686_v44, %v9060_v29  ;;  %v7394_v30 = vpop.f32.mrf.mxu0  ;;  %v7600_v56 = vpop.f32.mrf.mxu1  ;;  %v7819_v40 = vld [vmem:[%s10981_s0 + $0x2e8] sm:$0xff]  }
 0x16f   :  { %v1933_v41 = vcombine.high %v9140_v47, %v9140_v47  ;;  %v1023_v7 = vmul.f32 %v8686_v44, %v9089_v48  ;;  %v1223_v29 = vmax.f32 %v1125_v37, 0.0  ;;  %v9183_v11 = vadd.f32 %v8706_v9, %v4423_v2 }
 0x170   :  { %3454 = vst.msk [vmem:[%s10984_s4 + $0x18] sm:$0xf] %vm3447_vm5, %v7157_v32  ;;  %v6306_v12 = vcombine.low %v6033_v19, %v6034_v4  ;;  %v6313_v8 = vrot.slane %v6305_v34, %v8271_v16  ;;  %v4796_v50 = vld [vmem:[#allocation2 + $0xe0] ss:$2 sm:$0xff]  ;;  %v4845_v38 = vld [vmem:[#allocation2 + $0xe1] ss:$2 sm:$0xff]  ;;  %v1126_v61 = vadd.f32 %v8706_v9, %v1022_v62  ;;  %v743_v52 = vpop.f32.mrf.mxu0  ;;  %v9187_v17 = vpop.f32.mrf.mxu1  ;;  %v4425_v48 = vmul.f32 %v8686_v44, %v9091_v33 }
 0x171   :  { %v4894_v35 = vmax.f32 %v4796_v50, %v4845_v38  ;;  %7492 = vmatmul.mubr.msk.bf16.gmra.mxu0 %vm402_vm3, %v7816_v53  ;;  %v1127_v27 = vadd.f32 %v8706_v9, %v1023_v7  ;;  %7698 = vmatmul.mubr.msk.bf16.gmra.mxu1 %vm402_vm3, %v7817_v3  ;;  %1322 = vst.msk [vmem:[#allocation2 + $0x108] sm:$0xff] %vm1288_vm4, %v1223_v29  ;;  %v4618_v24 = vmax.f32 %v9148_v1, 0.0 }
 0x172   :  { %v6320_v13 = vrot.slane %v6306_v12, %v8271_v16  ;;  %v1417_v36 = vld [vmem:[#allocation2 + $0xf0] ss:$2 sm:$0xff]  ;;  %v1515_v10 = vld [vmem:[#allocation2 + $0xf1] ss:$2 sm:$0xff]  ;;  %7495 = vmatprep.mubr.msk.bf16.mxu0 %vm7838_vm2, %v7836_v0  ;;  %v1224_v58 = vmax.f32 %v1126_v61, 0.0  ;;  %v9200_v23 = vadd.f32 %v8706_v9, %v4424_v5  ;;  %v7397_v22 = vpop.f32.mrf.mxu0  ;;  %v7603_v6 = vpop.f32.mrf.mxu1  ;;  %7701 = vmatprep.mubr.msk.bf16.mxu1 %vm7838_vm2, %v7836_v0  ;;  %v1934_v21 = vcombine.high %v9166_v51, %v9166_v51 }
 0x173   :  { %v5216_v18 = vcombine.high %v4894_v35, %v4894_v35  ;;  %v1597_v60 = vmax.f32 %v1417_v36, %v1515_v10  ;;  %4714 = vst.msk [vmem:[#allocation2 + $0xf0] sm:$0xff] %vm1288_vm4, %v4616_v54  ;;  %4715 = vst.msk [vmem:[#allocation2 + $0xf8] sm:$0xff] %vm1288_vm4, %v4617_v43  ;;  %v9205_v55 = vrot.slane %v4894_v35, %v8271_v16  ;;  %v1225_v46 = vmax.f32 %v1127_v27, 0.0 }
 0x174   :  { %v6321_v33 = vcombine.low %v6313_v8, %v6320_v13  ;;  %1323 = vst.msk [vmem:[#allocation2 + $0x110] sm:$0xff] %vm1288_vm4, %v1224_v58  ;;  %v9215_v31 = vadd.f32 %v8706_v9, %v4425_v48  ;;  %v746_v63 = vpop.f32.mrf.mxu0  ;;  %v4154_v54 = vpop.f32.mrf.mxu1  ;;  %v1024_v39 = vmul.f32 %v8686_v44, %v9120_v57  ;;  %v4426_v49 = vmul.f32 %v8686_v44, %v9123_v42 }
 0x175   :  { %v9211_v28 = vrot.slane %v5216_v18, %v8271_v16  ;;  %v1935_v14 = vcombine.high %v1597_v60, %v1597_v60  ;;  %v9221_v15 = vrot.slane %v1597_v60, %v8271_v16  ;;  %1324 = vst.msk [vmem:[#allocation2 + $0x118] sm:$0xff] %vm1288_vm4, %v1225_v46  ;;  %v4619_v43 = vmax.f32 %v9183_v11, 0.0 }
 0x176   :  { %v7182_v45 = vpack.c.bf16 %v6321_v33, %v6321_v33  ;;  %v4620_v1 = vmax.f32 %v9200_v23, 0.0  ;;  %v1025_v59 = vmul.f32 %v8686_v44, %v9152_v20  ;;  %v7398_v53 = vpop.f32.mrf.mxu0  ;;  %v7604_v32 = vpop.f32.mrf.mxu1  ;;  %v5231_v57 = vcombine.high %v9205_v55, %v9205_v55 }
 0x177   :  { %v9232_v19 = vrot.slane %v1935_v14, %v8271_v16  ;;  %v1128_v42 = vadd.f32 %v8706_v9, %v1024_v39  ;;  %v4427_v4 = vmul.f32 %v8686_v44, %v9154_v25  ;;  %v1026_v34 = vmul.f32 %v8686_v44, %v743_v52 }
 0x178   :  { %7132 = vst.msk [vmem:[%s10984_s4 + $0x7c] sm:$0xf] %vm3447_vm5, %v7182_v45  ;;  %v4621_v2 = vmax.f32 %v9215_v31, 0.0  ;;  %v1129_v3 = vadd.f32 %v8706_v9, %v1025_v59  ;;  %v1027_v37 = vmul.f32 %v8686_v44, %v746_v63  ;;  %v751_v62 = vpop.f32.mrf.mxu0  ;;  %v9254_v5 = vpop.f32.mrf.mxu1  ;;  %v5232_v30 = vcombine.high %v9211_v28, %v9211_v28  ;;  %v1419_v8 = vld [vmem:[#allocation2 + $0x100] ss:$2 sm:$0xff] }
 0x179   :  { %v1951_v20 = vcombine.high %v9232_v19, %v9232_v19  ;;  %7496 = vmatmul.mubr.msk.bf16.gmra.mxu0 %vm402_vm3, %v7818_v26  ;;  %v1950_v25 = vcombine.high %v9221_v15, %v9221_v15  ;;  %v9261_v50 = vadd.f32 %v8706_v9, %v4426_v49  ;;  %v1130_v38 = vadd.f32 %v8706_v9, %v1026_v34  ;;  %v1517_v35 = vld [vmem:[#allocation2 + $0x101] ss:$2 sm:$0xff] }
 0x17a   :  { %v4797_v56 = vld [vmem:[#allocation2 + $0xf0] ss:$2 sm:$0xff]  ;;  %v4846_v12 = vld [vmem:[#allocation2 + $0xf1] ss:$2 sm:$0xff]  ;;  %7702 = vmatmul.mubr.msk.bf16.gmra.mxu1 %vm402_vm3, %v7819_v40  ;;  %v1226_v29 = vmax.f32 %v1128_v42, 0.0  ;;  %v4428_v11 = vmul.f32 %v8686_v44, %v9187_v17  ;;  %v4429_v61 = vmul.f32 %v8686_v44, %v4154_v54  ;;  %v7401_v52 = vpop.f32.mrf.mxu0  ;;  %v7607_v13 = vpop.f32.mrf.mxu1  ;;  %7499 = vmatprep.mubr.msk.bf16.mxu0 %vm7838_vm2, %v7836_v0  ;;  %v1598_v36 = vmax.f32 %v1419_v8, %v1517_v35 }
 0x17b   :  { %v4895_v7 = vmax.f32 %v4797_v56, %v4846_v12  ;;  %7705 = vmatprep.mubr.msk.bf16.mxu1 %vm7838_vm2, %v7836_v0  ;;  %4716 = vst.msk [vmem:[#allocation2 + $0x100] sm:$0xff] %vm1288_vm4, %v4618_v24  ;;  %4717 = vst.msk [vmem:[#allocation2 + $0x108] sm:$0xff] %vm1288_vm4, %v4619_v43  ;;  %v1227_v10 = vmax.f32 %v1129_v3, 0.0  ;;  %v9275_v27 = vadd.f32 %v8706_v9, %v4427_v4  ;;  %v1228_v17 = vmax.f32 %v1130_v38, 0.0  ;;  %v7820_v24 = vld [vmem:[%s10981_s0 + $0x168] sm:$0xff]  }
 0x17c   :  { %v2737_v18 = vmax.f32 %v9140_v47, %v1951_v20  ;;  %v1421_v60 = vld [vmem:[#allocation2 + $0x110] ss:$2 sm:$0xff]  ;;  %v1519_v58 = vld [vmem:[#allocation2 + $0x111] ss:$2 sm:$0xff]  ;;  %1325 = vst.msk [vmem:[#allocation2 + $0x120] sm:$0xff] %vm1288_vm4, %v1226_v29  ;;  %v1131_v23 = vadd.f32 %v8706_v9, %v1027_v37  ;;  %v1028_v22 = vmul.f32 %v8686_v44, %v751_v62  ;;  %v9281_v6 = vpop.f32.mrf.mxu0  ;;  %v9283_v33 = vpop.f32.mrf.mxu1  ;;  %v1952_v14 = vcombine.high %v1598_v36, %v1598_v36 }
 0x17d   :  { %v5233_v48 = vcombine.high %v4895_v7, %v4895_v7  ;;  %v9289_v46 = vrot.slane %v4895_v7, %v8271_v16  ;;  %v1959_v31 = vrot.slane %v1598_v36, %v8271_v16  ;;  %v1599_v63 = vmax.f32 %v1421_v60, %v1519_v58  ;;  %4718 = vst.msk [vmem:[#allocation2 + $0x110] sm:$0xff] %vm1288_vm4, %v4620_v1  ;;  %v7821_v44 = vld [vmem:[%s10981_s0 + $0x2f0] sm:$0xff]  }
 0x17e   :  { %4719 = vst.msk [vmem:[#allocation2 + $0x118] sm:$0xff] %vm1288_vm4, %v4621_v2  ;;  %1326 = vst.msk [vmem:[#allocation2 + $0x128] sm:$0xff] %vm1288_vm4, %v1227_v10  ;;  %v9303_v26 = vadd.f32 %v8706_v9, %v4428_v11  ;;  %v1229_v45 = vmax.f32 %v1131_v23, 0.0  ;;  %v9306_v39 = vadd.f32 %v8706_v9, %v4429_v61  ;;  %v7402_v49 = vpop.f32.mrf.mxu0  ;;  %v7608_v40 = vpop.f32.mrf.mxu1  ;;  %v1966_v43 = vrot.slane %v1952_v14, %v8271_v16  ;;  %v7822_v61 = vld [vmem:[%s10981_s0 + $0x170] sm:$0xff]  }
 0x17f   :  { %1327 = vst.msk [vmem:[#allocation2 + $0x130] sm:$0xff] %vm1288_vm4, %v1228_v17  ;;  %v9300_v54 = vrot.slane %v5233_v48, %v8271_v16  ;;  %v1967_v1 = vcombine.high %v1959_v31, %v1959_v31  ;;  %v2738_v59 = vmax.f32 %v1933_v41, %v1959_v31  ;;  %v1969_v53 = vcombine.high %v1599_v63, %v1599_v63 }
 0x180   :  { %v9315_v42 = vrot.slane %v1599_v63, %v8271_v16  ;;  %v4622_v4 = vmax.f32 %v9261_v50, 0.0  ;;  %v4623_v9 = vmax.f32 %v9275_v27, 0.0  ;;  %1328 = vst.msk [vmem:[#allocation2 + $0x138] sm:$0xff] %vm1288_vm4, %v1229_v45  ;;  %v9320_v34 = vpop.f32.mrf.mxu0  ;;  %v9323_v20 = vpop.f32.mrf.mxu1  ;;  %v1968_v47 = vcombine.high %v1966_v43, %v1966_v43  ;;  %v9339_v50 = vld [vmem:[%s10983_s3] ss:$0 sm:$0xff] }
 0x181   :  { %v5249_v32 = vcombine.high %v9300_v54, %v9300_v54  ;;  %7500 = vmatmul.mubr.msk.bf16.gmra.mxu0 %vm402_vm3, %v7820_v24  ;;  %v2739_v41 = vmax.f32 %v9166_v51, %v1967_v1  ;;  %v2740_v2 = vmax.f32 %v1934_v21, %v1966_v43  ;;  %v3024_v3 = vcombine.low %v2737_v18, %v2738_v59 }
 0x182   :  { %7706 = vmatmul.mubr.msk.bf16.gmra.mxu1 %vm402_vm3, %v7821_v44  ;;  %v5248_v37 = vcombine.high %v9289_v46, %v9289_v46  ;;  %v4798_v62 = vld [vmem:[#allocation2 + $0x100] ss:$2 sm:$0xff]  ;;  %v4847_v56 = vld [vmem:[#allocation2 + $0x101] ss:$2 sm:$0xff]  ;;  %v9333_v12 = vrot.slane %v1969_v53, %v8271_v16  ;;  %v4624_v8 = vmax.f32 %v9303_v26, 0.0  ;;  %v1132_v51 = vadd.f32 %v9339_v50, %v1028_v22  ;;  %v7405_v21 = vpop.f32.mrf.mxu0  ;;  %v7611_v38 = vpop.f32.mrf.mxu1  ;;  %7503 = vmatprep.mubr.msk.bf16.mxu0 %vm7838_vm2, %v7836_v0 }
 0x183   :  { %v3025_v7 = vcombine.low %v2739_v41, %v2740_v2  ;;  %v4896_v35 = vmax.f32 %v4798_v62, %v4847_v56  ;;  %v9345_v29 = vmax.f32 %v9205_v55, %v5249_v32  ;;  %v4625_v11 = vmax.f32 %v9306_v39, 0.0  ;;  %7709 = vmatprep.mubr.msk.bf16.mxu1 %vm7838_vm2, %v7836_v0  ;;  %v9377_v44 = vld [vmem:[%s10982_s2] ss:$0 sm:$0xff] }
 0x184   :  { %v3032_v52 = vrot.slane %v3024_v3, %v8271_v16  ;;  %v1984_v13 = vcombine.high %v9315_v42, %v9315_v42  ;;  %v2741_v36 = vmax.f32 %v9221_v15, %v1968_v47  ;;  %v2742_v10 = vmax.f32 %v1950_v25, %v9315_v42  ;;  %v9361_v18 = vpop.f32.mrf.mxu0  ;;  %v9363_v60 = vpop.f32.mrf.mxu1  ;;  %v7823_v15 = vld [vmem:[%s10981_s0 + $0x2f8] sm:$0xff]  }
 0x185   :  { %v4799_v27 = vld [vmem:[#allocation2 + $0x110] ss:$2 sm:$0xff]  ;;  %v4848_v17 = vld [vmem:[#allocation2 + $0x111] ss:$2 sm:$0xff]  ;;  %v1423_v48 = vld [vmem:[#allocation2 + $0x120] ss:$2 sm:$0xff]  ;;  %v3039_v58 = vrot.slane %v3025_v7, %v8271_v16  ;;  %v5250_v23 = vcombine.high %v4896_v35, %v4896_v35  ;;  %v5257_v22 = vrot.slane %v4896_v35, %v8271_v16  ;;  %v1985_v24 = vcombine.high %v9333_v12, %v9333_v12 }
 0x186   :  { %v1521_v14 = vld [vmem:[#allocation2 + $0x121] ss:$2 sm:$0xff]  ;;  %v4897_v25 = vmax.f32 %v4799_v27, %v4848_v17  ;;  %v1230_v63 = vmax.f32 %v1132_v51, 0.0  ;;  %v4430_v26 = vmul.f32 %v9377_v44, %v9254_v5  ;;  %v7406_v45 = vpop.f32.mrf.mxu0  ;;  %v7612_v39 = vpop.f32.mrf.mxu1  ;;  %v3041_v32 = vcombine.low %v2741_v36, %v2742_v10 }
 0x187   :  { %v1600_v31 = vmax.f32 %v1423_v48, %v1521_v14  ;;  %4720 = vst.msk [vmem:[#allocation2 + $0x120] sm:$0xff] %vm1288_vm4, %v4622_v4  ;;  %4721 = vst.msk [vmem:[#allocation2 + $0x128] sm:$0xff] %vm1288_vm4, %v4623_v9  ;;  %v3040_v49 = vcombine.low %v3032_v52, %v3039_v58  ;;  %v5264_v40 = vrot.slane %v5250_v23, %v8271_v16  ;;  %v1425_v59 = vld [vmem:[#allocation2 + $0x130] ss:$2 sm:$0xff]  ;;  %v1523_v53 = vld [vmem:[#allocation2 + $0x131] ss:$2 sm:$0xff] }
 0x188   :  { %v5265_v43 = vcombine.high %v5257_v22, %v5257_v22  ;;  %v6036_v1 = vmax.f32 %v5231_v57, %v5257_v22  ;;  %v5267_v42 = vcombine.high %v4897_v25, %v4897_v25  ;;  %v5274_v4 = vrot.slane %v4897_v25, %v8271_v16  ;;  %4722 = vst.msk [vmem:[#allocation2 + $0x130] sm:$0xff] %vm1288_vm4, %v4624_v8  ;;  %v9389_v5 = vpop.f32.mrf.mxu0  ;;  %v9392_v47 = vpop.f32.mrf.mxu1  ;;  %v7825_v17 = vld [vmem:[%s10981_s0 + $0x300] sm:$0xff]  }
 0x189   :  { %v1986_v9 = vcombine.high %v1600_v31, %v1600_v31  ;;  %4723 = vst.msk [vmem:[#allocation2 + $0x138] sm:$0xff] %vm1288_vm4, %v4625_v11  ;;  %1329 = vst.msk [vmem:[#allocation2 + $0x140] sm:$0xff] %vm1288_vm4, %v1230_v63  ;;  %7504 = vmatmul.mubr.msk.bf16.gmra.mxu0 %vm402_vm3, %v7822_v61  ;;  %v7158_v55 = vpack.c.bf16 %v3040_v49, %v3040_v49  ;;  %v5266_v57 = vcombine.high %v5264_v40, %v5264_v40 }
 0x18a   :  { %v6037_v41 = vmax.f32 %v9211_v28, %v5265_v43  ;;  %v6038_v2 = vmax.f32 %v5232_v30, %v5264_v40  ;;  %7710 = vmatmul.mubr.msk.bf16.gmra.mxu1 %vm402_vm3, %v7823_v15  ;;  %v6322_v3 = vcombine.low %v9345_v29, %v6036_v1  ;;  %v9401_v62 = vmax.f32 %v9232_v19, %v1984_v13  ;;  %v7409_v51 = vpop.f32.mrf.mxu0  ;;  %v7615_v21 = vpop.f32.mrf.mxu1 }
 0x18b   :  { %v9404_v56 = vrot.slane %v5267_v42, %v8271_v16  ;;  %v6040_v8 = vmax.f32 %v5248_v37, %v5274_v4  ;;  %7507 = vmatprep.mubr.msk.bf16.mxu0 %vm7838_vm2, %v7836_v0  ;;  %3455 = vst.msk [vmem:[%s10984_s4 + $0x1c] sm:$0xf] %vm3447_vm5, %v7158_v55  ;;  %v5282_v19 = vcombine.high %v5274_v4, %v5274_v4 }
 0x18c   :  { %v6323_v28 = vcombine.low %v6037_v41, %v6038_v2  ;;  %v9416_v30 = vadd.f32 %v9339_v50, %v4430_v26  ;;  %v1029_v38 = vmul.f32 %v9377_v44, %v9281_v6  ;;  %7713 = vmatprep.mubr.msk.bf16.mxu1 %vm7838_vm2, %v7836_v0  ;;  %v9423_v37 = vrot.slane %v3041_v32, %v8271_v16  ;;  %v9429_v11 = vpop.f32.mrf.mxu0  ;;  %v9431_v61 = vpop.f32.mrf.mxu1  ;;  %v7824_v6 = vld [vmem:[%s10981_s0 + $0x178] sm:$0xff]  }
 0x18d   :  { %v6039_v7 = vmax.f32 %v9289_v46, %v5266_v57  ;;  %v9427_v35 = vrot.slane %v1600_v31, %v8271_v16  ;;  %v1601_v29 = vmax.f32 %v1425_v59, %v1523_v53  ;;  %v6330_v52 = vrot.slane %v6322_v3, %v8271_v16 }
 0x18e   :  { %v6337_v13 = vrot.slane %v6323_v28, %v8271_v16  ;;  %v5283_v36 = vcombine.high %v9404_v56, %v9404_v56  ;;  %v9441_v46 = vrot.slane %v1986_v9, %v8271_v16  ;;  %v4800_v10 = vld [vmem:[#allocation2 + $0x120] ss:$2 sm:$0xff]  ;;  %v4849_v27 = vld [vmem:[#allocation2 + $0x121] ss:$2 sm:$0xff]  ;;  %v7410_v14 = vpop.f32.mrf.mxu0  ;;  %v7616_v15 = vpop.f32.mrf.mxu1  ;;  %v9450_v31 = vmax.f32 %v9300_v54, %v5282_v19 }
 0x18f   :  { %v6339_v48 = vcombine.low %v6039_v7, %v6040_v8  ;;  %v4898_v58 = vmax.f32 %v4800_v10, %v4849_v27  ;;  %v2003_v23 = vcombine.high %v1601_v29, %v1601_v29  ;;  %v9447_v22 = vrot.slane %v1601_v29, %v8271_v16  ;;  %v7826_v29 = vld [vmem:[%s10981_s0 + $0x180] sm:$0xff]  }
 0x190   :  { %v6338_v25 = vcombine.low %v6330_v52, %v6337_v13  ;;  %v4801_v63 = vld [vmem:[#allocation2 + $0x130] ss:$2 sm:$0xff]  ;;  %v4850_v26 = vld [vmem:[#allocation2 + $0x131] ss:$2 sm:$0xff]  ;;  %v1133_v45 = vadd.f32 %v9339_v50, %v1029_v38  ;;  %v4431_v39 = vmul.f32 %v9377_v44, %v9283_v33  ;;  %v2001_v49 = vcombine.high %v9427_v35, %v9427_v35  ;;  %v9460_v59 = vpop.f32.mrf.mxu0  ;;  %v9463_v54 = vpop.f32.mrf.mxu1 }
 0x191   :  { %v5284_v40 = vcombine.high %v4898_v58, %v4898_v58  ;;  %v2017_v43 = vrot.slane %v2003_v23, %v8271_v16  ;;  %v2018_v1 = vcombine.high %v9447_v22, %v9447_v22  ;;  %7508 = vmatmul.mubr.msk.bf16.gmra.mxu0 %vm402_vm3, %v7824_v6  ;;  %v2002_v32 = vcombine.high %v9441_v46, %v9441_v46 }
 0x192   :  { %v7183_v53 = vpack.c.bf16 %v6338_v25, %v6338_v25  ;;  %v4899_v33 = vmax.f32 %v4801_v63, %v4850_v26  ;;  %v1231_v42 = vmax.f32 %v1133_v45, 0.0  ;;  %7714 = vmatmul.mubr.msk.bf16.gmra.mxu1 %vm402_vm3, %v7825_v17  ;;  %7511 = vmatprep.mubr.msk.bf16.mxu0 %vm7838_vm2, %v7836_v0  ;;  %v9471_v4 = vrot.slane %v6339_v48, %v8271_v16  ;;  %v7413_v41 = vpop.f32.mrf.mxu0  ;;  %v7619_v2 = vpop.f32.mrf.mxu1 }
 0x193   :  { %v2019_v9 = vcombine.high %v2017_v43, %v2017_v43  ;;  %v2744_v55 = vmax.f32 %v9333_v12, %v2018_v1  ;;  %v4626_v57 = vmax.f32 %v9416_v30, 0.0  ;;  %7717 = vmatprep.mubr.msk.bf16.mxu1 %vm7838_vm2, %v7836_v0  ;;  %v9482_v3 = vrot.slane %v4898_v58, %v8271_v16 }
 0x194   :  { %7133 = vst.msk [vmem:[%s10984_s4 + $0x80] sm:$0xf] %vm3447_vm5, %v7183_v53  ;;  %v5301_v8 = vcombine.high %v4899_v33, %v4899_v33  ;;  %v9485_v51 = vrot.slane %v4899_v33, %v8271_v16  ;;  %v4529_v21 = vadd.f32 %v9339_v50, %v4431_v39  ;;  %v9490_v28 = vrot.slane %v5284_v40, %v8271_v16  ;;  %v9496_v38 = vpop.f32.mrf.mxu0  ;;  %v9498_v7 = vpop.f32.mrf.mxu1 }
 0x195   :  { %1330 = vst.msk [vmem:[#allocation2 + $0x148] sm:$0xff] %vm1288_vm4, %v1231_v42  ;;  %v2746_v0 = vmax.f32 %v9427_v35, %v2019_v9  ;;  %v3042_v19 = vcombine.low %v9401_v62, %v2744_v55  ;;  %v1030_v30 = vmul.f32 %v9377_v44, %v9320_v34  ;;  %v4432_v13 = vmul.f32 %v9377_v44, %v9323_v20  ;;  %v7827_v34 = vld [vmem:[%s10981_s0 + $0x308] sm:$0xff]  }
 0x196   :  { %v5315_v6 = vrot.slane %v5301_v8, %v8271_v16  ;;  %v5316_v52 = vcombine.high %v9485_v51, %v9485_v51  ;;  %v1031_v62 = vmul.f32 %v9377_v44, %v9361_v18  ;;  %v2745_v10 = vmax.f32 %v1985_v24, %v2017_v43  ;;  %v7414_v58 = vpop.f32.mrf.mxu0  ;;  %v7620_v20 = vpop.f32.mrf.mxu1 }
 0x197   :  { %v3056_v27 = vrot.slane %v3042_v19, %v8271_v16  ;;  %v1134_v17 = vadd.f32 %v9339_v50, %v1030_v30  ;;  %v4433_v48 = vmul.f32 %v9377_v44, %v9363_v60  ;;  %v5299_v18 = vcombine.high %v9482_v3, %v9482_v3 }
 0x198   :  { %v5317_v23 = vcombine.high %v5315_v6, %v5315_v6  ;;  %v6042_v14 = vmax.f32 %v9404_v56, %v5316_v52  ;;  %v4627_v15 = vmax.f32 %v4529_v21, 0.0  ;;  %v3058_v12 = vcombine.low %v2745_v10, %v2746_v0  ;;  %v9525_v26 = vpop.f32.mrf.mxu0  ;;  %v9528_v60 = vpop.f32.mrf.mxu1 }
 0x199   :  { %v3057_v25 = vcombine.low %v9423_v37, %v3056_v27  ;;  %v1232_v24 = vmax.f32 %v1134_v17, 0.0  ;;  %v1135_v63 = vadd.f32 %v9339_v50, %v1031_v62  ;;  %7512 = vmatmul.mubr.msk.bf16.gmra.mxu0 %vm402_vm3, %v7826_v29  ;;  %v6043_v45 = vmax.f32 %v5283_v36, %v5315_v6 }
 0x19a   :  { %v6044_v39 = vmax.f32 %v9482_v3, %v5317_v23  ;;  %v6340_v40 = vcombine.low %v9450_v31, %v6042_v14  ;;  %v9536_v37 = vadd.f32 %v9339_v50, %v4432_v13  ;;  %7718 = vmatmul.mubr.msk.bf16.gmra.mxu1 %vm402_vm3, %v7827_v34  ;;  %v9541_v42 = vadd.f32 %v9339_v50, %v4433_v48  ;;  %v7417_v36 = vpop.f32.mrf.mxu0  ;;  %v7623_v9 = vpop.f32.mrf.mxu1 }
 0x19b   :  { %v7159_v43 = vpack.c.bf16 %v3057_v25, %v3057_v25  ;;  %1331 = vst.msk [vmem:[#allocation2 + $0x150] sm:$0xff] %vm1288_vm4, %v1232_v24  ;;  %v1233_v33 = vmax.f32 %v1135_v63, 0.0  ;;  %v1032_v56 = vmul.f32 %v9377_v44, %v9389_v5  ;;  %v5300_v31 = vcombine.high %v9490_v28, %v9490_v28 }
 0x19c   :  { %v1427_v1 = vld [vmem:[#allocation2 + $0x140] ss:$2 sm:$0xff]  ;;  %v1525_v53 = vld [vmem:[#allocation2 + $0x141] ss:$2 sm:$0xff]  ;;  %v6354_v55 = vrot.slane %v6340_v40, %v8271_v16  ;;  %v4434_v2 = vmul.f32 %v9377_v44, %v9392_v47  ;;  %v9553_v8 = vrot.slane %v3058_v12, %v8271_v16  ;;  %v6356_v5 = vcombine.low %v6043_v45, %v6044_v39  ;;  %v9563_v0 = vpop.f32.mrf.mxu0  ;;  %v9565_v19 = vpop.f32.mrf.mxu1 }
 0x19d   :  { %v1602_v41 = vmax.f32 %v1427_v1, %v1525_v53  ;;  %4724 = vst.msk [vmem:[#allocation2 + $0x140] sm:$0xff] %vm1288_vm4, %v4626_v57  ;;  %4725 = vst.msk [vmem:[#allocation2 + $0x148] sm:$0xff] %vm1288_vm4, %v4627_v15  ;;  %v1136_v21 = vadd.f32 %v9339_v50, %v1032_v56  ;;  %v1033_v57 = vmul.f32 %v9377_v44, %v9429_v11  ;;  %v4628_v6 = vmax.f32 %v9536_v37, 0.0 }
 0x19e   :  { %3456 = vst.msk [vmem:[%s10984_s4 + $0x20] sm:$0xf] %vm3447_vm5, %v7159_v43  ;;  %v6355_v47 = vcombine.low %v9471_v4, %v6354_v55  ;;  %v4629_v52 = vmax.f32 %v9541_v42, 0.0  ;;  %v4435_v34 = vmul.f32 %v9377_v44, %v9431_v61  ;;  %v7418_v11 = vpop.f32.mrf.mxu0  ;;  %v7624_v10 = vpop.f32.mrf.mxu1  ;;  %v9576_v4 = vadd.f32 %v9339_v50, %v4434_v2 }
 0x19f   :  { %1332 = vst.msk [vmem:[#allocation2 + $0x158] sm:$0xff] %vm1288_vm4, %v1233_v33  ;;  %v2020_v30 = vcombine.high %v1602_v41, %v1602_v41  ;;  %v2027_v29 = vrot.slane %v1602_v41, %v8271_v16  ;;  %v1234_v13 = vmax.f32 %v1136_v21, 0.0  ;;  %v1137_v62 = vadd.f32 %v9339_v50, %v1033_v57 }
 0x1a0   :  { %v7184_v27 = vpack.c.bf16 %v6355_v47, %v6355_v47  ;;  %v9579_v58 = vrot.slane %v6356_v5, %v8271_v16  ;;  %v1034_v23 = vmul.f32 %v9377_v44, %v9460_v59  ;;  %v4436_v61 = vmul.f32 %v9377_v44, %v9463_v54  ;;  %v9586_v14 = vpop.f32.mrf.mxu0  ;;  %v9588_v15 = vpop.f32.mrf.mxu1 }
 0x1a1   :  { %v2034_v17 = vrot.slane %v2020_v30, %v8271_v16  ;;  %v2035_v48 = vcombine.high %v2027_v29, %v2027_v29  ;;  %1333 = vst.msk [vmem:[#allocation2 + $0x160] sm:$0xff] %vm1288_vm4, %v1234_v13  ;;  %v1235_v20 = vmax.f32 %v1137_v62, 0.0  ;;  %v2747_v12 = vmax.f32 %v2001_v49, %v2027_v29 }
 0x1a2   :  { %7134 = vst.msk [vmem:[%s10984_s4 + $0x84] sm:$0xf] %vm3447_vm5, %v7184_v27  ;;  %v1035_v59 = vmul.f32 %v9377_v44, %v9496_v38  ;;  %v4533_v45 = vadd.f32 %v9339_v50, %v4435_v34  ;;  %v1138_v39 = vadd.f32 %v9339_v50, %v1034_v23  ;;  %v9604_v40 = vadd.f32 %v9339_v50, %v4436_v61  ;;  %v7421_v49 = vpop.f32.mrf.mxu0  ;;  %v7627_v37 = vpop.f32.mrf.mxu1 }
 0x1a3   :  { %v2036_v25 = vcombine.high %v2034_v17, %v2034_v17  ;;  %v2748_v24 = vmax.f32 %v9441_v46, %v2035_v48  ;;  %1334 = vst.msk [vmem:[#allocation2 + $0x168] sm:$0xff] %vm1288_vm4, %v1235_v20  ;;  %v4437_v35 = vmul.f32 %v9377_v44, %v9498_v7  ;;  %v1036_v42 = vmul.f32 %v9377_v44, %v9525_v26 }
 0x1a4   :  { %v4802_v54 = vld [vmem:[#allocation2 + $0x140] ss:$2 sm:$0xff]  ;;  %v4851_v63 = vld [vmem:[#allocation2 + $0x141] ss:$2 sm:$0xff]  ;;  %v1139_v33 = vadd.f32 %v9339_v50, %v1035_v59  ;;  %v1236_v9 = vmax.f32 %v1138_v39, 0.0  ;;  %v9617_v55 = vpop.f32.mrf.mxu0  ;;  %v9619_v41 = vpop.f32.mrf.mxu1  ;;  %v2749_v21 = vmax.f32 %v2002_v32, %v2034_v17  ;;  %v4631_v47 = vmax.f32 %v4533_v45, 0.0 }
 0x1a5   :  { %v3059_v43 = vcombine.low %v2747_v12, %v2748_v24  ;;  %v4900_v1 = vmax.f32 %v4802_v54, %v4851_v63  ;;  %v2750_v56 = vmax.f32 %v9447_v22, %v2036_v25  ;;  %v9615_v7 = vadd.f32 %v9339_v50, %v4437_v35 }
 0x1a6   :  { %v1429_v53 = vld [vmem:[#allocation2 + $0x150] ss:$2 sm:$0xff]  ;;  %v1527_v38 = vld [vmem:[#allocation2 + $0x151] ss:$2 sm:$0xff]  ;;  %v4630_v22 = vmax.f32 %v9576_v4, 0.0  ;;  %1335 = vst.msk [vmem:[#allocation2 + $0x170] sm:$0xff] %vm1288_vm4, %v1236_v9  ;;  %v7422_v29 = vpop.f32.mrf.mxu0  ;;  %v1140_v32 = vadd.f32 %v9339_v50, %v1036_v42  ;;  %v4438_v45 = vmul.f32 %v9377_v44, %v9528_v60  ;;  %v1037_v39 = vmul.f32 %v9377_v44, %v9563_v0 }
 0x1a7   :  { %v1603_v36 = vmax.f32 %v1429_v53, %v1527_v38  ;;  %4726 = vst.msk [vmem:[#allocation2 + $0x150] sm:$0xff] %vm1288_vm4, %v4628_v6  ;;  %4727 = vst.msk [vmem:[#allocation2 + $0x158] sm:$0xff] %vm1288_vm4, %v4629_v52  ;;  %v3073_v2 = vrot.slane %v3059_v43, %v8271_v16  ;;  %v5318_v5 = vcombine.high %v4900_v1, %v4900_v1  ;;  %v1237_v30 = vmax.f32 %v1139_v33, 0.0  ;;  %v7628_v6 = vpop.f32.mrf.mxu1 }
 0x1a8   :  { %v5325_v26 = vrot.slane %v4900_v1, %v8271_v16  ;;  %v4632_v34 = vmax.f32 %v9604_v40, 0.0  ;;  %v3075_v11 = vcombine.low %v2749_v21, %v2750_v56  ;;  %v4633_v46 = vmax.f32 %v9615_v7, 0.0  ;;  %v9637_v27 = vpop.f32.mrf.mxu0 }
 0x1a9   :  { %v2037_v57 = vcombine.high %v1603_v36, %v1603_v36  ;;  %v3074_v52 = vcombine.low %v9553_v8, %v3073_v2  ;;  %v5332_v13 = vrot.slane %v5318_v5, %v8271_v16  ;;  %v9632_v10 = vrot.slane %v1603_v36, %v8271_v16  ;;  %1336 = vst.msk [vmem:[#allocation2 + $0x178] sm:$0xff] %vm1288_vm4, %v1237_v30  ;;  %v9639_v17 = vpop.f32.mrf.mxu1 }
 0x1aa   :  { %v5333_v62 = vcombine.high %v5325_v26, %v5325_v26  ;;  %v6045_v4 = vmax.f32 %v5299_v18, %v5325_v26  ;;  %v1431_v23 = vld [vmem:[#allocation2 + $0x160] ss:$2 sm:$0xff]  ;;  %v1529_v61 = vld [vmem:[#allocation2 + $0x161] ss:$2 sm:$0xff]  ;;  %v1238_v59 = vmax.f32 %v1140_v32, 0.0  ;;  %v7425_v54 = vpop.f32.mrf.mxu0  ;;  %v4439_v37 = vmul.f32 %v9377_v44, %v9565_v19 }
 0x1ab   :  { %v7160_v8 = vpack.c.bf16 %v3074_v52, %v3074_v52  ;;  %v5334_v48 = vcombine.high %v5332_v13, %v5332_v13  ;;  %v6047_v25 = vmax.f32 %v5300_v31, %v5332_v13  ;;  %v9649_v12 = vrot.slane %v2037_v57, %v8271_v16  ;;  %4728 = vst.msk [vmem:[#allocation2 + $0x160] sm:$0xff] %vm1288_vm4, %v4630_v22  ;;  %v7631_v3 = vpop.f32.mrf.mxu1 }
 0x1ac   :  { %v6046_v20 = vmax.f32 %v9490_v28, %v5333_v62  ;;  %v1604_v24 = vmax.f32 %v1431_v23, %v1529_v61  ;;  %4729 = vst.msk [vmem:[#allocation2 + $0x168] sm:$0xff] %vm1288_vm4, %v4631_v47  ;;  %1337 = vst.msk [vmem:[#allocation2 + $0x180] sm:$0xff] %vm1288_vm4, %v1238_v59  ;;  %v9673_v1 = vrot.slane %v3075_v11, %v8271_v16 }
 0x1ad   :  { %3457 = vst.msk [vmem:[%s10984_s4 + $0x24] sm:$0xf] %vm3447_vm5, %v7160_v8  ;;  %v6048_v18 = vmax.f32 %v9485_v51, %v5334_v48  ;;  %v9668_v51 = vpop.f32.mrf.mxu0  ;;  %v9670_v43 = vpop.f32.mrf.mxu1  ;;  %v1141_v53 = vadd.f32 %v9339_v50, %v1037_v39  ;;  %v2052_v38 = vcombine.high %v9632_v10, %v9632_v10  ;;  %v2053_v33 = vcombine.high %v9649_v12, %v9649_v12 }
 0x1ae   :  { %v6357_v28 = vcombine.low %v6045_v4, %v6046_v20  ;;  %v4803_v31 = vld [vmem:[#allocation2 + $0x150] ss:$2 sm:$0xff]  ;;  %v4852_v63 = vld [vmem:[#allocation2 + $0x151] ss:$2 sm:$0xff]  ;;  %v2054_v35 = vcombine.high %v1604_v24, %v1604_v24  ;;  %v9663_v49 = vrot.slane %v1604_v24, %v8271_v16  ;;  %v9689_v26 = vadd.f32 %v9339_v50, %v4438_v45 }
 0x1af   :  { %v4901_v40 = vmax.f32 %v4803_v31, %v4852_v63  ;;  %v6373_v0 = vcombine.low %v6047_v25, %v6048_v18  ;;  %v7426_v56 = vpop.f32.mrf.mxu0  ;;  %v7632_v36 = vpop.f32.mrf.mxu1  ;;  %v1239_v22 = vmax.f32 %v1141_v53, 0.0  ;;  %v1038_v11 = vmul.f32 %v9377_v44, %v9586_v14 }
 0x1b0   :  { %v6371_v60 = vrot.slane %v6357_v28, %v8271_v16  ;;  %v9682_v19 = vrot.slane %v2054_v35, %v8271_v16  ;;  %v1433_v2 = vld [vmem:[#allocation2 + $0x170] ss:$2 sm:$0xff]  ;;  %v1531_v5 = vld [vmem:[#allocation2 + $0x171] ss:$2 sm:$0xff]  ;;  %v2069_v21 = vcombine.high %v9663_v49, %v9663_v49  ;;  %v4634_v23 = vmax.f32 %v9689_v26, 0.0 }
 0x1b1   :  { %v5335_v42 = vcombine.high %v4901_v40, %v4901_v40  ;;  %v9686_v7 = vrot.slane %v4901_v40, %v8271_v16  ;;  %v1605_v47 = vmax.f32 %v1433_v2, %v1531_v5  ;;  %4730 = vst.msk [vmem:[#allocation2 + $0x170] sm:$0xff] %vm1288_vm4, %v4632_v34  ;;  %4731 = vst.msk [vmem:[#allocation2 + $0x178] sm:$0xff] %vm1288_vm4, %v4633_v46  ;;  %v9698_v30 = vpop.f32.mrf.mxu0  ;;  %v9700_v29 = vpop.f32.mrf.mxu1 }
 0x1b2   :  { %v6372_v9 = vcombine.low %v9579_v58, %v6371_v60  ;;  %v2070_v57 = vcombine.high %v9682_v19, %v9682_v19  ;;  %v4537_v58 = vadd.f32 %v9339_v50, %v4439_v37  ;;  %v9703_v6 = vrot.slane %v6373_v0, %v8271_v16  ;;  %1338 = vst.msk [vmem:[#allocation2 + $0x188] sm:$0xff] %vm1288_vm4, %v1239_v22 }
 0x1b3   :  { %v4804_v13 = vld [vmem:[#allocation2 + $0x160] ss:$2 sm:$0xff]  ;;  %v4853_v62 = vld [vmem:[#allocation2 + $0x161] ss:$2 sm:$0xff]  ;;  %v4440_v34 = vmul.f32 %v9377_v44, %v9588_v15  ;;  %v9711_v46 = vrot.slane %v5335_v42, %v8271_v16  ;;  %v2071_v8 = vcombine.high %v1605_v47, %v1605_v47  ;;  %v2078_v48 = vrot.slane %v1605_v47, %v8271_v16  ;;  %v7429_v4 = vpop.f32.mrf.mxu0  ;;  %v7635_v20 = vpop.f32.mrf.mxu1 }
 0x1b4   :  { %v7185_v52 = vpack.c.bf16 %v6372_v9, %v6372_v9  ;;  %v4902_v32 = vmax.f32 %v4804_v13, %v4853_v62  ;;  %v5350_v14 = vcombine.high %v9686_v7, %v9686_v7  ;;  %v1142_v15 = vadd.f32 %v9339_v50, %v1038_v11 }
 0x1b5   :  { %v1039_v61 = vmul.f32 %v9377_v44, %v9617_v55  ;;  %v2085_v24 = vrot.slane %v2071_v8, %v8271_v16  ;;  %v2086_v59 = vcombine.high %v2078_v48, %v2078_v48  ;;  %v2751_v54 = vmax.f32 %v9632_v10, %v2070_v57  ;;  %v9726_v3 = vpop.f32.mrf.mxu0  ;;  %v9728_v18 = vpop.f32.mrf.mxu1 }
 0x1b6   :  { %7135 = vst.msk [vmem:[%s10984_s4 + $0x88] sm:$0xf] %vm3447_vm5, %v7185_v52  ;;  %v5352_v25 = vcombine.high %v4902_v32, %v4902_v32  ;;  %v2752_v28 = vmax.f32 %v2052_v38, %v2078_v48  ;;  %v1240_v31 = vmax.f32 %v1142_v15, 0.0  ;;  %v9731_v63 = vadd.f32 %v9339_v50, %v4440_v34 }
 0x1b7   :  { %v1143_v45 = vadd.f32 %v9339_v50, %v1039_v61  ;;  %v5351_v55 = vcombine.high %v9711_v46, %v9711_v46  ;;  %v2753_v40 = vmax.f32 %v9649_v12, %v2086_v59  ;;  %v4635_v10 = vmax.f32 %v4537_v58, 0.0  ;;  %v7430_v35 = vpop.f32.mrf.mxu0  ;;  %v7636_v37 = vpop.f32.mrf.mxu1 }
 0x1b8   :  { %v9737_v39 = vrot.slane %v5352_v25, %v8271_v16  ;;  %v2754_v60 = vmax.f32 %v2053_v33, %v2085_v24  ;;  %v3076_v0 = vcombine.low %v2751_v54, %v2752_v28  ;;  %v4805_v53 = vld [vmem:[#allocation2 + $0x170] ss:$2 sm:$0xff]  ;;  %v4854_v38 = vld [vmem:[#allocation2 + $0x171] ss:$2 sm:$0xff]  ;;  %1339 = vst.msk [vmem:[#allocation2 + $0x190] sm:$0xff] %vm1288_vm4, %v1240_v31  ;;  %v4441_v56 = vmul.f32 %v9377_v44, %v9619_v41 }
 0x1b9   :  { %v1241_v42 = vmax.f32 %v1143_v45, 0.0  ;;  %v9744_v36 = vrot.slane %v4902_v32, %v8271_v16  ;;  %v4903_v12 = vmax.f32 %v4805_v53, %v4854_v38  ;;  %v1435_v2 = vld [vmem:[#allocation2 + $0x180] ss:$2 sm:$0xff]  ;;  %v1533_v5 = vld [vmem:[#allocation2 + $0x181] ss:$2 sm:$0xff]  ;;  %v1040_v33 = vmul.f32 %v9377_v44, %v9637_v27  ;;  %v9750_v26 = vpop.f32.mrf.mxu0  ;;  %v9752_v22 = vpop.f32.mrf.mxu1 }
 0x1ba   :  { %v5368_v9 = vcombine.high %v9737_v39, %v9737_v39  ;;  %v2087_v57 = vcombine.high %v2085_v24, %v2085_v24  ;;  %v3090_v47 = vrot.slane %v3076_v0, %v8271_v16  ;;  %v1606_v41 = vmax.f32 %v1435_v2, %v1533_v5  ;;  %4732 = vst.msk [vmem:[#allocation2 + $0x180] sm:$0xff] %vm1288_vm4, %v4634_v23 }
 0x1bb   :  { %4733 = vst.msk [vmem:[#allocation2 + $0x188] sm:$0xff] %vm1288_vm4, %v4635_v10  ;;  %v4636_v58 = vmax.f32 %v9731_v63, 0.0  ;;  %1340 = vst.msk [vmem:[#allocation2 + $0x198] sm:$0xff] %vm1288_vm4, %v1241_v42  ;;  %v3092_v52 = vcombine.low %v2753_v40, %v2754_v60  ;;  %v5369_v13 = vcombine.high %v4903_v12, %v4903_v12  ;;  %v5376_v27 = vrot.slane %v4903_v12, %v8271_v16  ;;  %v7433_v11 = vpop.f32.mrf.mxu0  ;;  %v7639_v34 = vpop.f32.mrf.mxu1 }
 0x1bc   :  { %v4539_v62 = vadd.f32 %v9339_v50, %v4441_v56  ;;  %v3091_v32 = vcombine.low %v9673_v1, %v3090_v47  ;;  %v2088_v8 = vcombine.high %v1606_v41, %v1606_v41  ;;  %v2095_v48 = vrot.slane %v1606_v41, %v8271_v16 }
 0x1bd   :  { %v1144_v4 = vadd.f32 %v9339_v50, %v1040_v33  ;;  %v5383_v20 = vrot.slane %v5369_v13, %v8271_v16  ;;  %v5384_v23 = vcombine.high %v5376_v27, %v5376_v27  ;;  %v6049_v15 = vmax.f32 %v9686_v7, %v5368_v9  ;;  %v9766_v25 = vpop.f32.mrf.mxu0  ;;  %v9768_v24 = vpop.f32.mrf.mxu1 }
 0x1be   :  { %v6050_v61 = vmax.f32 %v5350_v14, %v5376_v27  ;;  %v7161_v59 = vpack.c.bf16 %v3091_v32, %v3091_v32  ;;  %v9771_v54 = vrot.slane %v2088_v8, %v8271_v16  ;;  %v2755_v1 = vmax.f32 %v9663_v49, %v2087_v57 }
 0x1bf   :  { %v2756_v28 = vmax.f32 %v2069_v21, %v2095_v48  ;;  %v5367_v31 = vcombine.high %v9744_v36, %v9744_v36  ;;  %v6051_v7 = vmax.f32 %v9711_v46, %v5384_v23  ;;  %v6052_v14 = vmax.f32 %v5351_v55, %v5383_v20  ;;  %v7434_v45 = vpop.f32.mrf.mxu0  ;;  %v7640_v40 = vpop.f32.mrf.mxu1 }
 0x1c0   :  { %v6374_v63 = vcombine.low %v6049_v15, %v6050_v61  ;;  %v3100_v10 = vrot.slane %v3092_v52, %v8271_v16  ;;  %3458 = vst.msk [vmem:[%s10984_s4 + $0x28] sm:$0xf] %vm3447_vm5, %v7161_v59  ;;  %v4637_v37 = vmax.f32 %v4539_v62, 0.0  ;;  %v1242_v49 = vmax.f32 %v1144_v4, 0.0 }
 0x1c1   :  { %v3093_v35 = vcombine.low %v2755_v1, %v2756_v28  ;;  %v5385_v21 = vcombine.high %v5383_v20, %v5383_v20  ;;  %v2103_v0 = vcombine.high %v2095_v48, %v2095_v48  ;;  %v4442_v38 = vmul.f32 %v9377_v44, %v9639_v17  ;;  %v9788_v42 = vpop.f32.mrf.mxu0  ;;  %v9790_v56 = vpop.f32.mrf.mxu1 }
 0x1c2   :  { %v6388_v60 = vrot.slane %v6374_v63, %v8271_v16  ;;  %v4806_v53 = vld [vmem:[#allocation2 + $0x180] ss:$2 sm:$0xff]  ;;  %v4855_v46 = vld [vmem:[#allocation2 + $0x181] ss:$2 sm:$0xff]  ;;  %v1437_v55 = vld [vmem:[#allocation2 + $0x190] ss:$2 sm:$0xff]  ;;  %v2104_v9 = vcombine.high %v9771_v54, %v9771_v54  ;;  %v1041_v33 = vmul.f32 %v9377_v44, %v9668_v51  ;;  %v6390_v47 = vcombine.low %v6051_v7, %v6052_v14 }
 0x1c3   :  { %v3107_v12 = vrot.slane %v3093_v35, %v8271_v16  ;;  %v4904_v2 = vmax.f32 %v4806_v53, %v4855_v46  ;;  %v1535_v5 = vld [vmem:[#allocation2 + $0x191] ss:$2 sm:$0xff]  ;;  %1341 = vst.msk [vmem:[#allocation2 + $0x1a0] sm:$0xff] %vm1288_vm4, %v1242_v49  ;;  %v9802_v41 = vadd.f32 %v9339_v50, %v4442_v38  ;;  %v7437_v52 = vpop.f32.mrf.mxu0  ;;  %v7643_v13 = vpop.f32.mrf.mxu1  ;;  %v9816_v4 = vmax.f32 %v9682_v19, %v2103_v0 }
 0x1c4   :  { %v6389_v57 = vcombine.low %v9703_v6, %v6388_v60  ;;  %v1607_v17 = vmax.f32 %v1437_v55, %v1535_v5  ;;  %4734 = vst.msk [vmem:[#allocation2 + $0x190] sm:$0xff] %vm1288_vm4, %v4636_v58  ;;  %4735 = vst.msk [vmem:[#allocation2 + $0x198] sm:$0xff] %vm1288_vm4, %v4637_v37  ;;  %v1145_v34 = vadd.f32 %v9339_v50, %v1041_v33 }
 0x1c5   :  { %v3108_v27 = vcombine.low %v3100_v10, %v3107_v12  ;;  %v5386_v62 = vcombine.high %v4904_v2, %v4904_v2  ;;  %v5393_v11 = vrot.slane %v4904_v2, %v8271_v16  ;;  %v4443_v58 = vmul.f32 %v9377_v44, %v9670_v43  ;;  %v9811_v8 = vpop.f32.mrf.mxu0  ;;  %v9813_v48 = vpop.f32.mrf.mxu1 }
 0x1c6   :  { %v7186_v51 = vpack.c.bf16 %v6389_v57, %v6389_v57  ;;  %v2105_v32 = vcombine.high %v1607_v17, %v1607_v17  ;;  %v9807_v6 = vrot.slane %v1607_v17, %v8271_v16  ;;  %v6053_v23 = vmax.f32 %v9744_v36, %v5385_v21 }
 0x1c7   :  { %v7162_v20 = vpack.c.bf16 %v3108_v27, %v3108_v27  ;;  %v6054_v15 = vmax.f32 %v5367_v31, %v5393_v11  ;;  %v6398_v61 = vrot.slane %v6390_v47, %v8271_v16  ;;  %v9825_v43 = vrot.slane %v5386_v62, %v8271_v16  ;;  %v7438_v28 = vpop.f32.mrf.mxu0  ;;  %v7644_v19 = vpop.f32.mrf.mxu1 }
 0x1c8   :  { %7136 = vst.msk [vmem:[%s10984_s4 + $0x8c] sm:$0xf] %vm3447_vm5, %v7186_v51  ;;  %v4638_v59 = vmax.f32 %v9802_v41, 0.0  ;;  %v1243_v1 = vmax.f32 %v1145_v34, 0.0  ;;  %v5401_v36 = vcombine.high %v5393_v11, %v5393_v11  ;;  %v9833_v7 = vrot.slane %v2105_v32, %v8271_v16 }
 0x1c9   :  { %3459 = vst.msk [vmem:[%s10984_s4 + $0x2c] sm:$0xf] %vm3447_vm5, %v7162_v20  ;;  %v6391_v31 = vcombine.low %v6053_v23, %v6054_v15  ;;  %v1042_v14 = vmul.f32 %v9377_v44, %v9698_v30  ;;  %v2120_v63 = vcombine.high %v9807_v6, %v9807_v6  ;;  %v4541_v45 = vadd.f32 %v9339_v50, %v4443_v58  ;;  %v9845_v35 = vpop.f32.mrf.mxu0  ;;  %v9853_v53 = vpop.f32.mrf.mxu1 }
 0x1ca   :  { %1342 = vst.msk [vmem:[#allocation2 + $0x1a8] sm:$0xff] %vm1288_vm4, %v1243_v1  ;;  %v4444_v40 = vmul.f32 %v9377_v44, %v9700_v29  ;;  %v1043_v10 = vmul.f32 %v9377_v44, %v9726_v3  ;;  %v4445_v60 = vmul.f32 %v9377_v44, %v9728_v18  ;;  %v1044_v0 = vmul.f32 %v9377_v44, %v9750_v26 }
 0x1cb   :  { %v6405_v37 = vrot.slane %v6391_v31, %v8271_v16  ;;  %v4807_v49 = vld [vmem:[#allocation2 + $0x190] ss:$2 sm:$0xff]  ;;  %v4856_v21 = vld [vmem:[#allocation2 + $0x191] ss:$2 sm:$0xff]  ;;  %v1146_v30 = vadd.f32 %v9339_v50, %v1042_v14  ;;  %v5402_v29 = vcombine.high %v9825_v43, %v9825_v43  ;;  %v7441_v38 = vpop.f32.mrf.mxu0  ;;  %v4446_v18 = vmul.f32 %v9377_v44, %v9752_v22  ;;  %v7647_v26 = vpop.f32.mrf.mxu1 }
 0x1cc   :  { %v4905_v3 = vmax.f32 %v4807_v49, %v4856_v21  ;;  %v9858_v46 = vadd.f32 %v9339_v50, %v4444_v40  ;;  %v1147_v55 = vadd.f32 %v9339_v50, %v1043_v10  ;;  %v1148_v5 = vadd.f32 %v9339_v50, %v1044_v0  ;;  %v9940_v26 = vld [vmem:[%s10983_s3] ss:$0 sm:$0xff] }
 0x1cd   :  { %v6406_v12 = vcombine.low %v6398_v61, %v6405_v37  ;;  %v1244_v2 = vmax.f32 %v1146_v30, 0.0  ;;  %v9865_v33 = vmax.f32 %v9737_v39, %v5401_v36  ;;  %v2121_v57 = vcombine.high %v9833_v7, %v9833_v7  ;;  %v834_v41 = vpop.f32.mrf.mxu0  ;;  %v4242_v11 = vpop.f32.mrf.mxu1 }
 0x1ce   :  { %v1245_v47 = vmax.f32 %v1147_v55, 0.0  ;;  %v9870_v17 = vadd.f32 %v9339_v50, %v4445_v60  ;;  %v5403_v13 = vcombine.high %v4905_v3, %v4905_v3  ;;  %v4639_v27 = vmax.f32 %v4541_v45, 0.0 }
 0x1cf   :  { %v7187_v52 = vpack.c.bf16 %v6406_v12, %v6406_v12  ;;  %1343 = vst.msk [vmem:[#allocation2 + $0x1b0] sm:$0xff] %vm1288_vm4, %v1244_v2  ;;  %v1246_v62 = vmax.f32 %v1148_v5, 0.0  ;;  %v9874_v22 = vrot.slane %v4905_v3, %v8271_v16  ;;  %v4640_v39 = vmax.f32 %v9858_v46, 0.0  ;;  %v7442_v32 = vpop.f32.mrf.mxu0  ;;  %v7648_v61 = vpop.f32.mrf.mxu1 }
 0x1d0   :  { %1344 = vst.msk [vmem:[#allocation2 + $0x1b8] sm:$0xff] %vm1288_vm4, %v1245_v47  ;;  %v1045_v34 = vmul.f32 %v9377_v44, %v9766_v25  ;;  %v4447_v51 = vmul.f32 %v9377_v44, %v9768_v24  ;;  %v9888_v23 = vadd.f32 %v9339_v50, %v4446_v18  ;;  %v1046_v15 = vmul.f32 %v9377_v44, %v9788_v42 }
 0x1d1   :  { %7137 = vst.msk [vmem:[%s10984_s4 + $0x90] sm:$0xf] %vm3447_vm5, %v7187_v52  ;;  %v1439_v58 = vld [vmem:[#allocation2 + $0x1a0] ss:$2 sm:$0xff]  ;;  %v1537_v20 = vld [vmem:[#allocation2 + $0x1a1] ss:$2 sm:$0xff]  ;;  %v4448_v25 = vmul.f32 %v9377_v44, %v9790_v56  ;;  %v1047_v24 = vmul.f32 %v9377_v44, %v9811_v8  ;;  %v9903_v42 = vpop.f32.mrf.mxu0  ;;  %v9912_v14 = vpop.f32.mrf.mxu1  ;;  %v9915_v45 = vrot.slane %v5403_v13, %v8271_v16  ;;  %v5418_v21 = vcombine.high %v9874_v22, %v9874_v22 }
 0x1d2   :  { %1345 = vst.msk [vmem:[#allocation2 + $0x1c0] sm:$0xff] %vm1288_vm4, %v1246_v62  ;;  %v1608_v1 = vmax.f32 %v1439_v58, %v1537_v20  ;;  %4736 = vst.msk [vmem:[#allocation2 + $0x1a0] sm:$0xff] %vm1288_vm4, %v4638_v59  ;;  %v4641_v28 = vmax.f32 %v9870_v17, 0.0  ;;  %v1149_v19 = vadd.f32 %v9339_v50, %v1045_v34  ;;  %v9901_v36 = vadd.f32 %v9339_v50, %v4447_v51 }
 0x1d3   :  { %4737 = vst.msk [vmem:[#allocation2 + $0x1a8] sm:$0xff] %vm1288_vm4, %v4639_v27  ;;  %v1150_v56 = vadd.f32 %v9339_v50, %v1046_v15  ;;  %v9907_v31 = vadd.f32 %v9339_v50, %v4448_v25  ;;  %v1151_v8 = vadd.f32 %v9339_v50, %v1047_v24  ;;  %v4449_v59 = vmul.f32 %v9377_v44, %v9813_v48  ;;  %v7445_v49 = vpop.f32.mrf.mxu0  ;;  %v7651_v0 = vpop.f32.mrf.mxu1 }
 0x1d4   :  { %v2122_v40 = vcombine.high %v1608_v1, %v1608_v1  ;;  %v9918_v10 = vrot.slane %v1608_v1, %v8271_v16  ;;  %v1247_v37 = vmax.f32 %v1149_v19, 0.0  ;;  %v4642_v30 = vmax.f32 %v9888_v23, 0.0 }
 0x1d5   :  { %v1248_v50 = vmax.f32 %v1150_v56, 0.0  ;;  %v1249_v60 = vmax.f32 %v1151_v8, 0.0  ;;  %v1048_v46 = vmul.f32 %v9377_v44, %v9845_v35  ;;  %v4450_v55 = vmul.f32 %v9377_v44, %v9853_v53  ;;  %v9931_v38 = vpop.f32.mrf.mxu0  ;;  %v9944_v47 = vpop.f32.mrf.mxu1 }
 0x1d6   :  { %v2136_v48 = vrot.slane %v2122_v40, %v8271_v16  ;;  %v2137_v3 = vcombine.high %v9918_v10, %v9918_v10  ;;  %1346 = vst.msk [vmem:[#allocation2 + $0x1c8] sm:$0xff] %vm1288_vm4, %v1247_v37  ;;  %v4643_v5 = vmax.f32 %v9901_v36, 0.0  ;;  %v4644_v18 = vmax.f32 %v9907_v31, 0.0 }
 0x1d7   :  { %v1441_v12 = vld [vmem:[#allocation2 + $0x1b0] ss:$2 sm:$0xff]  ;;  %v1539_v2 = vld [vmem:[#allocation2 + $0x1b1] ss:$2 sm:$0xff]  ;;  %1347 = vst.msk [vmem:[#allocation2 + $0x1d0] sm:$0xff] %vm1288_vm4, %v1248_v50  ;;  %1348 = vst.msk [vmem:[#allocation2 + $0x1d8] sm:$0xff] %vm1288_vm4, %v1249_v60  ;;  %v4547_v35 = vadd.f32 %v9940_v26, %v4449_v59  ;;  %v1049_v53 = vmul.f32 %v9377_v44, %v834_v41  ;;  %v4451_v27 = vmul.f32 %v9377_v44, %v4242_v11  ;;  %v7446_v62 = vpop.f32.mrf.mxu0  ;;  %v7652_v23 = vpop.f32.mrf.mxu1 }
 0x1d8   :  { %v2138_v17 = vcombine.high %v2136_v48, %v2136_v48  ;;  %v2758_v52 = vmax.f32 %v9771_v54, %v2137_v3  ;;  %v1609_v13 = vmax.f32 %v1441_v12, %v1539_v2  ;;  %4738 = vst.msk [vmem:[#allocation2 + $0x1b0] sm:$0xff] %vm1288_vm4, %v4640_v39  ;;  %4739 = vst.msk [vmem:[#allocation2 + $0x1b8] sm:$0xff] %vm1288_vm4, %v4641_v28 }
 0x1d9   :  { %v2759_v34 = vmax.f32 %v2104_v9, %v2136_v48  ;;  %v1152_v41 = vadd.f32 %v9940_v26, %v1048_v46  ;;  %v9955_v58 = vadd.f32 %v9940_v26, %v4450_v55  ;;  %v1153_v20 = vadd.f32 %v9940_v26, %v1049_v53  ;;  %v9960_v25 = vpop.f32.mrf.mxu0  ;;  %v9963_v1 = vpop.f32.mrf.mxu1 }
 0x1da   :  { %v4808_v51 = vld [vmem:[#allocation2 + $0x1a0] ss:$2 sm:$0xff]  ;;  %v4857_v32 = vld [vmem:[#allocation2 + $0x1a1] ss:$2 sm:$0xff]  ;;  %v2760_v39 = vmax.f32 %v9807_v6, %v2138_v17  ;;  %v3109_v15 = vcombine.low %v9816_v4, %v2758_v52  ;;  %v2139_v11 = vcombine.high %v1609_v13, %v1609_v13  ;;  %v2146_v54 = vrot.slane %v1609_v13, %v8271_v16 }
 0x1db   :  { %v4906_v44 = vmax.f32 %v4808_v51, %v4857_v32  ;;  %v4645_v9 = vmax.f32 %v4547_v35, 0.0  ;;  %v1250_v24 = vmax.f32 %v1152_v41, 0.0  ;;  %v1251_v61 = vmax.f32 %v1153_v20, 0.0  ;;  %v7449_v4 = vpop.f32.mrf.mxu0  ;;  %v7655_v50 = vpop.f32.mrf.mxu1 }
 0x1dc   :  { %v3110_v28 = vcombine.low %v2759_v34, %v2760_v39  ;;  %v9969_v56 = vadd.f32 %v9940_v26, %v4451_v27  ;;  %v3117_v31 = vrot.slane %v3109_v15, %v8271_v16  ;;  %v2153_v8 = vrot.slane %v2139_v11, %v8271_v16 }
 0x1dd   :  { %v5420_v19 = vcombine.high %v4906_v44, %v4906_v44  ;;  %v9966_v36 = vrot.slane %v4906_v44, %v8271_v16  ;;  %v2154_v59 = vcombine.high %v2146_v54, %v2146_v54  ;;  %v1443_v40 = vld [vmem:[#allocation2 + $0x1c0] ss:$2 sm:$0xff]  ;;  %v1541_v37 = vld [vmem:[#allocation2 + $0x1c1] ss:$2 sm:$0xff]  ;;  %1349 = vst.msk [vmem:[#allocation2 + $0x1e0] sm:$0xff] %vm1288_vm4, %v1250_v24  ;;  %v4646_v49 = vmax.f32 %v9955_v58, 0.0  ;;  %v9982_v12 = vpop.f32.mrf.mxu0 }
 0x1de   :  { %1350 = vst.msk [vmem:[#allocation2 + $0x1e8] sm:$0xff] %vm1288_vm4, %v1251_v61  ;;  %v3124_v60 = vrot.slane %v3110_v28, %v8271_v16  ;;  %v1610_v3 = vmax.f32 %v1443_v40, %v1541_v37  ;;  %4740 = vst.msk [vmem:[#allocation2 + $0x1c0] sm:$0xff] %vm1288_vm4, %v4642_v30  ;;  %v1445_v46 = vld [vmem:[#allocation2 + $0x1d0] ss:$2 sm:$0xff]  ;;  %v1543_v55 = vld [vmem:[#allocation2 + $0x1d1] ss:$2 sm:$0xff]  ;;  %v2155_v2 = vcombine.high %v2153_v8, %v2153_v8  ;;  %v9993_v30 = vpop.f32.mrf.mxu1 }
 0x1df   :  { %v5434_v0 = vrot.slane %v5420_v19, %v8271_v16  ;;  %v5435_v48 = vcombine.high %v9966_v36, %v9966_v36  ;;  %4741 = vst.msk [vmem:[#allocation2 + $0x1c8] sm:$0xff] %vm1288_vm4, %v4643_v5  ;;  %v2761_v35 = vmax.f32 %v2120_v63, %v2146_v54  ;;  %v2762_v53 = vmax.f32 %v9833_v7, %v2154_v59  ;;  %v4809_v52 = vld [vmem:[#allocation2 + $0x1b0] ss:$2 sm:$0xff]  ;;  %v4858_v13 = vld [vmem:[#allocation2 + $0x1b1] ss:$2 sm:$0xff]  ;;  %v7450_v63 = vpop.f32.mrf.mxu0 }
 0x1e0   :  { %v2763_v17 = vmax.f32 %v2121_v57, %v2153_v8  ;;  %4742 = vst.msk [vmem:[#allocation2 + $0x1d0] sm:$0xff] %vm1288_vm4, %v4644_v18  ;;  %4743 = vst.msk [vmem:[#allocation2 + $0x1d8] sm:$0xff] %vm1288_vm4, %v4645_v9  ;;  %v3125_v5 = vcombine.low %v3117_v31, %v3124_v60  ;;  %v9996_v6 = vmax.f32 %v1445_v46, %v1543_v55  ;;  %v7656_v18 = vpop.f32.mrf.mxu1 }
 0x1e1   :  { %v5436_v27 = vcombine.high %v5434_v0, %v5434_v0  ;;  %v6056_v62 = vmax.f32 %v9825_v43, %v5435_v48  ;;  %v6057_v7 = vmax.f32 %v5402_v29, %v5434_v0  ;;  %v2764_v57 = vmax.f32 %v9918_v10, %v2155_v2  ;;  %v10004_v23 = vpop.f32.mrf.mxu0 }
 0x1e2   :  { %v3126_v34 = vcombine.low %v2761_v35, %v2762_v53  ;;  %v4907_v51 = vmax.f32 %v4809_v52, %v4858_v13  ;;  %v7163_v32 = vpack.c.bf16 %v3125_v5, %v3125_v5  ;;  %v2156_v20 = vcombine.high %v1610_v3, %v1610_v3  ;;  %v10008_v29 = vpop.f32.mrf.mxu1  ;;  %v10042_v13 = vld [vmem:[%s10982_s2] ss:$0 sm:$0xff] }
 0x1e3   :  { %v6058_v41 = vmax.f32 %v9874_v22, %v5436_v27  ;;  %v6407_v58 = vcombine.low %v9865_v33, %v6056_v62  ;;  %v3127_v39 = vcombine.low %v2763_v17, %v2764_v57  ;;  %v4647_v43 = vmax.f32 %v9969_v56, 0.0  ;;  %v7453_v61 = vpop.f32.mrf.mxu0 }
 0x1e4   :  { %v5437_v15 = vcombine.high %v4907_v51, %v4907_v51  ;;  %v5444_v44 = vrot.slane %v4907_v51, %v8271_v16  ;;  %v5419_v10 = vcombine.high %v9915_v45, %v9915_v45  ;;  %3460 = vst.msk [vmem:[%s10984_s4 + $0x30] sm:$0xf] %vm3447_vm5, %v7163_v32  ;;  %v3134_v11 = vrot.slane %v3126_v34, %v8271_v16  ;;  %v7659_v59 = vpop.f32.mrf.mxu1 }
 0x1e5   :  { %v6408_v33 = vcombine.low %v6057_v7, %v6058_v41  ;;  %v10018_v54 = vrot.slane %v1610_v3, %v8271_v16  ;;  %v1447_v9 = vld [vmem:[#allocation2 + $0x1e0] ss:$2 sm:$0xff]  ;;  %v1545_v24 = vld [vmem:[#allocation2 + $0x1e1] ss:$2 sm:$0xff]  ;;  %v6415_v28 = vrot.slane %v6407_v58, %v8271_v16  ;;  %v3141_v19 = vrot.slane %v3127_v39, %v8271_v16  ;;  %v10031_v0 = vpop.f32.mrf.mxu0 }
 0x1e6   :  { %v5451_v56 = vrot.slane %v5437_v15, %v8271_v16  ;;  %v5452_v4 = vcombine.high %v5444_v44, %v5444_v44  ;;  %v4810_v31 = vld [vmem:[#allocation2 + $0x1c0] ss:$2 sm:$0xff]  ;;  %v4859_v8 = vld [vmem:[#allocation2 + $0x1c1] ss:$2 sm:$0xff]  ;;  %4744 = vst.msk [vmem:[#allocation2 + $0x1e0] sm:$0xff] %vm1288_vm4, %v4646_v49  ;;  %4745 = vst.msk [vmem:[#allocation2 + $0x1e8] sm:$0xff] %vm1288_vm4, %v4647_v43  ;;  %v10027_v37 = vrot.slane %v2156_v20, %v8271_v16  ;;  %v10037_v55 = vpop.f32.mrf.mxu1 }
 0x1e7   :  { %v6422_v40 = vrot.slane %v6408_v33, %v8271_v16  ;;  %v4908_v50 = vmax.f32 %v4810_v31, %v4859_v8  ;;  %v2173_v60 = vcombine.high %v9996_v6, %v9996_v6  ;;  %v3142_v48 = vcombine.low %v3134_v11, %v3141_v19  ;;  %v4811_v17 = vld [vmem:[#allocation2 + $0x1d0] ss:$2 sm:$0xff]  ;;  %v4860_v52 = vld [vmem:[#allocation2 + $0x1d1] ss:$2 sm:$0xff]  ;;  %v7454_v27 = vpop.f32.mrf.mxu0 }
 0x1e8   :  { %v5453_v3 = vcombine.high %v5451_v56, %v5451_v56  ;;  %v6059_v49 = vmax.f32 %v5418_v21, %v5444_v44  ;;  %v6060_v46 = vmax.f32 %v9915_v45, %v5452_v4  ;;  %v6061_v35 = vmax.f32 %v5419_v10, %v5451_v56  ;;  %v7660_v63 = vpop.f32.mrf.mxu1 }
 0x1e9   :  { %v6423_v2 = vcombine.low %v6415_v28, %v6422_v40  ;;  %v5454_v53 = vcombine.high %v4908_v50, %v4908_v50  ;;  %v1050_v5 = vmul.f32 %v10042_v13, %v9903_v42  ;;  %v7164_v22 = vpack.c.bf16 %v3142_v48, %v3142_v48  ;;  %v10054_v51 = vpop.f32.mrf.mxu0 }
 0x1ea   :  { %v6062_v21 = vmax.f32 %v9966_v36, %v5453_v3  ;;  %v6424_v45 = vcombine.low %v6059_v49, %v6060_v46  ;;  %v10048_v62 = vrot.slane %v2173_v60, %v8271_v16  ;;  %v2171_v57 = vcombine.high %v10018_v54, %v10018_v54  ;;  %v10063_v41 = vpop.f32.mrf.mxu1 }
 0x1eb   :  { %v7188_v7 = vpack.c.bf16 %v6423_v2, %v6423_v2  ;;  %v2172_v34 = vcombine.high %v10027_v37, %v10027_v37  ;;  %3461 = vst.msk [vmem:[%s10984_s4 + $0x34] sm:$0xf] %vm3447_vm5, %v7164_v22  ;;  %v5461_v36 = vrot.slane %v4908_v50, %v8271_v16  ;;  %v4909_v32 = vmax.f32 %v4811_v17, %v4860_v52  ;;  %v7457_v10 = vpop.f32.mrf.mxu0 }
 0x1ec   :  { %v6425_v42 = vcombine.low %v6061_v35, %v6062_v21  ;;  %v2189_v18 = vcombine.high %v10048_v62, %v10048_v62  ;;  %v5468_v58 = vrot.slane %v5454_v53, %v8271_v16  ;;  %v10072_v20 = vrot.slane %v9996_v6, %v8271_v16  ;;  %v7663_v19 = vpop.f32.mrf.mxu1 }
 0x1ed   :  { %7138 = vst.msk [vmem:[%s10984_s4 + $0x94] sm:$0xf] %vm3447_vm5, %v7188_v7  ;;  %v1612_v39 = vmax.f32 %v1447_v9, %v1545_v24  ;;  %v4812_v15 = vld [vmem:[#allocation2 + $0x1e0] ss:$2 sm:$0xff]  ;;  %v4861_v44 = vld [vmem:[#allocation2 + $0x1e1] ss:$2 sm:$0xff]  ;;  %v1154_v43 = vadd.f32 %v9940_v26, %v1050_v5  ;;  %v6432_v33 = vrot.slane %v6424_v45, %v8271_v16  ;;  %v5471_v61 = vcombine.high %v4909_v32, %v4909_v32  ;;  %v10080_v9 = vpop.f32.mrf.mxu0 }
 0x1ee   :  { %v6439_v11 = vrot.slane %v6425_v42, %v8271_v16  ;;  %v4452_v28 = vmul.f32 %v10042_v13, %v9912_v14  ;;  %v4910_v6 = vmax.f32 %v4812_v15, %v4861_v44  ;;  %v5469_v8 = vcombine.high %v5461_v36, %v5461_v36  ;;  %v10086_v50 = vpop.f32.mrf.mxu1 }
 0x1ef   :  { %v2190_v56 = vcombine.high %v1612_v39, %v1612_v39  ;;  %v2197_v4 = vrot.slane %v1612_v39, %v8271_v16  ;;  %v1252_v31 = vmax.f32 %v1154_v43, 0.0  ;;  %v10083_v59 = vrot.slane %v5471_v61, %v8271_v16  ;;  %v7458_v49 = vpop.f32.mrf.mxu0 }
 0x1f0   :  { %v6440_v24 = vcombine.low %v6432_v33, %v6439_v11  ;;  %v2765_v40 = vmax.f32 %v10018_v54, %v2189_v18  ;;  %v5488_v3 = vcombine.high %v4910_v6, %v4910_v6  ;;  %v5470_v2 = vcombine.high %v5468_v58, %v5468_v58  ;;  %v7664_v17 = vpop.f32.mrf.mxu1 }
 0x1f1   :  { %v2204_v60 = vrot.slane %v2190_v56, %v8271_v16  ;;  %v2205_v14 = vcombine.high %v2197_v4, %v2197_v4  ;;  %v2766_v48 = vmax.f32 %v2171_v57, %v2197_v4  ;;  %1351 = vst.msk [vmem:[#allocation2 + $0x1f0] sm:$0xff] %vm1288_vm4, %v1252_v31  ;;  %v5487_v35 = vcombine.high %v10083_v59, %v10083_v59  ;;  %v10097_v22 = vpop.f32.mrf.mxu0 }
 0x1f2   :  { %v7189_v46 = vpack.c.bf16 %v6440_v24, %v6440_v24  ;;  %v5495_v53 = vrot.slane %v4910_v6, %v8271_v16  ;;  %v10095_v27 = vadd.f32 %v9940_v26, %v4452_v28  ;;  %v10104_v21 = vrot.slane %v5488_v3, %v8271_v16  ;;  %v10106_v57 = vpop.f32.mrf.mxu1 }
 0x1f3   :  { %v2767_v54 = vmax.f32 %v10027_v37, %v2205_v14  ;;  %v2768_v52 = vmax.f32 %v2172_v34, %v2204_v60  ;;  %v3143_v5 = vcombine.low %v2765_v40, %v2766_v48  ;;  %v6063_v63 = vmax.f32 %v5461_v36, %v5487_v35  ;;  %v7461_v39 = vpop.f32.mrf.mxu0 }
 0x1f4   :  { %7139 = vst.msk [vmem:[%s10984_s4 + $0x98] sm:$0xf] %vm3447_vm5, %v7189_v46  ;;  %v5503_v45 = vcombine.high %v5495_v53, %v5495_v53  ;;  %v6064_v7 = vmax.f32 %v5469_v8, %v5495_v53  ;;  %v2188_v37 = vcombine.high %v10072_v20, %v10072_v20  ;;  %v2206_v34 = vcombine.high %v2204_v60, %v2204_v60  ;;  %v7667_v33 = vpop.f32.mrf.mxu1 }
 0x1f5   :  { %v3144_v42 = vcombine.low %v2767_v54, %v2768_v52  ;;  %v1051_v18 = vmul.f32 %v10042_v13, %v9931_v38  ;;  %v3151_v15 = vrot.slane %v3143_v5, %v8271_v16  ;;  %v6066_v43 = vmax.f32 %v5470_v2, %v10104_v21  ;;  %v10120_v19 = vpop.f32.mrf.mxu0 }
 0x1f6   :  { %v6065_v44 = vmax.f32 %v5468_v58, %v5503_v45  ;;  %v6441_v10 = vcombine.low %v6063_v63, %v6064_v7  ;;  %v4453_v61 = vmul.f32 %v10042_v13, %v9944_v47  ;;  %v1052_v28 = vmul.f32 %v10042_v13, %v9960_v25  ;;  %v10128_v6 = vpop.f32.mrf.mxu1 }
 0x1f7   :  { %v3158_v36 = vrot.slane %v3144_v42, %v8271_v16  ;;  %v1155_v11 = vadd.f32 %v9940_v26, %v1051_v18  ;;  %v10123_v38 = vrot.slane %v4909_v32, %v8271_v16  ;;  %v4648_v56 = vmax.f32 %v10095_v27, 0.0  ;;  %v7462_v8 = vpop.f32.mrf.mxu0 }
 0x1f8   :  { %v6442_v58 = vcombine.low %v6065_v44, %v6066_v43  ;;  %v4454_v4 = vmul.f32 %v10042_v13, %v9963_v1  ;;  %v10131_v47 = vmax.f32 %v10072_v20, %v2206_v34  ;;  %v1156_v25 = vadd.f32 %v9940_v26, %v1052_v28  ;;  %v7668_v14 = vpop.f32.mrf.mxu1 }
 0x1f9   :  { %v3159_v31 = vcombine.low %v3151_v15, %v3158_v36  ;;  %v1253_v24 = vmax.f32 %v1155_v11, 0.0  ;;  %v6449_v40 = vrot.slane %v6441_v10, %v8271_v16  ;;  %v1053_v60 = vmul.f32 %v10042_v13, %v9982_v12  ;;  %v10144_v2 = vpop.f32.mrf.mxu0 }
 0x1fa   :  { %v6456_v32 = vrot.slane %v6442_v58, %v8271_v16  ;;  %v4455_v1 = vmul.f32 %v10042_v13, %v9993_v30  ;;  %v4551_v3 = vadd.f32 %v9940_v26, %v4453_v61  ;;  %v1254_v49 = vmax.f32 %v1156_v25, 0.0  ;;  %v10152_v17 = vpop.f32.mrf.mxu1 }
 0x1fb   :  { %v7165_v48 = vpack.c.bf16 %v3159_v31, %v3159_v31  ;;  %1352 = vst.msk [vmem:[#allocation2 + $0x1f8] sm:$0xff] %vm1288_vm4, %v1253_v24  ;;  %v1054_v46 = vmul.f32 %v10042_v13, %v10004_v23  ;;  %v5504_v35 = vcombine.high %v10104_v21, %v10104_v21  ;;  %v10149_v12 = vadd.f32 %v9940_v26, %v4454_v4  ;;  %v7465_v27 = vpop.f32.mrf.mxu0 }
 0x1fc   :  { %v6457_v53 = vcombine.low %v6449_v40, %v6456_v32  ;;  %v1157_v30 = vadd.f32 %v9940_v26, %v1053_v60  ;;  %1353 = vst.msk [vmem:[#allocation2 + $0x200] sm:$0xff] %vm1288_vm4, %v1254_v49  ;;  %v10160_v23 = vadd.f32 %v9940_v26, %v4455_v1  ;;  %v4456_v52 = vmul.f32 %v10042_v13, %v10008_v29  ;;  %v7671_v42 = vpop.f32.mrf.mxu1 }
 0x1fd   :  { %3462 = vst.msk [vmem:[%s10984_s4 + $0x38] sm:$0xf] %vm3447_vm5, %v7165_v48  ;;  %v1158_v54 = vadd.f32 %v9940_v26, %v1054_v46  ;;  %v1055_v5 = vmul.f32 %v10042_v13, %v10031_v0  ;;  %v4457_v7 = vmul.f32 %v10042_v13, %v10037_v55  ;;  %v1056_v34 = vmul.f32 %v10042_v13, %v10054_v51  ;;  %v10175_v44 = vpop.f32.mrf.mxu0 }
 0x1fe   :  { %v7190_v45 = vpack.c.bf16 %v6457_v53, %v6457_v53  ;;  %v1255_v63 = vmax.f32 %v1157_v30, 0.0  ;;  %v4649_v18 = vmax.f32 %v4551_v3, 0.0  ;;  %v10172_v15 = vadd.f32 %v9940_v26, %v4456_v52  ;;  %v10189_v10 = vpop.f32.mrf.mxu1 }
 0x1ff   :  { %v1256_v39 = vmax.f32 %v1158_v54, 0.0  ;;  %v1159_v29 = vadd.f32 %v9940_v26, %v1055_v5  ;;  %v1160_v0 = vadd.f32 %v9940_v26, %v1056_v34  ;;  %v4458_v55 = vmul.f32 %v10042_v13, %v10063_v41  ;;  %v7466_v28 = vpop.f32.mrf.mxu0 }
 0x200   :  { %7140 = vst.msk [vmem:[%s10984_s4 + $0x9c] sm:$0xf] %vm3447_vm5, %v7190_v45  ;;  %v1057_v51 = vmul.f32 %v10042_v13, %v10080_v9  ;;  %v4459_v43 = vmul.f32 %v10042_v13, %v10086_v50  ;;  %v4650_v33 = vmax.f32 %v10149_v12, 0.0  ;;  %v4651_v36 = vmax.f32 %v10160_v23, 0.0  ;;  %v7672_v24 = vpop.f32.mrf.mxu1 }
 0x201   :  { %1354 = vst.msk [vmem:[#allocation2 + $0x208] sm:$0xff] %vm1288_vm4, %v1255_v63  ;;  %1355 = vst.msk [vmem:[#allocation2 + $0x210] sm:$0xff] %vm1288_vm4, %v1256_v39  ;;  %v1257_v11 = vmax.f32 %v1159_v29, 0.0  ;;  %v1058_v61 = vmul.f32 %v10042_v13, %v10097_v22  ;;  %v10197_v9 = vadd.f32 %v9940_v26, %v4457_v7  ;;  %v1258_v4 = vmax.f32 %v1160_v0, 0.0  ;;  %v10211_v32 = vpop.f32.mrf.mxu0 }
 0x202   :  { %v1449_v41 = vld [vmem:[#allocation2 + $0x1f0] ss:$2 sm:$0xff]  ;;  %v1547_v58 = vld [vmem:[#allocation2 + $0x1f1] ss:$2 sm:$0xff]  ;;  %v10200_v50 = vadd.f32 %v9940_v26, %v4458_v55  ;;  %v1161_v31 = vadd.f32 %v9940_v26, %v1057_v51  ;;  %v4460_v8 = vmul.f32 %v10042_v13, %v10106_v57  ;;  %v1059_v40 = vmul.f32 %v10042_v13, %v10120_v19  ;;  %v10220_v48 = vpop.f32.mrf.mxu1 }
 0x203   :  { %v1613_v25 = vmax.f32 %v1449_v41, %v1547_v58  ;;  %4746 = vst.msk [vmem:[#allocation2 + $0x1f0] sm:$0xff] %vm1288_vm4, %v4648_v56  ;;  %4747 = vst.msk [vmem:[#allocation2 + $0x1f8] sm:$0xff] %vm1288_vm4, %v4649_v18  ;;  %v1162_v22 = vadd.f32 %v9940_v26, %v1058_v61  ;;  %v4652_v60 = vmax.f32 %v10172_v15, 0.0  ;;  %v10216_v56 = vadd.f32 %v9940_v26, %v4459_v43  ;;  %v7469_v46 = vpop.f32.mrf.mxu0 }
 0x204   :  { %1356 = vst.msk [vmem:[#allocation2 + $0x218] sm:$0xff] %vm1288_vm4, %v1257_v11  ;;  %1357 = vst.msk [vmem:[#allocation2 + $0x220] sm:$0xff] %vm1288_vm4, %v1258_v4  ;;  %v1259_v1 = vmax.f32 %v1161_v31, 0.0  ;;  %v4461_v14 = vmul.f32 %v10042_v13, %v10128_v6  ;;  %v10224_v19 = vadd.f32 %v9940_v26, %v4460_v8  ;;  %v4653_v53 = vmax.f32 %v10197_v9, 0.0  ;;  %v7675_v23 = vpop.f32.mrf.mxu1 }
 0x205   :  { %v2207_v3 = vcombine.high %v1613_v25, %v1613_v25  ;;  %v2214_v57 = vrot.slane %v1613_v25, %v8271_v16  ;;  %v1260_v49 = vmax.f32 %v1162_v22, 0.0  ;;  %v1163_v12 = vadd.f32 %v9940_v26, %v1059_v40  ;;  %v10242_v7 = vpop.f32.mrf.mxu0 }
 0x206   :  { %1358 = vst.msk [vmem:[#allocation2 + $0x228] sm:$0xff] %vm1288_vm4, %v1259_v1  ;;  %v10230_v30 = vadd.f32 %v9940_v26, %v4461_v14  ;;  %v1060_v6 = vmul.f32 %v10042_v13, %v10144_v2  ;;  %v4654_v63 = vmax.f32 %v10200_v50, 0.0  ;;  %v4462_v20 = vmul.f32 %v10042_v13, %v10152_v17 }
 0x207   :  { %v10235_v54 = vrot.slane %v2207_v3, %v8271_v16  ;;  %v2222_v52 = vcombine.high %v2214_v57, %v2214_v57  ;;  %v2770_v5 = vmax.f32 %v2188_v37, %v2214_v57  ;;  %1359 = vst.msk [vmem:[#allocation2 + $0x230] sm:$0xff] %vm1288_vm4, %v1260_v49  ;;  %v1261_v2 = vmax.f32 %v1163_v12, 0.0  ;;  %v10249_v37 = vpop.f32.mrf.mxu1  ;;  %v7470_v0 = vpop.f32.mrf.mxu0 }
 0x208   :  { %v1451_v27 = vld [vmem:[#allocation2 + $0x200] ss:$2 sm:$0xff]  ;;  %v1549_v45 = vld [vmem:[#allocation2 + $0x201] ss:$2 sm:$0xff]  ;;  %v1164_v42 = vadd.f32 %v9940_v26, %v1060_v6  ;;  %v4655_v39 = vmax.f32 %v10216_v56, 0.0  ;;  %v4656_v15 = vmax.f32 %v10224_v19, 0.0  ;;  %v5486_v55 = vcombine.high %v10123_v38, %v10123_v38 }
 0x209   :  { %v1614_v34 = vmax.f32 %v1451_v27, %v1549_v45  ;;  %4748 = vst.msk [vmem:[#allocation2 + $0x200] sm:$0xff] %vm1288_vm4, %v4650_v33  ;;  %4749 = vst.msk [vmem:[#allocation2 + $0x208] sm:$0xff] %vm1288_vm4, %v4651_v36  ;;  %v3160_v18 = vcombine.low %v10131_v47, %v2770_v5  ;;  %v4657_v29 = vmax.f32 %v10230_v30, 0.0  ;;  %v10261_v17 = vmax.f32 %v10123_v38, %v5504_v35  ;;  %v7676_v11 = vpop.f32.mrf.mxu1  ;;  %v10271_v9 = vpop.f32.mrf.mxu0 }
 0x20a   :  { %v4813_v51 = vld [vmem:[#allocation2 + $0x1f0] ss:$2 sm:$0xff]  ;;  %v4862_v43 = vld [vmem:[#allocation2 + $0x1f1] ss:$2 sm:$0xff]  ;;  %1360 = vst.msk [vmem:[#allocation2 + $0x238] sm:$0xff] %vm1288_vm4, %v1261_v2  ;;  %v1061_v36 = vmul.f32 %v10042_v13, %v10175_v44  ;;  %v2223_v61 = vcombine.high %v10235_v54, %v10235_v54  ;;  %v10269_v28 = vmax.f32 %v10048_v62, %v2222_v52  ;;  %v1262_v21 = vmax.f32 %v1164_v42, 0.0 }
 0x20b   :  { %v2224_v33 = vcombine.high %v1614_v34, %v1614_v34  ;;  %v1453_v47 = vld [vmem:[#allocation2 + $0x210] ss:$2 sm:$0xff]  ;;  %v4911_v41 = vmax.f32 %v4813_v51, %v4862_v43  ;;  %v1551_v58 = vld [vmem:[#allocation2 + $0x211] ss:$2 sm:$0xff]  ;;  %v10274_v38 = vrot.slane %v1614_v34, %v8271_v16  ;;  %v10279_v44 = vadd.f32 %v9940_v26, %v4462_v20  ;;  %v10282_v62 = vpop.f32.mrf.mxu1  ;;  %v7473_v40 = vpop.f32.mrf.mxu0 }
 0x20c   :  { %v1615_v35 = vmax.f32 %v1453_v47, %v1551_v58  ;;  %4750 = vst.msk [vmem:[#allocation2 + $0x210] sm:$0xff] %vm1288_vm4, %v4652_v60  ;;  %4751 = vst.msk [vmem:[#allocation2 + $0x218] sm:$0xff] %vm1288_vm4, %v4653_v53  ;;  %v1165_v4 = vadd.f32 %v9940_v26, %v1061_v36  ;;  %v10285_v50 = vrot.slane %v3160_v18, %v8271_v16 }
 0x20d   :  { %v5505_v31 = vcombine.high %v4911_v41, %v4911_v41  ;;  %v5512_v24 = vrot.slane %v4911_v41, %v8271_v16  ;;  %v1455_v25 = vld [vmem:[#allocation2 + $0x220] ss:$2 sm:$0xff]  ;;  %v1553_v22 = vld [vmem:[#allocation2 + $0x221] ss:$2 sm:$0xff]  ;;  %1361 = vst.msk [vmem:[#allocation2 + $0x240] sm:$0xff] %vm1288_vm4, %v1262_v21  ;;  %v4463_v8 = vmul.f32 %v10042_v13, %v10189_v10  ;;  %v10292_v60 = vrot.slane %v2224_v33, %v8271_v16  ;;  %v7679_v3 = vpop.f32.mrf.mxu1  ;;  %v10300_v6 = vpop.f32.mrf.mxu0 }
 0x20e   :  { %v2241_v1 = vcombine.high %v1615_v35, %v1615_v35  ;;  %v2248_v56 = vrot.slane %v1615_v35, %v8271_v16  ;;  %v1616_v14 = vmax.f32 %v1455_v25, %v1553_v22  ;;  %4752 = vst.msk [vmem:[#allocation2 + $0x220] sm:$0xff] %vm1288_vm4, %v4654_v63  ;;  %4753 = vst.msk [vmem:[#allocation2 + $0x228] sm:$0xff] %vm1288_vm4, %v4655_v39  ;;  %v1263_v12 = vmax.f32 %v1165_v4, 0.0 }
 0x20f   :  { %v10298_v57 = vrot.slane %v5505_v31, %v8271_v16  ;;  %v5520_v49 = vcombine.high %v5512_v24, %v5512_v24  ;;  %v6068_v46 = vmax.f32 %v5486_v55, %v5512_v24  ;;  %v10303_v45 = vpop.f32.mrf.mxu1  ;;  %v2239_v63 = vcombine.high %v10274_v38, %v10274_v38  ;;  %v7474_v39 = vpop.f32.mrf.mxu0 }
 0x210   :  { %v4814_v53 = vld [vmem:[#allocation2 + $0x200] ss:$2 sm:$0xff]  ;;  %v4863_v10 = vld [vmem:[#allocation2 + $0x201] ss:$2 sm:$0xff]  ;;  %v2255_v52 = vrot.slane %v2241_v1, %v8271_v16  ;;  %v2256_v5 = vcombine.high %v2248_v56, %v2248_v56  ;;  %v2258_v27 = vcombine.high %v1616_v14, %v1616_v14  ;;  %v2265_v34 = vrot.slane %v1616_v14, %v8271_v16  ;;  %1362 = vst.msk [vmem:[#allocation2 + $0x248] sm:$0xff] %vm1288_vm4, %v1263_v12 }
 0x211   :  { %v4912_v23 = vmax.f32 %v4814_v53, %v4863_v10  ;;  %v1457_v2 = vld [vmem:[#allocation2 + $0x230] ss:$2 sm:$0xff]  ;;  %v1555_v42 = vld [vmem:[#allocation2 + $0x231] ss:$2 sm:$0xff]  ;;  %v4658_v20 = vmax.f32 %v10279_v44, 0.0  ;;  %v10311_v18 = vadd.f32 %v9940_v26, %v4463_v8  ;;  %v6458_v0 = vcombine.low %v10261_v17, %v6068_v46  ;;  %v7680_v33 = vpop.f32.mrf.mxu1  ;;  %v10326_v21 = vpop.f32.mrf.mxu0 }
 0x212   :  { %v2240_v55 = vcombine.high %v10292_v60, %v10292_v60  ;;  %v2257_v51 = vcombine.high %v2255_v52, %v2255_v52  ;;  %v2772_v43 = vmax.f32 %v10235_v54, %v2256_v5  ;;  %4754 = vst.msk [vmem:[#allocation2 + $0x230] sm:$0xff] %vm1288_vm4, %v4656_v15  ;;  %4755 = vst.msk [vmem:[#allocation2 + $0x238] sm:$0xff] %vm1288_vm4, %v4657_v29 }
 0x213   :  { %v5521_v47 = vcombine.high %v10298_v57, %v10298_v57  ;;  %v5522_v36 = vcombine.high %v4912_v23, %v4912_v23  ;;  %v4815_v17 = vld [vmem:[#allocation2 + $0x210] ss:$2 sm:$0xff]  ;;  %v4864_v11 = vld [vmem:[#allocation2 + $0x211] ss:$2 sm:$0xff]  ;;  %v2272_v41 = vrot.slane %v2258_v27, %v8271_v16  ;;  %v2273_v58 = vcombine.high %v2265_v34, %v2265_v34  ;;  %v10336_v35 = vpop.f32.mrf.mxu1  ;;  %v7477_v8 = vpop.f32.mrf.mxu0 }
 0x214   :  { %v10329_v19 = vmax.f32 %v10083_v59, %v5520_v49  ;;  %v2773_v30 = vmax.f32 %v2223_v61, %v2255_v52  ;;  %v2774_v15 = vmax.f32 %v10274_v38, %v2257_v51  ;;  %v3161_v29 = vcombine.low %v10269_v28, %v2772_v43 }
 0x215   :  { %v4913_v44 = vmax.f32 %v4815_v17, %v4864_v11  ;;  %v2274_v4 = vcombine.high %v2272_v41, %v2272_v41  ;;  %v2775_v31 = vmax.f32 %v2239_v63, %v2265_v34  ;;  %v2776_v24 = vmax.f32 %v10292_v60, %v2273_v58  ;;  %v4816_v25 = vld [vmem:[#allocation2 + $0x220] ss:$2 sm:$0xff]  ;;  %v4865_v22 = vld [vmem:[#allocation2 + $0x221] ss:$2 sm:$0xff]  ;;  %v7683_v38 = vpop.f32.mrf.mxu1  ;;  %v10344_v49 = vpop.f32.mrf.mxu0 }
 0x216   :  { %v6466_v59 = vrot.slane %v6458_v0, %v8271_v16  ;;  %v5529_v40 = vrot.slane %v4912_v23, %v8271_v16  ;;  %v3175_v54 = vrot.slane %v3161_v29, %v8271_v16  ;;  %v3177_v61 = vcombine.low %v2773_v30, %v2774_v15 }
 0x217   :  { %v5536_v28 = vrot.slane %v5522_v36, %v8271_v16  ;;  %v5539_v1 = vcombine.high %v4913_v44, %v4913_v44  ;;  %v5546_v14 = vrot.slane %v4913_v44, %v8271_v16  ;;  %v3178_v3 = vcombine.low %v2775_v31, %v2776_v24  ;;  %v1459_v12 = vld [vmem:[#allocation2 + $0x240] ss:$2 sm:$0xff]  ;;  %v1557_v52 = vld [vmem:[#allocation2 + $0x241] ss:$2 sm:$0xff]  ;;  %v10347_v23 = vpop.f32.mrf.mxu1  ;;  %v7478_v39 = vpop.f32.mrf.mxu0 }
 0x218   :  { %v3176_v60 = vcombine.low %v10285_v50, %v3175_v54  ;;  %v2778_v46 = vmax.f32 %v2248_v56, %v2274_v4  ;;  %v4914_v53 = vmax.f32 %v4816_v25, %v4865_v22  ;;  %v1617_v10 = vmax.f32 %v1457_v2, %v1555_v42  ;;  %4756 = vst.msk [vmem:[#allocation2 + $0x240] sm:$0xff] %vm1288_vm4, %v4658_v20 }
 0x219   :  { %v3185_v5 = vrot.slane %v3177_v61, %v8271_v16  ;;  %v5553_v27 = vrot.slane %v5539_v1, %v8271_v16  ;;  %v5554_v63 = vcombine.high %v5546_v14, %v5546_v14  ;;  %v3192_v34 = vrot.slane %v3178_v3, %v8271_v16  ;;  %v7684_v2 = vpop.f32.mrf.mxu1  ;;  %v10355_v17 = vpop.f32.mrf.mxu0  ;;  %v4817_v58 = vld [vmem:[#allocation2 + $0x230] ss:$2 sm:$0xff]  ;;  %v4866_v30 = vld [vmem:[#allocation2 + $0x231] ss:$2 sm:$0xff] }
 0x21a   :  { %v7166_v0 = vpack.c.bf16 %v3176_v60, %v3176_v60  ;;  %v2777_v51 = vmax.f32 %v2240_v55, %v2272_v41  ;;  %v5556_v50 = vcombine.high %v4914_v53, %v4914_v53  ;;  %v5563_v56 = vrot.slane %v4914_v53, %v8271_v16 }
 0x21b   :  { %v5537_v42 = vcombine.high %v5529_v40, %v5529_v40  ;;  %v5555_v43 = vcombine.high %v5553_v27, %v5553_v27  ;;  %v6070_v33 = vmax.f32 %v10298_v57, %v5554_v63  ;;  %v3193_v36 = vcombine.low %v3185_v5, %v3192_v34  ;;  %v10362_v15 = vpop.f32.mrf.mxu1  ;;  %v7481_v31 = vpop.f32.mrf.mxu0 }
 0x21c   :  { %3463 = vst.msk [vmem:[%s10984_s4 + $0x3c] sm:$0xf] %vm3447_vm5, %v7166_v0  ;;  %v3194_v20 = vcombine.low %v2777_v51, %v2778_v46  ;;  %v5570_v11 = vrot.slane %v5556_v50, %v8271_v16  ;;  %v5571_v55 = vcombine.high %v5563_v56, %v5563_v56  ;;  %v2275_v41 = vcombine.high %v1617_v10, %v1617_v10 }
 0x21d   :  { %v6071_v29 = vmax.f32 %v5521_v47, %v5553_v27  ;;  %v6072_v44 = vmax.f32 %v5529_v40, %v5555_v43  ;;  %v6459_v57 = vcombine.low %v10329_v19, %v6070_v33  ;;  %v7167_v4 = vpack.c.bf16 %v3193_v36, %v3193_v36  ;;  %v7687_v54 = vpop.f32.mrf.mxu1  ;;  %v10373_v19 = vpop.f32.mrf.mxu0 }
 0x21e   :  { %v5538_v24 = vcombine.high %v5536_v28, %v5536_v28  ;;  %v5572_v25 = vcombine.high %v5570_v11, %v5570_v11  ;;  %v6073_v22 = vmax.f32 %v5537_v42, %v5563_v56  ;;  %v6074_v8 = vmax.f32 %v5536_v28, %v5571_v55 }
 0x21f   :  { %v6473_v61 = vrot.slane %v6459_v57, %v8271_v16  ;;  %v6475_v38 = vcombine.low %v6071_v29, %v6072_v44  ;;  %3464 = vst.msk [vmem:[%s10984_s4 + $0x40] sm:$0xf] %vm3447_vm5, %v7167_v4  ;;  %v10371_v47 = vrot.slane %v1617_v10, %v8271_v16  ;;  %v4915_v40 = vmax.f32 %v4817_v58, %v4866_v30  ;;  %v10378_v46 = vpop.f32.mrf.mxu1  ;;  %v7482_v63 = vpop.f32.mrf.mxu0 }
 0x220   :  { %v6076_v1 = vmax.f32 %v5546_v14, %v5572_v25  ;;  %v6476_v3 = vcombine.low %v6073_v22, %v6074_v8  ;;  %v10376_v60 = vrot.slane %v2275_v41, %v8271_v16  ;;  %v1618_v28 = vmax.f32 %v1459_v12, %v1557_v52 }
 0x221   :  { %v6474_v53 = vcombine.low %v6466_v59, %v6473_v61  ;;  %v10381_v5 = vrot.slane %v3194_v20, %v8271_v16  ;;  %v6075_v27 = vmax.f32 %v5538_v24, %v5570_v11  ;;  %v1062_v10 = vmul.f32 %v10042_v13, %v10211_v32  ;;  %v7688_v51 = vpop.f32.mrf.mxu1  ;;  %v10393_v56 = vpop.f32.mrf.mxu0 }
 0x222   :  { %v6483_v34 = vrot.slane %v6475_v38, %v8271_v16  ;;  %v6490_v14 = vrot.slane %v6476_v3, %v8271_v16  ;;  %v5573_v39 = vcombine.high %v4915_v40, %v4915_v40  ;;  %v2292_v0 = vcombine.high %v1618_v28, %v1618_v28 }
 0x223   :  { %v7191_v50 = vpack.c.bf16 %v6474_v53, %v6474_v53  ;;  %v2290_v12 = vcombine.high %v10371_v47, %v10371_v47  ;;  %v10390_v59 = vrot.slane %v4915_v40, %v8271_v16  ;;  %v4659_v52 = vmax.f32 %v10311_v18, 0.0  ;;  %v10400_v33 = vpop.f32.mrf.mxu1  ;;  %v7485_v55 = vpop.f32.mrf.mxu0 }
 0x224   :  { %v6491_v32 = vcombine.low %v6483_v34, %v6490_v14  ;;  %v6492_v2 = vcombine.low %v6075_v27, %v6076_v1  ;;  %v2291_v42 = vcombine.high %v10376_v60, %v10376_v60  ;;  %v10398_v43 = vrot.slane %v1618_v28, %v8271_v16 }
 0x225   :  { %7141 = vst.msk [vmem:[%s10984_s4 + $0xa0] sm:$0xf] %vm3447_vm5, %v7191_v50  ;;  %v10407_v36 = vrot.slane %v2292_v0, %v8271_v16  ;;  %v1166_v18 = vadd.f32 %v9940_v26, %v1062_v10  ;;  %v4464_v20 = vmul.f32 %v10042_v13, %v10220_v48  ;;  %v1063_v11 = vmul.f32 %v10042_v13, %v10242_v7  ;;  %v7691_v44 = vpop.f32.mrf.mxu1  ;;  %v10427_v31 = vpop.f32.mrf.mxu0 }
 0x226   :  { %4757 = vst.msk [vmem:[#allocation2 + $0x248] sm:$0xff] %vm1288_vm4, %v4659_v52  ;;  %v7192_v41 = vpack.c.bf16 %v6491_v32, %v6491_v32  ;;  %v10416_v58 = vrot.slane %v5573_v39, %v8271_v16  ;;  %v4465_v30 = vmul.f32 %v10042_v13, %v10249_v37  ;;  %v1064_v29 = vmul.f32 %v10042_v13, %v10271_v9  ;;  %v10479_v32 = vld [vmem:[%s10983_s3] ss:$0 sm:$0xff] }
 0x227   :  { %v5588_v57 = vcombine.high %v10390_v59, %v10390_v59  ;;  %v1264_v4 = vmax.f32 %v1166_v18, 0.0  ;;  %v1167_v48 = vadd.f32 %v9940_v26, %v1063_v11  ;;  %v4466_v7 = vmul.f32 %v10042_v13, %v10282_v62  ;;  %v10441_v22 = vpop.f32.mrf.mxu1  ;;  %v7486_v38 = vpop.f32.mrf.mxu0 }
 0x228   :  { %v10430_v24 = vrot.slane %v6492_v2, %v8271_v16  ;;  %7142 = vst.msk [vmem:[%s10984_s4 + $0xa4] sm:$0xf] %vm3447_vm5, %v7192_v41  ;;  %v2307_v37 = vcombine.high %v10398_v43, %v10398_v43  ;;  %v1168_v9 = vadd.f32 %v9940_v26, %v1064_v29  ;;  %v1065_v25 = vmul.f32 %v10042_v13, %v10300_v6 }
 0x229   :  { %v2308_v62 = vcombine.high %v10407_v36, %v10407_v36  ;;  %1363 = vst.msk [vmem:[#allocation2 + $0x250] sm:$0xff] %vm1288_vm4, %v1264_v4  ;;  %v4562_v8 = vadd.f32 %v9940_v26, %v4464_v20  ;;  %v1265_v54 = vmax.f32 %v1167_v48, 0.0  ;;  %v4563_v61 = vadd.f32 %v9940_v26, %v4465_v30  ;;  %v7692_v28 = vpop.f32.mrf.mxu1  ;;  %v10463_v34 = vpop.f32.mrf.mxu0 }
 0x22a   :  { %v1266_v40 = vmax.f32 %v1168_v9, 0.0  ;;  %v1169_v1 = vadd.f32 %v9940_v26, %v1065_v25  ;;  %v4467_v3 = vmul.f32 %v10042_v13, %v10303_v45  ;;  %v1066_v6 = vmul.f32 %v10042_v13, %v10326_v21 }
 0x22b   :  { %v5589_v53 = vcombine.high %v10416_v58, %v10416_v58  ;;  %1364 = vst.msk [vmem:[#allocation2 + $0x258] sm:$0xff] %vm1288_vm4, %v1265_v54  ;;  %v10457_v27 = vadd.f32 %v9940_v26, %v4466_v7  ;;  %v4468_v10 = vmul.f32 %v10042_v13, %v10336_v35  ;;  %v1067_v63 = vmul.f32 %v10042_v13, %v10344_v49  ;;  %v10471_v50 = vpop.f32.mrf.mxu1  ;;  %v7489_v2 = vpop.f32.mrf.mxu0 }
 0x22c   :  { %1365 = vst.msk [vmem:[#allocation2 + $0x260] sm:$0xff] %vm1288_vm4, %v1266_v40  ;;  %v1267_v21 = vmax.f32 %v1169_v1, 0.0  ;;  %v1170_v39 = vadd.f32 %v9940_v26, %v1066_v6  ;;  %v4469_v0 = vmul.f32 %v10042_v13, %v10347_v23  ;;  %v1068_v51 = vmul.f32 %v10042_v13, %v10355_v17 }
 0x22d   :  { %v4818_v45 = vld [vmem:[#allocation2 + $0x240] ss:$2 sm:$0xff]  ;;  %v4867_v14 = vld [vmem:[#allocation2 + $0x241] ss:$2 sm:$0xff]  ;;  %v4660_v52 = vmax.f32 %v4562_v8, 0.0  ;;  %v10474_v49 = vmax.f32 %v10371_v47, %v2308_v62  ;;  %v1171_v26 = vadd.f32 %v10479_v32, %v1067_v63  ;;  %v4661_v18 = vmax.f32 %v4563_v61, 0.0  ;;  %v7695_v11 = vpop.f32.mrf.mxu1  ;;  %v10491_v44 = vpop.f32.mrf.mxu0 }
 0x22e   :  { %v4916_v35 = vmax.f32 %v4818_v45, %v4867_v14  ;;  %1366 = vst.msk [vmem:[#allocation2 + $0x268] sm:$0xff] %vm1288_vm4, %v1267_v21  ;;  %v4565_v23 = vadd.f32 %v10479_v32, %v4467_v3  ;;  %v1268_v17 = vmax.f32 %v1170_v39, 0.0  ;;  %v1172_v20 = vadd.f32 %v10479_v32, %v1068_v51 }
 0x22f   :  { %v10486_v41 = vadd.f32 %v10479_v32, %v4468_v10  ;;  %v1269_v30 = vmax.f32 %v1171_v26, 0.0  ;;  %v10489_v29 = vadd.f32 %v10479_v32, %v4469_v0  ;;  %v4662_v4 = vmax.f32 %v10457_v27, 0.0  ;;  %v10499_v25 = vpop.f32.mrf.mxu1 }
 0x230   :  { %v5590_v55 = vcombine.high %v4916_v35, %v4916_v35  ;;  %1367 = vst.msk [vmem:[#allocation2 + $0x270] sm:$0xff] %vm1288_vm4, %v1268_v17  ;;  %v1270_v48 = vmax.f32 %v1172_v20, 0.0  ;;  %v4470_v7 = vmul.f32 %v10042_v13, %v10362_v15  ;;  %v1069_v9 = vmul.f32 %v10042_v13, %v10373_v19  ;;  %v7490_v15 = vpop.f32.mrf.mxu0 }
 0x231   :  { %v10502_v62 = vrot.slane %v4916_v35, %v8271_v16  ;;  %1368 = vst.msk [vmem:[#allocation2 + $0x278] sm:$0xff] %vm1288_vm4, %v1269_v30  ;;  %v4471_v54 = vmul.f32 %v10042_v13, %v10378_v46  ;;  %v1070_v61 = vmul.f32 %v10042_v13, %v10393_v56  ;;  %v4663_v19 = vmax.f32 %v4565_v23, 0.0  ;;  %v7696_v28 = vpop.f32.mrf.mxu1 }
 0x232   :  { %v10505_v8 = vrot.slane %v5590_v55, %v8271_v16  ;;  %v1461_v38 = vld [vmem:[#allocation2 + $0x250] ss:$2 sm:$0xff]  ;;  %v1559_v40 = vld [vmem:[#allocation2 + $0x251] ss:$2 sm:$0xff]  ;;  %1369 = vst.msk [vmem:[#allocation2 + $0x280] sm:$0xff] %vm1288_vm4, %v1270_v48  ;;  %v1173_v1 = vadd.f32 %v10479_v32, %v1069_v9  ;;  %v4472_v3 = vmul.f32 %v10042_v13, %v10400_v33  ;;  %v1071_v6 = vmul.f32 %v10042_v13, %v10427_v31  ;;  %v10523_v63 = vpop.f32.mrf.mxu0 }
 0x233   :  { %v1619_v27 = vmax.f32 %v1461_v38, %v1559_v40  ;;  %4758 = vst.msk [vmem:[#allocation2 + $0x250] sm:$0xff] %vm1288_vm4, %v4660_v52  ;;  %4759 = vst.msk [vmem:[#allocation2 + $0x258] sm:$0xff] %vm1288_vm4, %v4661_v18  ;;  %v4664_v46 = vmax.f32 %v10486_v41, 0.0  ;;  %v4665_v56 = vmax.f32 %v10489_v29, 0.0  ;;  %v1174_v10 = vadd.f32 %v10479_v32, %v1070_v61  ;;  %v10531_v21 = vpop.f32.mrf.mxu1 }
 0x234   :  { %v5606_v33 = vcombine.high %v10505_v8, %v10505_v8  ;;  %v10528_v45 = vadd.f32 %v10479_v32, %v4470_v7  ;;  %v1271_v31 = vmax.f32 %v1173_v1, 0.0  ;;  %v1175_v14 = vadd.f32 %v10479_v32, %v1071_v6  ;;  %v7493_v2 = vpop.f32.mrf.mxu0 }
 0x235   :  { %v5605_v39 = vcombine.high %v10502_v62, %v10502_v62  ;;  %v2309_v0 = vcombine.high %v1619_v27, %v1619_v27  ;;  %v2316_v51 = vrot.slane %v1619_v27, %v8271_v16  ;;  %v1463_v35 = vld [vmem:[#allocation2 + $0x260] ss:$2 sm:$0xff]  ;;  %v1561_v52 = vld [vmem:[#allocation2 + $0x261] ss:$2 sm:$0xff]  ;;  %v10537_v26 = vadd.f32 %v10479_v32, %v4471_v54  ;;  %v7699_v11 = vpop.f32.mrf.mxu1 }
 0x236   :  { %v1620_v18 = vmax.f32 %v1463_v35, %v1561_v52  ;;  %4760 = vst.msk [vmem:[#allocation2 + $0x260] sm:$0xff] %vm1288_vm4, %v4662_v4  ;;  %4761 = vst.msk [vmem:[#allocation2 + $0x268] sm:$0xff] %vm1288_vm4, %v4663_v19  ;;  %v1272_v23 = vmax.f32 %v1174_v10, 0.0  ;;  %v10543_v17 = vadd.f32 %v10479_v32, %v4472_v3  ;;  %v1273_v20 = vmax.f32 %v1175_v14, 0.0  ;;  %v10551_v4 = vpop.f32.mrf.mxu0 }
 0x237   :  { %1370 = vst.msk [vmem:[#allocation2 + $0x288] sm:$0xff] %vm1288_vm4, %v1271_v31  ;;  %v2323_v55 = vrot.slane %v2309_v0, %v8271_v16  ;;  %v2324_v41 = vcombine.high %v2316_v51, %v2316_v51  ;;  %v2780_v30 = vmax.f32 %v2290_v12, %v2316_v51  ;;  %v4473_v29 = vmul.f32 %v10042_v13, %v10441_v22  ;;  %v10562_v47 = vpop.f32.mrf.mxu1 }
 0x238   :  { %v10554_v48 = vmax.f32 %v10390_v59, %v5606_v33  ;;  %v2326_v7 = vcombine.high %v1620_v18, %v1620_v18  ;;  %v10557_v9 = vrot.slane %v1620_v18, %v8271_v16  ;;  %v1465_v54 = vld [vmem:[#allocation2 + $0x270] ss:$2 sm:$0xff]  ;;  %v1563_v61 = vld [vmem:[#allocation2 + $0x271] ss:$2 sm:$0xff]  ;;  %v4666_v15 = vmax.f32 %v10528_v45, 0.0  ;;  %1371 = vst.msk [vmem:[#allocation2 + $0x290] sm:$0xff] %vm1288_vm4, %v1272_v23  ;;  %v7494_v19 = vpop.f32.mrf.mxu0 }
 0x239   :  { %1372 = vst.msk [vmem:[#allocation2 + $0x298] sm:$0xff] %vm1288_vm4, %v1273_v20  ;;  %v2325_v12 = vcombine.high %v2323_v55, %v2323_v55  ;;  %v2781_v22 = vmax.f32 %v10376_v60, %v2324_v41  ;;  %v2782_v38 = vmax.f32 %v2291_v42, %v2323_v55  ;;  %v3195_v40 = vcombine.low %v10474_v49, %v2780_v30  ;;  %v7700_v42 = vpop.f32.mrf.mxu1 }
 0x23a   :  { %4762 = vst.msk [vmem:[#allocation2 + $0x270] sm:$0xff] %vm1288_vm4, %v4664_v46  ;;  %4763 = vst.msk [vmem:[#allocation2 + $0x278] sm:$0xff] %vm1288_vm4, %v4665_v56  ;;  %v4819_v1 = vld [vmem:[#allocation2 + $0x250] ss:$2 sm:$0xff]  ;;  %v4868_v3 = vld [vmem:[#allocation2 + $0x251] ss:$2 sm:$0xff]  ;;  %v2784_v6 = vmax.f32 %v2307_v37, %v10557_v9  ;;  %v1621_v28 = vmax.f32 %v1465_v54, %v1563_v61  ;;  %v10579_v56 = vadd.f32 %v10479_v32, %v4473_v29  ;;  %v10581_v33 = vpop.f32.mrf.mxu0 }
 0x23b   :  { %v4667_v27 = vmax.f32 %v10537_v26, 0.0  ;;  %v4668_v60 = vmax.f32 %v10543_v17, 0.0  ;;  %v3209_v49 = vrot.slane %v3195_v40, %v8271_v16  ;;  %v3211_v10 = vcombine.low %v2781_v22, %v2782_v38  ;;  %v10591_v0 = vpop.f32.mrf.mxu1 }
 0x23c   :  { %v4917_v46 = vmax.f32 %v4819_v1, %v4868_v3  ;;  %v10584_v45 = vrot.slane %v2326_v7, %v8271_v16  ;;  %v2783_v37 = vmax.f32 %v10398_v43, %v2325_v12  ;;  %v2343_v31 = vcombine.high %v1621_v28, %v1621_v28  ;;  %v7497_v17 = vpop.f32.mrf.mxu0 }
 0x23d   :  { %v10589_v14 = vmul.f32 %v10042_v13, %v10463_v34  ;;  %v3210_v51 = vcombine.low %v10381_v5, %v3209_v49  ;;  %v2341_v26 = vcombine.high %v10557_v9, %v10557_v9  ;;  %v4820_v2 = vld [vmem:[#allocation2 + $0x260] ss:$2 sm:$0xff]  ;;  %v4869_v18 = vld [vmem:[#allocation2 + $0x261] ss:$2 sm:$0xff]  ;;  %v3219_v43 = vrot.slane %v3211_v10, %v8271_v16  ;;  %v7703_v55 = vpop.f32.mrf.mxu1 }
 0x23e   :  { %v5607_v35 = vcombine.high %v4917_v46, %v4917_v46  ;;  %v5614_v52 = vrot.slane %v4917_v46, %v8271_v16  ;;  %v1467_v23 = vld [vmem:[#allocation2 + $0x280] ss:$2 sm:$0xff]  ;;  %v3212_v20 = vcombine.low %v2783_v37, %v2784_v6  ;;  %v4918_v11 = vmax.f32 %v4820_v2, %v4869_v18  ;;  %v1565_v34 = vld [vmem:[#allocation2 + $0x281] ss:$2 sm:$0xff]  ;;  %v10607_v54 = vpop.f32.mrf.mxu0 }
 0x23f   :  { %v10599_v13 = vrot.slane %v1621_v28, %v8271_v16  ;;  %v7168_v5 = vpack.c.bf16 %v3210_v51, %v3210_v51  ;;  %4764 = vst.msk [vmem:[#allocation2 + $0x280] sm:$0xff] %vm1288_vm4, %v4666_v15  ;;  %4765 = vst.msk [vmem:[#allocation2 + $0x288] sm:$0xff] %vm1288_vm4, %v4667_v27  ;;  %v10612_v38 = vrot.slane %v2343_v31, %v8271_v16  ;;  %v10615_v59 = vpop.f32.mrf.mxu1  ;;  %v10634_v27 = vld [vmem:[%s10982_s2] ss:$0 sm:$0xff] }
 0x240   :  { %v5621_v41 = vrot.slane %v5607_v35, %v8271_v16  ;;  %v5622_v30 = vcombine.high %v5614_v52, %v5614_v52  ;;  %v6078_v29 = vmax.f32 %v5588_v57, %v5614_v52  ;;  %v1469_v7 = vld [vmem:[#allocation2 + $0x290] ss:$2 sm:$0xff]  ;;  %v1567_v9 = vld [vmem:[#allocation2 + $0x291] ss:$2 sm:$0xff]  ;;  %v3226_v61 = vrot.slane %v3212_v20, %v8271_v16  ;;  %v7498_v1 = vpop.f32.mrf.mxu0 }
 0x241   :  { %v5624_v12 = vcombine.high %v4918_v11, %v4918_v11  ;;  %v5631_v22 = vrot.slane %v4918_v11, %v8271_v16  ;;  %4766 = vst.msk [vmem:[#allocation2 + $0x290] sm:$0xff] %vm1288_vm4, %v4668_v60  ;;  %v2342_v3 = vcombine.high %v10584_v45, %v10584_v45  ;;  %v10642_v42 = vmax.f32 %v10407_v36, %v2341_v26  ;;  %v4821_v10 = vld [vmem:[#allocation2 + $0x270] ss:$2 sm:$0xff] }
 0x242   :  { %3465 = vst.msk [vmem:[%s10984_s4 + $0x44] sm:$0xf] %vm3447_vm5, %v7168_v5  ;;  %v5623_v57 = vcombine.high %v5621_v41, %v5621_v41  ;;  %v6079_v15 = vmax.f32 %v10416_v58, %v5622_v30  ;;  %v6080_v40 = vmax.f32 %v5589_v53, %v5621_v41  ;;  %v6493_v19 = vcombine.low %v10554_v48, %v6078_v29  ;;  %v7704_v53 = vpop.f32.mrf.mxu1  ;;  %v10645_v46 = vpop.f32.mrf.mxu0 }
 0x243   :  { %v3227_v6 = vcombine.low %v3219_v43, %v3226_v61  ;;  %v6082_v28 = vmax.f32 %v5605_v39, %v5631_v22  ;;  %v10638_v58 = vmul.f32 %v10634_v27, %v10471_v50  ;;  %v4870_v39 = vld [vmem:[#allocation2 + $0x271] ss:$2 sm:$0xff]  ;;  %v5638_v31 = vrot.slane %v5624_v12, %v8271_v16 }
 0x244   :  { %v6507_v48 = vrot.slane %v6493_v19, %v8271_v16  ;;  %v6509_v60 = vcombine.low %v6079_v15, %v6080_v40  ;;  %v6081_v49 = vmax.f32 %v10502_v62, %v5623_v57  ;;  %v2358_v50 = vcombine.high %v10599_v13, %v10599_v13  ;;  %v10650_v35 = vpop.f32.mrf.mxu1  ;;  %v7501_v26 = vpop.f32.mrf.mxu0 }
 0x245   :  { %v7169_v37 = vpack.c.bf16 %v3227_v6, %v3227_v6  ;;  %v1622_v51 = vmax.f32 %v1467_v23, %v1565_v34  ;;  %v5639_v2 = vcombine.high %v5631_v22, %v5631_v22  ;;  %v2359_v62 = vcombine.high %v10612_v38, %v10612_v38 }
 0x246   :  { %v6508_v52 = vcombine.low %v10430_v24, %v6507_v48  ;;  %v6510_v36 = vcombine.low %v6081_v49, %v6082_v28  ;;  %v10659_v18 = vmax.f32 %v4821_v10, %v4870_v39  ;;  %v4822_v43 = vld [vmem:[#allocation2 + $0x280] ss:$2 sm:$0xff]  ;;  %v4871_v20 = vld [vmem:[#allocation2 + $0x281] ss:$2 sm:$0xff]  ;;  %v1623_v11 = vmax.f32 %v1469_v7, %v1567_v9  ;;  %v7707_v24 = vpop.f32.mrf.mxu1  ;;  %v10664_v30 = vpop.f32.mrf.mxu0 }
 0x247   :  { %3466 = vst.msk [vmem:[%s10984_s4 + $0x48] sm:$0xf] %vm3447_vm5, %v7169_v37  ;;  %v2360_v17 = vcombine.high %v1622_v51, %v1622_v51  ;;  %v2367_v23 = vrot.slane %v1622_v51, %v8271_v16  ;;  %v6517_v34 = vrot.slane %v6509_v60, %v8271_v16  ;;  %v4920_v41 = vmax.f32 %v4822_v43, %v4871_v20 }
 0x248   :  { %v7193_v55 = vpack.c.bf16 %v6508_v52, %v6508_v52  ;;  %v6524_v5 = vrot.slane %v6510_v36, %v8271_v16  ;;  %v5640_v29 = vcombine.high %v5638_v31, %v5638_v31  ;;  %v2377_v22 = vcombine.high %v1623_v11, %v1623_v11  ;;  %v10667_v57 = vpop.f32.mrf.mxu1  ;;  %v7502_v19 = vpop.f32.mrf.mxu0 }
 0x249   :  { %v2374_v61 = vrot.slane %v2360_v17, %v8271_v16  ;;  %v2375_v12 = vcombine.high %v2367_v23, %v2367_v23  ;;  %v6083_v7 = vmax.f32 %v10505_v8, %v5639_v2  ;;  %v5658_v15 = vcombine.high %v4920_v41, %v4920_v41 }
 0x24a   :  { %7143 = vst.msk [vmem:[%s10984_s4 + $0xa8] sm:$0xf] %vm3447_vm5, %v7193_v55  ;;  %v6525_v9 = vcombine.low %v6517_v34, %v6524_v5  ;;  %v10675_v40 = vrot.slane %v4920_v41, %v8271_v16  ;;  %v10679_v1 = vrot.slane %v10659_v18, %v8271_v16  ;;  %v2384_v53 = vrot.slane %v1623_v11, %v8271_v16  ;;  %v7708_v48 = vpop.f32.mrf.mxu1  ;;  %v10687_v39 = vpop.f32.mrf.mxu0 }
 0x24b   :  { %v2376_v6 = vcombine.high %v2374_v61, %v2374_v61  ;;  %v2786_v28 = vmax.f32 %v10584_v45, %v2375_v12  ;;  %v5672_v49 = vrot.slane %v5658_v15, %v8271_v16  ;;  %v2391_v10 = vrot.slane %v2377_v22, %v8271_v16 }
 0x24c   :  { %v7194_v60 = vpack.c.bf16 %v6525_v9, %v6525_v9  ;;  %v5673_v8 = vcombine.high %v10675_v40, %v10675_v40  ;;  %v2787_v37 = vmax.f32 %v2342_v3, %v2374_v61  ;;  %v2392_v2 = vcombine.high %v2384_v53, %v2384_v53  ;;  %v10691_v45 = vpop.f32.mrf.mxu1  ;;  %v7505_v20 = vpop.f32.mrf.mxu0 }
 0x24d   :  { %v2788_v51 = vmax.f32 %v10599_v13, %v2376_v6  ;;  %v3228_v52 = vcombine.low %v10642_v42, %v2786_v28  ;;  %v5674_v36 = vcombine.high %v5672_v49, %v5672_v49  ;;  %v2393_v17 = vcombine.high %v2391_v10, %v2391_v10 }
 0x24e   :  { %7144 = vst.msk [vmem:[%s10984_s4 + $0xac] sm:$0xf] %vm3447_vm5, %v7194_v60  ;;  %v6084_v26 = vmax.f32 %v5638_v31, %v5673_v8  ;;  %v2789_v43 = vmax.f32 %v2358_v50, %v2384_v53  ;;  %v6085_v24 = vmax.f32 %v5640_v29, %v5672_v49  ;;  %v2790_v3 = vmax.f32 %v10612_v38, %v2392_v2  ;;  %v7711_v34 = vpop.f32.mrf.mxu1  ;;  %v10700_v61 = vpop.f32.mrf.mxu0 }
 0x24f   :  { %v3229_v11 = vcombine.low %v2787_v37, %v2788_v51  ;;  %v2791_v13 = vmax.f32 %v2359_v62, %v2391_v10  ;;  %v6086_v42 = vmax.f32 %v10679_v1, %v5674_v36  ;;  %v2792_v5 = vmax.f32 %v2367_v23, %v2393_v17 }
 0x250   :  { %v6526_v55 = vcombine.low %v6083_v7, %v6084_v26  ;;  %v4669_v41 = vmax.f32 %v10579_v56, 0.0  ;;  %v3236_v12 = vrot.slane %v3228_v52, %v8271_v16  ;;  %v3245_v50 = vcombine.low %v2789_v43, %v2790_v3  ;;  %v10706_v22 = vpop.f32.mrf.mxu1  ;;  %v7506_v23 = vpop.f32.mrf.mxu0 }
 0x251   :  { %v3243_v31 = vrot.slane %v3229_v11, %v8271_v16  ;;  %v1176_v29 = vadd.f32 %v10479_v32, %v10589_v14  ;;  %v5641_v38 = vcombine.high %v10659_v18, %v10659_v18  ;;  %v6527_v62 = vcombine.low %v6085_v24, %v6086_v42 }
 0x252   :  { %v3246_v7 = vcombine.low %v2791_v13, %v2792_v5  ;;  %4767 = vst.msk [vmem:[#allocation2 + $0x298] sm:$0xff] %vm1288_vm4, %v4669_v41  ;;  %v1073_v56 = vmul.f32 %v10634_v27, %v10491_v44  ;;  %v6534_v15 = vrot.slane %v6526_v55, %v8271_v16  ;;  %v3253_v19 = vrot.slane %v3245_v50, %v8271_v16  ;;  %v7712_v14 = vpop.f32.mrf.mxu1  ;;  %v10720_v60 = vpop.f32.mrf.mxu0 }
 0x253   :  { %v3244_v9 = vcombine.low %v3236_v12, %v3243_v31  ;;  %v1274_v6 = vmax.f32 %v1176_v29, 0.0  ;;  %v6541_v28 = vrot.slane %v6527_v62, %v8271_v16  ;;  %v4475_v48 = vmul.f32 %v10634_v27, %v10499_v25 }
 0x254   :  { %v3260_v53 = vrot.slane %v3246_v7, %v8271_v16  ;;  %v1177_v18 = vadd.f32 %v10479_v32, %v1073_v56  ;;  %v1074_v49 = vmul.f32 %v10634_v27, %v10523_v63  ;;  %v4476_v8 = vmul.f32 %v10634_v27, %v10531_v21  ;;  %v10729_v37 = vpop.f32.mrf.mxu1  ;;  %v7509_v25 = vpop.f32.mrf.mxu0 }
 0x255   :  { %v7170_v44 = vpack.c.bf16 %v3244_v9, %v3244_v9  ;;  %1373 = vst.msk [vmem:[#allocation2 + $0x2a0] sm:$0xff] %vm1288_vm4, %v1274_v6  ;;  %v1075_v10 = vmul.f32 %v10634_v27, %v10551_v4  ;;  %v6542_v51 = vcombine.low %v6534_v15, %v6541_v28  ;;  %v10732_v36 = vrot.slane %v5641_v38, %v8271_v16 }
 0x256   :  { %v3261_v52 = vcombine.low %v3253_v19, %v3260_v53  ;;  %v1275_v2 = vmax.f32 %v1177_v18, 0.0  ;;  %v5656_v26 = vcombine.high %v10679_v1, %v10679_v1  ;;  %v1178_v63 = vadd.f32 %v10479_v32, %v1074_v49  ;;  %v7715_v4 = vpop.f32.mrf.mxu1  ;;  %v10747_v11 = vpop.f32.mrf.mxu0 }
 0x257   :  { %3467 = vst.msk [vmem:[%s10984_s4 + $0x4c] sm:$0xf] %vm3447_vm5, %v7170_v44  ;;  %v1179_v21 = vadd.f32 %v10479_v32, %v1075_v10  ;;  %v7195_v17 = vpack.c.bf16 %v6542_v51, %v6542_v51  ;;  %v4572_v20 = vadd.f32 %v10479_v32, %v10638_v58  ;;  %v1076_v1 = vmul.f32 %v10634_v27, %v10581_v33 }
 0x258   :  { %v7171_v43 = vpack.c.bf16 %v3261_v52, %v3261_v52  ;;  %1374 = vst.msk [vmem:[#allocation2 + $0x2a8] sm:$0xff] %vm1288_vm4, %v1275_v2  ;;  %v4573_v13 = vadd.f32 %v10479_v32, %v4475_v48  ;;  %v1276_v34 = vmax.f32 %v1178_v63, 0.0  ;;  %v10751_v42 = vadd.f32 %v10479_v32, %v4476_v8  ;;  %v10755_v5 = vpop.f32.mrf.mxu1 }
 0x259   :  { %v4823_v24 = vld [vmem:[#allocation2 + $0x290] ss:$2 sm:$0xff]  ;;  %v4872_v3 = vld [vmem:[#allocation2 + $0x291] ss:$2 sm:$0xff]  ;;  %v4477_v55 = vmul.f32 %v10634_v27, %v10562_v47  ;;  %7145 = vst.msk [vmem:[%s10984_s4 + $0xb0] sm:$0xf] %vm3447_vm5, %v7195_v17  ;;  %v1180_v41 = vadd.f32 %v10479_v32, %v1076_v1  ;;  %v1077_v12 = vmul.f32 %v10634_v27, %v10607_v54  ;;  %v7510_v47 = vpop.f32.mrf.mxu0  ;;  %v5657_v31 = vcombine.high %v10732_v36, %v10732_v36 }
 0x25a   :  { %3468 = vst.msk [vmem:[%s10984_s4 + $0x50] sm:$0xf] %vm3447_vm5, %v7171_v43  ;;  %v4921_v33 = vmax.f32 %v4823_v24, %v4872_v3  ;;  %v1277_v58 = vmax.f32 %v1179_v21, 0.0  ;;  %v4478_v50 = vmul.f32 %v10634_v27, %v10591_v0  ;;  %v4479_v29 = vmul.f32 %v10634_v27, %v10615_v59  ;;  %v7716_v62 = vpop.f32.mrf.mxu1 }
 0x25b   :  { %1375 = vst.msk [vmem:[#allocation2 + $0x2b0] sm:$0xff] %vm1288_vm4, %v1276_v34  ;;  %v1078_v38 = vmul.f32 %v10634_v27, %v10645_v46  ;;  %v1278_v54 = vmax.f32 %v1180_v41, 0.0  ;;  %v1181_v23 = vadd.f32 %v10479_v32, %v1077_v12  ;;  %v10780_v9 = vpop.f32.mrf.mxu0  ;;  %v4670_v15 = vmax.f32 %v4572_v20, 0.0 }
 0x25c   :  { %v5675_v7 = vcombine.high %v4921_v33, %v4921_v33  ;;  %v5682_v56 = vrot.slane %v4921_v33, %v8271_v16  ;;  %1376 = vst.msk [vmem:[#allocation2 + $0x2b8] sm:$0xff] %vm1288_vm4, %v1277_v58  ;;  %v4671_v19 = vmax.f32 %v4573_v13, 0.0  ;;  %v4575_v0 = vadd.f32 %v10479_v32, %v4477_v55  ;;  %v10784_v6 = vpop.f32.mrf.mxu1 }
 0x25d   :  { %v1182_v59 = vadd.f32 %v10479_v32, %v1078_v38  ;;  %v4672_v28 = vmax.f32 %v10751_v42, 0.0  ;;  %1377 = vst.msk [vmem:[#allocation2 + $0x2c0] sm:$0xff] %vm1288_vm4, %v1278_v54  ;;  %v1279_v53 = vmax.f32 %v1181_v23, 0.0  ;;  %v7513_v18 = vpop.f32.mrf.mxu0  ;;  %v4576_v49 = vadd.f32 %v10479_v32, %v4478_v50 }
 0x25e   :  { %v5689_v46 = vrot.slane %v5675_v7, %v8271_v16  ;;  %v5690_v14 = vcombine.high %v5682_v56, %v5682_v56  ;;  %v4577_v8 = vadd.f32 %v10479_v32, %v4479_v29  ;;  %v1079_v51 = vmul.f32 %v10634_v27, %v10664_v30  ;;  %v7719_v52 = vpop.f32.mrf.mxu1 }
 0x25f   :  { %v1471_v48 = vld [vmem:[#allocation2 + $0x2a0] ss:$2 sm:$0xff]  ;;  %v1569_v44 = vld [vmem:[#allocation2 + $0x2a1] ss:$2 sm:$0xff]  ;;  %v1280_v10 = vmax.f32 %v1182_v59, 0.0  ;;  %v6087_v25 = vmax.f32 %v5656_v26, %v5682_v56  ;;  %1378 = vst.msk [vmem:[#allocation2 + $0x2c8] sm:$0xff] %vm1288_vm4, %v1279_v53  ;;  %v10797_v4 = vpop.f32.mrf.mxu0  ;;  %v4480_v30 = vmul.f32 %v10634_v27, %v10650_v35  ;;  %v4481_v3 = vmul.f32 %v10634_v27, %v10667_v57 }
 0x260   :  { %v5691_v2 = vcombine.high %v5689_v46, %v5689_v46  ;;  %v6088_v63 = vmax.f32 %v10732_v36, %v5690_v14  ;;  %v1624_v21 = vmax.f32 %v1471_v48, %v1569_v44  ;;  %4768 = vst.msk [vmem:[#allocation2 + $0x2a0] sm:$0xff] %vm1288_vm4, %v4670_v15  ;;  %4769 = vst.msk [vmem:[#allocation2 + $0x2a8] sm:$0xff] %vm1288_vm4, %v4671_v19  ;;  %v4673_v17 = vmax.f32 %v4575_v0, 0.0  ;;  %v10805_v26 = vpop.f32.mrf.mxu1 }
 0x261   :  { %1379 = vst.msk [vmem:[#allocation2 + $0x2d0] sm:$0xff] %vm1288_vm4, %v1280_v10  ;;  %v1183_v43 = vadd.f32 %v10479_v32, %v1079_v51  ;;  %v1080_v36 = vmul.f32 %v10634_v27, %v10687_v39  ;;  %v6089_v20 = vmax.f32 %v5657_v31, %v5689_v46  ;;  %v7514_v13 = vpop.f32.mrf.mxu0  ;;  %v4674_v39 = vmax.f32 %v4576_v49, 0.0 }
 0x262   :  { %v6090_v1 = vmax.f32 %v10675_v40, %v5691_v2  ;;  %v6543_v24 = vcombine.low %v6087_v25, %v6088_v63  ;;  %v7720_v33 = vpop.f32.mrf.mxu1  ;;  %v2394_v41 = vcombine.high %v1624_v21, %v1624_v21  ;;  %v4675_v12 = vmax.f32 %v4577_v8, 0.0 }
 0x263   :  { %v1473_v34 = vld [vmem:[#allocation2 + $0x2b0] ss:$2 sm:$0xff]  ;;  %v1571_v42 = vld [vmem:[#allocation2 + $0x2b1] ss:$2 sm:$0xff]  ;;  %v1281_v55 = vmax.f32 %v1183_v43, 0.0  ;;  %v1184_v35 = vadd.f32 %v10479_v32, %v1080_v36  ;;  %v2401_v40 = vrot.slane %v1624_v21, %v8271_v16  ;;  %v4578_v57 = vadd.f32 %v10479_v32, %v4480_v30 }
 0x264   :  { %v6544_v58 = vcombine.low %v6089_v20, %v6090_v1  ;;  %4770 = vst.msk [vmem:[#allocation2 + $0x2b0] sm:$0xff] %vm1288_vm4, %v4672_v28  ;;  %4771 = vst.msk [vmem:[#allocation2 + $0x2b8] sm:$0xff] %vm1288_vm4, %v4673_v17  ;;  %v10814_v47 = vmax.f32 %v1473_v34, %v1571_v42  ;;  %v6551_v50 = vrot.slane %v6543_v24, %v8271_v16 }
 0x265   :  { %1380 = vst.msk [vmem:[#allocation2 + $0x2d8] sm:$0xff] %vm1288_vm4, %v1281_v55  ;;  %v1282_v31 = vmax.f32 %v1184_v35, 0.0  ;;  %v4579_v38 = vadd.f32 %v10479_v32, %v4481_v3  ;;  %v1081_v62 = vmul.f32 %v10634_v27, %v10700_v61  ;;  %v4482_v15 = vmul.f32 %v10634_v27, %v10691_v45 }
 0x266   :  { %v6558_v29 = vrot.slane %v6544_v58, %v8271_v16  ;;  %v2411_v54 = vcombine.high %v10814_v47, %v10814_v47  ;;  %v1475_v23 = vld [vmem:[#allocation2 + $0x2c0] ss:$2 sm:$0xff]  ;;  %v2408_v0 = vrot.slane %v2394_v41, %v8271_v16  ;;  %v1573_v46 = vld [vmem:[#allocation2 + $0x2c1] ss:$2 sm:$0xff]  ;;  %v2409_v28 = vcombine.high %v2401_v40, %v2401_v40 }
 0x267   :  { %v4824_v7 = vld [vmem:[#allocation2 + $0x2a0] ss:$2 sm:$0xff]  ;;  %v4873_v56 = vld [vmem:[#allocation2 + $0x2a1] ss:$2 sm:$0xff]  ;;  %1381 = vst.msk [vmem:[#allocation2 + $0x2e0] sm:$0xff] %vm1288_vm4, %v1282_v31  ;;  %v1185_v14 = vadd.f32 %v10479_v32, %v1081_v62  ;;  %v1626_v53 = vmax.f32 %v1475_v23, %v1573_v46  ;;  %4772 = vst.msk [vmem:[#allocation2 + $0x2c0] sm:$0xff] %vm1288_vm4, %v4674_v39  ;;  %v4483_v49 = vmul.f32 %v10634_v27, %v10706_v22 }
 0x268   :  { %v6559_v19 = vcombine.low %v6551_v50, %v6558_v29  ;;  %v4922_v59 = vmax.f32 %v4824_v7, %v4873_v56  ;;  %v10831_v61 = vrot.slane %v2411_v54, %v8271_v16  ;;  %4773 = vst.msk [vmem:[#allocation2 + $0x2c8] sm:$0xff] %vm1288_vm4, %v4675_v12  ;;  %v4676_v18 = vmax.f32 %v4578_v57, 0.0 }
 0x269   :  { %v4677_v44 = vmax.f32 %v4579_v38, 0.0  ;;  %v1283_v45 = vmax.f32 %v1185_v14, 0.0  ;;  %v2428_v52 = vcombine.high %v1626_v53, %v1626_v53  ;;  %v2435_v2 = vrot.slane %v1626_v53, %v8271_v16 }
 0x26a   :  { %v7196_v48 = vpack.c.bf16 %v6559_v19, %v6559_v19  ;;  %v2427_v8 = vcombine.high %v10831_v61, %v10831_v61  ;;  %v1082_v25 = vmul.f32 %v10634_v27, %v10720_v60  ;;  %v2410_v63 = vcombine.high %v2408_v0, %v2408_v0 }
 0x26b   :  { %v4825_v10 = vld [vmem:[#allocation2 + $0x2b0] ss:$2 sm:$0xff]  ;;  %v4874_v51 = vld [vmem:[#allocation2 + $0x2b1] ss:$2 sm:$0xff]  ;;  %v5692_v21 = vcombine.high %v4922_v59, %v4922_v59  ;;  %v4580_v43 = vadd.f32 %v10479_v32, %v4482_v15  ;;  %1382 = vst.msk [vmem:[#allocation2 + $0x2e8] sm:$0xff] %vm1288_vm4, %v1283_v45  ;;  %v10851_v36 = vrot.slane %v2428_v52, %v8271_v16  ;;  %v2443_v20 = vcombine.high %v2435_v2, %v2435_v2 }
 0x26c   :  { %7146 = vst.msk [vmem:[%s10984_s4 + $0xb4] sm:$0xf] %vm3447_vm5, %v7196_v48  ;;  %v10846_v17 = vmax.f32 %v4825_v10, %v4874_v51  ;;  %v1477_v22 = vld [vmem:[#allocation2 + $0x2d0] ss:$2 sm:$0xff]  ;;  %v1575_v30 = vld [vmem:[#allocation2 + $0x2d1] ss:$2 sm:$0xff]  ;;  %v2793_v60 = vmax.f32 %v2401_v40, %v2427_v8  ;;  %v2794_v1 = vmax.f32 %v2409_v28, %v2435_v2  ;;  %v5699_v24 = vrot.slane %v4922_v59, %v8271_v16 }
 0x26d   :  { %4774 = vst.msk [vmem:[#allocation2 + $0x2d0] sm:$0xff] %vm1288_vm4, %v4676_v18  ;;  %4775 = vst.msk [vmem:[#allocation2 + $0x2d8] sm:$0xff] %vm1288_vm4, %v4677_v44  ;;  %v4581_v13 = vadd.f32 %v10479_v32, %v4483_v49  ;;  %v2795_v34 = vmax.f32 %v2408_v0, %v2443_v20  ;;  %v2796_v42 = vmax.f32 %v2410_v63, %v10851_v36  ;;  %v4678_v57 = vmax.f32 %v4580_v43, 0.0 }
 0x26e   :  { %v5709_v3 = vcombine.high %v10846_v17, %v10846_v17  ;;  %v3262_v55 = vcombine.low %v2793_v60, %v2794_v1  ;;  %v1186_v35 = vadd.f32 %v10479_v32, %v1082_v25  ;;  %v5706_v33 = vrot.slane %v5692_v21, %v8271_v16 }
 0x26f   :  { %v4826_v41 = vld [vmem:[#allocation2 + $0x2c0] ss:$2 sm:$0xff]  ;;  %v4875_v39 = vld [vmem:[#allocation2 + $0x2c1] ss:$2 sm:$0xff]  ;;  %v3263_v12 = vcombine.low %v2795_v34, %v2796_v42  ;;  %v5707_v31 = vcombine.high %v5699_v24, %v5699_v24  ;;  %v4679_v38 = vmax.f32 %v4581_v13, 0.0  ;;  %v1083_v10 = vmul.f32 %v10634_v27, %v10747_v11 }
 0x270   :  { %v10863_v58 = vrot.slane %v5709_v3, %v8271_v16  ;;  %v4924_v40 = vmax.f32 %v4826_v41, %v4875_v39  ;;  %v3270_v29 = vrot.slane %v3262_v55, %v8271_v16  ;;  %v1284_v15 = vmax.f32 %v1186_v35, 0.0 }
 0x271   :  { %v3277_v62 = vrot.slane %v3263_v12, %v8271_v16  ;;  %v5708_v19 = vcombine.high %v5706_v33, %v5706_v33  ;;  %v1627_v52 = vmax.f32 %v1477_v22, %v1575_v30  ;;  %v1187_v2 = vadd.f32 %v10479_v32, %v1083_v10 }
 0x272   :  { %v5725_v50 = vcombine.high %v10863_v58, %v10863_v58  ;;  %v5726_v7 = vcombine.high %v4924_v40, %v4924_v40  ;;  %v5733_v56 = vrot.slane %v4924_v40, %v8271_v16  ;;  %v1479_v54 = vld [vmem:[#allocation2 + $0x2e0] ss:$2 sm:$0xff]  ;;  %v1577_v23 = vld [vmem:[#allocation2 + $0x2e1] ss:$2 sm:$0xff]  ;;  %1383 = vst.msk [vmem:[#allocation2 + $0x2f0] sm:$0xff] %vm1288_vm4, %v1284_v15  ;;  %v2418_v25 = vrot.slane %v10814_v47, %v8271_v16 }
 0x273   :  { %4776 = vst.msk [vmem:[#allocation2 + $0x2e0] sm:$0xff] %vm1288_vm4, %v4678_v57  ;;  %4777 = vst.msk [vmem:[#allocation2 + $0x2e8] sm:$0xff] %vm1288_vm4, %v4679_v38  ;;  %v3278_v0 = vcombine.low %v3270_v29, %v3277_v62  ;;  %v1084_v63 = vmul.f32 %v10634_v27, %v10780_v9  ;;  %v4484_v60 = vmul.f32 %v10634_v27, %v10729_v37  ;;  %v1285_v1 = vmax.f32 %v1187_v2, 0.0 }
 0x274   :  { %v10873_v59 = vrot.slane %v5726_v7, %v8271_v16  ;;  %v5741_v46 = vcombine.high %v5733_v56, %v5733_v56  ;;  %v6092_v14 = vmax.f32 %v5707_v31, %v5733_v56  ;;  %v6091_v28 = vmax.f32 %v5699_v24, %v5725_v50  ;;  %v4827_v43 = vld [vmem:[#allocation2 + $0x2d0] ss:$2 sm:$0xff]  ;;  %v4876_v20 = vld [vmem:[#allocation2 + $0x2d1] ss:$2 sm:$0xff] }
 0x275   :  { %v7172_v53 = vpack.c.bf16 %v3278_v0, %v3278_v0  ;;  %v4485_v11 = vmul.f32 %v10634_v27, %v10755_v5  ;;  %v1188_v22 = vadd.f32 %v10479_v32, %v1084_v63  ;;  %v1085_v30 = vmul.f32 %v10634_v27, %v10797_v4  ;;  %1384 = vst.msk [vmem:[#allocation2 + $0x2f8] sm:$0xff] %vm1288_vm4, %v1285_v1 }
 0x276   :  { %v6093_v18 = vmax.f32 %v5706_v33, %v5741_v46  ;;  %v6094_v48 = vmax.f32 %v5708_v19, %v10873_v59  ;;  %v6560_v44 = vcombine.low %v6091_v28, %v6092_v14  ;;  %v2452_v9 = vrot.slane %v1627_v52, %v8271_v16 }
 0x277   :  { %3469 = vst.msk [vmem:[%s10984_s4 + $0x54] sm:$0xf] %vm3447_vm5, %v7172_v53  ;;  %v2445_v47 = vcombine.high %v1627_v52, %v1627_v52  ;;  %v4925_v37 = vmax.f32 %v4827_v43, %v4876_v20  ;;  %v1286_v24 = vmax.f32 %v1188_v22, 0.0  ;;  %v1189_v3 = vadd.f32 %v10479_v32, %v1085_v30 }
 0x278   :  { %v6561_v45 = vcombine.low %v6093_v18, %v6094_v48  ;;  %v6568_v49 = vrot.slane %v6560_v44, %v8271_v16  ;;  %v2426_v5 = vcombine.high %v2418_v25, %v2418_v25  ;;  %v2444_v13 = vcombine.high %v10851_v36, %v10851_v36 }
 0x279   :  { %v4582_v4 = vadd.f32 %v10479_v32, %v4484_v60  ;;  %v4583_v34 = vadd.f32 %v10479_v32, %v4485_v11  ;;  %v5716_v42 = vrot.slane %v10846_v17, %v8271_v16  ;;  %1385 = vst.msk [vmem:[#allocation2 + $0x300] sm:$0xff] %vm1288_vm4, %v1286_v24  ;;  %v4486_v55 = vmul.f32 %v10634_v27, %v10784_v6 }
 0x27a   :  { %v6575_v8 = vrot.slane %v6561_v45, %v8271_v16  ;;  %v1287_v35 = vmax.f32 %v1189_v3, 0.0  ;;  %v4487_v33 = vmul.f32 %v10634_v27, %v10805_v26  ;;  %v2798_v41 = vmax.f32 %v2426_v5, %v2452_v9  ;;  %v4828_v56 = vld [vmem:[#allocation2 + $0x2e0] ss:$2 sm:$0xff] }
 0x27b   :  { %v2459_v39 = vrot.slane %v2445_v47, %v8271_v16  ;;  %v5750_v36 = vrot.slane %v4925_v37, %v8271_v16  ;;  %v1628_v12 = vmax.f32 %v1479_v54, %v1577_v23  ;;  %v2797_v40 = vmax.f32 %v2418_v25, %v2444_v13  ;;  %v4877_v54 = vld [vmem:[#allocation2 + $0x2e1] ss:$2 sm:$0xff] }
 0x27c   :  { %v6576_v51 = vcombine.low %v6568_v49, %v6575_v8  ;;  %1386 = vst.msk [vmem:[#allocation2 + $0x308] sm:$0xff] %vm1288_vm4, %v1287_v35  ;;  %v5743_v57 = vcombine.high %v4925_v37, %v4925_v37  ;;  %v4680_v17 = vmax.f32 %v4582_v4, 0.0  ;;  %v4681_v31 = vmax.f32 %v4583_v34, 0.0  ;;  %v1481_v29 = vld [vmem:[#allocation2 + $0x2f0] ss:$2 sm:$0xff] }
 0x27d   :  { %v5724_v50 = vcombine.high %v5716_v42, %v5716_v42  ;;  %v5742_v6 = vcombine.high %v10873_v59, %v10873_v59  ;;  %v1579_v38 = vld [vmem:[#allocation2 + $0x2f1] ss:$2 sm:$0xff]  ;;  %v4584_v27 = vadd.f32 %v10479_v32, %v4486_v55  ;;  %v4585_v26 = vadd.f32 %v10479_v32, %v4487_v33 }
 0x27e   :  { %v7197_v21 = vpack.c.bf16 %v6576_v51, %v6576_v51  ;;  %v2460_v62 = vcombine.high %v2452_v9, %v2452_v9  ;;  %v3279_v7 = vcombine.low %v2797_v40, %v2798_v41  ;;  %v1629_v23 = vmax.f32 %v1481_v29, %v1579_v38  ;;  %4778 = vst.msk [vmem:[#allocation2 + $0x2f0] sm:$0xff] %vm1288_vm4, %v4680_v17 }
 0x27f   :  { %4779 = vst.msk [vmem:[#allocation2 + $0x2f8] sm:$0xff] %vm1288_vm4, %v4681_v31  ;;  %v2461_v15 = vcombine.high %v2459_v39, %v2459_v39  ;;  %v6096_v19 = vmax.f32 %v5724_v50, %v5750_v36  ;;  %v2462_v0 = vcombine.high %v1628_v12, %v1628_v12  ;;  %v2469_v59 = vrot.slane %v1628_v12, %v8271_v16 }
 0x280   :  { %7147 = vst.msk [vmem:[%s10984_s4 + $0xb8] sm:$0xf] %vm3447_vm5, %v7197_v21  ;;  %v10926_v46 = vrot.slane %v5743_v57, %v8271_v16  ;;  %v5758_v14 = vcombine.high %v5750_v36, %v5750_v36  ;;  %v2479_v28 = vcombine.high %v1629_v23, %v1629_v23  ;;  %v2486_v32 = vrot.slane %v1629_v23, %v8271_v16 }
 0x281   :  { %v6095_v53 = vmax.f32 %v5716_v42, %v5742_v6  ;;  %v4926_v18 = vmax.f32 %v4828_v56, %v4877_v54  ;;  %v4682_v48 = vmax.f32 %v4584_v27, 0.0  ;;  %v4683_v44 = vmax.f32 %v4585_v26, 0.0 }
 0x282   :  { %v2799_v45 = vmax.f32 %v10831_v61, %v2460_v62  ;;  %v3287_v49 = vrot.slane %v3279_v7, %v8271_v16  ;;  %v2493_v8 = vrot.slane %v2479_v28, %v8271_v16  ;;  %v2494_v10 = vcombine.high %v2486_v32, %v2486_v32 }
 0x283   :  { %v1483_v51 = vld [vmem:[#allocation2 + $0x300] ss:$2 sm:$0xff]  ;;  %v1581_v52 = vld [vmem:[#allocation2 + $0x301] ss:$2 sm:$0xff]  ;;  %v6577_v2 = vcombine.low %v6095_v53, %v6096_v19  ;;  %v2476_v25 = vrot.slane %v2462_v0, %v8271_v16  ;;  %v2477_v63 = vcombine.high %v2469_v59, %v2469_v59  ;;  %v5759_v43 = vcombine.high %v10926_v46, %v10926_v46 }
 0x284   :  { %v1630_v21 = vmax.f32 %v1483_v51, %v1581_v52  ;;  %4780 = vst.msk [vmem:[#allocation2 + $0x300] sm:$0xff] %vm1288_vm4, %v4682_v48  ;;  %4781 = vst.msk [vmem:[#allocation2 + $0x308] sm:$0xff] %vm1288_vm4, %v4683_v44  ;;  %v6097_v61 = vmax.f32 %v10863_v58, %v5758_v14  ;;  %v2495_v20 = vcombine.high %v2493_v8, %v2493_v8 }
 0x285   :  { %v2800_v60 = vmax.f32 %v2459_v39, %v2494_v10  ;;  %v5760_v1 = vcombine.high %v4926_v18, %v4926_v18  ;;  %v5767_v11 = vrot.slane %v4926_v18, %v8271_v16  ;;  %v2801_v37 = vmax.f32 %v2461_v15, %v2493_v8 }
 0x286   :  { %v4829_v22 = vld [vmem:[#allocation2 + $0x2f0] ss:$2 sm:$0xff]  ;;  %v4878_v30 = vld [vmem:[#allocation2 + $0x2f1] ss:$2 sm:$0xff]  ;;  %v2496_v9 = vcombine.high %v1630_v21, %v1630_v21  ;;  %v2503_v47 = vrot.slane %v1630_v21, %v8271_v16  ;;  %v2802_v24 = vmax.f32 %v2469_v59, %v2495_v20  ;;  %v6585_v13 = vrot.slane %v6577_v2, %v8271_v16 }
 0x287   :  { %v3280_v3 = vcombine.low %v2799_v45, %v2800_v60  ;;  %v4927_v5 = vmax.f32 %v4829_v22, %v4878_v30  ;;  %v2478_v4 = vcombine.high %v2476_v25, %v2476_v25  ;;  %v5774_v41 = vrot.slane %v5760_v1, %v8271_v16 }
 0x288   :  { %v2510_v34 = vrot.slane %v2496_v9, %v8271_v16  ;;  %v2511_v58 = vcombine.high %v2503_v47, %v2503_v47  ;;  %v3296_v55 = vcombine.low %v2801_v37, %v2802_v24  ;;  %v2803_v36 = vmax.f32 %v2477_v63, %v2503_v47 }
 0x289   :  { %v3294_v42 = vrot.slane %v3280_v3, %v8271_v16  ;;  %v5777_v35 = vcombine.high %v4927_v5, %v4927_v5  ;;  %v5784_v33 = vrot.slane %v4927_v5, %v8271_v16  ;;  %v5775_v40 = vcombine.high %v5767_v11, %v5767_v11 }
 0x28a   :  { %v2512_v39 = vcombine.high %v2510_v34, %v2510_v34  ;;  %v2804_v12 = vmax.f32 %v2476_v25, %v2511_v58  ;;  %v2805_v29 = vmax.f32 %v2478_v4, %v2510_v34  ;;  %v3304_v62 = vrot.slane %v3296_v55, %v8271_v16 }
 0x28b   :  { %v3295_v57 = vcombine.low %v3287_v49, %v3294_v42  ;;  %v5791_v17 = vrot.slane %v5777_v35, %v8271_v16  ;;  %v5792_v31 = vcombine.high %v5784_v33, %v5784_v33  ;;  %v4830_v50 = vld [vmem:[#allocation2 + $0x300] ss:$2 sm:$0xff]  ;;  %v4879_v6 = vld [vmem:[#allocation2 + $0x301] ss:$2 sm:$0xff]  ;;  %v5776_v45 = vcombine.high %v5774_v41, %v5774_v41 }
 0x28c   :  { %v2806_v38 = vmax.f32 %v2486_v32, %v2512_v39  ;;  %v3297_v27 = vcombine.low %v2803_v36, %v2804_v12  ;;  %v4928_v26 = vmax.f32 %v4830_v50, %v4879_v6 }
 0x28d   :  { %v7173_v7 = vpack.c.bf16 %v3295_v57, %v3295_v57  ;;  %v5793_v56 = vcombine.high %v5791_v17, %v5791_v17  ;;  %v6098_v54 = vmax.f32 %v10926_v46, %v5792_v31  ;;  %v6099_v59 = vmax.f32 %v5759_v43, %v5791_v17 }
 0x28e   :  { %v3311_v23 = vrot.slane %v3297_v27, %v8271_v16  ;;  %v3313_v15 = vcombine.low %v2805_v29, %v2806_v38  ;;  %v5794_v19 = vcombine.high %v4928_v26, %v4928_v26  ;;  %v5801_v0 = vrot.slane %v4928_v26, %v8271_v16 }
 0x28f   :  { %3470 = vst.msk [vmem:[%s10984_s4 + $0x58] sm:$0xf] %vm3447_vm5, %v7173_v7  ;;  %v6100_v14 = vmax.f32 %v5767_v11, %v5793_v56  ;;  %v6578_v28 = vcombine.low %v6097_v61, %v6098_v54 }
 0x290   :  { %v3312_v32 = vcombine.low %v3304_v62, %v3311_v23  ;;  %v3320_v53 = vrot.slane %v3313_v15, %v8271_v16  ;;  %v5808_v46 = vrot.slane %v5794_v19, %v8271_v16  ;;  %v5809_v18 = vcombine.high %v5801_v0, %v5801_v0 }
 0x291   :  { %v6592_v48 = vrot.slane %v6578_v28, %v8271_v16  ;;  %v6594_v44 = vcombine.low %v6099_v59, %v6100_v14  ;;  %v6101_v49 = vmax.f32 %v5775_v40, %v5801_v0 }
 0x292   :  { %v7174_v8 = vpack.c.bf16 %v3312_v32, %v3312_v32  ;;  %v7175_v10 = vpack.c.bf16 %v3320_v53, %v3320_v53  ;;  %v5810_v51 = vcombine.high %v5808_v46, %v5808_v46  ;;  %v6102_v52 = vmax.f32 %v5774_v41, %v5809_v18 }
 0x293   :  { %v6593_v2 = vcombine.low %v6585_v13, %v6592_v48  ;;  %v6103_v25 = vmax.f32 %v5776_v45, %v5808_v46  ;;  %v6602_v61 = vrot.slane %v6594_v44, %v8271_v16 }
 0x294   :  { %3471 = vst.msk [vmem:[%s10984_s4 + $0x5c] sm:$0xf] %vm3447_vm5, %v7174_v8  ;;  %v6104_v63 = vmax.f32 %v5784_v33, %v5810_v51  ;;  %v6595_v21 = vcombine.low %v6101_v49, %v6102_v52 }
 0x295   :  { %3473 = vst.msk [vmem:[%s10984_s4 + $0x60] sm:$0x3] %vm3472_vm6, %v7175_v10  ;;  %v7198_v43 = vpack.c.bf16 %v6593_v2, %v6593_v2 }
 0x296   :  { %v6609_v20 = vrot.slane %v6595_v21, %v8271_v16  ;;  %v6611_v60 = vcombine.low %v6103_v25, %v6104_v63 }
 0x297   :  { %7148 = vst.msk [vmem:[%s10984_s4 + $0xbc] sm:$0xf] %vm3447_vm5, %v7198_v43 }
 0x298   :  { %v6610_v1 = vcombine.low %v6602_v61, %v6609_v20  ;;  %v6618_v11 = vrot.slane %v6611_v60, %v8271_v16 }
 0x29a   :  { %v7199_v22 = vpack.c.bf16 %v6610_v1, %v6610_v1  ;;  %v7200_v30 = vpack.c.bf16 %v6618_v11, %v6618_v11 }
 0x29c   :  { %7149 = vst.msk [vmem:[%s10984_s4 + $0xc0] sm:$0xf] %vm3447_vm5, %v7199_v22 }
 0x29d   :  { %7150 = vst.msk [vmem:[%s10984_s4 + $0xc4] sm:$0x3] %vm3472_vm6, %v7200_v30 }

// kernel: coolnet_forward.4
= control target key start
LH: loop header
LB: loop body
LE: loop exit
PB: predicated region body
PF: predicated region fallthrough
CT: control target
= control target key end

     0   :  { %v3997_v36 = vmov 0.0   ;;  %vm3998_vm0 = vmmov 0   ;;  %vm706_vm1 = vcmask 261120   ;;  %vm1131_vm2 = vcmask 523264   ;;  %s5350_s1 = inlined_call_operand.vmem [shape: bf16[800,64], index: 1, kind: input, shape index: {}]   ;;  %s5351_s0 = inlined_call_operand.vmem [shape: bf16[2,100,800], index: 0, kind: input, shape index: {}]   ;;  %s5352_s2 = inlined_call_operand.vmem [shape: f32[1,64], index: 2, kind: input, shape index: {}]   ;;  %s5353_s3 = inlined_call_operand.vmem [shape: f32[1,64], index: 3, kind: input, shape index: {}]   ;;  %s5354_s4 = inlined_call_operand.vmem [shape: bf16[2,25,64], index: 4, kind: output, shape index: {}]  }
   0x1   :  { %v4028_v0 = vld [vmem:[%s5350_s1 + $0x78] sm:$0xff]   ;;  %v4051_v4 = vld [vmem:[%s5350_s1 + $0x70] sm:$0xff]   ;;  %v4075_v8 = vld [vmem:[%s5350_s1 + $0x68] sm:$0xff]   ;;  %vm1144_vm3 = vcmask 519168   ;;  %vm1787_vm4 = vcmask 516096  }
   0x2   :  { %v4033_v1 = vld [vmem:[%s5350_s1 + $0xf8] sm:$0xff]   ;;  %3378 = vmatprep.subr.bf16.mxu0 %v4028_v0  ;;  %v4057_v5 = vld [vmem:[%s5350_s1 + $0xf0] sm:$0xff]   ;;  %v4081_v9 = vld [vmem:[%s5350_s1 + $0xe8] sm:$0xff]   ;;  %vm1788_vm5 = vsmask.f32 256 }
   0x3   :  { %v4039_v2 = vld [vmem:[%s5350_s1 + $0x38] sm:$0xff]   ;;  %3436 = vmatprep.subr.bf16.mxu1 %v4033_v1  ;;  %v4063_v6 = vld [vmem:[%s5350_s1 + $0x30] sm:$0xff]   ;;  %v4087_v10 = vld [vmem:[%s5350_s1 + $0x28] sm:$0xff]  }
   0x4   :  { %v4045_v3 = vld [vmem:[%s5350_s1 + $0xb8] sm:$0xff]   ;;  %3379 = vmatpush3.bf16.msra.mxu0 %v4039_v2  ;;  %v4069_v7 = vld [vmem:[%s5350_s1 + $0xb0] sm:$0xff]   ;;  %v4093_v11 = vld [vmem:[%s5350_s1 + $0xa8] sm:$0xff]  }
   0x5   :  { %3437 = vmatpush3.bf16.msra.mxu1 %v4045_v3  ;;  %3380 = vmatprep.subr.bf16.mxu0 %v4051_v4  ;;  %v4099_v12 = vld [vmem:[%s5350_s1 + $0x60] sm:$0xff]   ;;  %v4123_v16 = vld [vmem:[%s5350_s1 + $0x58] sm:$0xff]   ;;  %v4147_v20 = vld [vmem:[%s5350_s1 + $0x50] sm:$0xff]  }
   0x6   :  { %3438 = vmatprep.subr.bf16.mxu1 %v4057_v5  ;;  %v4105_v13 = vld [vmem:[%s5350_s1 + $0xe0] sm:$0xff]   ;;  %v4129_v17 = vld [vmem:[%s5350_s1 + $0xd8] sm:$0xff]   ;;  %v4153_v21 = vld [vmem:[%s5350_s1 + $0xd0] sm:$0xff]  }
   0x7   :  { %v4111_v14 = vld [vmem:[%s5350_s1 + $0x20] sm:$0xff]   ;;  %v4135_v18 = vld [vmem:[%s5350_s1 + $0x18] sm:$0xff]   ;;  %v4159_v22 = vld [vmem:[%s5350_s1 + $0x10] sm:$0xff]  }
   0x8   :  { %3381 = vmatpush3.bf16.msra.mxu0 %v4063_v6  ;;  %v4117_v15 = vld [vmem:[%s5350_s1 + $0xa0] sm:$0xff]   ;;  %v4141_v19 = vld [vmem:[%s5350_s1 + $0x98] sm:$0xff]   ;;  %v4165_v23 = vld [vmem:[%s5350_s1 + $0x90] sm:$0xff]  }
   0x9   :  { %3439 = vmatpush3.bf16.msra.mxu1 %v4069_v7  ;;  %3382 = vmatprep.subr.bf16.mxu0 %v4075_v8  ;;  %v4171_v24 = vld [vmem:[%s5350_s1 + $0x48] sm:$0xff]   ;;  %v4195_v28 = vld [vmem:[%s5350_s1 + $0x40] sm:$0xff]   ;;  %v4233_v37 = vld [vmem:[%s5350_s1 + $0x178] sm:$0xff]  }
   0xa   :  { %3440 = vmatprep.subr.bf16.mxu1 %v4081_v9  ;;  %v4177_v25 = vld [vmem:[%s5350_s1 + $0xc8] sm:$0xff]   ;;  %v4201_v29 = vld [vmem:[%s5350_s1 + $0xc0] sm:$0xff]   ;;  %v4238_v38 = vld [vmem:[%s5350_s1 + $0x138] sm:$0xff]  }
   0xb   :  { %v4183_v26 = vld [vmem:[%s5350_s1 + $0x8] sm:$0xff]   ;;  %v4207_v30 = vld [vmem:[%s5350_s1] sm:$0xff]   ;;  %v3851_v39 = vld [vmem:[%s5351_s0 + $0x3c] ss:$28 sps:$4 sm:$0xff]  }
   0xc   :  { %3383 = vmatpush3.bf16.msra.mxu0 %v4087_v10  ;;  %v4189_v27 = vld [vmem:[%s5350_s1 + $0x88] sm:$0xff]   ;;  %v4213_v31 = vld [vmem:[%s5350_s1 + $0x80] sm:$0xff]   ;;  %v4251_v41 = vld [vmem:[%s5350_s1 + $0x170] sm:$0xff]  }
   0xd   :  { %3441 = vmatpush3.bf16.msra.mxu1 %v4093_v11  ;;  %3384 = vmatprep.subr.bf16.mxu0 %v4099_v12  ;;  %v3843_v32 = vld [vmem:[%s5351_s0] ss:$28 sps:$4 sm:$0xff]   ;;  %v3846_v34 = vld [vmem:[%s5351_s0 + $0x8] ss:$28 sps:$4 sm:$0xff]   ;;  %v3857_v43 = vld [vmem:[%s5351_s0 + $0x38] ss:$28 sps:$4 sm:$0xff]  }
   0xe   :  { %3442 = vmatprep.subr.bf16.mxu1 %v4105_v13  ;;  %v3845_v33 = vld [vmem:[%s5351_s0 + $0x4] ss:$28 sps:$4 sm:$0xff]   ;;  %v3848_v35 = vld [vmem:[%s5351_s0 + $0xc] ss:$28 sps:$4 sm:$0xff]   ;;  %v4269_v45 = vld [vmem:[%s5350_s1 + $0x130] sm:$0xff]  }
   0xf   :  { %760 = vmatprep.mubr.bf16.mxu0 %v3845_v33  ;;  %848 = vmatprep.mubr.bf16.mxu1 %v3848_v35  ;;  %v3853_v40 = vld [vmem:[%s5351_s0 + $0x44] ss:$28 sps:$4 sm:$0xff]   ;;  %v4256_v42 = vld [vmem:[%s5350_s1 + $0x188] sm:$0xff]   ;;  %v3861_v47 = vld [vmem:[%s5351_s0 + $0x74] ss:$28 sps:$4 sm:$0xff]  }
  0x10   :  { %3385 = vmatpush3.bf16.msra.mxu0 %v4111_v14  ;;  %v3858_v44 = vld [vmem:[%s5351_s0 + $0x40] ss:$28 sps:$4 sm:$0xff]   ;;  %v4274_v46 = vld [vmem:[%s5350_s1 + $0x168] sm:$0xff]   ;;  %v3867_v51 = vld [vmem:[%s5351_s0 + $0x78] ss:$28 sps:$4 sm:$0xff]  }
  0x11   :  { %3443 = vmatpush3.bf16.msra.mxu1 %v4117_v15  ;;  %3386 = vmatprep.subr.bf16.mxu0 %v4123_v16  ;;  %v3863_v48 = vld [vmem:[%s5351_s0 + $0x7c] ss:$28 sps:$4 sm:$0xff]   ;;  %v4288_v49 = vld [vmem:[%s5350_s1 + $0x128] sm:$0xff]   ;;  %v4299_v52 = vld [vmem:[%s5350_s1 + $0x160] sm:$0xff]  }
  0x12   :  { %3444 = vmatprep.subr.bf16.mxu1 %v4129_v17  ;;  %v3866_v50 = vld [vmem:[%s5351_s0 + $0x70] ss:$28 sps:$4 sm:$0xff]   ;;  %v4304_v53 = vld [vmem:[%s5350_s1 + $0x120] sm:$0xff]   ;;  %v4317_v56 = vld [vmem:[%s5350_s1 + $0x158] sm:$0xff]  }
  0x13   :  { %v3870_v54 = vld [vmem:[%s5351_s0 + $0xac] ss:$28 sps:$4 sm:$0xff]   ;;  %v3872_v55 = vld [vmem:[%s5351_s0 + $0xb4] ss:$28 sps:$4 sm:$0xff]   ;;  %v4323_v57 = vld [vmem:[%s5350_s1 + $0x118] sm:$0xff]  }
  0x14   :  { %3387 = vmatpush3.bf16.msra.mxu0 %v4135_v18  ;;  %v3874_v58 = vld [vmem:[%s5351_s0 + $0xa8] ss:$28 sps:$4 sm:$0xff]   ;;  %v3875_v59 = vld [vmem:[%s5351_s0 + $0xb0] ss:$28 sps:$4 sm:$0xff]   ;;  %v3882_v33 = vld [vmem:[%s5351_s0 + $0xe0] ss:$28 sps:$4 sm:$0xff]  }
  0x15   :  { %3445 = vmatpush3.bf16.msra.mxu1 %v4141_v19  ;;  %3388 = vmatprep.subr.bf16.mxu0 %v4147_v20  ;;  %v3878_v60 = vld [vmem:[%s5351_s0 + $0xe4] ss:$28 sps:$4 sm:$0xff]   ;;  %v3880_v61 = vld [vmem:[%s5351_s0 + $0xec] ss:$28 sps:$4 sm:$0xff]   ;;  %v4342_v62 = vld [vmem:[%s5350_s1 + $0x150] sm:$0xff]  }
  0x16   :  { %3446 = vmatprep.subr.bf16.mxu1 %v4153_v21  ;;  %v4347_v63 = vld [vmem:[%s5350_s1 + $0x180] sm:$0xff]   ;;  %vm5086_vm6 = vmand %vm1787_vm4, %vm1788_vm5 }
  0x17   :  { %v3883_v35 = vld [vmem:[%s5351_s0 + $0xe8] ss:$28 sps:$4 sm:$0xff]  }
  0x18   :  { %3389 = vmatpush3.bf16.msra.mxu0 %v4159_v22 }
  0x19   :  { %3447 = vmatpush3.bf16.msra.mxu1 %v4165_v23  ;;  %3390 = vmatprep.subr.bf16.mxu0 %v4171_v24 }
  0x1a   :  { %3448 = vmatprep.subr.bf16.mxu1 %v4177_v25 }
  0x1c   :  { %3391 = vmatpush3.bf16.msra.mxu0 %v4183_v26 }
  0x1d   :  { %3449 = vmatpush3.bf16.msra.mxu1 %v4189_v27  ;;  %3392 = vmatprep.subr.bf16.mxu0 %v4195_v28 }
  0x1e   :  { %3450 = vmatprep.subr.bf16.mxu1 %v4201_v29 }
  0x20   :  { %3393 = vmatpush3.bf16.msra.mxu0 %v4207_v30 }
  0x21   :  { %3451 = vmatpush3.bf16.msra.mxu1 %v4213_v31  ;;  %3494 = vmatprep.subr.bf16.mxu0 %v4233_v37 }
  0x22   :  { %3744 = vmatprep.subr.bf16.mxu1 %v3997_v36 }
  0x23   :  { %761 = vmatmul.mubr.bf16.vlgmr.msra.gmra.mxu0 %v3843_v32  ;;  %v4353_v32 = vld [vmem:[%s5350_s1 + $0x110] sm:$0xff]  }
  0x24   :  { %849 = vmatmul.mubr.bf16.vlgmr.msra.gmra.mxu1 %v3846_v34  ;;  %3495 = vmatpush3.bf16.msra.mxu0 %v4238_v38  ;;  %v4363_v34 = vld [vmem:[%s5350_s1 + $0x148] sm:$0xff]  }
  0x25   :  { %768 = vmatprep.mubr.bf16.mxu0 %v3851_v39  ;;  %856 = vmatprep.mubr.bf16.mxu1 %v3853_v40  ;;  %v4371_v39 = vld [vmem:[%s5350_s1 + $0x108] sm:$0xff]   ;;  %v3887_v40 = vld [vmem:[%s5351_s0 + $0x11c] ss:$28 sps:$4 sm:$0xff]  }
  0x26   :  { %3496 = vmatprep.subr.bf16.mxu0 %v4251_v41  ;;  %3745 = vmatpush3.bf16.msra.mxu1 %v4256_v42 }
  0x27   :  { %3746 = vmatprep.subr.bf16.mxu1 %v3997_v36 }
  0x28   :  { %3497 = vmatpush3.bf16.msra.mxu0 %v4269_v45 }
  0x29   :  { %3498 = vmatprep.subr.bf16.mxu0 %v4274_v46 }
  0x2a   :  { %3747 = vmatpush3.bf16.msra.mxu1 %v4347_v63 }
  0x2b   :  { %769 = vmatmul.mubr.bf16.gmra.mxu0 %v3857_v43  ;;  %3619 = vmatprep.subr.bf16.mxu1 %v4033_v1  ;;  %v3889_v43 = vld [vmem:[%s5351_s0 + $0x124] ss:$28 sps:$4 sm:$0xff]  }
  0x2c   :  { %857 = vmatmul.mubr.bf16.gmra.mxu1 %v3858_v44  ;;  %776 = vmatprep.mubr.bf16.mxu0 %v3861_v47  ;;  %v4384_v44 = vld [vmem:[%s5350_s1 + $0x140] sm:$0xff]   ;;  %v168_v47 = vld [vmem:[%s5351_s0 + $0x150] sm:$0x33] }
  0x2d   :  { %864 = vmatprep.mubr.bf16.mxu1 %v3863_v48  ;;  %3499 = vmatpush3.bf16.msra.mxu0 %v4288_v49  ;;  %v4390_v1 = vld [vmem:[%s5350_s1 + $0x100] sm:$0xff]   ;;  %v169_v48 = vld [vmem:[%s5351_s0 + $0x158] sm:$0x33] }
  0x2e   :  { %3500 = vmatprep.subr.bf16.mxu0 %v4299_v52 }
  0x31   :  { %3501 = vmatpush3.bf16.msra.mxu0 %v4304_v53 }
  0x32   :  { %3502 = vmatprep.subr.bf16.mxu0 %v4317_v56 }
  0x33   :  { %777 = vmatmul.mubr.bf16.gmra.mxu0 %v3866_v50  ;;  %v3891_v50 = vld [vmem:[%s5351_s0 + $0x118] ss:$28 sps:$4 sm:$0xff]  }
  0x34   :  { %865 = vmatmul.mubr.bf16.gmra.mxu1 %v3867_v51  ;;  %784 = vmatprep.mubr.bf16.mxu0 %v3870_v54  ;;  %v3892_v51 = vld [vmem:[%s5351_s0 + $0x120] ss:$28 sps:$4 sm:$0xff]   ;;  %v3184_v54 = vcombine.high %v168_v47, %v168_v47 }
  0x35   :  { %872 = vmatprep.mubr.bf16.mxu1 %v3872_v55  ;;  %3503 = vmatpush3.bf16.msra.mxu0 %v4323_v57  ;;  %v3186_v55 = vcombine.high %v169_v48, %v169_v48 }
  0x36   :  { %3504 = vmatprep.subr.bf16.mxu0 %v4342_v62 }
  0x39   :  { %3505 = vmatpush3.bf16.msra.mxu0 %v4353_v32 }
  0x3a   :  { %3506 = vmatprep.subr.bf16.mxu0 %v4363_v34 }
  0x3b   :  { %785 = vmatmul.mubr.bf16.gmra.mxu0 %v3874_v58  ;;  %v3183_v58 = vcombine.low %v168_v47, %v168_v47  ;;  %v3972_v47 = vld [vmem:[%s5351_s0 + $0x1b8] ss:$28 sps:$4 sm:$0xff]  }
  0x3c   :  { %873 = vmatmul.mubr.bf16.gmra.mxu1 %v3875_v59  ;;  %792 = vmatprep.mubr.bf16.mxu0 %v3878_v60  ;;  %v3185_v59 = vcombine.low %v169_v48, %v169_v48  ;;  %v3901_v60 = vld [vmem:[%s5351_s0 + $0x10] ss:$28 sps:$4 sm:$0xff]  }
  0x3d   :  { %880 = vmatprep.mubr.bf16.mxu1 %v3880_v61  ;;  %3507 = vmatpush3.bf16.msra.mxu0 %v4371_v39  ;;  %v3904_v61 = vld [vmem:[%s5351_s0 + $0x18] ss:$28 sps:$4 sm:$0xff]  }
  0x3e   :  { %3508 = vmatprep.subr.bf16.mxu0 %v4384_v44  ;;  %v3974_v48 = vld [vmem:[%s5351_s0 + $0x1b4] ss:$28 sps:$4 sm:$0xff]  }
  0x41   :  { %3509 = vmatpush3.bf16.msra.mxu0 %v4390_v1 }
  0x42   :  { %3561 = vmatprep.subr.bf16.mxu0 %v4028_v0  ;;  %v3903_v0 = vld [vmem:[%s5351_s0 + $0x14] ss:$28 sps:$4 sm:$0xff]  }
  0x43   :  { %793 = vmatmul.mubr.bf16.gmra.mxu0 %v3882_v33  ;;  %v3905_v33 = vld [vmem:[%s5351_s0 + $0x4c] ss:$28 sps:$4 sm:$0xff]  }
  0x44   :  { %881 = vmatmul.mubr.bf16.gmra.mxu1 %v3883_v35  ;;  %800 = vmatprep.mubr.bf16.mxu0 %v3887_v40  ;;  %v3907_v35 = vld [vmem:[%s5351_s0 + $0x48] ss:$28 sps:$4 sm:$0xff]   ;;  %v3908_v40 = vld [vmem:[%s5351_s0 + $0x50] ss:$28 sps:$4 sm:$0xff]  }
  0x45   :  { %888 = vmatprep.mubr.bf16.mxu1 %v3889_v43  ;;  %v3970_v43 = vld [vmem:[%s5351_s0 + $0x180] ss:$28 sps:$4 sm:$0xff]  }
  0x4b   :  { %801 = vmatmul.mubr.bf16.gmra.mxu0 %v3891_v50  ;;  %v3975_v50 = vld [vmem:[%s5351_s0 + $0x1bc] ss:$28 sps:$4 sm:$0xff]  }
  0x4c   :  { %889 = vmatmul.mubr.bf16.gmra.mxu1 %v3892_v51  ;;  %808 = vmatprep.mubr.bf16.mxu0 %v3184_v54  ;;  %v3976_v51 = vld [vmem:[%s5351_s0 + $0x1f0] ss:$28 sps:$4 sm:$0xff]  }
  0x4d   :  { %896 = vmatprep.mubr.bf16.mxu1 %v3186_v55  ;;  %v3978_v54 = vld [vmem:[%s5351_s0 + $0x1ec] ss:$28 sps:$4 sm:$0xff]   ;;  %v3979_v55 = vld [vmem:[%s5351_s0 + $0x1f4] ss:$28 sps:$4 sm:$0xff]  }
  0x53   :  { %809 = vmatmul.mubr.bf16.gmra.mxu0 %v3183_v58  ;;  %v3980_v58 = vld [vmem:[%s5351_s0 + $0x228] ss:$28 sps:$4 sm:$0xff]  }
  0x54   :  { %897 = vmatmul.mubr.bf16.gmra.mxu1 %v3185_v59  ;;  %936 = vmatprep.mubr.bf16.mxu0 %v3903_v0  ;;  %v3982_v59 = vld [vmem:[%s5351_s0 + $0x224] ss:$28 sps:$4 sm:$0xff]   ;;  %v3983_v0 = vld [vmem:[%s5351_s0 + $0x22c] ss:$28 sps:$4 sm:$0xff]  }
  0x55   :  { %3748 = vmatprep.mubr.msk.bf16.mxu1 %vm3998_vm0, %v3997_v36 }
  0x5b   :  { %937 = vmatmul.mubr.bf16.vlgmr.msra.gmra.mxu0 %v3901_v60  ;;  %v3984_v60 = vld [vmem:[%s5351_s0 + $0x260] ss:$28 sps:$4 sm:$0xff]  }
  0x5c   :  { %3749 = vmatmul.mubr.msk.bf16.vlgmr.msra.gmra.mxu1 %vm706_vm1, %v3904_v61  ;;  %3562 = vmatpush3.bf16.msra.mxu0 %v4039_v2  ;;  %v3909_v2 = vld [vmem:[%s5351_s0 + $0x84] ss:$28 sps:$4 sm:$0xff]  }
  0x5d   :  { %944 = vmatprep.mubr.bf16.mxu0 %v3905_v33  ;;  %3752 = vmatprep.mubr.msk.bf16.mxu1 %vm3998_vm0, %v3997_v36 }
  0x5e   :  { %3563 = vmatprep.subr.bf16.mxu0 %v4051_v4  ;;  %3620 = vmatpush3.bf16.msra.mxu1 %v4045_v3  ;;  %v3911_v3 = vld [vmem:[%s5351_s0 + $0x80] ss:$28 sps:$4 sm:$0xff]   ;;  %v3912_v4 = vld [vmem:[%s5351_s0 + $0x88] ss:$28 sps:$4 sm:$0xff]  }
  0x5f   :  { %3621 = vmatprep.subr.bf16.mxu1 %v4057_v5  ;;  %v3913_v5 = vld [vmem:[%s5351_s0 + $0xbc] ss:$28 sps:$4 sm:$0xff]  }
  0x60   :  { %3564 = vmatpush3.bf16.msra.mxu0 %v4063_v6  ;;  %v3915_v6 = vld [vmem:[%s5351_s0 + $0xb8] ss:$28 sps:$4 sm:$0xff]  }
  0x61   :  { %3565 = vmatprep.subr.bf16.mxu0 %v4075_v8  ;;  %v3917_v8 = vld [vmem:[%s5351_s0 + $0xf4] ss:$28 sps:$4 sm:$0xff]  }
  0x62   :  { %3622 = vmatpush3.bf16.msra.mxu1 %v4069_v7  ;;  %v3916_v7 = vld [vmem:[%s5351_s0 + $0xc0] ss:$28 sps:$4 sm:$0xff]  }
  0x63   :  { %945 = vmatmul.mubr.bf16.gmra.mxu0 %v3907_v35  ;;  %3623 = vmatprep.subr.bf16.mxu1 %v4081_v9  ;;  %v3919_v9 = vld [vmem:[%s5351_s0 + $0xf0] ss:$28 sps:$4 sm:$0xff]  }
  0x64   :  { %3753 = vmatmul.mubr.msk.bf16.gmra.mxu1 %vm706_vm1, %v3908_v40  ;;  %952 = vmatprep.mubr.bf16.mxu0 %v3909_v2 }
  0x65   :  { %3756 = vmatprep.mubr.msk.bf16.mxu1 %vm3998_vm0, %v3997_v36  ;;  %3566 = vmatpush3.bf16.msra.mxu0 %v4087_v10  ;;  %v3920_v10 = vld [vmem:[%s5351_s0 + $0xf8] ss:$28 sps:$4 sm:$0xff]  }
  0x66   :  { %3567 = vmatprep.subr.bf16.mxu0 %v4099_v12  ;;  %3624 = vmatpush3.bf16.msra.mxu1 %v4093_v11  ;;  %v3921_v11 = vld [vmem:[%s5351_s0 + $0x12c] ss:$28 sps:$4 sm:$0xff]   ;;  %v170_v12 = vld [vmem:[%s5351_s0 + $0x160] sm:$0x33] }
  0x67   :  { %3625 = vmatprep.subr.bf16.mxu1 %v4105_v13  ;;  %v3923_v13 = vld [vmem:[%s5351_s0 + $0x128] ss:$28 sps:$4 sm:$0xff]  }
  0x69   :  { %3568 = vmatpush3.bf16.msra.mxu0 %v4111_v14  ;;  %v3924_v14 = vld [vmem:[%s5351_s0 + $0x130] ss:$28 sps:$4 sm:$0xff]  }
  0x6a   :  { %3569 = vmatprep.subr.bf16.mxu0 %v4123_v16  ;;  %3626 = vmatpush3.bf16.msra.mxu1 %v4117_v15  ;;  %v3188_v15 = vcombine.high %v170_v12, %v170_v12  ;;  %v3187_v16 = vcombine.low %v170_v12, %v170_v12  ;;  %v3303_v12 = vld [vmem:[%s5351_s0 + $0x2cc] sm:$0x33] }
  0x6b   :  { %953 = vmatmul.mubr.bf16.gmra.mxu0 %v3911_v3  ;;  %3627 = vmatprep.subr.bf16.mxu1 %v4129_v17  ;;  %v3927_v17 = vld [vmem:[%s5351_s0 + $0x168] ss:$0 sps:$4 sm:$0x33]   ;;  %v3986_v3 = vld [vmem:[%s5351_s0 + $0x25c] ss:$28 sps:$4 sm:$0xff]  }
  0x6c   :  { %3757 = vmatmul.mubr.msk.bf16.gmra.mxu1 %vm706_vm1, %v3912_v4  ;;  %960 = vmatprep.mubr.bf16.mxu0 %v3913_v5  ;;  %v3987_v5 = vld [vmem:[%s5351_s0 + $0x264] ss:$28 sps:$4 sm:$0xff]  }
  0x6d   :  { %3760 = vmatprep.mubr.msk.bf16.mxu1 %vm3998_vm0, %v3997_v36  ;;  %3570 = vmatpush3.bf16.msra.mxu0 %v4135_v18  ;;  %v3930_v18 = vld [vmem:[%s5351_s0 + $0x170] ss:$28 sps:$4 sm:$0xff]  }
  0x6e   :  { %3571 = vmatprep.subr.bf16.mxu0 %v4147_v20  ;;  %3628 = vmatpush3.bf16.msra.mxu1 %v4141_v19  ;;  %v3933_v19 = vld [vmem:[%s5351_s0 + $0x178] ss:$28 sps:$4 sm:$0xff]   ;;  %v3928_v20 = vld [vmem:[%s5351_s0 + $0x16c] ss:$28 sps:$4 sm:$0xff]  }
  0x6f   :  { %3629 = vmatprep.subr.bf16.mxu1 %v4153_v21  ;;  %v3931_v21 = vld [vmem:[%s5351_s0 + $0x174] ss:$28 sps:$4 sm:$0xff]  }
  0x71   :  { %3572 = vmatpush3.bf16.msra.mxu0 %v4159_v22  ;;  %v3934_v22 = vld [vmem:[%s5351_s0 + $0x1a8] ss:$28 sps:$4 sm:$0xff]  }
  0x72   :  { %3573 = vmatprep.subr.bf16.mxu0 %v4171_v24  ;;  %3630 = vmatpush3.bf16.msra.mxu1 %v4165_v23  ;;  %v3936_v23 = vld [vmem:[%s5351_s0 + $0x1b0] ss:$28 sps:$4 sm:$0xff]   ;;  %v3938_v24 = vld [vmem:[%s5351_s0 + $0x1a4] ss:$28 sps:$4 sm:$0xff]  }
  0x73   :  { %961 = vmatmul.mubr.bf16.gmra.mxu0 %v3915_v6  ;;  %3631 = vmatprep.subr.bf16.mxu1 %v4177_v25  ;;  %v3939_v25 = vld [vmem:[%s5351_s0 + $0x1ac] ss:$28 sps:$4 sm:$0xff]   ;;  %v3988_v6 = vld [vmem:[%s5351_s0 + $0x298] ss:$28 sps:$4 sm:$0xff]  }
  0x74   :  { %3761 = vmatmul.mubr.msk.bf16.gmra.mxu1 %vm706_vm1, %v3916_v7  ;;  %968 = vmatprep.mubr.bf16.mxu0 %v3917_v8 }
  0x75   :  { %3764 = vmatprep.mubr.msk.bf16.mxu1 %vm3998_vm0, %v3997_v36  ;;  %3574 = vmatpush3.bf16.msra.mxu0 %v4183_v26  ;;  %v3940_v26 = vld [vmem:[%s5351_s0 + $0x1e0] ss:$28 sps:$4 sm:$0xff]  }
  0x76   :  { %3575 = vmatprep.subr.bf16.mxu0 %v4195_v28  ;;  %3632 = vmatpush3.bf16.msra.mxu1 %v4189_v27  ;;  %v3942_v27 = vld [vmem:[%s5351_s0 + $0x1e8] ss:$28 sps:$4 sm:$0xff]   ;;  %v3944_v28 = vld [vmem:[%s5351_s0 + $0x1dc] ss:$28 sps:$4 sm:$0xff]  }
  0x77   :  { %3633 = vmatprep.subr.bf16.mxu1 %v4201_v29  ;;  %v3945_v29 = vld [vmem:[%s5351_s0 + $0x1e4] ss:$28 sps:$4 sm:$0xff]  }
  0x79   :  { %3576 = vmatpush3.bf16.msra.mxu0 %v4207_v30  ;;  %v3946_v30 = vld [vmem:[%s5351_s0 + $0x218] ss:$28 sps:$4 sm:$0xff]  }
  0x7a   :  { %3634 = vmatpush3.bf16.msra.mxu1 %v4213_v31  ;;  %3677 = vmatprep.subr.bf16.mxu0 %v4233_v37  ;;  %v3948_v31 = vld [vmem:[%s5351_s0 + $0x220] ss:$28 sps:$4 sm:$0xff]   ;;  %v3950_v37 = vld [vmem:[%s5351_s0 + $0x214] ss:$28 sps:$4 sm:$0xff]  }
  0x7b   :  { %969 = vmatmul.mubr.bf16.gmra.mxu0 %v3919_v9  ;;  %3776 = vmatprep.subr.bf16.mxu1 %v3997_v36 }
  0x7c   :  { %3765 = vmatmul.mubr.msk.bf16.gmra.mxu1 %vm706_vm1, %v3920_v10  ;;  %976 = vmatprep.mubr.bf16.mxu0 %v3921_v11 }
  0x7d   :  { %3768 = vmatprep.mubr.msk.bf16.mxu1 %vm3998_vm0, %v3997_v36 }
  0x83   :  { %977 = vmatmul.mubr.bf16.gmra.mxu0 %v3923_v13 }
  0x84   :  { %3769 = vmatmul.mubr.msk.bf16.gmra.mxu1 %vm706_vm1, %v3924_v14  ;;  %984 = vmatprep.mubr.bf16.mxu0 %v3188_v15  ;;  %v3990_v15 = vld [vmem:[%s5351_s0 + $0x294] ss:$28 sps:$4 sm:$0xff]  }
  0x85   :  { %3772 = vmatprep.mubr.msk.bf16.mxu1 %vm3998_vm0, %v3997_v36 }
  0x8b   :  { %985 = vmatmul.mubr.bf16.gmra.mxu0 %v3187_v16 }
  0x8c   :  { %3773 = vmatmul.mubr.msk.bf16.gmra.mxu1 %vm706_vm1, %v3927_v17  ;;  %2133 = vmatprep.mubr.bf16.mxu0 %v3930_v18  ;;  %v3991_v17 = vld [vmem:[%s5351_s0 + $0x29c] ss:$28 sps:$4 sm:$0xff]   ;;  %v3352_v18 = vcombine.high %v3303_v12, %v3303_v12 }
  0x8d   :  { %2221 = vmatprep.mubr.bf16.mxu1 %v3933_v19 }
  0x93   :  { %2134 = vmatmul.mubr.bf16.vlgmr.msra.gmra.mxu0 %v3928_v20 }
  0x94   :  { %2222 = vmatmul.mubr.bf16.vlgmr.msra.gmra.mxu1 %v3931_v21  ;;  %3678 = vmatpush3.bf16.msra.mxu0 %v4238_v38  ;;  %v3951_v38 = vld [vmem:[%s5351_s0 + $0x21c] ss:$28 sps:$4 sm:$0xff]  }
  0x95   :  { %2141 = vmatprep.mubr.bf16.mxu0 %v3934_v22  ;;  %2229 = vmatprep.mubr.bf16.mxu1 %v3936_v23 }
  0x96   :  { %3679 = vmatprep.subr.bf16.mxu0 %v4251_v41  ;;  %3777 = vmatpush3.bf16.msra.mxu1 %v4256_v42  ;;  %v3952_v41 = vld [vmem:[%s5351_s0 + $0x250] ss:$28 sps:$4 sm:$0xff]   ;;  %v3954_v42 = vld [vmem:[%s5351_s0 + $0x258] ss:$28 sps:$4 sm:$0xff]  }
  0x97   :  { %3778 = vmatprep.subr.bf16.mxu1 %v3997_v36 }
  0x98   :  { %3680 = vmatpush3.bf16.msra.mxu0 %v4269_v45  ;;  %v3956_v45 = vld [vmem:[%s5351_s0 + $0x24c] ss:$28 sps:$4 sm:$0xff]  }
  0x99   :  { %3681 = vmatprep.subr.bf16.mxu0 %v4274_v46  ;;  %v3957_v46 = vld [vmem:[%s5351_s0 + $0x254] ss:$28 sps:$4 sm:$0xff]  }
  0x9a   :  { %3779 = vmatpush3.bf16.msra.mxu1 %v4347_v63 }
  0x9b   :  { %2142 = vmatmul.mubr.bf16.gmra.mxu0 %v3938_v24 }
  0x9c   :  { %2230 = vmatmul.mubr.bf16.gmra.mxu1 %v3939_v25  ;;  %2149 = vmatprep.mubr.bf16.mxu0 %v3940_v26  ;;  %v3351_v26 = vcombine.low %v3303_v12, %v3303_v12 }
  0x9d   :  { %2237 = vmatprep.mubr.bf16.mxu1 %v3942_v27  ;;  %3682 = vmatpush3.bf16.msra.mxu0 %v4288_v49  ;;  %v3958_v49 = vld [vmem:[%s5351_s0 + $0x288] ss:$28 sps:$4 sm:$0xff]  }
  0x9e   :  { %3683 = vmatprep.subr.bf16.mxu0 %v4299_v52  ;;  %v3960_v52 = vld [vmem:[%s5351_s0 + $0x290] ss:$28 sps:$4 sm:$0xff]  }
  0xa1   :  { %3684 = vmatpush3.bf16.msra.mxu0 %v4304_v53  ;;  %v3301_v53 = vld [vmem:[%s5351_s0 + $0x2bc] sm:$0x33] }
  0xa2   :  { %3685 = vmatprep.subr.bf16.mxu0 %v4317_v56  ;;  %v3302_v56 = vld [vmem:[%s5351_s0 + $0x2c4] sm:$0x33]  ;;  %v3348_v63 = vcombine.high %v3301_v53, %v3301_v53 }
  0xa3   :  { %2150 = vmatmul.mubr.bf16.gmra.mxu0 %v3944_v28  ;;  %v3994_v28 = vld [vmem:[%s5351_s0 + $0x2d4] ss:$0 sps:$4 sm:$0x33]  }
  0xa4   :  { %2238 = vmatmul.mubr.bf16.gmra.mxu1 %v3945_v29  ;;  %2157 = vmatprep.mubr.bf16.mxu0 %v3946_v30 }
  0xa5   :  { %2245 = vmatprep.mubr.bf16.mxu1 %v3948_v31  ;;  %3686 = vmatpush3.bf16.msra.mxu0 %v4323_v57  ;;  %v3962_v57 = vld [vmem:[%s5351_s0 + $0x284] ss:$28 sps:$4 sm:$0xff]  }
  0xa6   :  { %3687 = vmatprep.subr.bf16.mxu0 %v4342_v62  ;;  %v3963_v62 = vld [vmem:[%s5351_s0 + $0x28c] ss:$28 sps:$4 sm:$0xff]  }
  0xa9   :  { %3688 = vmatpush3.bf16.msra.mxu0 %v4353_v32  ;;  %v3350_v32 = vcombine.high %v3302_v56, %v3302_v56 }
  0xaa   :  { %3689 = vmatprep.subr.bf16.mxu0 %v4363_v34  ;;  %v3347_v34 = vcombine.low %v3301_v53, %v3301_v53 }
  0xab   :  { %2158 = vmatmul.mubr.bf16.gmra.mxu0 %v3950_v37 }
  0xac   :  { %2246 = vmatmul.mubr.bf16.gmra.mxu1 %v3951_v38  ;;  %2165 = vmatprep.mubr.bf16.mxu0 %v3952_v41 }
  0xad   :  { %2253 = vmatprep.mubr.bf16.mxu1 %v3954_v42  ;;  %3690 = vmatpush3.bf16.msra.mxu0 %v4371_v39  ;;  %v3349_v39 = vcombine.low %v3302_v56, %v3302_v56 }
  0xae   :  { %3691 = vmatprep.subr.bf16.mxu0 %v4384_v44  ;;  %v3968_v44 = vld [vmem:[%s5351_s0 + $0x17c] ss:$28 sps:$4 sm:$0xff]  }
  0xb1   :  { %3692 = vmatpush3.bf16.msra.mxu0 %v4390_v1  ;;  %v3971_v1 = vld [vmem:[%s5351_s0 + $0x184] ss:$28 sps:$4 sm:$0xff]  }
  0xb3   :  { %2166 = vmatmul.mubr.bf16.gmra.mxu0 %v3956_v45 }
  0xb4   :  { %2254 = vmatmul.mubr.bf16.gmra.mxu1 %v3957_v46  ;;  %2173 = vmatprep.mubr.bf16.mxu0 %v3958_v49 }
  0xb5   :  { %2261 = vmatprep.mubr.bf16.mxu1 %v3960_v52 }
  0xbb   :  { %2174 = vmatmul.mubr.bf16.gmra.mxu0 %v3962_v57 }
  0xbc   :  { %2262 = vmatmul.mubr.bf16.gmra.mxu1 %v3963_v62  ;;  %2181 = vmatprep.mubr.bf16.mxu0 %v3348_v63 }
  0xbd   :  { %2269 = vmatprep.mubr.bf16.mxu1 %v3350_v32 }
  0xc3   :  { %2182 = vmatmul.mubr.bf16.gmra.mxu0 %v3347_v34 }
  0xc4   :  { %2270 = vmatmul.mubr.bf16.gmra.mxu1 %v3349_v39  ;;  %2309 = vmatprep.mubr.bf16.mxu0 %v3970_v43 }
  0xc5   :  { %3780 = vmatprep.mubr.msk.bf16.mxu1 %vm3998_vm0, %v3997_v36 }
  0xcb   :  { %2310 = vmatmul.mubr.bf16.vlgmr.msra.gmra.mxu0 %v3968_v44 }
  0xcc   :  { %3781 = vmatmul.mubr.msk.bf16.vlgmr.msra.gmra.mxu1 %vm706_vm1, %v3971_v1  ;;  %2317 = vmatprep.mubr.bf16.mxu0 %v3972_v47 }
  0xcd   :  { %3784 = vmatprep.mubr.msk.bf16.mxu1 %vm3998_vm0, %v3997_v36 }
  0xd3   :  { %2318 = vmatmul.mubr.bf16.gmra.mxu0 %v3974_v48 }
  0xd4   :  { %3785 = vmatmul.mubr.msk.bf16.gmra.mxu1 %vm706_vm1, %v3975_v50  ;;  %2325 = vmatprep.mubr.bf16.mxu0 %v3976_v51 }
  0xd5   :  { %3788 = vmatprep.mubr.msk.bf16.mxu1 %vm3998_vm0, %v3997_v36 }
  0xdb   :  { %2326 = vmatmul.mubr.bf16.gmra.mxu0 %v3978_v54 }
  0xdc   :  { %3789 = vmatmul.mubr.msk.bf16.gmra.mxu1 %vm706_vm1, %v3979_v55  ;;  %2333 = vmatprep.mubr.bf16.mxu0 %v3980_v58 }
  0xdd   :  { %3792 = vmatprep.mubr.msk.bf16.mxu1 %vm3998_vm0, %v3997_v36 }
  0xe3   :  { %v4666_v61 = vpop.f32.mrf.mxu0  ;;  %2334 = vmatmul.mubr.bf16.gmra.mxu0 %v3982_v59 }
  0xe4   :  { %v4668_v33 = vpop.f32.mrf.mxu1  ;;  %3793 = vmatmul.mubr.msk.bf16.gmra.mxu1 %vm706_vm1, %v3983_v0  ;;  %2341 = vmatprep.mubr.bf16.mxu0 %v3984_v60 }
  0xe5   :  { %v4671_v35 = vpop.f32.mrf.mxu0  ;;  %3796 = vmatprep.mubr.msk.bf16.mxu1 %vm3998_vm0, %v3997_v36 }
  0xe6   :  { %v4675_v40 = vpop.f32.mrf.mxu1 }
  0xe7   :  { %v4677_v2 = vpop.f32.mrf.mxu0 }
  0xe8   :  { %v4682_v4 = vpop.f32.mrf.mxu1 }
  0xe9   :  { %v4690_v7 = vpop.f32.mrf.mxu0 }
  0xea   :  { %v4692_v8 = vpop.f32.mrf.mxu1 }
  0xeb   :  { %v4694_v9 = vpop.f32.mrf.mxu0  ;;  %2342 = vmatmul.mubr.bf16.gmra.mxu0 %v3986_v3  ;;  %v3396_v3 = vadd.f32 %v4671_v35, %v4666_v61  ;;  %v4816_v35 = vld [vmem:[%s5352_s2] ss:$0 sm:$0xff] }
  0xec   :  { %v4696_v10 = vpop.f32.mrf.mxu1  ;;  %3797 = vmatmul.mubr.msk.bf16.gmra.mxu1 %vm706_vm1, %v3987_v5  ;;  %2349 = vmatprep.mubr.bf16.mxu0 %v3988_v6  ;;  %v3454_v5 = vadd.f32 %v4675_v40, %v4668_v33 }
  0xed   :  { %v4699_v11 = vpop.f32.mrf.mxu0  ;;  %3800 = vmatprep.mubr.msk.bf16.mxu1 %vm3998_vm0, %v3997_v36 }
  0xee   :  { %v4706_v13 = vpop.f32.mrf.mxu1  ;;  %v3402_v61 = vadd.f32 %v4699_v11, %v4694_v9 }
  0xef   :  { %v4708_v14 = vpop.f32.mrf.mxu0  ;;  %v3460_v33 = vadd.f32 %v4706_v13, %v4696_v10 }
  0xf0   :  { %v4713_v16 = vpop.f32.mrf.mxu1 }
  0xf1   :  { %v4718_v19 = vpop.f32.mrf.mxu0  ;;  %v859_v13 = vadd.f32 %v3460_v33, %v3402_v61 }
  0xf2   :  { %v4720_v20 = vpop.f32.mrf.mxu1 }
  0xf3   :  { %v4722_v21 = vpop.f32.mrf.mxu0  ;;  %2350 = vmatmul.mubr.bf16.gmra.mxu0 %v3990_v15 }
  0xf4   :  { %v4724_v22 = vpop.f32.mrf.mxu1  ;;  %3801 = vmatmul.mubr.msk.bf16.gmra.mxu1 %vm706_vm1, %v3991_v17  ;;  %2357 = vmatprep.mubr.bf16.mxu0 %v3352_v18  ;;  %v851_v18 = vadd.f32 %v3454_v5, %v3396_v3  ;;  %v4821_v3 = vld [vmem:[%s5353_s3] ss:$0 sm:$0xff] }
  0xf5   :  { %v4727_v23 = vpop.f32.mrf.mxu0  ;;  %3804 = vmatprep.mubr.msk.bf16.mxu1 %vm3998_vm0, %v3997_v36 }
  0xf6   :  { %v4731_v24 = vpop.f32.mrf.mxu1  ;;  %v3408_v61 = vadd.f32 %v4727_v23, %v4722_v21  ;;  %v3999_v23 = vmov 1966171168  }
  0xf7   :  { %v4733_v25 = vpop.f32.mrf.mxu0 }
  0xf8   :  { %v4735_v27 = vpop.f32.mrf.mxu1 }
  0xf9   :  { %v4740_v29 = vpop.f32.mrf.mxu0 }
  0xfa   :  { %v4742_v30 = vpop.f32.mrf.mxu1  ;;  %v3411_v21 = vadd.f32 %v4740_v29, %v4733_v25 }
  0xfb   :  { %v4744_v31 = vpop.f32.mrf.mxu0  ;;  %2358 = vmatmul.mubr.bf16.gmra.mxu0 %v3351_v26  ;;  %v3399_v26 = vadd.f32 %v4690_v7, %v4677_v2 }
  0xfc   :  { %v4746_v37 = vpop.f32.mrf.mxu1  ;;  %3805 = vmatmul.mubr.msk.bf16.gmra.mxu1 %vm706_vm1, %v3994_v28  ;;  %v3457_v28 = vadd.f32 %v4692_v8, %v4682_v4 }
  0xfd   :  { %v4749_v36 = vpop.f32.mrf.mxu0 }
  0xfe   :  { %v4751_v38 = vpop.f32.mrf.mxu1  ;;  %v854_v2 = vadd.f32 %v3457_v28, %v3399_v26  ;;  %v3414_v29 = vadd.f32 %v4749_v36, %v4744_v31 }
  0xff   :  { %v4753_v41 = vpop.f32.mrf.mxu0 }
 0x100   :  { %v4755_v42 = vpop.f32.mrf.mxu1 }
 0x101   :  { %v4757_v45 = vpop.f32.mrf.mxu0 }
 0x102   :  { %v4759_v46 = vpop.f32.mrf.mxu1 }
 0x103   :  { %v4761_v49 = vpop.f32.mrf.mxu0  ;;  %v3475_v31 = vadd.f32 %v4759_v46, %v4755_v42 }
 0x104   :  { %v4763_v52 = vpop.f32.mrf.mxu1 }
 0x105   :  { %v4765_v53 = vpop.f32.mrf.mxu0 }
 0x106   :  { %v4767_v56 = vpop.f32.mrf.mxu1 }
 0x107   :  { %v4769_v57 = vpop.f32.mrf.mxu0 }
 0x108   :  { %v4771_v62 = vpop.f32.mrf.mxu1 }
 0x109   :  { %v4773_v63 = vpop.f32.mrf.mxu0 }
 0x10a   :  { %v4775_v32 = vpop.f32.mrf.mxu1 }
 0x10b   :  { %v4777_v34 = vpop.f32.mrf.mxu0 }
 0x10c   :  { %v4779_v39 = vpop.f32.mrf.mxu1 }
 0x10d   :  { %v4781_v43 = vpop.f32.mrf.mxu0 }
 0x10e   :  { %v4783_v44 = vpop.f32.mrf.mxu1 }
 0x10f   :  { %v4785_v1 = vpop.f32.mrf.mxu0 }
 0x110   :  { %v4787_v47 = vpop.f32.mrf.mxu1 }
 0x111   :  { %v4789_v48 = vpop.f32.mrf.mxu0 }
 0x112   :  { %v4791_v50 = vpop.f32.mrf.mxu1 }
 0x113   :  { %v4793_v51 = vpop.f32.mrf.mxu0 }
 0x114   :  { %v4795_v54 = vpop.f32.mrf.mxu1 }
 0x115   :  { %5356 = vst [vmem:[#allocation3_spill] sm:$0xff] %v4795_v54  ;;  %v4797_v55 = vpop.f32.mrf.mxu0 }
 0x116   :  { %v4799_v58 = vpop.f32.mrf.mxu1 }
 0x117   :  { %5357 = vst [vmem:[#allocation4_spill] sm:$0xff] %v4799_v58  ;;  %v3433_v59 = vpop.f32.mrf.mxu0 }
 0x118   :  { %v3491_v0 = vpop.f32.mrf.mxu1 }
 0x119   :  { %v3434_v60 = vpop.f32.mrf.mxu0 }
 0x11a   :  { %v3492_v6 = vpop.f32.mrf.mxu1 }
 0x11b   :  { %v3510_v12 = vpop.f32.mrf.mxu0  ;;  %v3405_v6 = vadd.f32 %v4718_v19, %v4708_v14  ;;  %v3466_v14 = vadd.f32 %v4731_v24, %v4724_v22  ;;  %v1189_v24 = vunpack.c.l.s4 %v3999_v23 }
 0x11c   :  { %v1026_v15 = vpop.f32.mrf.mxu1 }
 0x11d   :  { %v3511_v17 = vpop.f32.mrf.mxu0 }
 0x11e   :  { %v3512_v59 = vadd.f32 %v3511_v17, %v3510_v12  ;;  %v3750_v0 = vpop.f32.mrf.mxu1 }
 0x11f   :  { %v3513_v60 = vpop.f32.mrf.mxu0 }
 0x120   :  { %v939_v58 = vadd.f32 %v3512_v59, %v851_v18  ;;  %v1029_v54 = vpop.f32.mrf.mxu1 }
 0x121   :  { %v3514_v40 = vpop.f32.mrf.mxu0 }
 0x122   :  { %v1027_v7 = vadd.f32 %v1026_v15, %v939_v58  ;;  %v3515_v4 = vadd.f32 %v3514_v40, %v3513_v60  ;;  %v3751_v8 = vpop.f32.mrf.mxu1  ;;  %v3463_v58 = vadd.f32 %v4720_v20, %v4713_v16 }
 0x123   :  { %v3516_v5 = vpop.f32.mrf.mxu0 }
 0x124   :  { %v1086_v9 = vmul.f32 %v4816_v35, %v1027_v7  ;;  %v942_v11 = vadd.f32 %v3515_v4, %v854_v2  ;;  %v1034_v10 = vpop.f32.mrf.mxu1  ;;  %v862_v16 = vadd.f32 %v3463_v58, %v3405_v6  ;;  %v3469_v6 = vadd.f32 %v4742_v30, %v4735_v27 }
 0x125   :  { %v3517_v12 = vpop.f32.mrf.mxu0  ;;  %v1190_v30 = vunpack.c.0.s8 %v1189_v24 }
 0x126   :  { %v1105_v15 = vadd.f32 %v4821_v3, %v1086_v9  ;;  %v1030_v17 = vadd.f32 %v1029_v54, %v942_v11  ;;  %v3518_v18 = vadd.f32 %v3517_v12, %v3516_v5  ;;  %v3754_v26 = vpop.f32.mrf.mxu1  ;;  %v867_v11 = vadd.f32 %v3466_v14, %v3408_v61 }
 0x127   :  { %v3519_v28 = vpop.f32.mrf.mxu0 }
 0x128   :  { %v1118_v59 = vmax.f32 %v1105_v15, 0.0  ;;  %v1087_v0 = vmul.f32 %v4816_v35, %v1030_v17  ;;  %v947_v60 = vadd.f32 %v3518_v18, %v859_v13  ;;  %v1037_v40 = vpop.f32.mrf.mxu1  ;;  %v1191_v13 = vlaneseq }
 0x129   :  { %v3520_v19 = vpop.f32.mrf.mxu0 }
 0x12a   :  { %1132 = vst.msk [vmem:[#allocation2] sm:$0xff] %vm1131_vm2, %v1118_v59  ;;  %v1106_v20 = vadd.f32 %v4821_v3, %v1087_v0  ;;  %v1035_v54 = vadd.f32 %v1034_v10, %v947_v60  ;;  %v3521_v33 = vadd.f32 %v3520_v19, %v3519_v28  ;;  %v3755_v2 = vpop.f32.mrf.mxu1  ;;  %v3472_v59 = vadd.f32 %v4751_v38, %v4746_v37 }
 0x12b   :  { %v3522_v7 = vpop.f32.mrf.mxu0  ;;  %v1192_v0 = vshrl.u32 %v1191_v13, 7  ;;  %v870_v60 = vadd.f32 %v3469_v6, %v3411_v21 }
 0x12c   :  { %v1119_v4 = vmax.f32 %v1106_v20, 0.0  ;;  %v1088_v8 = vmul.f32 %v4816_v35, %v1035_v54  ;;  %v950_v5 = vadd.f32 %v3521_v33, %v862_v16  ;;  %v1042_v9 = vpop.f32.mrf.mxu1  ;;  %v3417_v16 = vadd.f32 %v4757_v45, %v4753_v41 }
 0x12d   :  { %v3523_v22 = vpop.f32.mrf.mxu0  ;;  %v875_v33 = vadd.f32 %v3472_v59, %v3414_v29 }
 0x12e   :  { %1133 = vst.msk [vmem:[#allocation2 + $0x8] sm:$0xff] %vm1131_vm2, %v1119_v4  ;;  %v1107_v10 = vadd.f32 %v4821_v3, %v1088_v8  ;;  %v1038_v12 = vadd.f32 %v1037_v40, %v950_v5  ;;  %v3524_v58 = vadd.f32 %v3523_v22, %v3522_v7  ;;  %v3758_v15 = vpop.f32.mrf.mxu1  ;;  %v4855_v8 = vsub.s32 %v1190_v30, %v1192_v0 }
 0x12f   :  { %v3525_v17 = vpop.f32.mrf.mxu0  ;;  %v878_v46 = vadd.f32 %v3475_v31, %v3417_v16  ;;  %v3484_v16 = vadd.f32 %v4783_v44, %v4779_v39  ;;  %v3429_v31 = vadd.f32 %v4789_v48, %v4785_v1 }
 0x130   :  { %v1120_v18 = vmax.f32 %v1107_v10, 0.0  ;;  %v1089_v26 = vmul.f32 %v4816_v35, %v1038_v12  ;;  %v955_v28 = vadd.f32 %v3524_v58, %v867_v11  ;;  %v1045_v25 = vpop.f32.mrf.mxu1  ;;  %v3420_v11 = vadd.f32 %v4765_v53, %v4761_v49 }
 0x131   :  { %v3526_v27 = vpop.f32.mrf.mxu0  ;;  %v3478_v10 = vadd.f32 %v4767_v56, %v4763_v52  ;;  %v3423_v12 = vadd.f32 %v4773_v63, %v4769_v57  ;;  %v3481_v58 = vadd.f32 %v4775_v32, %v4771_v62 }
 0x132   :  { %1134 = vst.msk [vmem:[#allocation2 + $0x10] sm:$0xff] %vm1131_vm2, %v1120_v18  ;;  %v1108_v40 = vadd.f32 %v4821_v3, %v1089_v26  ;;  %v1043_v61 = vadd.f32 %v1042_v9, %v955_v28  ;;  %v3527_v14 = vadd.f32 %v3526_v27, %v3525_v17  ;;  %v3759_v19 = vpop.f32.mrf.mxu1 }
 0x133   :  { %v3528_v36 = vpop.f32.mrf.mxu0  ;;  %v883_v29 = vadd.f32 %v3478_v10, %v3420_v11  ;;  %v886_v62 = vadd.f32 %v3481_v58, %v3423_v12  ;;  %v3426_v19 = vadd.f32 %v4781_v43, %v4777_v34 }
 0x134   :  { %v1121_v20 = vmax.f32 %v1108_v40, 0.0  ;;  %v1090_v37 = vmul.f32 %v4816_v35, %v1043_v61  ;;  %v958_v38 = vadd.f32 %v3527_v14, %v870_v60  ;;  %v1050_v54 = vpop.f32.mrf.mxu1 }
 0x135   :  { %v3529_v2 = vpop.f32.mrf.mxu0  ;;  %v1146_v7 = vld [vmem:[#allocation2] ss:$2 sm:$0xff]  ;;  %v1160_v4 = vld [vmem:[#allocation2 + $0x1] ss:$2 sm:$0xff] }
 0x136   :  { %1135 = vst.msk [vmem:[#allocation2 + $0x18] sm:$0xff] %vm1131_vm2, %v1121_v20  ;;  %v1109_v5 = vadd.f32 %v4821_v3, %v1090_v37  ;;  %v1046_v41 = vadd.f32 %v1045_v25, %v958_v38  ;;  %v3530_v45 = vadd.f32 %v3529_v2, %v3528_v36  ;;  %v3762_v9 = vpop.f32.mrf.mxu1  ;;  %v1173_v42 = vmax.f32 %v1146_v7, %v1160_v4 }
 0x137   :  { %v3531_v21 = vpop.f32.mrf.mxu0  ;;  %v3487_v37 = vadd.f32 %v4791_v50, %v4787_v47 }
 0x138   :  { %v1122_v22 = vmax.f32 %v1109_v5, 0.0  ;;  %v1091_v23 = vmul.f32 %v4816_v35, %v1046_v41  ;;  %v963_v24 = vadd.f32 %v3530_v45, %v875_v33  ;;  %v1053_v13 = vpop.f32.mrf.mxu1  ;;  %v1187_v6 = vcombine.high %v1173_v42, %v1173_v42 }
 0x139   :  { %v3532_v15 = vpop.f32.mrf.mxu0  ;;  %v1194_v17 = vrot.slane %v1173_v42, %v4855_v8  ;;  %v891_v42 = vadd.f32 %v3484_v16, %v3426_v19 }
 0x13a   :  { %1136 = vst.msk [vmem:[#allocation2 + $0x20] sm:$0xff] %vm1131_vm2, %v1122_v22  ;;  %v1110_v49 = vadd.f32 %v4821_v3, %v1091_v23  ;;  %v1051_v53 = vadd.f32 %v1050_v54, %v963_v24  ;;  %v3533_v18 = vadd.f32 %v3532_v15, %v3531_v21  ;;  %v3763_v26 = vpop.f32.mrf.mxu1  ;;  %v1201_v28 = vrot.slane %v1187_v6, %v4855_v8 }
 0x13b   :  { %v3534_v25 = vpop.f32.mrf.mxu0  ;;  %v1202_v59 = vcombine.high %v1194_v17, %v1194_v17  ;;  %v4885_v4 = vrot.slane %v1194_v17, %v4855_v8  ;;  %v894_v23 = vadd.f32 %v3487_v37, %v3429_v31 }
 0x13c   :  { %v1123_v52 = vmax.f32 %v1110_v49, 0.0  ;;  %v1092_v56 = vmul.f32 %v4816_v35, %v1051_v53  ;;  %v966_v57 = vadd.f32 %v3533_v18, %v878_v46  ;;  %v1058_v63 = vpop.f32.mrf.mxu1  ;;  %v1203_v14 = vcombine.high %v1201_v28, %v1201_v28 }
 0x13d   :  { %v3535_v32 = vpop.f32.mrf.mxu0  ;;  %v1148_v27 = vld [vmem:[#allocation2 + $0x10] ss:$2 sm:$0xff]  ;;  %v1162_v30 = vld [vmem:[#allocation2 + $0x11] ss:$2 sm:$0xff]  ;;  %v1224_v34 = vrot.slane %v1202_v59, %v4855_v8  ;;  %v4895_v41 = vrot.slane %v1201_v28, %v4855_v8  ;;  %v3432_v59 = vadd.f32 %v4797_v55, %v4793_v51 }
 0x13e   :  { %1137 = vst.msk [vmem:[#allocation2 + $0x28] sm:$0xff] %vm1131_vm2, %v1123_v52  ;;  %v1111_v0 = vadd.f32 %v4821_v3, %v1092_v56  ;;  %v1054_v60 = vadd.f32 %v1053_v13, %v966_v57  ;;  %v3536_v40 = vadd.f32 %v3535_v32, %v3534_v25  ;;  %v3766_v61 = vpop.f32.mrf.mxu1  ;;  %v1174_v20 = vmax.f32 %v1148_v27, %v1162_v30  ;;  %v5358_v27 = vld [vmem:[#allocation3_spill] sm:$0xff]  ;;  %v5359_v30 = vld [vmem:[#allocation4_spill] sm:$0xff] }
 0x13f   :  { %v3537_v36 = vpop.f32.mrf.mxu0  ;;  %v4892_v50 = vrot.slane %v1203_v14, %v4855_v8  ;;  %v1232_v13 = vcombine.high %v4885_v4, %v4885_v4  ;;  %v1234_v6 = vcombine.high %v1224_v34, %v1224_v34  ;;  %v1233_v28 = vcombine.high %v4895_v41, %v4895_v41 }
 0x140   :  { %v1124_v38 = vmax.f32 %v1111_v0, 0.0  ;;  %v1093_v54 = vmul.f32 %v4816_v35, %v1054_v60  ;;  %v971_v33 = vadd.f32 %v3536_v40, %v883_v29  ;;  %v1061_v2 = vpop.f32.mrf.mxu1  ;;  %v1236_v39 = vcombine.high %v1174_v20, %v1174_v20 }
 0x141   :  { %v3538_v7 = vpop.f32.mrf.mxu0  ;;  %v1243_v43 = vrot.slane %v1174_v20, %v4855_v8  ;;  %v1235_v18 = vcombine.high %v4892_v50, %v4892_v50  ;;  %v3490_v0 = vadd.f32 %v5359_v30, %v5358_v27  ;;  %v1553_v40 = vmax.f32 %v4885_v4, %v4892_v50 }
 0x142   :  { %1138 = vst.msk [vmem:[#allocation2 + $0x30] sm:$0xff] %vm1131_vm2, %v1124_v38  ;;  %v1112_v44 = vadd.f32 %v4821_v3, %v1093_v54  ;;  %v1059_v1 = vadd.f32 %v1058_v63, %v971_v33  ;;  %v3539_v47 = vadd.f32 %v3538_v7, %v3537_v36  ;;  %v3767_v48 = vpop.f32.mrf.mxu1  ;;  %v4898_v45 = vrot.slane %v1236_v39, %v4855_v8 }
 0x143   :  { %v3540_v5 = vpop.f32.mrf.mxu0  ;;  %v1259_v9 = vrot.slane %v1243_v43, %v4855_v8  ;;  %v1251_v25 = vcombine.high %v1243_v43, %v1243_v43  ;;  %v1555_v36 = vmax.f32 %v1232_v13, %v1235_v18  ;;  %v1554_v51 = vmax.f32 %v1224_v34, %v1233_v28 }
 0x144   :  { %v1125_v46 = vmax.f32 %v1112_v44, 0.0  ;;  %v1094_v11 = vmul.f32 %v4816_v35, %v1059_v1  ;;  %v974_v21 = vadd.f32 %v3539_v47, %v886_v62  ;;  %v1066_v22 = vpop.f32.mrf.mxu1  ;;  %v1252_v10 = vcombine.high %v4898_v45, %v4898_v45 }
 0x145   :  { %v3541_v24 = vpop.f32.mrf.mxu0  ;;  %v1150_v12 = vld [vmem:[#allocation2 + $0x20] ss:$2 sm:$0xff]  ;;  %v1164_v58 = vld [vmem:[#allocation2 + $0x21] ss:$2 sm:$0xff]  ;;  %v1556_v56 = vmax.f32 %v1234_v6, %v1259_v9  ;;  %v1273_v55 = vrot.slane %v1251_v25, %v4855_v8  ;;  %v1281_v37 = vcombine.high %v1259_v9, %v1259_v9  ;;  %v899_v48 = vadd.f32 %v3490_v0, %v3432_v59 }
 0x146   :  { %1139 = vst.msk [vmem:[#allocation2 + $0x38] sm:$0xff] %vm1131_vm2, %v1125_v46  ;;  %v1113_v15 = vadd.f32 %v4821_v3, %v1094_v11  ;;  %v1062_v17 = vadd.f32 %v1061_v2, %v974_v21  ;;  %v3542_v49 = vadd.f32 %v3541_v24, %v3540_v5  ;;  %v3770_v53 = vpop.f32.mrf.mxu1  ;;  %v4913_v52 = vrot.slane %v1252_v10, %v4855_v8 }
 0x147   :  { %v3543_v26 = vpop.f32.mrf.mxu0  ;;  %v1175_v32 = vmax.f32 %v1150_v12, %v1164_v58  ;;  %v1604_v4 = vcombine.low %v1555_v36, %v1556_v56  ;;  %v1603_v46 = vcombine.low %v1553_v40, %v1554_v51  ;;  %v1557_v11 = vmax.f32 %v4895_v41, %v1273_v55 }
 0x148   :  { %v1126_v57 = vmax.f32 %v1113_v15, 0.0  ;;  %v1095_v63 = vmul.f32 %v4816_v35, %v1062_v17  ;;  %v979_v29 = vadd.f32 %v3542_v49, %v891_v42  ;;  %v1069_v62 = vpop.f32.mrf.mxu1  ;;  %v1284_v61 = vcombine.high %v4913_v52, %v4913_v52 }
 0x149   :  { %v3544_v60 = vpop.f32.mrf.mxu0  ;;  %v1292_v38 = vrot.slane %v1175_v32, %v4855_v8  ;;  %v1285_v44 = vcombine.high %v1175_v32, %v1175_v32  ;;  %v1283_v21 = vcombine.high %v1273_v55, %v1273_v55  ;;  %v4941_v58 = vrot.slane %v4898_v45, %v4855_v8 }
 0x14a   :  { %1140 = vst.msk [vmem:[#allocation2 + $0x40] sm:$0xff] %vm1131_vm2, %v1126_v57  ;;  %v1114_v14 = vadd.f32 %v4821_v3, %v1095_v63  ;;  %v1067_v19 = vadd.f32 %v1066_v22, %v979_v29  ;;  %v3545_v16 = vadd.f32 %v3544_v60, %v3543_v26  ;;  %v3771_v31 = vpop.f32.mrf.mxu1  ;;  %v1558_v43 = vmax.f32 %v1281_v37, %v1284_v61 }
 0x14b   :  { %v3546_v20 = vpop.f32.mrf.mxu0  ;;  %v1300_v1 = vcombine.high %v1292_v38, %v1292_v38  ;;  %v4930_v47 = vrot.slane %v1292_v38, %v4855_v8  ;;  %v1620_v49 = vrot.slane %v1604_v4, %v4855_v8  ;;  %v1299_v41 = vrot.slane %v1285_v44, %v4855_v8 }
 0x14c   :  { %v1127_v54 = vmax.f32 %v1114_v14, 0.0  ;;  %v1096_v33 = vmul.f32 %v4816_v35, %v1067_v19  ;;  %v982_v2 = vadd.f32 %v3545_v16, %v894_v23  ;;  %v1074_v7 = vpop.f32.mrf.mxu1  ;;  %v1605_v17 = vcombine.low %v1557_v11, %v1558_v43 }
 0x14d   :  { %v3547_v39 = vpop.f32.mrf.mxu0  ;;  %v4936_v22 = vrot.slane %v1300_v1, %v4855_v8  ;;  %v1152_v23 = vld [vmem:[#allocation2 + $0x30] ss:$2 sm:$0xff]  ;;  %v1166_v24 = vld [vmem:[#allocation2 + $0x31] ss:$2 sm:$0xff]  ;;  %v1559_v53 = vmax.f32 %v1283_v21, %v4930_v47  ;;  %v1613_v57 = vrot.slane %v1603_v46, %v4855_v8  ;;  %v1301_v14 = vcombine.high %v1299_v41, %v1299_v41 }
 0x14e   :  { %1141 = vst.msk [vmem:[#allocation2 + $0x48] sm:$0xff] %vm1131_vm2, %v1127_v54  ;;  %v1115_v34 = vadd.f32 %v4821_v3, %v1096_v33  ;;  %v1070_v50 = vadd.f32 %v1069_v62, %v982_v2  ;;  %v3548_v5 = vadd.f32 %v3547_v39, %v3546_v20  ;;  %v3774_v9 = vpop.f32.mrf.mxu1  ;;  %v1176_v56 = vmax.f32 %v1152_v23, %v1166_v24 }
 0x14f   :  { %v3549_v42 = vpop.f32.mrf.mxu0  ;;  %v1560_v25 = vmax.f32 %v4941_v58, %v4936_v22  ;;  %v1635_v27 = vcombine.low %v1613_v57, %v1620_v49  ;;  %v1627_v61 = vrot.slane %v1605_v17, %v4855_v8  ;;  %v1315_v38 = vrot.slane %v1299_v41, %v4855_v8 }
 0x150   :  { %v1128_v13 = vmax.f32 %v1115_v34, 0.0  ;;  %v1097_v6 = vmul.f32 %v4816_v35, %v1070_v50  ;;  %v987_v10 = vadd.f32 %v3548_v5, %v899_v48  ;;  %v1077_v12 = vpop.f32.mrf.mxu1  ;;  %v1334_v30 = vcombine.high %v1176_v56, %v1176_v56 }
 0x151   :  { %v3550_v15 = vpop.f32.mrf.mxu0  ;;  %v1606_v32 = vcombine.low %v1559_v53, %v1560_v25  ;;  %v1341_v0 = vrot.slane %v1176_v56, %v4855_v8  ;;  %v1643_v44 = vrot.slane %v1635_v27, %v4855_v8  ;;  %v1329_v1 = vrot.slane %v1301_v14, %v4855_v8 }
 0x152   :  { %1142 = vst.msk [vmem:[#allocation2 + $0x50] sm:$0xff] %vm1131_vm2, %v1128_v13  ;;  %v1116_v18 = vadd.f32 %v4821_v3, %v1097_v6  ;;  %v1075_v26 = vadd.f32 %v1074_v7, %v987_v10  ;;  %v3775_v28 = vpop.f32.mrf.mxu1  ;;  %v1348_v2 = vrot.slane %v1334_v30, %v4855_v8  ;;  %v1282_v50 = vcombine.high %v4941_v58, %v4941_v58 }
 0x153   :  { %v4950_v45 = vpop.f32.mrf.mxu0  ;;  %v1634_v19 = vrot.slane %v1606_v32, %v4855_v8  ;;  %v1349_v20 = vcombine.high %v1341_v0, %v1341_v0  ;;  %v4968_v51 = vrot.slane %v1341_v0, %v4855_v8  ;;  %v1332_v5 = vcombine.high %v4936_v22, %v4936_v22 }
 0x154   :  { %v1129_v63 = vmax.f32 %v1116_v18, 0.0  ;;  %v1098_v29 = vmul.f32 %v4816_v35, %v1075_v26  ;;  %v4954_v62 = vpop.f32.mrf.mxu1  ;;  %v1330_v24 = vcombine.high %v4930_v47, %v4930_v47  ;;  %v1331_v13 = vcombine.high %v1315_v38, %v1315_v38 }
 0x155   :  { %v4956_v59 = vpop.f32.mrf.mxu0  ;;  %v1154_v16 = vld [vmem:[#allocation2 + $0x40] ss:$2 sm:$0xff]  ;;  %v1168_v31 = vld [vmem:[#allocation2 + $0x41] ss:$2 sm:$0xff]  ;;  %v1636_v54 = vcombine.low %v1627_v61, %v1634_v19  ;;  %v1371_v7 = vrot.slane %v1349_v20, %v4855_v8  ;;  %v1379_v4 = vcombine.high %v4968_v51, %v4968_v51  ;;  %v1350_v6 = vcombine.high %v1348_v2, %v1348_v2 }
 0x156   :  { %1143 = vst.msk [vmem:[#allocation2 + $0x58] sm:$0xff] %vm1131_vm2, %v1129_v63  ;;  %v1117_v60 = vadd.f32 %v4821_v3, %v1098_v29  ;;  %v4961_v40 = vpop.f32.mrf.mxu1  ;;  %v1177_v39 = vmax.f32 %v1154_v16, %v1168_v31  ;;  %v1364_v22 = vrot.slane %v1348_v2, %v4855_v8  ;;  %v1562_v18 = vmax.f32 %v1282_v50, %v1332_v5 }
 0x157   :  { %v4965_v36 = vpop.f32.mrf.mxu0  ;;  %v1650_v48 = vrot.slane %v1636_v54, %v4855_v8  ;;  %v1381_v46 = vcombine.high %v1371_v7, %v1371_v7  ;;  %v1563_v11 = vmax.f32 %v1315_v38, %v1371_v7  ;;  %v1564_v21 = vmax.f32 %v1329_v1, %v1379_v4 }
 0x158   :  { %v1130_v55 = vmax.f32 %v1117_v60, 0.0  ;;  %v4970_v37 = vpop.f32.mrf.mxu1  ;;  %v1383_v10 = vcombine.high %v1177_v39, %v1177_v39  ;;  %v1390_v49 = vrot.slane %v1177_v39, %v4855_v8  ;;  %v1333_v26 = vcombine.high %v1329_v1, %v1329_v1 }
 0x159   :  { %v4973_v33 = vpop.f32.mrf.mxu0  ;;  %v1651_v42 = vcombine.low %v1643_v44, %v1650_v48  ;;  %v1565_v25 = vmax.f32 %v1331_v13, %v1381_v46  ;;  %v1653_v56 = vcombine.low %v1563_v11, %v1564_v21  ;;  %v1561_v32 = vmax.f32 %v4913_v52, %v1330_v24 }
 0x15a   :  { %1145 = vst.msk [vmem:[#allocation2 + $0x60] sm:$0xf] %vm1144_vm3, %v1130_v55  ;;  %v4980_v43 = vpop.f32.mrf.mxu1  ;;  %v1397_v28 = vrot.slane %v1383_v10, %v4855_v8  ;;  %v1398_v57 = vcombine.high %v1390_v49, %v1390_v49  ;;  %v1378_v27 = vrot.slane %v1350_v6, %v4855_v8  ;;  %v1406_v0 = vrot.slane %v1390_v49, %v4855_v8 }
 0x15b   :  { %v4985_v34 = vpop.f32.mrf.mxu0  ;;  %v3370_v17 = vpack.c.bf16 %v1651_v42, %v1651_v42  ;;  %v1566_v61 = vmax.f32 %v1333_v26, %v1364_v22  ;;  %v1652_v20 = vcombine.low %v1561_v32, %v1562_v18  ;;  %v1380_v54 = vcombine.high %v1364_v22, %v1364_v22 }
 0x15c   :  { %v4991_v9 = vpop.f32.mrf.mxu1  ;;  %v1399_v30 = vcombine.high %v1397_v28, %v1397_v28  ;;  %v1413_v14 = vrot.slane %v1397_v28, %v4855_v8  ;;  %v1420_v19 = vrot.slane %v1398_v57, %v4855_v8  ;;  %v1669_v7 = vrot.slane %v1653_v56, %v4855_v8 }
 0x15d   :  { %v4993_v23 = vpop.f32.mrf.mxu0  ;;  %v1156_v12 = vld [vmem:[#allocation2 + $0x50] ss:$2 sm:$0xff]  ;;  %v1170_v15 = vld [vmem:[#allocation2 + $0x51] ss:$2 sm:$0xff]  ;;  %1784 = vst.msk [vmem:[%s5354_s4] sm:$0xf] %vm1144_vm3, %v3370_v17  ;;  %v1654_v2 = vcombine.low %v1565_v25, %v1566_v61  ;;  %v1428_v44 = vcombine.high %v1406_v0, %v1406_v0  ;;  %v1567_v11 = vmax.f32 %v4968_v51, %v1378_v27  ;;  %v1662_v6 = vrot.slane %v1652_v20, %v4855_v8 }
 0x15e   :  { %v4997_v58 = vpop.f32.mrf.mxu1  ;;  %v1178_v41 = vmax.f32 %v1156_v12, %v1170_v15  ;;  %v1427_v55 = vrot.slane %v1399_v30, %v4855_v8  ;;  %v1430_v4 = vcombine.high %v1420_v19, %v1420_v19  ;;  %v1429_v1 = vcombine.high %v1413_v14, %v1413_v14 }
 0x15f   :  { %v5001_v53 = vpop.f32.mrf.mxu0  ;;  %v1382_v10 = vcombine.high %v1378_v27, %v1378_v27  ;;  %v1676_v51 = vrot.slane %v1654_v2, %v4855_v8  ;;  %v1684_v28 = vcombine.low %v1662_v6, %v1669_v7 }
 0x160   :  { %v5004_v47 = vpop.f32.mrf.mxu1  ;;  %v1432_v63 = vcombine.high %v1178_v41, %v1178_v41  ;;  %v1439_v16 = vrot.slane %v1178_v41, %v4855_v8  ;;  %v1431_v48 = vcombine.high %v1427_v55, %v1427_v55  ;;  %v1568_v21 = vmax.f32 %v1380_v54, %v1430_v4 }
 0x161   :  { %v5010_v29 = vpop.f32.mrf.mxu0  ;;  %v1158_v5 = vld [vmem:[#allocation2 + $0x60] ss:$2 sm:$0x3]  ;;  %v1172_v42 = vld [vmem:[#allocation2 + $0x61] ss:$2 sm:$0x3]  ;;  %v1570_v25 = vmax.f32 %v1406_v0, %v1427_v55  ;;  %v1571_v56 = vmax.f32 %v1420_v19, %v1429_v1 }
 0x162   :  { %v5015_v60 = vpop.f32.mrf.mxu1  ;;  %v1446_v52 = vrot.slane %v1432_v63, %v4855_v8  ;;  %v1447_v24 = vcombine.high %v1439_v16, %v1439_v16  ;;  %v1572_v12 = vmax.f32 %v1428_v44, %v1431_v48  ;;  %v1655_v22 = vcombine.low %v1567_v11, %v1568_v21 }
 0x163   :  { %v5020_v31 = vpop.f32.mrf.mxu0  ;;  %v1455_v49 = vrot.slane %v1439_v16, %v4855_v8  ;;  %v1179_v41 = vmax.f32 %v1158_v5, %v1172_v42  ;;  %v1569_v63 = vmax.f32 %v1382_v10, %v1413_v14 }
 0x164   :  { %v5024_v38 = vpop.f32.mrf.mxu1  ;;  %v1448_v50 = vcombine.high %v1446_v52, %v1446_v52  ;;  %v1462_v18 = vrot.slane %v1446_v52, %v4855_v8  ;;  %v1683_v32 = vrot.slane %v1655_v22, %v4855_v8  ;;  %v1469_v27 = vrot.slane %v1447_v24, %v4855_v8 }
 0x165   :  { %v5027_v39 = vpop.f32.mrf.mxu0  ;;  %v1702_v16 = vcombine.low %v1571_v56, %v1572_v12  ;;  %v1487_v54 = vrot.slane %v1179_v41, %v4855_v8  ;;  %v1477_v0 = vcombine.high %v1455_v49, %v1455_v49  ;;  %v1701_v14 = vcombine.low %v1569_v63, %v1570_v25 }
 0x166   :  { %v5029_v46 = vpop.f32.mrf.mxu1  ;;  %v1476_v15 = vrot.slane %v1448_v50, %v4855_v8  ;;  %v1478_v30 = vcombine.high %v1462_v18, %v1462_v18  ;;  %v1685_v2 = vcombine.low %v1676_v51, %v1683_v32  ;;  %v1479_v19 = vcombine.high %v1469_v27, %v1469_v27 }
 0x167   :  { %v5032_v13 = vpop.f32.mrf.mxu0  ;;  %v1488_v44 = vcombine.high %v1487_v54, %v1487_v54  ;;  %v1495_v1 = vrot.slane %v1487_v54, %v4855_v8  ;;  %v1692_v50 = vrot.slane %v1684_v28, %v4855_v8  ;;  %v1718_v21 = vrot.slane %v1702_v16, %v4855_v8 }
 0x168   :  { %v5036_v17 = vpop.f32.mrf.mxu1  ;;  %v1573_v20 = vmax.f32 %v1455_v49, %v1476_v15  ;;  %v1480_v52 = vcombine.high %v1476_v15, %v1476_v15  ;;  %v1574_v55 = vmax.f32 %v1469_v27, %v1478_v30  ;;  %v1699_v5 = vrot.slane %v1685_v2, %v4855_v8 }
 0x169   :  { %v5040_v26 = vpop.f32.mrf.mxu0  ;;  %v1502_v24 = vrot.slane %v1488_v44, %v4855_v8  ;;  %v1576_v6 = vmax.f32 %v1479_v19, %v1495_v1  ;;  %v1711_v49 = vrot.slane %v1701_v14, %v4855_v8  ;;  %v5360_v2 = vmov 0 }
 0x16a   :  { %v5043_v57 = vpop.f32.mrf.mxu1  ;;  %v1575_v42 = vmax.f32 %v1477_v0, %v1480_v52  ;;  %v1703_v10 = vcombine.low %v1573_v20, %v1574_v55  ;;  %v1700_v15 = vcombine.low %v1692_v50, %v1699_v5  ;;  %v5361_v2 = vsel %vm5086_vm6, 4294967295, %v5360_v2  ;;  %v1790_v0 = vld [vmem:[%s5354_s4 + $0xc] sm:$0x1] }
 0x16b   :  { %v5047_v61 = vpop.f32.mrf.mxu0  ;;  %v1577_v41 = vmax.f32 %v1462_v18, %v1502_v24  ;;  %v1733_v63 = vcombine.low %v1711_v49, %v1718_v21  ;;  %5362 = vst [vmem:[#allocation3_spill] sm:$0xff] %v5361_v2 }
 0x16c   :  { %v5050_v4 = vpop.f32.mrf.mxu1  ;;  %v1704_v51 = vcombine.low %v1575_v42, %v1576_v6  ;;  %v3371_v25 = vpack.c.bf16 %v1700_v15, %v1700_v15  ;;  %v1725_v32 = vrot.slane %v1703_v10, %v4855_v8 }
 0x16d   :  { %v5052_v7 = vpop.f32.mrf.mxu0  ;;  %v1756_v30 = vrot.slane %v1577_v41, %v4855_v8  ;;  %v1741_v55 = vrot.slane %v1733_v63, %v4855_v8 }
 0x16e   :  { %v5055_v48 = vpop.f32.mrf.mxu1  ;;  %v1732_v27 = vrot.slane %v1704_v51, %v4855_v8  ;;  %1785 = vst.msk [vmem:[%s5354_s4 + $0x4] sm:$0xf] %vm1144_vm3, %v3371_v25 }
 0x16f   :  { %v5059_v11 = vpop.f32.mrf.mxu0  ;;  %v1763_v52 = vrot.slane %v1756_v30, %v4855_v8 }
 0x170   :  { %v5063_v12 = vpop.f32.mrf.mxu1  ;;  %v1734_v20 = vcombine.low %v1725_v32, %v1732_v27 }
 0x171   :  { %v5065_v22 = vpop.f32.mrf.mxu0  ;;  %v3373_v44 = vpack.c.bf16 %v1763_v52, %v1763_v52 }
 0x172   :  { %v5068_v28 = vpop.f32.mrf.mxu1  ;;  %v1748_v14 = vrot.slane %v1734_v20, %v4855_v8 }
 0x173   :  { %v5070_v56 = vpop.f32.mrf.mxu0  ;;  %v1791_v42 = vsel %vm5086_vm6, %v3373_v44, %v1790_v0  ;;  %v3637_v44 = vadd.f32 %v4961_v40, %v4954_v62  ;;  %v3643_v62 = vadd.f32 %v4997_v58, %v4991_v9 }
 0x174   :  { %v5075_v16 = vpop.f32.mrf.mxu1  ;;  %v1749_v5 = vcombine.low %v1741_v55, %v1748_v14  ;;  %1792 = vst [vmem:[%s5354_s4 + $0xc] sm:$0x1] %v1791_v42  ;;  %v3579_v14 = vadd.f32 %v4956_v59, %v4950_v45  ;;  %v3585_v45 = vadd.f32 %v4993_v23, %v4985_v34  ;;  %v3646_v34 = vadd.f32 %v5015_v60, %v5004_v47 }
 0x175   :  { %v5081_v18 = vpop.f32.mrf.mxu0 }
 0x176   :  { %v5084_v54 = vpop.f32.mrf.mxu1  ;;  %v3372_v6 = vpack.c.bf16 %v1749_v5, %v1749_v5 }
 0x177   :  { %v5093_v19 = vpop.f32.mrf.mxu0 }
 0x178   :  { %v5097_v1 = vpop.f32.mrf.mxu1  ;;  %1786 = vst.msk [vmem:[%s5354_s4 + $0x8] sm:$0xf] %vm1144_vm3, %v3372_v6 }
 0x179   :  { %v5099_v50 = vpop.f32.mrf.mxu0 }
 0x17a   :  { %v5103_v21 = vpop.f32.mrf.mxu1 }
 0x17b   :  { %v5108_v24 = vpop.f32.mrf.mxu0 }
 0x17c   :  { %v5110_v10 = vpop.f32.mrf.mxu1 }
 0x17d   :  { %v5112_v15 = vpop.f32.mrf.mxu0 }
 0x17e   :  { %v5118_v49 = vpop.f32.mrf.mxu1 }
 0x17f   :  { %v5120_v41 = vpop.f32.mrf.mxu0 }
 0x180   :  { %v5122_v51 = vpop.f32.mrf.mxu1 }
 0x181   :  { %v5124_v25 = vpop.f32.mrf.mxu0 }
 0x182   :  { %v5126_v63 = vpop.f32.mrf.mxu1 }
 0x183   :  { %5363 = vst [vmem:[#allocation4_spill] sm:$0xff] %v5126_v63  ;;  %v5128_v32 = vpop.f32.mrf.mxu0 }
 0x184   :  { %5364 = vst [vmem:[#allocation5_spill] sm:$0xff] %v5128_v32  ;;  %v5130_v27 = vpop.f32.mrf.mxu1  ;;  %v2224_v32 = vadd.f32 %v3637_v44, %v3579_v14 }
 0x185   :  { %5365 = vst [vmem:[#allocation6_spill] sm:$0xff] %v5130_v27  ;;  %v5132_v30 = vpop.f32.mrf.mxu0  ;;  %v3582_v27 = vadd.f32 %v4973_v33, %v4965_v36 }
 0x186   :  { %5366 = vst [vmem:[#allocation7_spill] sm:$0xff] %v5132_v30  ;;  %v5134_v20 = vpop.f32.mrf.mxu1 }
 0x187   :  { %5367 = vst [vmem:[#allocation8_spill] sm:$0xff] %v5134_v20  ;;  %v3616_v52 = vpop.f32.mrf.mxu0  ;;  %v3640_v20 = vadd.f32 %v4980_v43, %v4970_v37 }
 0x188   :  { %v3674_v0 = vpop.f32.mrf.mxu1 }
 0x189   :  { %v3617_v55 = vpop.f32.mrf.mxu0  ;;  %v2227_v40 = vadd.f32 %v3640_v20, %v3582_v27 }
 0x18a   :  { %v3675_v5 = vpop.f32.mrf.mxu1 }
 0x18b   :  { %v3693_v42 = vpop.f32.mrf.mxu0 }
 0x18c   :  { %v2399_v6 = vpop.f32.mrf.mxu1 }
 0x18d   :  { %v3694_v2 = vpop.f32.mrf.mxu0 }
 0x18e   :  { %v3695_v52 = vadd.f32 %v3694_v2, %v3693_v42  ;;  %v3782_v0 = vpop.f32.mrf.mxu1  ;;  %v2232_v2 = vadd.f32 %v3643_v62, %v3585_v45 }
 0x18f   :  { %v3696_v55 = vpop.f32.mrf.mxu0 }
 0x190   :  { %v2312_v30 = vadd.f32 %v3695_v52, %v2224_v32  ;;  %v2402_v63 = vpop.f32.mrf.mxu1  ;;  %v3588_v32 = vadd.f32 %v5010_v29, %v5001_v53  ;;  %v3649_v53 = vadd.f32 %v5029_v46, %v5024_v38 }
 0x191   :  { %v3697_v59 = vpop.f32.mrf.mxu0 }
 0x192   :  { %v2400_v14 = vadd.f32 %v2399_v6, %v2312_v30  ;;  %v3698_v44 = vadd.f32 %v3697_v59, %v3696_v55  ;;  %v3783_v5 = vpop.f32.mrf.mxu1  ;;  %v3591_v55 = vadd.f32 %v5027_v39, %v5020_v31  ;;  %v2235_v45 = vadd.f32 %v3646_v34, %v3588_v32 }
 0x193   :  { %v3699_v36 = vpop.f32.mrf.mxu0  ;;  %v3594_v31 = vadd.f32 %v5040_v26, %v5032_v13  ;;  %v3652_v39 = vadd.f32 %v5043_v57, %v5036_v17 }
 0x194   :  { %v2453_v33 = vmul.f32 %v4816_v35, %v2400_v14  ;;  %v2315_v37 = vadd.f32 %v3698_v44, %v2227_v40  ;;  %v2407_v43 = vpop.f32.mrf.mxu1 }
 0x195   :  { %v3700_v42 = vpop.f32.mrf.mxu0 }
 0x196   :  { %v2466_v9 = vadd.f32 %v4821_v3, %v2453_v33  ;;  %v2403_v23 = vadd.f32 %v2402_v63, %v2315_v37  ;;  %v3701_v58 = vadd.f32 %v3700_v42, %v3699_v36  ;;  %v3786_v27 = vpop.f32.mrf.mxu1  ;;  %v2240_v36 = vadd.f32 %v3649_v53, %v3591_v55 }
 0x197   :  { %v3702_v30 = vpop.f32.mrf.mxu0  ;;  %v3597_v27 = vadd.f32 %v5052_v7, %v5047_v61 }
 0x198   :  { %v2479_v20 = vmax.f32 %v2466_v9, 0.0  ;;  %v2454_v6 = vmul.f32 %v4816_v35, %v2403_v23  ;;  %v2320_v52 = vadd.f32 %v3701_v58, %v2232_v2  ;;  %v2410_v0 = vpop.f32.mrf.mxu1  ;;  %v2243_v58 = vadd.f32 %v3652_v39, %v3594_v31 }
 0x199   :  { %v3703_v29 = vpop.f32.mrf.mxu0 }
 0x19a   :  { %2492 = vst.msk [vmem:[#allocation2] sm:$0xff] %vm1131_vm2, %v2479_v20  ;;  %v2467_v47 = vadd.f32 %v4821_v3, %v2454_v6  ;;  %v2408_v60 = vadd.f32 %v2407_v43, %v2320_v52  ;;  %v3704_v63 = vadd.f32 %v3703_v29, %v3702_v30  ;;  %v3787_v62 = vpop.f32.mrf.mxu1  ;;  %v3655_v30 = vadd.f32 %v5055_v48, %v5050_v4 }
 0x19b   :  { %v3705_v59 = vpop.f32.mrf.mxu0  ;;  %v3600_v20 = vadd.f32 %v5065_v22, %v5059_v11  ;;  %v3658_v6 = vadd.f32 %v5068_v28, %v5063_v12 }
 0x19c   :  { %v2480_v40 = vmax.f32 %v2467_v47, 0.0  ;;  %v2455_v14 = vmul.f32 %v4816_v35, %v2408_v60  ;;  %v2323_v44 = vadd.f32 %v3704_v63, %v2235_v45  ;;  %v2415_v5 = vpop.f32.mrf.mxu1  ;;  %v2248_v11 = vadd.f32 %v3655_v30, %v3597_v27 }
 0x19d   :  { %v3706_v38 = vpop.f32.mrf.mxu0  ;;  %v2251_v22 = vadd.f32 %v3658_v6, %v3600_v20  ;;  %v5223_v20 = vadd.f32 %v5124_v25, %v5120_v41 }
 0x19e   :  { %2493 = vst.msk [vmem:[#allocation2 + $0x8] sm:$0xff] %vm1131_vm2, %v2480_v40  ;;  %v2468_v46 = vadd.f32 %v4821_v3, %v2455_v14  ;;  %v2411_v33 = vadd.f32 %v2410_v0, %v2323_v44  ;;  %v3707_v37 = vadd.f32 %v3706_v38, %v3705_v59  ;;  %v3790_v43 = vpop.f32.mrf.mxu1  ;;  %v5186_v59 = vld [vmem:[%s5352_s2] ss:$0 sm:$0xff]  ;;  %v3661_v44 = vadd.f32 %v5084_v54, %v5075_v16 }
 0x19f   :  { %v3708_v2 = vpop.f32.mrf.mxu0  ;;  %v3664_v38 = vadd.f32 %v5103_v21, %v5097_v1  ;;  %v3609_v54 = vadd.f32 %v5112_v15, %v5108_v24 }
 0x1a0   :  { %v2481_v32 = vmax.f32 %v2468_v46, 0.0  ;;  %v2456_v42 = vmul.f32 %v4816_v35, %v2411_v33  ;;  %v2328_v34 = vadd.f32 %v3707_v37, %v2240_v36  ;;  %v2418_v9 = vpop.f32.mrf.mxu1 }
 0x1a1   :  { %v3709_v23 = vpop.f32.mrf.mxu0 }
 0x1a2   :  { %2494 = vst.msk [vmem:[#allocation2 + $0x10] sm:$0xff] %vm1131_vm2, %v2481_v32  ;;  %v2469_v13 = vadd.f32 %v4821_v3, %v2456_v42  ;;  %v2416_v17 = vadd.f32 %v2415_v5, %v2328_v34  ;;  %v3710_v26 = vadd.f32 %v3709_v23, %v3708_v2  ;;  %v3791_v57 = vpop.f32.mrf.mxu1  ;;  %v3606_v5 = vadd.f32 %v5099_v50, %v5093_v19 }
 0x1a3   :  { %v3711_v52 = vpop.f32.mrf.mxu0  ;;  %v3667_v19 = vadd.f32 %v5118_v49, %v5110_v10 }
 0x1a4   :  { %v2482_v0 = vmax.f32 %v2469_v13, 0.0  ;;  %v2457_v55 = vmul.f32 %v4816_v35, %v2416_v17  ;;  %v2331_v53 = vadd.f32 %v3710_v26, %v2243_v58  ;;  %v2423_v29 = vpop.f32.mrf.mxu1  ;;  %v2259_v24 = vadd.f32 %v3664_v38, %v3606_v5 }
 0x1a5   :  { %v2505_v45 = vld [vmem:[#allocation2] ss:$2 sm:$0xff]  ;;  %v2512_v47 = vld [vmem:[#allocation2 + $0x1] ss:$2 sm:$0xff]  ;;  %v3712_v60 = vpop.f32.mrf.mxu0  ;;  %v5217_v17 = vadd.f32 %v3667_v19, %v3609_v54 }
 0x1a6   :  { %v2519_v63 = vmax.f32 %v2505_v45, %v2512_v47  ;;  %2495 = vst.msk [vmem:[#allocation2 + $0x18] sm:$0xff] %vm1131_vm2, %v2482_v0  ;;  %v2470_v61 = vadd.f32 %v4821_v3, %v2457_v55  ;;  %v2419_v4 = vadd.f32 %v2418_v9, %v2331_v53  ;;  %v3713_v7 = vadd.f32 %v3712_v60, %v3711_v52  ;;  %v3794_v48 = vpop.f32.mrf.mxu1 }
 0x1a7   :  { %v3714_v12 = vpop.f32.mrf.mxu0  ;;  %v3603_v3 = vadd.f32 %v5081_v18, %v5070_v56  ;;  %v5202_v56 = vld [vmem:[%s5353_s3] ss:$0 sm:$0xff] }
 0x1a8   :  { %v2533_v28 = vcombine.high %v2519_v63, %v2519_v63  ;;  %v2540_v62 = vrot.slane %v2519_v63, %v4855_v8  ;;  %v2483_v35 = vmax.f32 %v2470_v61, 0.0  ;;  %v2458_v40 = vmul.f32 %v5186_v59, %v2419_v4  ;;  %v2426_v14 = vpop.f32.mrf.mxu1 }
 0x1a9   :  { %v2336_v36 = vadd.f32 %v3713_v7, %v2248_v11  ;;  %v3715_v31 = vpop.f32.mrf.mxu0  ;;  %v2256_v2 = vadd.f32 %v3661_v44, %v3603_v3 }
 0x1aa   :  { %v2547_v39 = vrot.slane %v2533_v28, %v4855_v8  ;;  %v2548_v46 = vcombine.high %v2540_v62, %v2540_v62  ;;  %2496 = vst.msk [vmem:[#allocation2 + $0x20] sm:$0xff] %vm1131_vm2, %v2483_v35  ;;  %v2471_v16 = vadd.f32 %v5202_v56, %v2458_v40  ;;  %v3795_v18 = vpop.f32.mrf.mxu1  ;;  %v3716_v50 = vadd.f32 %v3715_v31, %v3714_v12  ;;  %v5368_v28 = vld [vmem:[#allocation4_spill] sm:$0xff]  ;;  %v5369_v35 = vld [vmem:[#allocation5_spill] sm:$0xff]  ;;  %v5370_v40 = vld [vmem:[#allocation7_spill] sm:$0xff] }
 0x1ab   :  { %v2424_v1 = vadd.f32 %v2423_v29, %v2336_v36  ;;  %v3717_v21 = vpop.f32.mrf.mxu0  ;;  %v2556_v6 = vrot.slane %v2540_v62, %v4855_v8  ;;  %v3670_v62 = vadd.f32 %v5368_v28, %v5122_v51 }
 0x1ac   :  { %v2549_v33 = vcombine.high %v2547_v39, %v2547_v39  ;;  %v5210_v37 = vrot.slane %v2547_v39, %v4855_v8  ;;  %v2431_v43 = vpop.f32.mrf.mxu1  ;;  %v2484_v34 = vmax.f32 %v2471_v16, 0.0  ;;  %v2339_v23 = vadd.f32 %v3716_v50, %v2251_v22 }
 0x1ad   :  { %v2506_v32 = vld [vmem:[#allocation2 + $0x10] ss:$2 sm:$0xff]  ;;  %v2513_v42 = vld [vmem:[#allocation2 + $0x11] ss:$2 sm:$0xff]  ;;  %v2459_v9 = vmul.f32 %v5186_v59, %v2424_v1  ;;  %v3718_v58 = vpop.f32.mrf.mxu0  ;;  %v2570_v15 = vrot.slane %v2548_v46, %v4855_v8  ;;  %v2578_v36 = vcombine.high %v2556_v6, %v2556_v6 }
 0x1ae   :  { %v5215_v10 = vrot.slane %v2549_v33, %v4855_v8  ;;  %v2520_v49 = vmax.f32 %v2506_v32, %v2513_v42  ;;  %v3798_v13 = vpop.f32.mrf.mxu1  ;;  %2497 = vst.msk [vmem:[#allocation2 + $0x28] sm:$0xff] %vm1131_vm2, %v2484_v34  ;;  %v2427_v57 = vadd.f32 %v2426_v14, %v2339_v23  ;;  %v3719_v27 = vadd.f32 %v3718_v58, %v3717_v21  ;;  %v5371_v21 = vld [vmem:[#allocation6_spill] sm:$0xff]  ;;  %v5372_v33 = vld [vmem:[#allocation8_spill] sm:$0xff] }
 0x1af   :  { %v2472_v26 = vadd.f32 %v5202_v56, %v2459_v9  ;;  %v3720_v30 = vpop.f32.mrf.mxu0  ;;  %v2579_v52 = vcombine.high %v5210_v37, %v5210_v37  ;;  %v2580_v61 = vcombine.high %v2570_v15, %v2570_v15  ;;  %v5240_v14 = vadd.f32 %v5370_v40, %v5369_v35 }
 0x1b0   :  { %v2582_v0 = vcombine.high %v2520_v49, %v2520_v49  ;;  %v2434_v55 = vpop.f32.mrf.mxu1  ;;  %v2589_v53 = vrot.slane %v2520_v49, %v4855_v8  ;;  %v2460_v45 = vmul.f32 %v5186_v59, %v2427_v57  ;;  %v2344_v47 = vadd.f32 %v3719_v27, %v2256_v2 }
 0x1b1   :  { %v2485_v29 = vmax.f32 %v2472_v26, 0.0  ;;  %v3721_v60 = vpop.f32.mrf.mxu0  ;;  %v2581_v63 = vcombine.high %v5215_v10, %v5215_v10  ;;  %v2899_v31 = vmax.f32 %v2556_v6, %v5215_v10  ;;  %v2900_v16 = vmax.f32 %v2570_v15, %v2579_v52 }
 0x1b2   :  { %v2596_v41 = vrot.slane %v2582_v0, %v4855_v8  ;;  %v3722_v25 = vadd.f32 %v3721_v60, %v3720_v30  ;;  %v3799_v4 = vpop.f32.mrf.mxu1  ;;  %v2597_v7 = vcombine.high %v2589_v53, %v2589_v53  ;;  %v2605_v48 = vrot.slane %v2589_v53, %v4855_v8 }
 0x1b3   :  { %2498 = vst.msk [vmem:[#allocation2 + $0x30] sm:$0xff] %vm1131_vm2, %v2485_v29  ;;  %v2473_v11 = vadd.f32 %v5202_v56, %v2460_v45  ;;  %v2432_v22 = vadd.f32 %v2431_v43, %v2344_v47  ;;  %v3723_v12 = vpop.f32.mrf.mxu0  ;;  %v3673_v43 = vadd.f32 %v5372_v33, %v5371_v21  ;;  %v2901_v2 = vmax.f32 %v2578_v36, %v2581_v63 }
 0x1b4   :  { %v2598_v3 = vcombine.high %v2596_v41, %v2596_v41  ;;  %v2347_v44 = vadd.f32 %v3722_v25, %v2259_v24  ;;  %v2439_v5 = vpop.f32.mrf.mxu1  ;;  %v2902_v38 = vmax.f32 %v2580_v61, %v2605_v48  ;;  %v2619_v32 = vrot.slane %v2597_v7, %v4855_v8 }
 0x1b5   :  { %v2486_v39 = vmax.f32 %v2473_v11, 0.0  ;;  %v3724_v46 = vpop.f32.mrf.mxu0  ;;  %v2507_v54 = vld [vmem:[#allocation2 + $0x20] ss:$2 sm:$0xff]  ;;  %v2514_v19 = vld [vmem:[#allocation2 + $0x21] ss:$2 sm:$0xff]  ;;  %v2461_v51 = vmul.f32 %v5186_v59, %v2432_v22  ;;  %v2627_v10 = vcombine.high %v2605_v48, %v2605_v48  ;;  %v2949_v27 = vcombine.low %v2899_v31, %v2900_v16 }
 0x1b6   :  { %v5244_v18 = vrot.slane %v2598_v3, %v4855_v8  ;;  %v2435_v1 = vadd.f32 %v2434_v55, %v2347_v44  ;;  %v3802_v50 = vpop.f32.mrf.mxu1  ;;  %v2521_v42 = vmax.f32 %v2507_v54, %v2514_v19  ;;  %v3725_v24 = vadd.f32 %v3724_v46, %v3723_v12 }
 0x1b7   :  { %2499 = vst.msk [vmem:[#allocation2 + $0x38] sm:$0xff] %vm1131_vm2, %v2486_v39  ;;  %v3726_v34 = vpop.f32.mrf.mxu0  ;;  %v2474_v23 = vadd.f32 %v5202_v56, %v2461_v51  ;;  %v2950_v49 = vcombine.low %v2901_v2, %v2902_v38  ;;  %v5259_v55 = vrot.slane %v2596_v41, %v4855_v8  ;;  %v2903_v60 = vmax.f32 %v5210_v37, %v2619_v32 }
 0x1b8   :  { %v2630_v9 = vcombine.high %v5244_v18, %v5244_v18  ;;  %v2462_v58 = vmul.f32 %v5186_v59, %v2435_v1  ;;  %v2442_v15 = vpop.f32.mrf.mxu1  ;;  %v2631_v13 = vcombine.high %v2521_v42, %v2521_v42  ;;  %v2638_v26 = vrot.slane %v2521_v42, %v4855_v8 }
 0x1b9   :  { %v3727_v57 = vpop.f32.mrf.mxu0  ;;  %v2487_v30 = vmax.f32 %v2474_v23, 0.0  ;;  %v2352_v52 = vadd.f32 %v3725_v24, %v5217_v17  ;;  %v2966_v17 = vrot.slane %v2950_v49, %v4855_v8  ;;  %v2629_v7 = vcombine.high %v2619_v32, %v2619_v32 }
 0x1ba   :  { %v2475_v6 = vadd.f32 %v5202_v56, %v2462_v58  ;;  %v3803_v0 = vpop.f32.mrf.mxu1  ;;  %v2904_v53 = vmax.f32 %v2627_v10, %v2630_v9  ;;  %v2646_v29 = vcombine.high %v2638_v26, %v2638_v26  ;;  %v5262_v45 = vrot.slane %v2638_v26, %v4855_v8 }
 0x1bb   :  { %v3729_v47 = vpop.f32.mrf.mxu0  ;;  %2500 = vst.msk [vmem:[#allocation2 + $0x40] sm:$0xff] %vm1131_vm2, %v2487_v30  ;;  %v2440_v61 = vadd.f32 %v2439_v5, %v2352_v52  ;;  %v3728_v25 = vadd.f32 %v3727_v57, %v3726_v34  ;;  %v2645_v41 = vrot.slane %v2631_v13, %v4855_v8  ;;  %v2267_v22 = vadd.f32 %v3670_v62, %v5223_v20 }
 0x1bc   :  { %v2488_v63 = vmax.f32 %v2475_v6, 0.0  ;;  %v2447_v4 = vpop.f32.mrf.mxu1  ;;  %v2668_v48 = vrot.slane %v2646_v29, %v4855_v8  ;;  %v2959_v40 = vrot.slane %v2949_v27, %v4855_v8  ;;  %v2951_v3 = vcombine.low %v2903_v60, %v2904_v53 }
 0x1bd   :  { %v3730_v11 = vpop.f32.mrf.mxu0  ;;  %v2463_v37 = vmul.f32 %v5186_v59, %v2440_v61  ;;  %v2905_v44 = vmax.f32 %v2629_v7, %v5262_v45  ;;  %v2272_v31 = vadd.f32 %v3673_v43, %v5240_v14  ;;  %v2355_v62 = vadd.f32 %v3728_v25, %v2267_v22 }
 0x1be   :  { %v2508_v12 = vld [vmem:[#allocation2 + $0x30] ss:$2 sm:$0xff]  ;;  %v2515_v28 = vld [vmem:[#allocation2 + $0x31] ss:$2 sm:$0xff]  ;;  %2501 = vst.msk [vmem:[#allocation2 + $0x48] sm:$0xff] %vm1131_vm2, %v2488_v63  ;;  %v3806_v35 = vpop.f32.mrf.mxu1  ;;  %v2906_v5 = vmax.f32 %v5259_v55, %v2668_v48  ;;  %v2981_v46 = vcombine.low %v2959_v40, %v2966_v17  ;;  %v2647_v16 = vcombine.high %v2645_v41, %v2645_v41  ;;  %v3731_v19 = vadd.f32 %v3730_v11, %v3729_v47 }
 0x1bf   :  { %v3732_v36 = vpop.f32.mrf.mxu0  ;;  %v2522_v38 = vmax.f32 %v2508_v12, %v2515_v28  ;;  %v2476_v20 = vadd.f32 %v5202_v56, %v2463_v37  ;;  %v2443_v33 = vadd.f32 %v2442_v15, %v2355_v62  ;;  %v2973_v32 = vrot.slane %v2951_v3, %v4855_v8 }
 0x1c0   :  { %v2450_v39 = vpop.f32.mrf.mxu1  ;;  %v2952_v54 = vcombine.low %v2905_v44, %v2906_v5  ;;  %v2360_v43 = vadd.f32 %v3731_v19, %v2272_v31  ;;  %v2989_v58 = vrot.slane %v2981_v46, %v4855_v8  ;;  %v2661_v13 = vrot.slane %v2645_v41, %v4855_v8 }
 0x1c1   :  { %v3733_v51 = vpop.f32.mrf.mxu0  ;;  %v2680_v1 = vcombine.high %v2522_v38, %v2522_v38  ;;  %v2687_v50 = vrot.slane %v2522_v38, %v4855_v8  ;;  %v2489_v21 = vmax.f32 %v2476_v20, 0.0  ;;  %v2464_v23 = vmul.f32 %v5186_v59, %v2443_v33 }
 0x1c2   :  { %v3807_v2 = vpop.f32.mrf.mxu1  ;;  %v2980_v14 = vrot.slane %v2952_v54, %v4855_v8  ;;  %v2448_v49 = vadd.f32 %v2447_v4, %v2360_v43  ;;  %v2675_v26 = vrot.slane %v2647_v16, %v4855_v8  ;;  %v2678_v30 = vcombine.high %v2668_v48, %v2668_v48 }
 0x1c3   :  { %v2694_v42 = vrot.slane %v2680_v1, %v4855_v8  ;;  %v2695_v34 = vcombine.high %v2687_v50, %v2687_v50  ;;  %v2703_v9 = vrot.slane %v2687_v50, %v4855_v8  ;;  %2502 = vst.msk [vmem:[#allocation2 + $0x50] sm:$0xff] %vm1131_vm2, %v2489_v21  ;;  %v2477_v0 = vadd.f32 %v5202_v56, %v2464_v23 }
 0x1c4   :  { %v2982_v24 = vcombine.low %v2973_v32, %v2980_v14  ;;  %v2628_v53 = vcombine.high %v5259_v55, %v5259_v55  ;;  %v2676_v29 = vcombine.high %v5262_v45, %v5262_v45  ;;  %v2465_v60 = vmul.f32 %v5186_v59, %v2448_v49 }
 0x1c5   :  { %v2509_v10 = vld [vmem:[#allocation2 + $0x40] ss:$2 sm:$0xff]  ;;  %v2516_v15 = vld [vmem:[#allocation2 + $0x41] ss:$2 sm:$0xff]  ;;  %v2717_v57 = vrot.slane %v2695_v34, %v4855_v8  ;;  %v2725_v27 = vcombine.high %v2703_v9, %v2703_v9  ;;  %v2696_v47 = vcombine.high %v2694_v42, %v2694_v42  ;;  %v2490_v22 = vmax.f32 %v2477_v0, 0.0 }
 0x1c6   :  { %v2996_v6 = vrot.slane %v2982_v24, %v4855_v8  ;;  %v2523_v52 = vmax.f32 %v2509_v10, %v2516_v15  ;;  %v2908_v41 = vmax.f32 %v2628_v53, %v2678_v30  ;;  %v2677_v12 = vcombine.high %v2661_v13, %v2661_v13 }
 0x1c7   :  { %v2909_v61 = vmax.f32 %v2661_v13, %v2717_v57  ;;  %v2910_v25 = vmax.f32 %v2675_v26, %v2725_v27  ;;  %v2727_v17 = vcombine.high %v2717_v57, %v2717_v57  ;;  %v2710_v55 = vrot.slane %v2694_v42, %v4855_v8  ;;  %2503 = vst.msk [vmem:[#allocation2 + $0x58] sm:$0xff] %vm1131_vm2, %v2490_v22 }
 0x1c8   :  { %v2997_v63 = vcombine.low %v2989_v58, %v2996_v6  ;;  %v2729_v4 = vcombine.high %v2523_v52, %v2523_v52  ;;  %v2736_v7 = vrot.slane %v2523_v52, %v4855_v8  ;;  %v2478_v45 = vadd.f32 %v5202_v56, %v2465_v60 }
 0x1c9   :  { %v2907_v59 = vmax.f32 %v5244_v18, %v2676_v29  ;;  %v2724_v37 = vrot.slane %v2696_v47, %v4855_v8  ;;  %v2999_v35 = vcombine.low %v2909_v61, %v2910_v25  ;;  %v2679_v3 = vcombine.high %v2675_v26, %v2675_v26 }
 0x1ca   :  { %v3374_v48 = vpack.c.bf16 %v2997_v63, %v2997_v63  ;;  %v2743_v11 = vrot.slane %v2729_v4, %v4855_v8  ;;  %v2744_v28 = vcombine.high %v2736_v7, %v2736_v7  ;;  %v2911_v44 = vmax.f32 %v2677_v12, %v2727_v17 }
 0x1cb   :  { %v2491_v36 = vmax.f32 %v2478_v45, 0.0  ;;  %v2998_v31 = vcombine.low %v2907_v59, %v2908_v41  ;;  %v2726_v56 = vcombine.high %v2710_v55, %v2710_v55  ;;  %v2912_v38 = vmax.f32 %v2679_v3, %v2710_v55 }
 0x1cc   :  { %3365 = vst.msk [vmem:[%s5354_s4 + $0x10] sm:$0xf] %vm1144_vm3, %v3374_v48  ;;  %v2745_v40 = vcombine.high %v2743_v11, %v2743_v11  ;;  %v2766_v5 = vrot.slane %v2744_v28, %v4855_v8  ;;  %v2913_v62 = vmax.f32 %v2703_v9, %v2724_v37  ;;  %v3015_v39 = vrot.slane %v2999_v35, %v4855_v8 }
 0x1cd   :  { %2504 = vst.msk [vmem:[#allocation2 + $0x60] sm:$0xf] %vm1144_vm3, %v2491_v36  ;;  %v3000_v46 = vcombine.low %v2911_v44, %v2912_v38  ;;  %v2752_v16 = vrot.slane %v2736_v7, %v4855_v8  ;;  %v2759_v54 = vrot.slane %v2743_v11, %v4855_v8  ;;  %v3008_v51 = vrot.slane %v2998_v31, %v4855_v8 }
 0x1ce   :  { %v2773_v18 = vrot.slane %v2745_v40, %v4855_v8  ;;  %v2776_v20 = vcombine.high %v2766_v5, %v2766_v5  ;;  %v2510_v21 = vld [vmem:[#allocation2 + $0x50] ss:$2 sm:$0xff]  ;;  %v2517_v33 = vld [vmem:[#allocation2 + $0x51] ss:$2 sm:$0xff]  ;;  %v2728_v26 = vcombine.high %v2724_v37, %v2724_v37 }
 0x1cf   :  { %v3030_v2 = vcombine.low %v3008_v51, %v3015_v39  ;;  %v2524_v32 = vmax.f32 %v2510_v21, %v2517_v33  ;;  %v3022_v14 = vrot.slane %v3000_v46, %v4855_v8  ;;  %v2774_v43 = vcombine.high %v2752_v16, %v2752_v16 }
 0x1d0   :  { %v2914_v19 = vmax.f32 %v2726_v56, %v2776_v20  ;;  %v2777_v1 = vcombine.high %v2773_v18, %v2773_v18  ;;  %v2775_v42 = vcombine.high %v2759_v54, %v2759_v54  ;;  %v2916_v30 = vmax.f32 %v2752_v16, %v2773_v18 }
 0x1d1   :  { %v2778_v9 = vcombine.high %v2524_v32, %v2524_v32  ;;  %v2785_v23 = vrot.slane %v2524_v32, %v4855_v8  ;;  %v3038_v13 = vrot.slane %v3030_v2, %v4855_v8  ;;  %v2915_v63 = vmax.f32 %v2728_v26, %v2759_v54 }
 0x1d2   :  { %v3001_v50 = vcombine.low %v2913_v62, %v2914_v19  ;;  %v2918_v10 = vmax.f32 %v2774_v43, %v2777_v1  ;;  %v2917_v6 = vmax.f32 %v2766_v5, %v2775_v42  ;;  %v3368_v62 = vld [vmem:[%s5354_s4 + $0x1c] sm:$0x1] }
 0x1d3   :  { %v2792_v57 = vrot.slane %v2778_v9, %v4855_v8  ;;  %v2793_v27 = vcombine.high %v2785_v23, %v2785_v23  ;;  %v2801_v29 = vrot.slane %v2785_v23, %v4855_v8  ;;  %v3047_v11 = vcombine.low %v2915_v63, %v2916_v30 }
 0x1d4   :  { %v3029_v34 = vrot.slane %v3001_v50, %v4855_v8  ;;  %v2511_v58 = vld [vmem:[#allocation2 + $0x60] ss:$2 sm:$0x3]  ;;  %v2518_v24 = vld [vmem:[#allocation2 + $0x61] ss:$2 sm:$0x3]  ;;  %v3048_v25 = vcombine.low %v2917_v6, %v2918_v10 }
 0x1d5   :  { %v2525_v49 = vmax.f32 %v2511_v58, %v2518_v24  ;;  %v2794_v53 = vcombine.high %v2792_v57, %v2792_v57  ;;  %v2808_v47 = vrot.slane %v2792_v57, %v4855_v8  ;;  %v2815_v60 = vrot.slane %v2793_v27, %v4855_v8 }
 0x1d6   :  { %v3031_v15 = vcombine.low %v3022_v14, %v3029_v34  ;;  %v2823_v55 = vcombine.high %v2801_v29, %v2801_v29  ;;  %v3064_v35 = vrot.slane %v3048_v25, %v4855_v8  ;;  %v3057_v36 = vrot.slane %v3047_v11, %v4855_v8 }
 0x1d7   :  { %v2833_v0 = vrot.slane %v2525_v49, %v4855_v8  ;;  %v2822_v17 = vrot.slane %v2794_v53, %v4855_v8  ;;  %v2824_v7 = vcombine.high %v2808_v47, %v2808_v47  ;;  %v2825_v41 = vcombine.high %v2815_v60, %v2815_v60 }
 0x1d8   :  { %v3045_v52 = vrot.slane %v3031_v15, %v4855_v8  ;;  %v3079_v38 = vcombine.low %v3057_v36, %v3064_v35 }
 0x1d9   :  { %v2834_v4 = vcombine.high %v2833_v0, %v2833_v0  ;;  %v2841_v48 = vrot.slane %v2833_v0, %v4855_v8  ;;  %v2919_v28 = vmax.f32 %v2801_v29, %v2822_v17  ;;  %v2826_v45 = vcombine.high %v2822_v17, %v2822_v17 }
 0x1da   :  { %v3046_v61 = vcombine.low %v3038_v13, %v3045_v52  ;;  %v2920_v59 = vmax.f32 %v2815_v60, %v2824_v7  ;;  %v3087_v19 = vrot.slane %v3079_v38, %v4855_v8 }
 0x1db   :  { %v2848_v12 = vrot.slane %v2834_v4, %v4855_v8  ;;  %v2921_v40 = vmax.f32 %v2823_v55, %v2826_v45  ;;  %v2922_v3 = vmax.f32 %v2825_v41, %v2841_v48 }
 0x1dc   :  { %v3375_v22 = vpack.c.bf16 %v3046_v61, %v3046_v61  ;;  %v3049_v44 = vcombine.low %v2919_v28, %v2920_v59 }
 0x1dd   :  { %v2923_v37 = vmax.f32 %v2808_v47, %v2848_v12  ;;  %v3050_v31 = vcombine.low %v2921_v40, %v2922_v3 }
 0x1de   :  { %3366 = vst.msk [vmem:[%s5354_s4 + $0x14] sm:$0xf] %vm1144_vm3, %v3375_v22  ;;  %v3071_v18 = vrot.slane %v3049_v44, %v4855_v8 }
 0x1df   :  { %v3102_v5 = vrot.slane %v2923_v37, %v4855_v8  ;;  %v3078_v20 = vrot.slane %v3050_v31, %v4855_v8 }
 0x1e1   :  { %v3109_v56 = vrot.slane %v3102_v5, %v4855_v8  ;;  %v3080_v46 = vcombine.low %v3071_v18, %v3078_v20 }
 0x1e3   :  { %v3377_v39 = vpack.c.bf16 %v3109_v56, %v3109_v56  ;;  %v3094_v51 = vrot.slane %v3080_v46, %v4855_v8 }
 0x1e5   :  { %v3135_v54 = vsel %vm5086_vm6, %v3377_v39, %v3368_v62  ;;  %v3095_v1 = vcombine.low %v3087_v19, %v3094_v51 }
 0x1e6   :  { %3369 = vst [vmem:[%s5354_s4 + $0x1c] sm:$0x1] %v3135_v54 }
 0x1e7   :  { %v3376_v50 = vpack.c.bf16 %v3095_v1, %v3095_v1 }
 0x1e9   :  { %3367 = vst.msk [vmem:[%s5354_s4 + $0x18] sm:$0xf] %vm1144_vm3, %v3376_v50 }

// kernel: coolnet_forward.5
= control target key start
LH: loop header
LB: loop body
LE: loop exit
PB: predicated region body
PF: predicated region fallthrough
CT: control target
= control target key end

     0   :  { %v233_v29 = vlaneseq  ;;  %v1783_v35 = vmov 1966171168   ;;  %s2182_s0 = inlined_call_operand.vmem [shape: bf16[2,1600], index: 0, kind: input, shape index: {}]   ;;  %s2183_s1 = inlined_call_operand.vmem [shape: bf16[1600,128], index: 1, kind: input, shape index: {}]   ;;  %s2184_s2 = inlined_call_operand.vmem [shape: f32[1,128], index: 2, kind: input, shape index: {}]   ;;  %s2185_s3 = inlined_call_operand.vmem [shape: f32[1,128], index: 3, kind: input, shape index: {}]   ;;  %s2186_s4 = inlined_call_operand.vmem [shape: bf16[128,128], index: 4, kind: input, shape index: {}]   ;;  %s2187_s5 = inlined_call_operand.vmem [shape: f32[1,128], index: 5, kind: input, shape index: {}]   ;;  %s2188_s6 = inlined_call_operand.hbm [shape: f32[2,128], index: 6, kind: output, shape index: {}]  }
   0x1   :  { %v1651_v0 = vld [vmem:[%s2183_s1 + $0x78] sm:$0xff]   ;;  %v1655_v4 = vld [vmem:[%s2183_s1 + $0x70] sm:$0xff]   ;;  %v1659_v8 = vld [vmem:[%s2183_s1 + $0x68] sm:$0xff]   ;;  %v231_v36 = vunpack.c.l.s4 %v1783_v35 }
   0x2   :  { %v1652_v1 = vld [vmem:[%s2183_s1 + $0xf8] sm:$0xff]   ;;  %1469 = vmatprep.subr.bf16.mxu0 %v1651_v0  ;;  %v1656_v5 = vld [vmem:[%s2183_s1 + $0xf0] sm:$0xff]   ;;  %v1660_v9 = vld [vmem:[%s2183_s1 + $0xe8] sm:$0xff]   ;;  %v234_v33 = vshrl.u32 %v233_v29, 7 }
   0x3   :  { %v1653_v2 = vld [vmem:[%s2183_s1 + $0x38] sm:$0xff]   ;;  %1491 = vmatprep.subr.bf16.mxu1 %v1652_v1  ;;  %v1657_v6 = vld [vmem:[%s2183_s1 + $0x30] sm:$0xff]   ;;  %v1661_v10 = vld [vmem:[%s2183_s1 + $0x28] sm:$0xff]   ;;  %v232_v39 = vunpack.c.0.s8 %v231_v36 }
   0x4   :  { %v1654_v3 = vld [vmem:[%s2183_s1 + $0xb8] sm:$0xff]   ;;  %1470 = vmatpush3.bf16.msra.mxu0 %v1653_v2  ;;  %v1658_v7 = vld [vmem:[%s2183_s1 + $0xb0] sm:$0xff]   ;;  %v1662_v11 = vld [vmem:[%s2183_s1 + $0xa8] sm:$0xff]  }
   0x5   :  { %1492 = vmatpush3.bf16.msra.mxu1 %v1654_v3  ;;  %1471 = vmatprep.subr.bf16.mxu0 %v1655_v4  ;;  %v1663_v12 = vld [vmem:[%s2183_s1 + $0x60] sm:$0xff]   ;;  %v1667_v16 = vld [vmem:[%s2183_s1 + $0x58] sm:$0xff]   ;;  %v1671_v20 = vld [vmem:[%s2183_s1 + $0x50] sm:$0xff]   ;;  %v1927_v41 = vsub.s32 %v232_v39, %v234_v33 }
   0x6   :  { %1493 = vmatprep.subr.bf16.mxu1 %v1656_v5  ;;  %v1664_v13 = vld [vmem:[%s2183_s1 + $0xe0] sm:$0xff]   ;;  %v1668_v17 = vld [vmem:[%s2183_s1 + $0xd8] sm:$0xff]   ;;  %v1672_v21 = vld [vmem:[%s2183_s1 + $0xd0] sm:$0xff]  }
   0x7   :  { %v1665_v14 = vld [vmem:[%s2183_s1 + $0x20] sm:$0xff]   ;;  %v1669_v18 = vld [vmem:[%s2183_s1 + $0x18] sm:$0xff]   ;;  %v1673_v22 = vld [vmem:[%s2183_s1 + $0x10] sm:$0xff]  }
   0x8   :  { %1472 = vmatpush3.bf16.msra.mxu0 %v1657_v6  ;;  %v1666_v15 = vld [vmem:[%s2183_s1 + $0xa0] sm:$0xff]   ;;  %v1670_v19 = vld [vmem:[%s2183_s1 + $0x98] sm:$0xff]   ;;  %v1674_v23 = vld [vmem:[%s2183_s1 + $0x90] sm:$0xff]  }
   0x9   :  { %1494 = vmatpush3.bf16.msra.mxu1 %v1658_v7  ;;  %1473 = vmatprep.subr.bf16.mxu0 %v1659_v8  ;;  %v1675_v24 = vld [vmem:[%s2183_s1 + $0x48] sm:$0xff]   ;;  %v1679_v28 = vld [vmem:[%s2183_s1 + $0x40] sm:$0xff]   ;;  %v1684_v34 = vld [vmem:[%s2183_s1 + $0x178] sm:$0xff]  }
   0xa   :  { %1495 = vmatprep.subr.bf16.mxu1 %v1660_v9  ;;  %v1676_v25 = vld [vmem:[%s2183_s1 + $0xc8] sm:$0xff]   ;;  %v1680_v30 = vld [vmem:[%s2183_s1 + $0xc0] sm:$0xff]   ;;  %v1686_v40 = vld [vmem:[%s2183_s1 + $0x1f8] sm:$0xff]  }
   0xb   :  { %v1677_v26 = vld [vmem:[%s2183_s1 + $0x8] sm:$0xff]   ;;  %v1681_v31 = vld [vmem:[%s2183_s1] sm:$0xff]   ;;  %v1685_v47 = vld [vmem:[%s2183_s1 + $0x138] sm:$0xff]  }
   0xc   :  { %1474 = vmatpush3.bf16.msra.mxu0 %v1661_v10  ;;  %v1678_v27 = vld [vmem:[%s2183_s1 + $0x88] sm:$0xff]   ;;  %v1682_v32 = vld [vmem:[%s2183_s1 + $0x80] sm:$0xff]   ;;  %v1687_v49 = vld [vmem:[%s2183_s1 + $0x1b8] sm:$0xff]  }
   0xd   :  { %1496 = vmatpush3.bf16.msra.mxu1 %v1662_v11  ;;  %1475 = vmatprep.subr.bf16.mxu0 %v1663_v12  ;;  %v25_v37 = vld [vmem:[%s2182_s0] sm:$0xff]  ;;  %v1688_v52 = vld [vmem:[%s2183_s1 + $0x170] sm:$0xff]   ;;  %v1692_v58 = vld [vmem:[%s2183_s1 + $0x168] sm:$0xff]  }
   0xe   :  { %1497 = vmatprep.subr.bf16.mxu1 %v1664_v13  ;;  %v229_v38 = vcombine.high %v25_v37, %v25_v37  ;;  %v236_v42 = vrot.slane %v25_v37, %v1927_v41  ;;  %v1689_v54 = vld [vmem:[%s2183_s1 + $0x130] sm:$0xff]   ;;  %v1693_v59 = vld [vmem:[%s2183_s1 + $0x128] sm:$0xff]   ;;  %v1696_v62 = vld [vmem:[%s2183_s1 + $0x160] sm:$0xff]  }
   0xf   :  { %v1690_v55 = vld [vmem:[%s2183_s1 + $0x1f0] sm:$0xff]   ;;  %v1694_v60 = vld [vmem:[%s2183_s1 + $0x1e8] sm:$0xff]   ;;  %v1697_v63 = vld [vmem:[%s2183_s1 + $0x120] sm:$0xff]  }
  0x10   :  { %1476 = vmatpush3.bf16.msra.mxu0 %v1665_v14  ;;  %v1931_v43 = vrot.slane %v229_v38, %v1927_v41  ;;  %v244_v44 = vcombine.high %v236_v42, %v236_v42  ;;  %v252_v45 = vrot.slane %v236_v42, %v1927_v41  ;;  %v1691_v57 = vld [vmem:[%s2183_s1 + $0x1b0] sm:$0xff]   ;;  %v1695_v61 = vld [vmem:[%s2183_s1 + $0x1a8] sm:$0xff]   ;;  %v1698_v0 = vld [vmem:[%s2183_s1 + $0x1e0] sm:$0xff]  }
  0x11   :  { %1498 = vmatpush3.bf16.msra.mxu1 %v1666_v15  ;;  %1477 = vmatprep.subr.bf16.mxu0 %v1667_v16  ;;  %v1699_v1 = vld [vmem:[%s2183_s1 + $0x1a0] sm:$0xff]   ;;  %v1700_v2 = vld [vmem:[%s2183_s1 + $0x158] sm:$0xff]   ;;  %v1704_v6 = vld [vmem:[%s2183_s1 + $0x150] sm:$0xff]  }
  0x12   :  { %1499 = vmatprep.subr.bf16.mxu1 %v1668_v17  ;;  %v245_v46 = vcombine.high %v1931_v43, %v1931_v43  ;;  %v266_v48 = vrot.slane %v244_v44, %v1927_v41  ;;  %v274_v51 = vcombine.high %v252_v45, %v252_v45  ;;  %v1701_v3 = vld [vmem:[%s2183_s1 + $0x118] sm:$0xff]   ;;  %v1705_v7 = vld [vmem:[%s2183_s1 + $0x110] sm:$0xff]   ;;  %v1708_v10 = vld [vmem:[%s2183_s1 + $0x148] sm:$0xff]  }
  0x13   :  { %v1702_v4 = vld [vmem:[%s2183_s1 + $0x1d8] sm:$0xff]   ;;  %v1706_v8 = vld [vmem:[%s2183_s1 + $0x1d0] sm:$0xff]   ;;  %v1709_v11 = vld [vmem:[%s2183_s1 + $0x108] sm:$0xff]  }
  0x14   :  { %1478 = vmatpush3.bf16.msra.mxu0 %v1669_v18  ;;  %v273_v50 = vrot.slane %v245_v46, %v1927_v41  ;;  %965 = vmatprep.mubr.bf16.mxu0 %v266_v48  ;;  %v276_v53 = vcombine.high %v266_v48, %v266_v48  ;;  %v1703_v5 = vld [vmem:[%s2183_s1 + $0x198] sm:$0xff]   ;;  %v1707_v9 = vld [vmem:[%s2183_s1 + $0x190] sm:$0xff]   ;;  %v1710_v12 = vld [vmem:[%s2183_s1 + $0x1c8] sm:$0xff]   ;;  %v259_v18 = vrot.slane %v1931_v43, %v1927_v41 }
  0x15   :  { %1500 = vmatpush3.bf16.msra.mxu1 %v1670_v19  ;;  %1479 = vmatprep.subr.bf16.mxu0 %v1671_v20  ;;  %v1711_v13 = vld [vmem:[%s2183_s1 + $0x188] sm:$0xff]   ;;  %v1712_v14 = vld [vmem:[%s2183_s1 + $0x140] sm:$0xff]   ;;  %v1716_v19 = vld [vmem:[%s2183_s1 + $0x278] sm:$0xff]  }
  0x16   :  { %1501 = vmatprep.subr.bf16.mxu1 %v1672_v21  ;;  %v277_v56 = vcombine.high %v273_v50, %v273_v50  ;;  %1005 = vmatprep.mubr.bf16.mxu1 %v276_v53  ;;  %v1713_v15 = vld [vmem:[%s2183_s1 + $0x100] sm:$0xff]   ;;  %v1717_v20 = vld [vmem:[%s2183_s1 + $0x238] sm:$0xff]   ;;  %v1725_v29 = vld [vmem:[%s2183_s1 + $0x228] sm:$0xff]  }
  0x17   :  { %v1714_v16 = vld [vmem:[%s2183_s1 + $0x1c0] sm:$0xff]   ;;  %v1718_v21 = vld [vmem:[%s2183_s1 + $0x2f8] sm:$0xff]   ;;  %v1737_v42 = vld [vmem:[%s2183_s1 + $0x210] sm:$0xff]  }
  0x18   :  { %1480 = vmatpush3.bf16.msra.mxu0 %v1673_v22  ;;  %v1715_v17 = vld [vmem:[%s2183_s1 + $0x180] sm:$0xff]   ;;  %v1719_v22 = vld [vmem:[%s2183_s1 + $0x2b8] sm:$0xff]   ;;  %v1738_v43 = vld [vmem:[%s2183_s1 + $0x2d0] sm:$0xff]  }
  0x19   :  { %1502 = vmatpush3.bf16.msra.mxu1 %v1674_v23  ;;  %1481 = vmatprep.subr.bf16.mxu0 %v1675_v24  ;;  %v275_v23 = vcombine.high %v259_v18, %v259_v18  ;;  %v1720_v24 = vld [vmem:[%s2183_s1 + $0x270] sm:$0xff]   ;;  %v1729_v33 = vld [vmem:[%s2183_s1 + $0x220] sm:$0xff]   ;;  %v1732_v36 = vld [vmem:[%s2183_s1 + $0x258] sm:$0xff]  }
  0x1a   :  { %1503 = vmatprep.subr.bf16.mxu1 %v1676_v25  ;;  %v1721_v25 = vld [vmem:[%s2183_s1 + $0x230] sm:$0xff]   ;;  %v1731_v35 = vld [vmem:[%s2183_s1 + $0x2a0] sm:$0xff]   ;;  %v1733_v37 = vld [vmem:[%s2183_s1 + $0x218] sm:$0xff]  }
  0x1b   :  { %v1734_v38 = vld [vmem:[%s2183_s1 + $0x2d8] sm:$0xff]   ;;  %v1739_v44 = vld [vmem:[%s2183_s1 + $0x290] sm:$0xff]   ;;  %v1740_v46 = vld [vmem:[%s2183_s1 + $0x248] sm:$0xff]  }
  0x1c   :  { %1482 = vmatpush3.bf16.msra.mxu0 %v1677_v26  ;;  %v1722_v26 = vld [vmem:[%s2183_s1 + $0x2f0] sm:$0xff]   ;;  %v1735_v39 = vld [vmem:[%s2183_s1 + $0x298] sm:$0xff]   ;;  %v1741_v48 = vld [vmem:[%s2183_s1 + $0x208] sm:$0xff]  }
  0x1d   :  { %1504 = vmatpush3.bf16.msra.mxu1 %v1678_v27  ;;  %1483 = vmatprep.subr.bf16.mxu0 %v1679_v28  ;;  %v1723_v27 = vld [vmem:[%s2183_s1 + $0x2b0] sm:$0xff]   ;;  %v1724_v28 = vld [vmem:[%s2183_s1 + $0x268] sm:$0xff]   ;;  %v1746_v53 = vld [vmem:[%s2183_s1 + $0x2c0] sm:$0xff]  }
  0x1e   :  { %1505 = vmatprep.subr.bf16.mxu1 %v1680_v30  ;;  %v1726_v30 = vld [vmem:[%s2183_s1 + $0x2e8] sm:$0xff]  }
  0x20   :  { %1484 = vmatpush3.bf16.msra.mxu0 %v1681_v31  ;;  %v1727_v31 = vld [vmem:[%s2183_s1 + $0x2a8] sm:$0xff]  }
  0x21   :  { %1506 = vmatpush3.bf16.msra.mxu1 %v1682_v32  ;;  %1513 = vmatprep.subr.bf16.mxu0 %v1684_v34  ;;  %v1728_v32 = vld [vmem:[%s2183_s1 + $0x260] sm:$0xff]  }
  0x22   :  { %1535 = vmatprep.subr.bf16.mxu1 %v1686_v40  ;;  %v1730_v34 = vld [vmem:[%s2183_s1 + $0x2e0] sm:$0xff]   ;;  %v1736_v40 = vld [vmem:[%s2183_s1 + $0x250] sm:$0xff]  }
  0x23   :  { %966 = vmatmul.mubr.bf16.vlgmr.msra.gmra.mxu0 %v252_v45  ;;  %v26_v45 = vld [vmem:[%s2182_s0 + $0x8] sm:$0x1f] }
  0x24   :  { %1514 = vmatpush3.bf16.msra.mxu0 %v1685_v47  ;;  %1006 = vmatmul.mubr.bf16.vlgmr.msra.gmra.mxu1 %v274_v51  ;;  %v285_v47 = vrot.slane %v26_v45, %v1927_v41  ;;  %v1743_v51 = vld [vmem:[%s2183_s1 + $0x288] sm:$0xff]  }
  0x25   :  { %1515 = vmatprep.subr.bf16.mxu0 %v1688_v52  ;;  %1536 = vmatpush3.bf16.msra.mxu1 %v1687_v49  ;;  %v1742_v49 = vld [vmem:[%s2183_s1 + $0x2c8] sm:$0xff]   ;;  %v1744_v52 = vld [vmem:[%s2183_s1 + $0x240] sm:$0xff]  }
  0x26   :  { %1045 = vmatprep.mubr.bf16.mxu0 %v273_v50  ;;  %1537 = vmatprep.subr.bf16.mxu1 %v1690_v55  ;;  %v293_v50 = vcombine.high %v285_v47, %v285_v47  ;;  %v1745_v55 = vld [vmem:[%s2183_s1 + $0x200] sm:$0xff]  }
  0x27   :  { %1085 = vmatprep.mubr.bf16.mxu1 %v277_v56 }
  0x28   :  { %1516 = vmatpush3.bf16.msra.mxu0 %v1689_v54  ;;  %v314_v54 = vrot.slane %v293_v50, %v1927_v41 }
  0x29   :  { %1517 = vmatprep.subr.bf16.mxu0 %v1692_v58  ;;  %1538 = vmatpush3.bf16.msra.mxu1 %v1691_v57  ;;  %v1748_v57 = vld [vmem:[%s2183_s1 + $0x280] sm:$0xff]   ;;  %v300_v58 = vrot.slane %v285_v47, %v1927_v41 }
  0x2a   :  { %1539 = vmatprep.subr.bf16.mxu1 %v1694_v60  ;;  %v316_v56 = vcombine.high %v314_v54, %v314_v54 }
  0x2c   :  { %1518 = vmatpush3.bf16.msra.mxu0 %v1693_v59 }
  0x2d   :  { %1519 = vmatprep.subr.bf16.mxu0 %v1696_v62  ;;  %1540 = vmatpush3.bf16.msra.mxu1 %v1695_v61 }
  0x2e   :  { %1541 = vmatprep.subr.bf16.mxu1 %v1698_v0 }
  0x30   :  { %1520 = vmatpush3.bf16.msra.mxu0 %v1697_v63 }
  0x31   :  { %1521 = vmatprep.subr.bf16.mxu0 %v1700_v2  ;;  %1542 = vmatpush3.bf16.msra.mxu1 %v1699_v1 }
  0x32   :  { %1543 = vmatprep.subr.bf16.mxu1 %v1702_v4 }
  0x34   :  { %1522 = vmatpush3.bf16.msra.mxu0 %v1701_v3 }
  0x35   :  { %1523 = vmatprep.subr.bf16.mxu0 %v1704_v6  ;;  %1544 = vmatpush3.bf16.msra.mxu1 %v1703_v5 }
  0x36   :  { %1545 = vmatprep.subr.bf16.mxu1 %v1706_v8 }
  0x38   :  { %1524 = vmatpush3.bf16.msra.mxu0 %v1705_v7 }
  0x39   :  { %1525 = vmatprep.subr.bf16.mxu0 %v1708_v10  ;;  %1546 = vmatpush3.bf16.msra.mxu1 %v1707_v9 }
  0x3a   :  { %1547 = vmatprep.subr.bf16.mxu1 %v1710_v12 }
  0x3c   :  { %1526 = vmatpush3.bf16.msra.mxu0 %v1709_v11 }
  0x3d   :  { %1527 = vmatprep.subr.bf16.mxu0 %v1712_v14  ;;  %1548 = vmatpush3.bf16.msra.mxu1 %v1711_v13 }
  0x3e   :  { %1549 = vmatprep.subr.bf16.mxu1 %v1714_v16 }
  0x40   :  { %1528 = vmatpush3.bf16.msra.mxu0 %v1713_v15 }
  0x41   :  { %1557 = vmatprep.subr.bf16.mxu0 %v1716_v19  ;;  %1550 = vmatpush3.bf16.msra.mxu1 %v1715_v17 }
  0x42   :  { %1579 = vmatprep.subr.bf16.mxu1 %v1718_v21 }
  0x43   :  { %1046 = vmatmul.mubr.bf16.vlgmr.msra.gmra.mxu0 %v259_v18 }
  0x44   :  { %1558 = vmatpush3.bf16.msra.mxu0 %v1717_v20  ;;  %1086 = vmatmul.mubr.bf16.vlgmr.msra.gmra.mxu1 %v275_v23 }
  0x45   :  { %1559 = vmatprep.subr.bf16.mxu0 %v1720_v24  ;;  %1580 = vmatpush3.bf16.msra.mxu1 %v1719_v22 }
  0x46   :  { %1581 = vmatprep.subr.bf16.mxu1 %v1722_v26  ;;  %1125 = vmatprep.mubr.bf16.mxu0 %v314_v54 }
  0x47   :  { %1165 = vmatprep.mubr.bf16.mxu1 %v316_v56 }
  0x48   :  { %1560 = vmatpush3.bf16.msra.mxu0 %v1721_v25 }
  0x49   :  { %1561 = vmatprep.subr.bf16.mxu0 %v1724_v28  ;;  %1582 = vmatpush3.bf16.msra.mxu1 %v1723_v27 }
  0x4a   :  { %1583 = vmatprep.subr.bf16.mxu1 %v1726_v30 }
  0x4c   :  { %1562 = vmatpush3.bf16.msra.mxu0 %v1725_v29 }
  0x4d   :  { %1563 = vmatprep.subr.bf16.mxu0 %v1728_v32  ;;  %1584 = vmatpush3.bf16.msra.mxu1 %v1727_v31 }
  0x4e   :  { %1585 = vmatprep.subr.bf16.mxu1 %v1730_v34 }
  0x50   :  { %1564 = vmatpush3.bf16.msra.mxu0 %v1729_v33 }
  0x51   :  { %1565 = vmatprep.subr.bf16.mxu0 %v1732_v36  ;;  %1586 = vmatpush3.bf16.msra.mxu1 %v1731_v35 }
  0x52   :  { %1587 = vmatprep.subr.bf16.mxu1 %v1734_v38 }
  0x54   :  { %1566 = vmatpush3.bf16.msra.mxu0 %v1733_v37 }
  0x55   :  { %1567 = vmatprep.subr.bf16.mxu0 %v1736_v40  ;;  %1588 = vmatpush3.bf16.msra.mxu1 %v1735_v39 }
  0x56   :  { %1589 = vmatprep.subr.bf16.mxu1 %v1738_v43 }
  0x58   :  { %1568 = vmatpush3.bf16.msra.mxu0 %v1737_v42 }
  0x59   :  { %1569 = vmatprep.subr.bf16.mxu0 %v1740_v46  ;;  %1590 = vmatpush3.bf16.msra.mxu1 %v1739_v44 }
  0x5a   :  { %1591 = vmatprep.subr.bf16.mxu1 %v1742_v49 }
  0x5c   :  { %1570 = vmatpush3.bf16.msra.mxu0 %v1741_v48 }
  0x5d   :  { %1571 = vmatprep.subr.bf16.mxu0 %v1744_v52  ;;  %1592 = vmatpush3.bf16.msra.mxu1 %v1743_v51 }
  0x5e   :  { %1593 = vmatprep.subr.bf16.mxu1 %v1746_v53 }
  0x5f   :  { %11 = vsyncpa [#allocation3], 0  ;;  %v1749_v59 = vld [vmem:[%s2183_s1 + $0x318] sm:$0xff]   ;;  %v1784_v60 = vmov 0.0   ;;  %v315_v61 = vcombine.high %v300_v58, %v300_v58  ;;  %v1750_v62 = vld [vmem:[%s2183_s1 + $0x310] sm:$0xff]   ;;  %vm1785_vm0 = vmmov 0   ;;  %v278_v63 = vcombine.high %v26_v45, %v26_v45 }
  0x60   :  { %1572 = vmatpush3.bf16.msra.mxu0 %v1745_v55  ;;  %v1751_v0 = vld [vmem:[%s2183_s1 + $0x308] sm:$0xff]   ;;  %v1752_v2 = vld [vmem:[%s2183_s1 + $0x300] sm:$0xff]   ;;  %vm929_vm1 = vcmask 523264   ;;  %v1753_v4 = vld [vmem:[%s2186_s4 + $0x38] sm:$0xff]   ;;  %s1786_s27 = smov [#allocation2]  }
  0x61   :  { %1615 = vmatprep.subr.bf16.mxu0 %v1784_v60  ;;  %1594 = vmatpush3.bf16.msra.mxu1 %v1748_v57  ;;  %v292_v1 = vrot.slane %v278_v63, %v1927_v41  ;;  %v1754_v5 = vld [vmem:[%s2186_s4 + $0x30] sm:$0xff]   ;;  %v1755_v6 = vld [vmem:[%s2186_s4 + $0x28] sm:$0xff]   ;;  %v1757_v7 = vld [vmem:[%s2186_s4 + $0x18] sm:$0xff]   ;;  %s1349_s28 = sshll.u32 %s1786_s27, 4  ;;  %s1350_s28 = int_to_ptr.vmem [resolvable:$true] %s1349_s28 }
  0x62   :  { %1627 = vmatprep.subr.bf16.mxu1 %v1784_v60  ;;  %v1758_v8 = vld [vmem:[%s2186_s4 + $0x10] sm:$0xff]   ;;  %v1759_v9 = vld [vmem:[%s2186_s4 + $0x8] sm:$0xff]   ;;  %v1760_v10 = vld [vmem:[%s2186_s4] sm:$0xff]   ;;  %p1766_p1 = scmp.lt.s32.totalorder %s1350_s28, %s1350_s28 }
  0x63   :  { %1126 = vmatmul.mubr.bf16.vlgmr.msra.gmra.mxu0 %v300_v58  ;;  %v307_v3 = vrot.slane %v292_v1, %v1927_v41  ;;  %v1756_v41 = vld [vmem:[%s2186_s4 + $0x20] sm:$0xff]  }
  0x64   :  { %1616 = vmatpush3.bf16.msra.mxu0 %v1749_v59  ;;  %1623 = vmatprep.mubr.msk.bf16.mxu0 %vm1785_vm0, %v1784_v60  ;;  %v1458_v48 = vld [vmem:[%s2184_s2] ss:$0 sm:$0xff]  ;;  %s1761_s2 = scalar_lea.vmem %s1350_s28, 32 }
  0x65   :  { %1166 = vmatmul.mubr.bf16.vlgmr.msra.gmra.mxu1 %v315_v61  ;;  %1617 = vmatprep.subr.bf16.mxu0 %v1784_v60  ;;  %v1459_v50 = vld [vmem:[%s2185_s3] ss:$0 sm:$0xff]  ;;  %p1762_p0 = scmp.ne.s32.totalorder %s1350_s28, %s1761_s2  ;;  %p1767_p2 = scmp.lt.s32.totalorder %s1761_s2, %s1761_s2 }
  0x66   :  { %1643 = vmatprep.mubr.msk.bf16.mxu1 %vm1785_vm0, %v1784_v60  ;;  %1628 = vmatpush3.bf16.msra.mxu1 %v1753_v4  ;;  %v1460_v58 = vld [vmem:[%s2187_s5] ss:$0 sm:$0xff] }
  0x67   :  { %1629 = vmatprep.subr.bf16.mxu1 %v1784_v60  ;;  %p1768_p3 = por %p1767_p2, %p1766_p1 }
  0x68   :  { %1618 = vmatpush3.bf16.msra.mxu0 %v1750_v62 }
  0x69   :  { %1619 = vmatprep.subr.bf16.mxu0 %v1784_v60  ;;  %p1769_p4 = pnand %p1768_p3, %p1762_p0 }
  0x6a   :  { %1630 = vmatpush3.bf16.msra.mxu1 %v1754_v5 }
  0x6b   :  { %1631 = vmatprep.subr.bf16.mxu1 %v1784_v60 }
  0x6c   :  { %1620 = vmatpush3.bf16.msra.mxu0 %v1751_v0 }
  0x6d   :  { %1621 = vmatprep.subr.bf16.mxu0 %v1784_v60 }
  0x6e   :  { %1632 = vmatpush3.bf16.msra.mxu1 %v1755_v6 }
  0x6f   :  { %1633 = vmatprep.subr.bf16.mxu1 %v1784_v60 }
  0x70   :  { %1622 = vmatpush3.bf16.msra.mxu0 %v1752_v2 }
  0x72   :  { %1634 = vmatpush3.bf16.msra.mxu1 %v1756_v41 }
  0x73   :  { %1624 = vmatmul.mubr.msk.bf16.vlgmr.msra.gmra.mxu0 %vm929_vm1, %v307_v3  ;;  %1635 = vmatprep.subr.bf16.mxu1 %v1784_v60 }
  0x76   :  { %1636 = vmatpush3.bf16.msra.mxu1 %v1757_v7 }
  0x77   :  { %1637 = vmatprep.subr.bf16.mxu1 %v1784_v60 }
  0x7a   :  { %1638 = vmatpush3.bf16.msra.mxu1 %v1758_v8 }
  0x7b   :  { %1639 = vmatprep.subr.bf16.mxu1 %v1784_v60 }
  0x7e   :  { %1640 = vmatpush3.bf16.msra.mxu1 %v1759_v9 }
  0x7f   :  { %1641 = vmatprep.subr.bf16.mxu1 %v1784_v60 }
  0x82   :  { %1642 = vmatpush3.bf16.msra.mxu1 %v1760_v10 }
  0xe3   :  { %v1485_v11 = vpop.f32.mrf.mxu0 }
  0xe4   :  { %v1507_v12 = vpop.f32.mrf.mxu1 }
  0xe5   :  { %v1486_v13 = vpop.f32.mrf.mxu0 }
  0xe6   :  { %v1487_v14 = vadd.f32 %v1486_v13, %v1485_v11  ;;  %v1508_v15 = vpop.f32.mrf.mxu1 }
  0xe7   :  { %v1488_v16 = vpop.f32.mrf.mxu0  ;;  %v1509_v17 = vadd.f32 %v1508_v15, %v1507_v12 }
  0xe8   :  { %v1510_v19 = vpop.f32.mrf.mxu1 }
  0xe9   :  { %v1489_v18 = vpop.f32.mrf.mxu0  ;;  %v1008_v20 = vadd.f32 %v1509_v17, %v1487_v14 }
  0xea   :  { %v1511_v21 = vpop.f32.mrf.mxu1 }
 0x103   :  { %v1529_v22 = vpop.f32.mrf.mxu0 }
 0x104   :  { %v1551_v24 = vpop.f32.mrf.mxu1 }
 0x105   :  { %v1530_v23 = vpop.f32.mrf.mxu0 }
 0x106   :  { %v1552_v26 = vpop.f32.mrf.mxu1  ;;  %v1531_v31 = vadd.f32 %v1530_v23, %v1529_v22 }
 0x107   :  { %v1532_v25 = vpop.f32.mrf.mxu0  ;;  %v1553_v37 = vadd.f32 %v1552_v26, %v1551_v24 }
 0x108   :  { %v1554_v28 = vpop.f32.mrf.mxu1  ;;  %v1048_v36 = vadd.f32 %v1531_v31, %v1008_v20 }
 0x109   :  { %v1533_v27 = vpop.f32.mrf.mxu0 }
 0x10a   :  { %v1555_v29 = vpop.f32.mrf.mxu1  ;;  %v1088_v43 = vadd.f32 %v1553_v37, %v1048_v36 }
 0x123   :  { %v1573_v30 = vpop.f32.mrf.mxu0 }
 0x125   :  { %v1574_v32 = vpop.f32.mrf.mxu0  ;;  %v1595_v33 = vpop.f32.mrf.mxu1 }
 0x126   :  { %v1575_v40 = vadd.f32 %v1574_v32, %v1573_v30 }
 0x127   :  { %v1576_v34 = vpop.f32.mrf.mxu0  ;;  %v1596_v35 = vpop.f32.mrf.mxu1 }
 0x128   :  { %v1128_v44 = vadd.f32 %v1575_v40, %v1088_v43  ;;  %v1597_v45 = vadd.f32 %v1596_v35, %v1595_v33 }
 0x129   :  { %v1577_v38 = vpop.f32.mrf.mxu0  ;;  %v1598_v39 = vpop.f32.mrf.mxu1 }
 0x12a   :  { %v1168_v46 = vadd.f32 %v1597_v45, %v1128_v44 }
 0x12b   :  { %v1599_v42 = vpop.f32.mrf.mxu1 }
 0x133   :  { %v1207_v47 = vpop.f32.mrf.mxu0 }
 0x134   :  { %v1208_v49 = vadd.f32 %v1207_v47, %v1168_v46 }
 0x135   :  { %v1625_v51 = vpop.f32.mrf.mxu0 }
 0x136   :  { %v1220_v52 = vmul.f32 %v1458_v48, %v1208_v49 }
 0x137   :  { %v1210_v53 = vpop.f32.mrf.mxu0 }
 0x138   :  { %v1228_v54 = vadd.f32 %v1459_v50, %v1220_v52 }
 0x139   :  { %v1626_v55 = vpop.f32.mrf.mxu0 }
 0x13a   :  { %v1229_v56 = vmax.f32 %v1228_v54, 0.0 }
 0x13c   :  { %v1230_v57 = vpack.c.bf16 %v1229_v56, %v1229_v56 }
 0x13e   :  { %1644 = vmatmul.mubr.bf16.vlgmr.msra.gmra.mxu1 %v1230_v57 }
 0x1fe   :  { %v1336_v59 = vpop.f32.mrf.mxu1 }
 0x1ff   :  { %v1337_v60 = vadd.f32 %v1460_v58, %v1336_v59 }
 0x200   :  { %v1645_v61 = vpop.f32.mrf.mxu1 }
 0x201   :  { %1342 = vst [vmem:[#allocation2] sm:$0x3] %v1337_v60 }
 0x202   :  { %v1339_v62 = vpop.f32.mrf.mxu1 }
 0x203   :  { %1772 = shalt.err (!%p1769_p4)
}
 0x204   :  { %1352 = dma.vmem_to_hbm [thread:$0]  %s1350_s28, 32, %s2188_s6, [#allocation3]   ;;  %v1646_v63 = vpop.f32.mrf.mxu1 }
 0x205   :  { %1781 = dma.done.wait [#allocation3], 32  }
 0x206   :  { %1782 = vsyncadd [#allocation3], 4294967264 }
 0x207   :  { %1356 = vsyncpa [#allocation3], 1 }

</bundles_post_ra>
